<compile_context>
chip_gen: v7x
topology: tpu7x:2x2x1
jax: 0.10.0
libtpu: 0.0.40
codegen_flags: <defaults>
</compile_context>

<pallas_src>
import functools
import math

import jax
import jax.numpy as jnp
from jax.experimental import pallas as pl
from jax.experimental.pallas import tpu as pltpu

NEG_SLOPE = 0.01                  # torch.nn.LeakyReLU() default negative_slope
LANE = 128
VMEM_LIMIT = 32 * 1024 * 1024     # safe on v5e (16 MiB scoped default) / v6e / v7x;
                                  # the per-step working set here is well below it.


def _round_up(x, m):
    return (x + m - 1) // m * m


def _pick_tn(c):
    """Out-channel tile: 256 matches the 256x256 MXU of v6e/v7x, else 128."""
    if c <= 256:
        return c
    return 256 if c % 256 == 0 else 128


# ------------------------------- Pallas kernels ------------------------------- #

def _conv3x3s2_kernel(ee_ref, eo_ref, oe_ref, oo_ref, w_ref, b_ref, o_ref, *,
                      ho, wo, cin, leaky):
    """3x3 / stride-2 / pad-1 conv (+bias, +LeakyReLU) for one image and one
    out-channel block, accumulating the 9 taps from VMEM-resident parity phases.

    ee/eo/oe/oo: (1, Ho+1, Wo+1, Cin) parity phases of the pad-1 input (bf16).
    w_ref: (9*Cin, TN) bf16, rows ordered (kh, kw, cin).   b_ref: (1, TN) f32.
    o_ref: (1, Ho, Wo, TN).
    """
    phases = (ee_ref, eo_ref, oe_ref, oo_ref)
    tn = o_ref.shape[3]
    bias = b_ref[...]                                     # (1, TN) f32

    # Static loop over output rows: every tap becomes a static 2-D slice of a
    # phase block, so no in-kernel reshapes / relayouts are needed.
    # NOTE: for very large spatial this unrolled loop could be swapped for a
    # lax.fori_loop; at GradualStyleBlock sizes (spatial <= 64) it is fine.
    for h in range(ho):
        acc = jnp.zeros((wo, tn), jnp.float32)
        for kh in range(3):
            for kw in range(3):
                p = (kh % 2) * 2 + (kw % 2)               # which parity phase
                dh, dw = kh // 2, kw // 2                 # in-phase offsets (0/1)
                t = kh * 3 + kw
                lhs = phases[p][0, h + dh, dw:dw + wo, :]             # (Wo, Cin)
                acc += jnp.dot(lhs, w_ref[t * cin:(t + 1) * cin, :],  # (Cin, TN)
                               preferred_element_type=jnp.float32)
        acc = acc + bias
        if leaky:
            acc = jnp.where(acc >= 0, acc, NEG_SLOPE * acc)
        o_ref[0, h] = acc.astype(o_ref.dtype)


def _tail_kernel(x_ref, wc_ref, bc_ref, wl_ref, bl_ref, o_ref):
    """Fused [last conv (2x2 -> 1x1, == plain GEMM)] + LeakyReLU + EqualLinear.

    The intermediate activation stays resident in VMEM (no HBM round trip,
    one launch instead of two)."""
    h = jnp.dot(x_ref[...], wc_ref[...], preferred_element_type=jnp.float32)
    h = h + bc_ref[...]
    h = jnp.where(h >= 0, h, NEG_SLOPE * h)
    y = jnp.dot(h.astype(wl_ref.dtype), wl_ref[...],
                preferred_element_type=jnp.float32)
    o_ref[...] = y + bl_ref[...]


# ------------------------------ Pallas wrappers ------------------------------ #

def _conv3x3s2(x, w, b, *, leaky=True, out_dtype=jnp.bfloat16):
    """y = leaky_relu(conv3x3_s2_p1(x) @ ... + b).   x: (N, H, W, Cin) NHWC."""
    n, hi, wi, cin = x.shape
    assert hi % 2 == 0 and wi % 2 == 0, "spatial must be even (power-of-two)"
    ho, wo = hi // 2, wi // 2
    cout = w.shape[1]
    assert w.shape[0] == 9 * cin
    tn = _pick_tn(cout)

    # Stride-2 resolved in plain JAX: split the pad-1 input into its 4 parity
    # phases (~1x layout copy, replacing the 2.25x im2col write + read).  Every
    # (kh, kw) tap is then a contiguous static window of one phase.
    xp = jnp.pad(x, ((0, 0), (1, 1), (1, 1), (0, 0)))
    ee = xp[:, 0::2, 0::2, :]
    eo = xp[:, 0::2, 1::2, :]
    oe = xp[:, 1::2, 0::2, :]
    oo = xp[:, 1::2, 1::2, :]                 # each (N, Ho+1, Wo+1, Cin)

    hh, wh = ho + 1, wo + 1
    phase_spec = pl.BlockSpec((1, hh, wh, cin), lambda j, i: (i, 0, 0, 0))
    # Weight / bias only change with the *outer* out-channel axis -> single
    # buffer them (double buffering just duplicated the VMEM allocation).
    const1 = dict(pipeline_mode=pl.Buffered(1))

    return pl.pallas_call(
        functools.partial(_conv3x3s2_kernel, ho=ho, wo=wo, cin=cin, leaky=leaky),
        out_shape=jax.ShapeDtypeStruct((n, ho, wo, cout), out_dtype),
        grid=(cout // tn, n),                 # (out-channel blocks, batch)
        in_specs=[phase_spec, phase_spec, phase_spec, phase_spec,
                  pl.BlockSpec((9 * cin, tn), lambda j, i: (0, j), **const1),
                  pl.BlockSpec((1, tn), lambda j, i: (0, j), **const1)],
        out_specs=pl.BlockSpec((1, ho, wo, tn), lambda j, i: (i, 0, 0, j)),
        compiler_params=pltpu.CompilerParams(
            dimension_semantics=("parallel", "parallel"),   # megacore split (v7x)
            vmem_limit_bytes=VMEM_LIMIT),
    )(ee, eo, oe, oo, w, b)


def _fused_tail(x4c, wc, bc, wl, bl):
    """out = EqualLinear(LeakyReLU(x4c @ wc + bc)); single full-block grid step,
    intermediate resident in VMEM.  M = batch is tiny for this module, so no row
    tiling / padding is needed (avoids pad + slice HBM round trips)."""
    m, k = x4c.shape
    c = wc.shape[1]
    x4c = x4c.astype(jnp.bfloat16)
    return pl.pallas_call(
        _tail_kernel,
        out_shape=jax.ShapeDtypeStruct((m, c), jnp.float32),
        grid=(1,),
        in_specs=[pl.BlockSpec((m, k), lambda i: (0, 0)),
                  pl.BlockSpec((k, c), lambda i: (0, 0)),
                  pl.BlockSpec((1, c), lambda i: (0, 0)),
                  pl.BlockSpec((c, c), lambda i: (0, 0)),
                  pl.BlockSpec((1, c), lambda i: (0, 0))],
        out_specs=pl.BlockSpec((m, c), lambda i: (0, 0)),
        compiler_params=pltpu.CompilerParams(
            dimension_semantics=("arbitrary",),
            vmem_limit_bytes=VMEM_LIMIT),
    )(x4c, wc, bc, wl, bl)


# -------------------------------- parameters -------------------------------- #

def init_params(key, in_c, out_c, spatial):
    """Deterministic synthetic parameters matching the module's shapes."""
    assert spatial >= 2 and (spatial & (spatial - 1)) == 0, "spatial must be 2^k"
    num_pools = int(math.log2(spatial))
    keys = jax.random.split(key, 2 * num_pools + 1)
    convs = []
    cin = in_c
    for i in range(num_pools):
        # conv weight stored as (kh, kw, cin, cout) to match the kernel's tap order.
        # NOTE: real PyTorch Conv2d weights are (cout, cin, kh, kw) -> permute on load.
        w = jax.random.normal(keys[2 * i], (3, 3, cin, out_c), jnp.float32) * 0.05
        b = jax.random.normal(keys[2 * i + 1], (out_c,), jnp.float32) * 0.01
        convs.append((w, b))
        cin = out_c
    # EqualLinear(out_c, out_c, lr_mul=1): weight (out,in) ~ N(0,1), bias = 0
    lin_w = jax.random.normal(keys[-1], (out_c, out_c), jnp.float32)
    lin_b = jnp.zeros((out_c,), jnp.float32)
    return {"convs": convs, "lin_w": lin_w, "lin_b": lin_b}


def pack_params(params, out_c):
    """One-time packing: pad channels to lane multiples (128), reshape conv
    weights to the (9*cin, cout) tap-GEMM layout, fold the EqualLinear scale +
    transpose, and cast GEMM operands to bf16 (biases stay f32)."""
    c_pad = _round_up(out_c, LANE)
    convs = params["convs"]
    n_convs = len(convs)

    packed_convs = []
    for i, (w, b) in enumerate(convs[:-1]):
        _, _, cin, cout = w.shape
        cin_p = cin if i == 0 else c_pad      # later layers see padded activations
        wp = jnp.zeros((3, 3, cin_p, c_pad), jnp.float32).at[:, :, :cin, :cout].set(w)
        wp = wp.reshape(9 * cin_p, c_pad).astype(jnp.bfloat16)  # rows (kh, kw, cin)
        bp = jnp.zeros((1, c_pad), jnp.float32).at[0, :cout].set(b)
        packed_convs.append((wp, bp))

    # Last conv acts on a 2x2 activation: only taps (kh,kw) in {1,2}x{1,2} are live.
    w_last, b_last = convs[-1]
    cin = w_last.shape[2]
    cin_p = cin if n_convs == 1 else c_pad
    wl = jnp.zeros((3, 3, cin_p, c_pad), jnp.float32).at[:, :, :cin, :out_c].set(w_last)
    w_tail_conv = wl[1:3, 1:3].reshape(4 * cin_p, c_pad).astype(jnp.bfloat16)
    b_tail_conv = jnp.zeros((1, c_pad), jnp.float32).at[0, :out_c].set(b_last)

    # EqualLinear: fold scale once (lr_mul = 1), transpose to (in, out), pad.
    scale = 1.0 / math.sqrt(out_c)
    wlin = (params["lin_w"] * scale).T            # (in_dim, out_dim)
    w_lin = jnp.zeros((c_pad, c_pad), jnp.float32).at[:out_c, :out_c].set(wlin)
    w_lin = w_lin.astype(jnp.bfloat16)
    b_lin = jnp.zeros((1, c_pad), jnp.float32).at[0, :out_c].set(params["lin_b"])

    return {"convs": packed_convs,
            "tail_conv": (w_tail_conv, b_tail_conv),
            "lin": (w_lin, b_lin)}


# --------------------------------- forward ---------------------------------- #

def gradual_style_block_forward(x_nchw, packed, out_c):
    """GradualStyleBlock forward.  x_nchw: (N, in_c, H, W) (PyTorch layout)."""
    # NCHW -> NHWC (channels on the lane axis); bf16 activations halve HBM traffic.
    x = jnp.transpose(x_nchw, (0, 2, 3, 1)).astype(jnp.bfloat16)

    # All but the last conv: fused 3x3/s2 conv + bias + LeakyReLU Pallas kernels.
    for (w, b) in packed["convs"]:
        x = _conv3x3s2(x, w, b, leaky=True, out_dtype=jnp.bfloat16)

    # Fused tail: last conv (2x2 -> 1x1 == flatten + GEMM) + LeakyReLU +
    # EqualLinear in one kernel.  Padded channels are identically zero, so
    # slicing [:, :out_c] reproduces torch's x.view(-1, out_c) @ linear exactly.
    assert x.shape[1] == 2 and x.shape[2] == 2, "expected a 2x2 activation"
    n = x.shape[0]
    x4c = x.reshape(n, -1)                        # (N, 4*C), flatten order (h, w, c)
    wc, bc = packed["tail_conv"]
    wl, bl = packed["lin"]
    out = _fused_tail(x4c, wc, bc, wl, bl)
    return out[:, :out_c]


# ----------------------------------- demo ------------------------------------ #

if __name__ == "__main__":
    key = jax.random.PRNGKey(0)
    k_x, k_p = jax.random.split(key)

    N, in_c, out_c, spatial = 2, 4, 32, 16          # GradualStyleBlock(4, 32, spatial=16)
    x = jax.random.normal(k_x, (N, in_c, spatial, spatial), jnp.float32)  # NCHW
    raw_params = init_params(k_p, in_c, out_c, spatial)
    packed = pack_params(raw_params, out_c)          # one-time weight packing

    fwd = jax.jit(gradual_style_block_forward, static_argnums=(2,))
    out = jax.block_until_ready(fwd(x, packed, out_c))

    assert out.shape == (N, out_c), out.shape
    assert bool(jnp.all(jnp.isfinite(out)))
    print("KERNEL_OK")
</pallas_src>

<mosaic_0001>
module attributes {stable_mosaic.version = 11 : i64} {
  func.func @_conv3x3s2_kernel(%arg0: i32, %arg1: i32, %arg2: memref<1x5x5x128xbf16, #tpu.memory_space<vmem>>, %arg3: memref<1x5x5x128xbf16, #tpu.memory_space<vmem>>, %arg4: memref<1x5x5x128xbf16, #tpu.memory_space<vmem>>, %arg5: memref<1x5x5x128xbf16, #tpu.memory_space<vmem>>, %arg6: memref<1152x128xbf16, #tpu.memory_space<vmem>>, %arg7: memref<1x128xf32, #tpu.memory_space<vmem>>, %arg8: memref<1x4x4x128xbf16, #tpu.memory_space<vmem>>) attributes {dimension_semantics = [#tpu.dimension_semantics<parallel>, #tpu.dimension_semantics<parallel>], iteration_bounds = array<i64: 1, 2>, scalar_prefetch = 0 : i64, scratch_operands = 0 : i64, tpu.core_type = #tpu.core_type<tc>, window_params = [{transform_indices = @transform_0, window_bounds = array<i64: 1, 5, 5, 128>}, {transform_indices = @transform_1, window_bounds = array<i64: 1, 5, 5, 128>}, {transform_indices = @transform_2, window_bounds = array<i64: 1, 5, 5, 128>}, {transform_indices = @transform_3, window_bounds = array<i64: 1, 5, 5, 128>}, {pipeline_mode = #tpu.pipeline_mode<synchronous>, transform_indices = @transform_4, window_bounds = array<i64: 1152, 128>}, {pipeline_mode = #tpu.pipeline_mode<synchronous>, transform_indices = @transform_5, window_bounds = array<i64: 1, 128>}, {transform_indices = @transform_6, window_bounds = array<i64: 1, 4, 4, 128>}]} {
    %c0 = arith.constant 0 : index
    %c0_0 = arith.constant 0 : index
    %0 = vector.load %arg7[%c0, %c0_0] : memref<1x128xf32, #tpu.memory_space<vmem>>, vector<1x128xf32>
    %cst = arith.constant 0.000000e+00 : f32
    %1 = vector.broadcast %cst : f32 to vector<4x128xf32>
    %c0_1 = arith.constant 0 : index
    %c0_2 = arith.constant 0 : index
    %c0_3 = arith.constant 0 : index
    %c0_4 = arith.constant 0 : index
    %2 = vector.load %arg2[%c0_1, %c0_2, %c0_3, %c0_4] : memref<1x5x5x128xbf16, #tpu.memory_space<vmem>>, vector<1x1x4x128xbf16>
    %3 = vector.shape_cast %2 : vector<1x1x4x128xbf16> to vector<4x128xbf16>
    %c0_5 = arith.constant 0 : index
    %c0_6 = arith.constant 0 : index
    %4 = vector.load %arg6[%c0_5, %c0_6] : memref<1152x128xbf16, #tpu.memory_space<vmem>>, vector<128x128xbf16>
    %cst_7 = arith.constant dense<0.000000e+00> : vector<4x128xf32>
    %5 = tpu.matmul %3, %4, %cst_7 {dimension_numbers = #tpu.dot_dimension_numbers<[1], [0], [0], [1], [0, 0, 1, 1], [], []>} : vector<4x128xbf16>, vector<128x128xbf16>, vector<4x128xf32> -> vector<4x128xf32>
    %6 = arith.addf %1, %5 : vector<4x128xf32>
    %c0_8 = arith.constant 0 : index
    %c0_9 = arith.constant 0 : index
    %c0_10 = arith.constant 0 : index
    %c0_11 = arith.constant 0 : index
    %7 = vector.load %arg3[%c0_8, %c0_9, %c0_10, %c0_11] : memref<1x5x5x128xbf16, #tpu.memory_space<vmem>>, vector<1x1x4x128xbf16>
    %8 = vector.shape_cast %7 : vector<1x1x4x128xbf16> to vector<4x128xbf16>
    %c128 = arith.constant 128 : index
    %c0_12 = arith.constant 0 : index
    %9 = vector.load %arg6[%c128, %c0_12] : memref<1152x128xbf16, #tpu.memory_space<vmem>>, vector<128x128xbf16>
    %cst_13 = arith.constant dense<0.000000e+00> : vector<4x128xf32>
    %10 = tpu.matmul %8, %9, %cst_13 {dimension_numbers = #tpu.dot_dimension_numbers<[1], [0], [0], [1], [0, 0, 1, 1], [], []>} : vector<4x128xbf16>, vector<128x128xbf16>, vector<4x128xf32> -> vector<4x128xf32>
    %11 = arith.addf %6, %10 : vector<4x128xf32>
    %c0_14 = arith.constant 0 : index
    %c0_15 = arith.constant 0 : index
    %c1 = arith.constant 1 : index
    %c0_16 = arith.constant 0 : index
    %12 = vector.load %arg2[%c0_14, %c0_15, %c1, %c0_16] : memref<1x5x5x128xbf16, #tpu.memory_space<vmem>>, vector<1x1x4x128xbf16>
    %13 = vector.shape_cast %12 : vector<1x1x4x128xbf16> to vector<4x128xbf16>
    %c256 = arith.constant 256 : index
    %c0_17 = arith.constant 0 : index
    %14 = vector.load %arg6[%c256, %c0_17] : memref<1152x128xbf16, #tpu.memory_space<vmem>>, vector<128x128xbf16>
    %cst_18 = arith.constant dense<0.000000e+00> : vector<4x128xf32>
    %15 = tpu.matmul %13, %14, %cst_18 {dimension_numbers = #tpu.dot_dimension_numbers<[1], [0], [0], [1], [0, 0, 1, 1], [], []>} : vector<4x128xbf16>, vector<128x128xbf16>, vector<4x128xf32> -> vector<4x128xf32>
    %16 = arith.addf %11, %15 : vector<4x128xf32>
    %c0_19 = arith.constant 0 : index
    %c0_20 = arith.constant 0 : index
    %c0_21 = arith.constant 0 : index
    %c0_22 = arith.constant 0 : index
    %17 = vector.load %arg4[%c0_19, %c0_20, %c0_21, %c0_22] : memref<1x5x5x128xbf16, #tpu.memory_space<vmem>>, vector<1x1x4x128xbf16>
    %18 = vector.shape_cast %17 : vector<1x1x4x128xbf16> to vector<4x128xbf16>
    %c384 = arith.constant 384 : index
    %c0_23 = arith.constant 0 : index
    %19 = vector.load %arg6[%c384, %c0_23] : memref<1152x128xbf16, #tpu.memory_space<vmem>>, vector<128x128xbf16>
    %cst_24 = arith.constant dense<0.000000e+00> : vector<4x128xf32>
    %20 = tpu.matmul %18, %19, %cst_24 {dimension_numbers = #tpu.dot_dimension_numbers<[1], [0], [0], [1], [0, 0, 1, 1], [], []>} : vector<4x128xbf16>, vector<128x128xbf16>, vector<4x128xf32> -> vector<4x128xf32>
    %21 = arith.addf %16, %20 : vector<4x128xf32>
    %c0_25 = arith.constant 0 : index
    %c0_26 = arith.constant 0 : index
    %c0_27 = arith.constant 0 : index
    %c0_28 = arith.constant 0 : index
    %22 = vector.load %arg5[%c0_25, %c0_26, %c0_27, %c0_28] : memref<1x5x5x128xbf16, #tpu.memory_space<vmem>>, vector<1x1x4x128xbf16>
    %23 = vector.shape_cast %22 : vector<1x1x4x128xbf16> to vector<4x128xbf16>
    %c512 = arith.constant 512 : index
    %c0_29 = arith.constant 0 : index
    %24 = vector.load %arg6[%c512, %c0_29] : memref<1152x128xbf16, #tpu.memory_space<vmem>>, vector<128x128xbf16>
    %cst_30 = arith.constant dense<0.000000e+00> : vector<4x128xf32>
    %25 = tpu.matmul %23, %24, %cst_30 {dimension_numbers = #tpu.dot_dimension_numbers<[1], [0], [0], [1], [0, 0, 1, 1], [], []>} : vector<4x128xbf16>, vector<128x128xbf16>, vector<4x128xf32> -> vector<4x128xf32>
    %26 = arith.addf %21, %25 : vector<4x128xf32>
    %c0_31 = arith.constant 0 : index
    %c0_32 = arith.constant 0 : index
    %c1_33 = arith.constant 1 : index
    %c0_34 = arith.constant 0 : index
    %27 = vector.load %arg4[%c0_31, %c0_32, %c1_33, %c0_34] : memref<1x5x5x128xbf16, #tpu.memory_space<vmem>>, vector<1x1x4x128xbf16>
    %28 = vector.shape_cast %27 : vector<1x1x4x128xbf16> to vector<4x128xbf16>
    %c640 = arith.constant 640 : index
    %c0_35 = arith.constant 0 : index
    %29 = vector.load %arg6[%c640, %c0_35] : memref<1152x128xbf16, #tpu.memory_space<vmem>>, vector<128x128xbf16>
    %cst_36 = arith.constant dense<0.000000e+00> : vector<4x128xf32>
    %30 = tpu.matmul %28, %29, %cst_36 {dimension_numbers = #tpu.dot_dimension_numbers<[1], [0], [0], [1], [0, 0, 1, 1], [], []>} : vector<4x128xbf16>, vector<128x128xbf16>, vector<4x128xf32> -> vector<4x128xf32>
    %31 = arith.addf %26, %30 : vector<4x128xf32>
    %c0_37 = arith.constant 0 : index
    %c1_38 = arith.constant 1 : index
    %c0_39 = arith.constant 0 : index
    %c0_40 = arith.constant 0 : index
    %32 = vector.load %arg2[%c0_37, %c1_38, %c0_39, %c0_40] : memref<1x5x5x128xbf16, #tpu.memory_space<vmem>>, vector<1x1x4x128xbf16>
    %33 = vector.shape_cast %32 : vector<1x1x4x128xbf16> to vector<4x128xbf16>
    %c768 = arith.constant 768 : index
    %c0_41 = arith.constant 0 : index
    %34 = vector.load %arg6[%c768, %c0_41] : memref<1152x128xbf16, #tpu.memory_space<vmem>>, vector<128x128xbf16>
    %cst_42 = arith.constant dense<0.000000e+00> : vector<4x128xf32>
    %35 = tpu.matmul %33, %34, %cst_42 {dimension_numbers = #tpu.dot_dimension_numbers<[1], [0], [0], [1], [0, 0, 1, 1], [], []>} : vector<4x128xbf16>, vector<128x128xbf16>, vector<4x128xf32> -> vector<4x128xf32>
    %36 = arith.addf %31, %35 : vector<4x128xf32>
    %c0_43 = arith.constant 0 : index
    %c1_44 = arith.constant 1 : index
    %c0_45 = arith.constant 0 : index
    %c0_46 = arith.constant 0 : index
    %37 = vector.load %arg3[%c0_43, %c1_44, %c0_45, %c0_46] : memref<1x5x5x128xbf16, #tpu.memory_space<vmem>>, vector<1x1x4x128xbf16>
    %38 = vector.shape_cast %37 : vector<1x1x4x128xbf16> to vector<4x128xbf16>
    %c896 = arith.constant 896 : index
    %c0_47 = arith.constant 0 : index
    %39 = vector.load %arg6[%c896, %c0_47] : memref<1152x128xbf16, #tpu.memory_space<vmem>>, vector<128x128xbf16>
    %cst_48 = arith.constant dense<0.000000e+00> : vector<4x128xf32>
    %40 = tpu.matmul %38, %39, %cst_48 {dimension_numbers = #tpu.dot_dimension_numbers<[1], [0], [0], [1], [0, 0, 1, 1], [], []>} : vector<4x128xbf16>, vector<128x128xbf16>, vector<4x128xf32> -> vector<4x128xf32>
    %41 = arith.addf %36, %40 : vector<4x128xf32>
    %c0_49 = arith.constant 0 : index
    %c1_50 = arith.constant 1 : index
    %c1_51 = arith.constant 1 : index
    %c0_52 = arith.constant 0 : index
    %42 = vector.load %arg2[%c0_49, %c1_50, %c1_51, %c0_52] : memref<1x5x5x128xbf16, #tpu.memory_space<vmem>>, vector<1x1x4x128xbf16>
    %43 = vector.shape_cast %42 : vector<1x1x4x128xbf16> to vector<4x128xbf16>
    %c1024 = arith.constant 1024 : index
    %c0_53 = arith.constant 0 : index
    %44 = vector.load %arg6[%c1024, %c0_53] : memref<1152x128xbf16, #tpu.memory_space<vmem>>, vector<128x128xbf16>
    %cst_54 = arith.constant dense<0.000000e+00> : vector<4x128xf32>
    %45 = tpu.matmul %43, %44, %cst_54 {dimension_numbers = #tpu.dot_dimension_numbers<[1], [0], [0], [1], [0, 0, 1, 1], [], []>} : vector<4x128xbf16>, vector<128x128xbf16>, vector<4x128xf32> -> vector<4x128xf32>
    %46 = arith.addf %41, %45 : vector<4x128xf32>
    %47 = vector.broadcast %0 : vector<1x128xf32> to vector<4x128xf32>
    %48 = arith.addf %46, %47 : vector<4x128xf32>
    %cst_55 = arith.constant 0.000000e+00 : f32
    %49 = vector.broadcast %cst_55 : f32 to vector<4x128xf32>
    %50 = arith.cmpf oge, %48, %49 : vector<4x128xf32>
    %cst_56 = arith.constant 0.00999999977 : f32
    %51 = vector.broadcast %cst_56 : f32 to vector<4x128xf32>
    %52 = arith.mulf %51, %48 : vector<4x128xf32>
    %53 = arith.select %50, %48, %52 : vector<4x128xi1>, vector<4x128xf32>
    %54 = arith.truncf %53 : vector<4x128xf32> to vector<4x128xbf16>
    %c0_57 = arith.constant 0 : index
    %c0_58 = arith.constant 0 : index
    %c0_59 = arith.constant 0 : index
    %c0_60 = arith.constant 0 : index
    %55 = vector.load %arg8[%c0_57, %c0_58, %c0_59, %c0_60] : memref<1x4x4x128xbf16, #tpu.memory_space<vmem>>, vector<1x1x4x128xbf16>
    %56 = vector.shape_cast %55 : vector<1x1x4x128xbf16> to vector<4x128xbf16>
    %57 = vector.shape_cast %54 : vector<4x128xbf16> to vector<1x1x4x128xbf16>
    tpu.vector_store %arg8[%c0_57, %c0_58, %c0_59, %c0_60], %57 {strides = array<i32>} : memref<1x4x4x128xbf16, #tpu.memory_space<vmem>>, vector<1x1x4x128xbf16>,
    %cst_61 = arith.constant 0.000000e+00 : f32
    %58 = vector.broadcast %cst_61 : f32 to vector<4x128xf32>
    %c0_62 = arith.constant 0 : index
    %c1_63 = arith.constant 1 : index
    %c0_64 = arith.constant 0 : index
    %c0_65 = arith.constant 0 : index
    %59 = vector.load %arg2[%c0_62, %c1_63, %c0_64, %c0_65] : memref<1x5x5x128xbf16, #tpu.memory_space<vmem>>, vector<1x1x4x128xbf16>
    %60 = vector.shape_cast %59 : vector<1x1x4x128xbf16> to vector<4x128xbf16>
    %c0_66 = arith.constant 0 : index
    %c0_67 = arith.constant 0 : index
    %61 = vector.load %arg6[%c0_66, %c0_67] : memref<1152x128xbf16, #tpu.memory_space<vmem>>, vector<128x128xbf16>
    %cst_68 = arith.constant dense<0.000000e+00> : vector<4x128xf32>
    %62 = tpu.matmul %60, %61, %cst_68 {dimension_numbers = #tpu.dot_dimension_numbers<[1], [0], [0], [1], [0, 0, 1, 1], [], []>} : vector<4x128xbf16>, vector<128x128xbf16>, vector<4x128xf32> -> vector<4x128xf32>
    %63 = arith.addf %58, %62 : vector<4x128xf32>
    %c0_69 = arith.constant 0 : index
    %c1_70 = arith.constant 1 : index
    %c0_71 = arith.constant 0 : index
    %c0_72 = arith.constant 0 : index
    %64 = vector.load %arg3[%c0_69, %c1_70, %c0_71, %c0_72] : memref<1x5x5x128xbf16, #tpu.memory_space<vmem>>, vector<1x1x4x128xbf16>
    %65 = vector.shape_cast %64 : vector<1x1x4x128xbf16> to vector<4x128xbf16>
    %c128_73 = arith.constant 128 : index
    %c0_74 = arith.constant 0 : index
    %66 = vector.load %arg6[%c128_73, %c0_74] : memref<1152x128xbf16, #tpu.memory_space<vmem>>, vector<128x128xbf16>
    %cst_75 = arith.constant dense<0.000000e+00> : vector<4x128xf32>
    %67 = tpu.matmul %65, %66, %cst_75 {dimension_numbers = #tpu.dot_dimension_numbers<[1], [0], [0], [1], [0, 0, 1, 1], [], []>} : vector<4x128xbf16>, vector<128x128xbf16>, vector<4x128xf32> -> vector<4x128xf32>
    %68 = arith.addf %63, %67 : vector<4x128xf32>
    %c0_76 = arith.constant 0 : index
    %c1_77 = arith.constant 1 : index
    %c1_78 = arith.constant 1 : index
    %c0_79 = arith.constant 0 : index
    %69 = vector.load %arg2[%c0_76, %c1_77, %c1_78, %c0_79] : memref<1x5x5x128xbf16, #tpu.memory_space<vmem>>, vector<1x1x4x128xbf16>
    %70 = vector.shape_cast %69 : vector<1x1x4x128xbf16> to vector<4x128xbf16>
    %c256_80 = arith.constant 256 : index
    %c0_81 = arith.constant 0 : index
    %71 = vector.load %arg6[%c256_80, %c0_81] : memref<1152x128xbf16, #tpu.memory_space<vmem>>, vector<128x128xbf16>
    %cst_82 = arith.constant dense<0.000000e+00> : vector<4x128xf32>
    %72 = tpu.matmul %70, %71, %cst_82 {dimension_numbers = #tpu.dot_dimension_numbers<[1], [0], [0], [1], [0, 0, 1, 1], [], []>} : vector<4x128xbf16>, vector<128x128xbf16>, vector<4x128xf32> -> vector<4x128xf32>
    %73 = arith.addf %68, %72 : vector<4x128xf32>
    %c0_83 = arith.constant 0 : index
    %c1_84 = arith.constant 1 : index
    %c0_85 = arith.constant 0 : index
    %c0_86 = arith.constant 0 : index
    %74 = vector.load %arg4[%c0_83, %c1_84, %c0_85, %c0_86] : memref<1x5x5x128xbf16, #tpu.memory_space<vmem>>, vector<1x1x4x128xbf16>
    %75 = vector.shape_cast %74 : vector<1x1x4x128xbf16> to vector<4x128xbf16>
    %c384_87 = arith.constant 384 : index
    %c0_88 = arith.constant 0 : index
    %76 = vector.load %arg6[%c384_87, %c0_88] : memref<1152x128xbf16, #tpu.memory_space<vmem>>, vector<128x128xbf16>
    %cst_89 = arith.constant dense<0.000000e+00> : vector<4x128xf32>
    %77 = tpu.matmul %75, %76, %cst_89 {dimension_numbers = #tpu.dot_dimension_numbers<[1], [0], [0], [1], [0, 0, 1, 1], [], []>} : vector<4x128xbf16>, vector<128x128xbf16>, vector<4x128xf32> -> vector<4x128xf32>
    %78 = arith.addf %73, %77 : vector<4x128xf32>
    %c0_90 = arith.constant 0 : index
    %c1_91 = arith.constant 1 : index
    %c0_92 = arith.constant 0 : index
    %c0_93 = arith.constant 0 : index
    %79 = vector.load %arg5[%c0_90, %c1_91, %c0_92, %c0_93] : memref<1x5x5x128xbf16, #tpu.memory_space<vmem>>, vector<1x1x4x128xbf16>
    %80 = vector.shape_cast %79 : vector<1x1x4x128xbf16> to vector<4x128xbf16>
    %c512_94 = arith.constant 512 : index
    %c0_95 = arith.constant 0 : index
    %81 = vector.load %arg6[%c512_94, %c0_95] : memref<1152x128xbf16, #tpu.memory_space<vmem>>, vector<128x128xbf16>
    %cst_96 = arith.constant dense<0.000000e+00> : vector<4x128xf32>
    %82 = tpu.matmul %80, %81, %cst_96 {dimension_numbers = #tpu.dot_dimension_numbers<[1], [0], [0], [1], [0, 0, 1, 1], [], []>} : vector<4x128xbf16>, vector<128x128xbf16>, vector<4x128xf32> -> vector<4x128xf32>
    %83 = arith.addf %78, %82 : vector<4x128xf32>
    %c0_97 = arith.constant 0 : index
    %c1_98 = arith.constant 1 : index
    %c1_99 = arith.constant 1 : index
    %c0_100 = arith.constant 0 : index
    %84 = vector.load %arg4[%c0_97, %c1_98, %c1_99, %c0_100] : memref<1x5x5x128xbf16, #tpu.memory_space<vmem>>, vector<1x1x4x128xbf16>
    %85 = vector.shape_cast %84 : vector<1x1x4x128xbf16> to vector<4x128xbf16>
    %c640_101 = arith.constant 640 : index
    %c0_102 = arith.constant 0 : index
    %86 = vector.load %arg6[%c640_101, %c0_102] : memref<1152x128xbf16, #tpu.memory_space<vmem>>, vector<128x128xbf16>
    %cst_103 = arith.constant dense<0.000000e+00> : vector<4x128xf32>
    %87 = tpu.matmul %85, %86, %cst_103 {dimension_numbers = #tpu.dot_dimension_numbers<[1], [0], [0], [1], [0, 0, 1, 1], [], []>} : vector<4x128xbf16>, vector<128x128xbf16>, vector<4x128xf32> -> vector<4x128xf32>
    %88 = arith.addf %83, %87 : vector<4x128xf32>
    %c0_104 = arith.constant 0 : index
    %c2 = arith.constant 2 : index
    %c0_105 = arith.constant 0 : index
    %c0_106 = arith.constant 0 : index
    %89 = vector.load %arg2[%c0_104, %c2, %c0_105, %c0_106] : memref<1x5x5x128xbf16, #tpu.memory_space<vmem>>, vector<1x1x4x128xbf16>
    %90 = vector.shape_cast %89 : vector<1x1x4x128xbf16> to vector<4x128xbf16>
    %c768_107 = arith.constant 768 : index
    %c0_108 = arith.constant 0 : index
    %91 = vector.load %arg6[%c768_107, %c0_108] : memref<1152x128xbf16, #tpu.memory_space<vmem>>, vector<128x128xbf16>
    %cst_109 = arith.constant dense<0.000000e+00> : vector<4x128xf32>
    %92 = tpu.matmul %90, %91, %cst_109 {dimension_numbers = #tpu.dot_dimension_numbers<[1], [0], [0], [1], [0, 0, 1, 1], [], []>} : vector<4x128xbf16>, vector<128x128xbf16>, vector<4x128xf32> -> vector<4x128xf32>
    %93 = arith.addf %88, %92 : vector<4x128xf32>
    %c0_110 = arith.constant 0 : index
    %c2_111 = arith.constant 2 : index
    %c0_112 = arith.constant 0 : index
    %c0_113 = arith.constant 0 : index
    %94 = vector.load %arg3[%c0_110, %c2_111, %c0_112, %c0_113] : memref<1x5x5x128xbf16, #tpu.memory_space<vmem>>, vector<1x1x4x128xbf16>
    %95 = vector.shape_cast %94 : vector<1x1x4x128xbf16> to vector<4x128xbf16>
    %c896_114 = arith.constant 896 : index
    %c0_115 = arith.constant 0 : index
    %96 = vector.load %arg6[%c896_114, %c0_115] : memref<1152x128xbf16, #tpu.memory_space<vmem>>, vector<128x128xbf16>
    %cst_116 = arith.constant dense<0.000000e+00> : vector<4x128xf32>
    %97 = tpu.matmul %95, %96, %cst_116 {dimension_numbers = #tpu.dot_dimension_numbers<[1], [0], [0], [1], [0, 0, 1, 1], [], []>} : vector<4x128xbf16>, vector<128x128xbf16>, vector<4x128xf32> -> vector<4x128xf32>
    %98 = arith.addf %93, %97 : vector<4x128xf32>
    %c0_117 = arith.constant 0 : index
    %c2_118 = arith.constant 2 : index
    %c1_119 = arith.constant 1 : index
    %c0_120 = arith.constant 0 : index
    %99 = vector.load %arg2[%c0_117, %c2_118, %c1_119, %c0_120] : memref<1x5x5x128xbf16, #tpu.memory_space<vmem>>, vector<1x1x4x128xbf16>
    %100 = vector.shape_cast %99 : vector<1x1x4x128xbf16> to vector<4x128xbf16>
    %c1024_121 = arith.constant 1024 : index
    %c0_122 = arith.constant 0 : index
    %101 = vector.load %arg6[%c1024_121, %c0_122] : memref<1152x128xbf16, #tpu.memory_space<vmem>>, vector<128x128xbf16>
    %cst_123 = arith.constant dense<0.000000e+00> : vector<4x128xf32>
    %102 = tpu.matmul %100, %101, %cst_123 {dimension_numbers = #tpu.dot_dimension_numbers<[1], [0], [0], [1], [0, 0, 1, 1], [], []>} : vector<4x128xbf16>, vector<128x128xbf16>, vector<4x128xf32> -> vector<4x128xf32>
    %103 = arith.addf %98, %102 : vector<4x128xf32>
    %104 = vector.broadcast %0 : vector<1x128xf32> to vector<4x128xf32>
    %105 = arith.addf %103, %104 : vector<4x128xf32>
    %cst_124 = arith.constant 0.000000e+00 : f32
    %106 = vector.broadcast %cst_124 : f32 to vector<4x128xf32>
    %107 = arith.cmpf oge, %105, %106 : vector<4x128xf32>
    %cst_125 = arith.constant 0.00999999977 : f32
    %108 = vector.broadcast %cst_125 : f32 to vector<4x128xf32>
    %109 = arith.mulf %108, %105 : vector<4x128xf32>
    %110 = arith.select %107, %105, %109 : vector<4x128xi1>, vector<4x128xf32>
    %111 = arith.truncf %110 : vector<4x128xf32> to vector<4x128xbf16>
    %c0_126 = arith.constant 0 : index
    %c1_127 = arith.constant 1 : index
    %c0_128 = arith.constant 0 : index
    %c0_129 = arith.constant 0 : index
    %112 = vector.load %arg8[%c0_126, %c1_127, %c0_128, %c0_129] : memref<1x4x4x128xbf16, #tpu.memory_space<vmem>>, vector<1x1x4x128xbf16>
    %113 = vector.shape_cast %112 : vector<1x1x4x128xbf16> to vector<4x128xbf16>
    %114 = vector.shape_cast %111 : vector<4x128xbf16> to vector<1x1x4x128xbf16>
    tpu.vector_store %arg8[%c0_126, %c1_127, %c0_128, %c0_129], %114 {strides = array<i32>} : memref<1x4x4x128xbf16, #tpu.memory_space<vmem>>, vector<1x1x4x128xbf16>,
    %cst_130 = arith.constant 0.000000e+00 : f32
    %115 = vector.broadcast %cst_130 : f32 to vector<4x128xf32>
    %c0_131 = arith.constant 0 : index
    %c2_132 = arith.constant 2 : index
    %c0_133 = arith.constant 0 : index
    %c0_134 = arith.constant 0 : index
    %116 = vector.load %arg2[%c0_131, %c2_132, %c0_133, %c0_134] : memref<1x5x5x128xbf16, #tpu.memory_space<vmem>>, vector<1x1x4x128xbf16>
    %117 = vector.shape_cast %116 : vector<1x1x4x128xbf16> to vector<4x128xbf16>
    %c0_135 = arith.constant 0 : index
    %c0_136 = arith.constant 0 : index
    %118 = vector.load %arg6[%c0_135, %c0_136] : memref<1152x128xbf16, #tpu.memory_space<vmem>>, vector<128x128xbf16>
    %cst_137 = arith.constant dense<0.000000e+00> : vector<4x128xf32>
    %119 = tpu.matmul %117, %118, %cst_137 {dimension_numbers = #tpu.dot_dimension_numbers<[1], [0], [0], [1], [0, 0, 1, 1], [], []>} : vector<4x128xbf16>, vector<128x128xbf16>, vector<4x128xf32> -> vector<4x128xf32>
    %120 = arith.addf %115, %119 : vector<4x128xf32>
    %c0_138 = arith.constant 0 : index
    %c2_139 = arith.constant 2 : index
    %c0_140 = arith.constant 0 : index
    %c0_141 = arith.constant 0 : index
    %121 = vector.load %arg3[%c0_138, %c2_139, %c0_140, %c0_141] : memref<1x5x5x128xbf16, #tpu.memory_space<vmem>>, vector<1x1x4x128xbf16>
    %122 = vector.shape_cast %121 : vector<1x1x4x128xbf16> to vector<4x128xbf16>
    %c128_142 = arith.constant 128 : index
    %c0_143 = arith.constant 0 : index
    %123 = vector.load %arg6[%c128_142, %c0_143] : memref<1152x128xbf16, #tpu.memory_space<vmem>>, vector<128x128xbf16>
    %cst_144 = arith.constant dense<0.000000e+00> : vector<4x128xf32>
    %124 = tpu.matmul %122, %123, %cst_144 {dimension_numbers = #tpu.dot_dimension_numbers<[1], [0], [0], [1], [0, 0, 1, 1], [], []>} : vector<4x128xbf16>, vector<128x128xbf16>, vector<4x128xf32> -> vector<4x128xf32>
    %125 = arith.addf %120, %124 : vector<4x128xf32>
    %c0_145 = arith.constant 0 : index
    %c2_146 = arith.constant 2 : index
    %c1_147 = arith.constant 1 : index
    %c0_148 = arith.constant 0 : index
    %126 = vector.load %arg2[%c0_145, %c2_146, %c1_147, %c0_148] : memref<1x5x5x128xbf16, #tpu.memory_space<vmem>>, vector<1x1x4x128xbf16>
    %127 = vector.shape_cast %126 : vector<1x1x4x128xbf16> to vector<4x128xbf16>
    %c256_149 = arith.constant 256 : index
    %c0_150 = arith.constant 0 : index
    %128 = vector.load %arg6[%c256_149, %c0_150] : memref<1152x128xbf16, #tpu.memory_space<vmem>>, vector<128x128xbf16>
    %cst_151 = arith.constant dense<0.000000e+00> : vector<4x128xf32>
    %129 = tpu.matmul %127, %128, %cst_151 {dimension_numbers = #tpu.dot_dimension_numbers<[1], [0], [0], [1], [0, 0, 1, 1], [], []>} : vector<4x128xbf16>, vector<128x128xbf16>, vector<4x128xf32> -> vector<4x128xf32>
    %130 = arith.addf %125, %129 : vector<4x128xf32>
    %c0_152 = arith.constant 0 : index
    %c2_153 = arith.constant 2 : index
    %c0_154 = arith.constant 0 : index
    %c0_155 = arith.constant 0 : index
    %131 = vector.load %arg4[%c0_152, %c2_153, %c0_154, %c0_155] : memref<1x5x5x128xbf16, #tpu.memory_space<vmem>>, vector<1x1x4x128xbf16>
    %132 = vector.shape_cast %131 : vector<1x1x4x128xbf16> to vector<4x128xbf16>
    %c384_156 = arith.constant 384 : index
    %c0_157 = arith.constant 0 : index
    %133 = vector.load %arg6[%c384_156, %c0_157] : memref<1152x128xbf16, #tpu.memory_space<vmem>>, vector<128x128xbf16>
    %cst_158 = arith.constant dense<0.000000e+00> : vector<4x128xf32>
    %134 = tpu.matmul %132, %133, %cst_158 {dimension_numbers = #tpu.dot_dimension_numbers<[1], [0], [0], [1], [0, 0, 1, 1], [], []>} : vector<4x128xbf16>, vector<128x128xbf16>, vector<4x128xf32> -> vector<4x128xf32>
    %135 = arith.addf %130, %134 : vector<4x128xf32>
    %c0_159 = arith.constant 0 : index
    %c2_160 = arith.constant 2 : index
    %c0_161 = arith.constant 0 : index
    %c0_162 = arith.constant 0 : index
    %136 = vector.load %arg5[%c0_159, %c2_160, %c0_161, %c0_162] : memref<1x5x5x128xbf16, #tpu.memory_space<vmem>>, vector<1x1x4x128xbf16>
    %137 = vector.shape_cast %136 : vector<1x1x4x128xbf16> to vector<4x128xbf16>
    %c512_163 = arith.constant 512 : index
    %c0_164 = arith.constant 0 : index
    %138 = vector.load %arg6[%c512_163, %c0_164] : memref<1152x128xbf16, #tpu.memory_space<vmem>>, vector<128x128xbf16>
    %cst_165 = arith.constant dense<0.000000e+00> : vector<4x128xf32>
    %139 = tpu.matmul %137, %138, %cst_165 {dimension_numbers = #tpu.dot_dimension_numbers<[1], [0], [0], [1], [0, 0, 1, 1], [], []>} : vector<4x128xbf16>, vector<128x128xbf16>, vector<4x128xf32> -> vector<4x128xf32>
    %140 = arith.addf %135, %139 : vector<4x128xf32>
    %c0_166 = arith.constant 0 : index
    %c2_167 = arith.constant 2 : index
    %c1_168 = arith.constant 1 : index
    %c0_169 = arith.constant 0 : index
    %141 = vector.load %arg4[%c0_166, %c2_167, %c1_168, %c0_169] : memref<1x5x5x128xbf16, #tpu.memory_space<vmem>>, vector<1x1x4x128xbf16>
    %142 = vector.shape_cast %141 : vector<1x1x4x128xbf16> to vector<4x128xbf16>
    %c640_170 = arith.constant 640 : index
    %c0_171 = arith.constant 0 : index
    %143 = vector.load %arg6[%c640_170, %c0_171] : memref<1152x128xbf16, #tpu.memory_space<vmem>>, vector<128x128xbf16>
    %cst_172 = arith.constant dense<0.000000e+00> : vector<4x128xf32>
    %144 = tpu.matmul %142, %143, %cst_172 {dimension_numbers = #tpu.dot_dimension_numbers<[1], [0], [0], [1], [0, 0, 1, 1], [], []>} : vector<4x128xbf16>, vector<128x128xbf16>, vector<4x128xf32> -> vector<4x128xf32>
    %145 = arith.addf %140, %144 : vector<4x128xf32>
    %c0_173 = arith.constant 0 : index
    %c3 = arith.constant 3 : index
    %c0_174 = arith.constant 0 : index
    %c0_175 = arith.constant 0 : index
    %146 = vector.load %arg2[%c0_173, %c3, %c0_174, %c0_175] : memref<1x5x5x128xbf16, #tpu.memory_space<vmem>>, vector<1x1x4x128xbf16>
    %147 = vector.shape_cast %146 : vector<1x1x4x128xbf16> to vector<4x128xbf16>
    %c768_176 = arith.constant 768 : index
    %c0_177 = arith.constant 0 : index
    %148 = vector.load %arg6[%c768_176, %c0_177] : memref<1152x128xbf16, #tpu.memory_space<vmem>>, vector<128x128xbf16>
    %cst_178 = arith.constant dense<0.000000e+00> : vector<4x128xf32>
    %149 = tpu.matmul %147, %148, %cst_178 {dimension_numbers = #tpu.dot_dimension_numbers<[1], [0], [0], [1], [0, 0, 1, 1], [], []>} : vector<4x128xbf16>, vector<128x128xbf16>, vector<4x128xf32> -> vector<4x128xf32>
    %150 = arith.addf %145, %149 : vector<4x128xf32>
    %c0_179 = arith.constant 0 : index
    %c3_180 = arith.constant 3 : index
    %c0_181 = arith.constant 0 : index
    %c0_182 = arith.constant 0 : index
    %151 = vector.load %arg3[%c0_179, %c3_180, %c0_181, %c0_182] : memref<1x5x5x128xbf16, #tpu.memory_space<vmem>>, vector<1x1x4x128xbf16>
    %152 = vector.shape_cast %151 : vector<1x1x4x128xbf16> to vector<4x128xbf16>
    %c896_183 = arith.constant 896 : index
    %c0_184 = arith.constant 0 : index
    %153 = vector.load %arg6[%c896_183, %c0_184] : memref<1152x128xbf16, #tpu.memory_space<vmem>>, vector<128x128xbf16>
    %cst_185 = arith.constant dense<0.000000e+00> : vector<4x128xf32>
    %154 = tpu.matmul %152, %153, %cst_185 {dimension_numbers = #tpu.dot_dimension_numbers<[1], [0], [0], [1], [0, 0, 1, 1], [], []>} : vector<4x128xbf16>, vector<128x128xbf16>, vector<4x128xf32> -> vector<4x128xf32>
    %155 = arith.addf %150, %154 : vector<4x128xf32>
    %c0_186 = arith.constant 0 : index
    %c3_187 = arith.constant 3 : index
    %c1_188 = arith.constant 1 : index
    %c0_189 = arith.constant 0 : index
    %156 = vector.load %arg2[%c0_186, %c3_187, %c1_188, %c0_189] : memref<1x5x5x128xbf16, #tpu.memory_space<vmem>>, vector<1x1x4x128xbf16>
    %157 = vector.shape_cast %156 : vector<1x1x4x128xbf16> to vector<4x128xbf16>
    %c1024_190 = arith.constant 1024 : index
    %c0_191 = arith.constant 0 : index
    %158 = vector.load %arg6[%c1024_190, %c0_191] : memref<1152x128xbf16, #tpu.memory_space<vmem>>, vector<128x128xbf16>
    %cst_192 = arith.constant dense<0.000000e+00> : vector<4x128xf32>
    %159 = tpu.matmul %157, %158, %cst_192 {dimension_numbers = #tpu.dot_dimension_numbers<[1], [0], [0], [1], [0, 0, 1, 1], [], []>} : vector<4x128xbf16>, vector<128x128xbf16>, vector<4x128xf32> -> vector<4x128xf32>
    %160 = arith.addf %155, %159 : vector<4x128xf32>
    %161 = vector.broadcast %0 : vector<1x128xf32> to vector<4x128xf32>
    %162 = arith.addf %160, %161 : vector<4x128xf32>
    %cst_193 = arith.constant 0.000000e+00 : f32
    %163 = vector.broadcast %cst_193 : f32 to vector<4x128xf32>
    %164 = arith.cmpf oge, %162, %163 : vector<4x128xf32>
    %cst_194 = arith.constant 0.00999999977 : f32
    %165 = vector.broadcast %cst_194 : f32 to vector<4x128xf32>
    %166 = arith.mulf %165, %162 : vector<4x128xf32>
    %167 = arith.select %164, %162, %166 : vector<4x128xi1>, vector<4x128xf32>
    %168 = arith.truncf %167 : vector<4x128xf32> to vector<4x128xbf16>
    %c0_195 = arith.constant 0 : index
    %c2_196 = arith.constant 2 : index
    %c0_197 = arith.constant 0 : index
    %c0_198 = arith.constant 0 : index
    %169 = vector.load %arg8[%c0_195, %c2_196, %c0_197, %c0_198] : memref<1x4x4x128xbf16, #tpu.memory_space<vmem>>, vector<1x1x4x128xbf16>
    %170 = vector.shape_cast %169 : vector<1x1x4x128xbf16> to vector<4x128xbf16>
    %171 = vector.shape_cast %168 : vector<4x128xbf16> to vector<1x1x4x128xbf16>
    tpu.vector_store %arg8[%c0_195, %c2_196, %c0_197, %c0_198], %171 {strides = array<i32>} : memref<1x4x4x128xbf16, #tpu.memory_space<vmem>>, vector<1x1x4x128xbf16>,
    %cst_199 = arith.constant 0.000000e+00 : f32
    %172 = vector.broadcast %cst_199 : f32 to vector<4x128xf32>
    %c0_200 = arith.constant 0 : index
    %c3_201 = arith.constant 3 : index
    %c0_202 = arith.constant 0 : index
    %c0_203 = arith.constant 0 : index
    %173 = vector.load %arg2[%c0_200, %c3_201, %c0_202, %c0_203] : memref<1x5x5x128xbf16, #tpu.memory_space<vmem>>, vector<1x1x4x128xbf16>
    %174 = vector.shape_cast %173 : vector<1x1x4x128xbf16> to vector<4x128xbf16>
    %c0_204 = arith.constant 0 : index
    %c0_205 = arith.constant 0 : index
    %175 = vector.load %arg6[%c0_204, %c0_205] : memref<1152x128xbf16, #tpu.memory_space<vmem>>, vector<128x128xbf16>
    %cst_206 = arith.constant dense<0.000000e+00> : vector<4x128xf32>
    %176 = tpu.matmul %174, %175, %cst_206 {dimension_numbers = #tpu.dot_dimension_numbers<[1], [0], [0], [1], [0, 0, 1, 1], [], []>} : vector<4x128xbf16>, vector<128x128xbf16>, vector<4x128xf32> -> vector<4x128xf32>
    %177 = arith.addf %172, %176 : vector<4x128xf32>
    %c0_207 = arith.constant 0 : index
    %c3_208 = arith.constant 3 : index
    %c0_209 = arith.constant 0 : index
    %c0_210 = arith.constant 0 : index
    %178 = vector.load %arg3[%c0_207, %c3_208, %c0_209, %c0_210] : memref<1x5x5x128xbf16, #tpu.memory_space<vmem>>, vector<1x1x4x128xbf16>
    %179 = vector.shape_cast %178 : vector<1x1x4x128xbf16> to vector<4x128xbf16>
    %c128_211 = arith.constant 128 : index
    %c0_212 = arith.constant 0 : index
    %180 = vector.load %arg6[%c128_211, %c0_212] : memref<1152x128xbf16, #tpu.memory_space<vmem>>, vector<128x128xbf16>
    %cst_213 = arith.constant dense<0.000000e+00> : vector<4x128xf32>
    %181 = tpu.matmul %179, %180, %cst_213 {dimension_numbers = #tpu.dot_dimension_numbers<[1], [0], [0], [1], [0, 0, 1, 1], [], []>} : vector<4x128xbf16>, vector<128x128xbf16>, vector<4x128xf32> -> vector<4x128xf32>
    %182 = arith.addf %177, %181 : vector<4x128xf32>
    %c0_214 = arith.constant 0 : index
    %c3_215 = arith.constant 3 : index
    %c1_216 = arith.constant 1 : index
    %c0_217 = arith.constant 0 : index
    %183 = vector.load %arg2[%c0_214, %c3_215, %c1_216, %c0_217] : memref<1x5x5x128xbf16, #tpu.memory_space<vmem>>, vector<1x1x4x128xbf16>
    %184 = vector.shape_cast %183 : vector<1x1x4x128xbf16> to vector<4x128xbf16>
    %c256_218 = arith.constant 256 : index
    %c0_219 = arith.constant 0 : index
    %185 = vector.load %arg6[%c256_218, %c0_219] : memref<1152x128xbf16, #tpu.memory_space<vmem>>, vector<128x128xbf16>
    %cst_220 = arith.constant dense<0.000000e+00> : vector<4x128xf32>
    %186 = tpu.matmul %184, %185, %cst_220 {dimension_numbers = #tpu.dot_dimension_numbers<[1], [0], [0], [1], [0, 0, 1, 1], [], []>} : vector<4x128xbf16>, vector<128x128xbf16>, vector<4x128xf32> -> vector<4x128xf32>
    %187 = arith.addf %182, %186 : vector<4x128xf32>
    %c0_221 = arith.constant 0 : index
    %c3_222 = arith.constant 3 : index
    %c0_223 = arith.constant 0 : index
    %c0_224 = arith.constant 0 : index
    %188 = vector.load %arg4[%c0_221, %c3_222, %c0_223, %c0_224] : memref<1x5x5x128xbf16, #tpu.memory_space<vmem>>, vector<1x1x4x128xbf16>
    %189 = vector.shape_cast %188 : vector<1x1x4x128xbf16> to vector<4x128xbf16>
    %c384_225 = arith.constant 384 : index
    %c0_226 = arith.constant 0 : index
    %190 = vector.load %arg6[%c384_225, %c0_226] : memref<1152x128xbf16, #tpu.memory_space<vmem>>, vector<128x128xbf16>
    %cst_227 = arith.constant dense<0.000000e+00> : vector<4x128xf32>
    %191 = tpu.matmul %189, %190, %cst_227 {dimension_numbers = #tpu.dot_dimension_numbers<[1], [0], [0], [1], [0, 0, 1, 1], [], []>} : vector<4x128xbf16>, vector<128x128xbf16>, vector<4x128xf32> -> vector<4x128xf32>
    %192 = arith.addf %187, %191 : vector<4x128xf32>
    %c0_228 = arith.constant 0 : index
    %c3_229 = arith.constant 3 : index
    %c0_230 = arith.constant 0 : index
    %c0_231 = arith.constant 0 : index
    %193 = vector.load %arg5[%c0_228, %c3_229, %c0_230, %c0_231] : memref<1x5x5x128xbf16, #tpu.memory_space<vmem>>, vector<1x1x4x128xbf16>
    %194 = vector.shape_cast %193 : vector<1x1x4x128xbf16> to vector<4x128xbf16>
    %c512_232 = arith.constant 512 : index
    %c0_233 = arith.constant 0 : index
    %195 = vector.load %arg6[%c512_232, %c0_233] : memref<1152x128xbf16, #tpu.memory_space<vmem>>, vector<128x128xbf16>
    %cst_234 = arith.constant dense<0.000000e+00> : vector<4x128xf32>
    %196 = tpu.matmul %194, %195, %cst_234 {dimension_numbers = #tpu.dot_dimension_numbers<[1], [0], [0], [1], [0, 0, 1, 1], [], []>} : vector<4x128xbf16>, vector<128x128xbf16>, vector<4x128xf32> -> vector<4x128xf32>
    %197 = arith.addf %192, %196 : vector<4x128xf32>
    %c0_235 = arith.constant 0 : index
    %c3_236 = arith.constant 3 : index
    %c1_237 = arith.constant 1 : index
    %c0_238 = arith.constant 0 : index
    %198 = vector.load %arg4[%c0_235, %c3_236, %c1_237, %c0_238] : memref<1x5x5x128xbf16, #tpu.memory_space<vmem>>, vector<1x1x4x128xbf16>
    %199 = vector.shape_cast %198 : vector<1x1x4x128xbf16> to vector<4x128xbf16>
    %c640_239 = arith.constant 640 : index
    %c0_240 = arith.constant 0 : index
    %200 = vector.load %arg6[%c640_239, %c0_240] : memref<1152x128xbf16, #tpu.memory_space<vmem>>, vector<128x128xbf16>
    %cst_241 = arith.constant dense<0.000000e+00> : vector<4x128xf32>
    %201 = tpu.matmul %199, %200, %cst_241 {dimension_numbers = #tpu.dot_dimension_numbers<[1], [0], [0], [1], [0, 0, 1, 1], [], []>} : vector<4x128xbf16>, vector<128x128xbf16>, vector<4x128xf32> -> vector<4x128xf32>
    %202 = arith.addf %197, %201 : vector<4x128xf32>
    %c0_242 = arith.constant 0 : index
    %c4 = arith.constant 4 : index
    %c0_243 = arith.constant 0 : index
    %c0_244 = arith.constant 0 : index
    %203 = vector.load %arg2[%c0_242, %c4, %c0_243, %c0_244] : memref<1x5x5x128xbf16, #tpu.memory_space<vmem>>, vector<1x1x4x128xbf16>
    %204 = vector.shape_cast %203 : vector<1x1x4x128xbf16> to vector<4x128xbf16>
    %c768_245 = arith.constant 768 : index
    %c0_246 = arith.constant 0 : index
    %205 = vector.load %arg6[%c768_245, %c0_246] : memref<1152x128xbf16, #tpu.memory_space<vmem>>, vector<128x128xbf16>
    %cst_247 = arith.constant dense<0.000000e+00> : vector<4x128xf32>
    %206 = tpu.matmul %204, %205, %cst_247 {dimension_numbers = #tpu.dot_dimension_numbers<[1], [0], [0], [1], [0, 0, 1, 1], [], []>} : vector<4x128xbf16>, vector<128x128xbf16>, vector<4x128xf32> -> vector<4x128xf32>
    %207 = arith.addf %202, %206 : vector<4x128xf32>
    %c0_248 = arith.constant 0 : index
    %c4_249 = arith.constant 4 : index
    %c0_250 = arith.constant 0 : index
    %c0_251 = arith.constant 0 : index
    %208 = vector.load %arg3[%c0_248, %c4_249, %c0_250, %c0_251] : memref<1x5x5x128xbf16, #tpu.memory_space<vmem>>, vector<1x1x4x128xbf16>
    %209 = vector.shape_cast %208 : vector<1x1x4x128xbf16> to vector<4x128xbf16>
    %c896_252 = arith.constant 896 : index
    %c0_253 = arith.constant 0 : index
    %210 = vector.load %arg6[%c896_252, %c0_253] : memref<1152x128xbf16, #tpu.memory_space<vmem>>, vector<128x128xbf16>
    %cst_254 = arith.constant dense<0.000000e+00> : vector<4x128xf32>
    %211 = tpu.matmul %209, %210, %cst_254 {dimension_numbers = #tpu.dot_dimension_numbers<[1], [0], [0], [1], [0, 0, 1, 1], [], []>} : vector<4x128xbf16>, vector<128x128xbf16>, vector<4x128xf32> -> vector<4x128xf32>
    %212 = arith.addf %207, %211 : vector<4x128xf32>
    %c0_255 = arith.constant 0 : index
    %c4_256 = arith.constant 4 : index
    %c1_257 = arith.constant 1 : index
    %c0_258 = arith.constant 0 : index
    %213 = vector.load %arg2[%c0_255, %c4_256, %c1_257, %c0_258] : memref<1x5x5x128xbf16, #tpu.memory_space<vmem>>, vector<1x1x4x128xbf16>
    %214 = vector.shape_cast %213 : vector<1x1x4x128xbf16> to vector<4x128xbf16>
    %c1024_259 = arith.constant 1024 : index
    %c0_260 = arith.constant 0 : index
    %215 = vector.load %arg6[%c1024_259, %c0_260] : memref<1152x128xbf16, #tpu.memory_space<vmem>>, vector<128x128xbf16>
    %cst_261 = arith.constant dense<0.000000e+00> : vector<4x128xf32>
    %216 = tpu.matmul %214, %215, %cst_261 {dimension_numbers = #tpu.dot_dimension_numbers<[1], [0], [0], [1], [0, 0, 1, 1], [], []>} : vector<4x128xbf16>, vector<128x128xbf16>, vector<4x128xf32> -> vector<4x128xf32>
    %217 = arith.addf %212, %216 : vector<4x128xf32>
    %218 = vector.broadcast %0 : vector<1x128xf32> to vector<4x128xf32>
    %219 = arith.addf %217, %218 : vector<4x128xf32>
    %cst_262 = arith.constant 0.000000e+00 : f32
    %220 = vector.broadcast %cst_262 : f32 to vector<4x128xf32>
    %221 = arith.cmpf oge, %219, %220 : vector<4x128xf32>
    %cst_263 = arith.constant 0.00999999977 : f32
    %222 = vector.broadcast %cst_263 : f32 to vector<4x128xf32>
    %223 = arith.mulf %222, %219 : vector<4x128xf32>
    %224 = arith.select %221, %219, %223 : vector<4x128xi1>, vector<4x128xf32>
    %225 = arith.truncf %224 : vector<4x128xf32> to vector<4x128xbf16>
    %c0_264 = arith.constant 0 : index
    %c3_265 = arith.constant 3 : index
    %c0_266 = arith.constant 0 : index
    %c0_267 = arith.constant 0 : index
    %226 = vector.load %arg8[%c0_264, %c3_265, %c0_266, %c0_267] : memref<1x4x4x128xbf16, #tpu.memory_space<vmem>>, vector<1x1x4x128xbf16>
    %227 = vector.shape_cast %226 : vector<1x1x4x128xbf16> to vector<4x128xbf16>
    %228 = vector.shape_cast %225 : vector<4x128xbf16> to vector<1x1x4x128xbf16>
    tpu.vector_store %arg8[%c0_264, %c3_265, %c0_266, %c0_267], %228 {strides = array<i32>} : memref<1x4x4x128xbf16, #tpu.memory_space<vmem>>, vector<1x1x4x128xbf16>,
    return
  }
  func.func @transform_0(%arg0: i32, %arg1: i32) -> (i32, i32, i32, i32) {
    %c0_i32 = arith.constant 0 : i32
    %c0_i32_0 = arith.constant 0 : i32
    %c0_i32_1 = arith.constant 0 : i32
    %c0_i32_2 = arith.constant 0 : i32
    return %arg1, %c0_i32, %c0_i32_0, %c0_i32_1 : i32, i32, i32, i32
  }
  func.func @transform_1(%arg0: i32, %arg1: i32) -> (i32, i32, i32, i32) {
    %c0_i32 = arith.constant 0 : i32
    %c0_i32_0 = arith.constant 0 : i32
    %c0_i32_1 = arith.constant 0 : i32
    %c0_i32_2 = arith.constant 0 : i32
    return %arg1, %c0_i32, %c0_i32_0, %c0_i32_1 : i32, i32, i32, i32
  }
  func.func @transform_2(%arg0: i32, %arg1: i32) -> (i32, i32, i32, i32) {
    %c0_i32 = arith.constant 0 : i32
    %c0_i32_0 = arith.constant 0 : i32
    %c0_i32_1 = arith.constant 0 : i32
    %c0_i32_2 = arith.constant 0 : i32
    return %arg1, %c0_i32, %c0_i32_0, %c0_i32_1 : i32, i32, i32, i32
  }
  func.func @transform_3(%arg0: i32, %arg1: i32) -> (i32, i32, i32, i32) {
    %c0_i32 = arith.constant 0 : i32
    %c0_i32_0 = arith.constant 0 : i32
    %c0_i32_1 = arith.constant 0 : i32
    %c0_i32_2 = arith.constant 0 : i32
    return %arg1, %c0_i32, %c0_i32_0, %c0_i32_1 : i32, i32, i32, i32
  }
  func.func @transform_4(%arg0: i32, %arg1: i32) -> (i32, i32) {
    %c0_i32 = arith.constant 0 : i32
    %c0_i32_0 = arith.constant 0 : i32
    return %c0_i32, %arg0 : i32, i32
  }
  func.func @transform_5(%arg0: i32, %arg1: i32) -> (i32, i32) {
    %c0_i32 = arith.constant 0 : i32
    %c0_i32_0 = arith.constant 0 : i32
    return %c0_i32, %arg0 : i32, i32
  }
  func.func @transform_6(%arg0: i32, %arg1: i32) -> (i32, i32, i32, i32) {
    %c0_i32 = arith.constant 0 : i32
    %c0_i32_0 = arith.constant 0 : i32
    %c0_i32_1 = arith.constant 0 : i32
    return %arg1, %c0_i32, %c0_i32_0, %arg0 : i32, i32, i32, i32
  }
}

module attributes {stable_mosaic.version = 11 : i64} {
  func.func @_conv3x3s2_kernel(%arg0: i32, %arg1: i32, %arg2: memref<1x9x9x4xbf16, #tpu.memory_space<vmem>>, %arg3: memref<1x9x9x4xbf16, #tpu.memory_space<vmem>>, %arg4: memref<1x9x9x4xbf16, #tpu.memory_space<vmem>>, %arg5: memref<1x9x9x4xbf16, #tpu.memory_space<vmem>>, %arg6: memref<36x128xbf16, #tpu.memory_space<vmem>>, %arg7: memref<1x128xf32, #tpu.memory_space<vmem>>, %arg8: memref<1x8x8x128xbf16, #tpu.memory_space<vmem>>) attributes {dimension_semantics = [#tpu.dimension_semantics<parallel>, #tpu.dimension_semantics<parallel>], iteration_bounds = array<i64: 1, 2>, scalar_prefetch = 0 : i64, scratch_operands = 0 : i64, tpu.core_type = #tpu.core_type<tc>, window_params = [{transform_indices = @transform_0, window_bounds = array<i64: 1, 9, 9, 4>}, {transform_indices = @transform_1, window_bounds = array<i64: 1, 9, 9, 4>}, {transform_indices = @transform_2, window_bounds = array<i64: 1, 9, 9, 4>}, {transform_indices = @transform_3, window_bounds = array<i64: 1, 9, 9, 4>}, {pipeline_mode = #tpu.pipeline_mode<synchronous>, transform_indices = @transform_4, window_bounds = array<i64: 36, 128>}, {pipeline_mode = #tpu.pipeline_mode<synchronous>, transform_indices = @transform_5, window_bounds = array<i64: 1, 128>}, {transform_indices = @transform_6, window_bounds = array<i64: 1, 8, 8, 128>}]} {
    %c0 = arith.constant 0 : index
    %c0_0 = arith.constant 0 : index
    %0 = vector.load %arg7[%c0, %c0_0] : memref<1x128xf32, #tpu.memory_space<vmem>>, vector<1x128xf32>
    %cst = arith.constant 0.000000e+00 : f32
    %1 = vector.broadcast %cst : f32 to vector<8x128xf32>
    %c0_1 = arith.constant 0 : index
    %c0_2 = arith.constant 0 : index
    %c0_3 = arith.constant 0 : index
    %c0_4 = arith.constant 0 : index
    %2 = vector.load %arg2[%c0_1, %c0_2, %c0_3, %c0_4] : memref<1x9x9x4xbf16, #tpu.memory_space<vmem>>, vector<1x1x8x4xbf16>
    %3 = vector.shape_cast %2 : vector<1x1x8x4xbf16> to vector<8x4xbf16>
    %c0_5 = arith.constant 0 : index
    %c0_6 = arith.constant 0 : index
    %4 = vector.load %arg6[%c0_5, %c0_6] : memref<36x128xbf16, #tpu.memory_space<vmem>>, vector<4x128xbf16>
    %cst_7 = arith.constant dense<0.000000e+00> : vector<8x128xf32>
    %5 = tpu.matmul %3, %4, %cst_7 {dimension_numbers = #tpu.dot_dimension_numbers<[1], [0], [0], [1], [0, 0, 1, 1], [], []>} : vector<8x4xbf16>, vector<4x128xbf16>, vector<8x128xf32> -> vector<8x128xf32>
    %6 = arith.addf %1, %5 : vector<8x128xf32>
    %c0_8 = arith.constant 0 : index
    %c0_9 = arith.constant 0 : index
    %c0_10 = arith.constant 0 : index
    %c0_11 = arith.constant 0 : index
    %7 = vector.load %arg3[%c0_8, %c0_9, %c0_10, %c0_11] : memref<1x9x9x4xbf16, #tpu.memory_space<vmem>>, vector<1x1x8x4xbf16>
    %8 = vector.shape_cast %7 : vector<1x1x8x4xbf16> to vector<8x4xbf16>
    %c4 = arith.constant 4 : index
    %c0_12 = arith.constant 0 : index
    %9 = vector.load %arg6[%c4, %c0_12] : memref<36x128xbf16, #tpu.memory_space<vmem>>, vector<4x128xbf16>
    %cst_13 = arith.constant dense<0.000000e+00> : vector<8x128xf32>
    %10 = tpu.matmul %8, %9, %cst_13 {dimension_numbers = #tpu.dot_dimension_numbers<[1], [0], [0], [1], [0, 0, 1, 1], [], []>} : vector<8x4xbf16>, vector<4x128xbf16>, vector<8x128xf32> -> vector<8x128xf32>
    %11 = arith.addf %6, %10 : vector<8x128xf32>
    %c0_14 = arith.constant 0 : index
    %c0_15 = arith.constant 0 : index
    %c1 = arith.constant 1 : index
    %c0_16 = arith.constant 0 : index
    %12 = vector.load %arg2[%c0_14, %c0_15, %c1, %c0_16] : memref<1x9x9x4xbf16, #tpu.memory_space<vmem>>, vector<1x1x8x4xbf16>
    %13 = vector.shape_cast %12 : vector<1x1x8x4xbf16> to vector<8x4xbf16>
    %c8 = arith.constant 8 : index
    %c0_17 = arith.constant 0 : index
    %14 = vector.load %arg6[%c8, %c0_17] : memref<36x128xbf16, #tpu.memory_space<vmem>>, vector<4x128xbf16>
    %cst_18 = arith.constant dense<0.000000e+00> : vector<8x128xf32>
    %15 = tpu.matmul %13, %14, %cst_18 {dimension_numbers = #tpu.dot_dimension_numbers<[1], [0], [0], [1], [0, 0, 1, 1], [], []>} : vector<8x4xbf16>, vector<4x128xbf16>, vector<8x128xf32> -> vector<8x128xf32>
    %16 = arith.addf %11, %15 : vector<8x128xf32>
    %c0_19 = arith.constant 0 : index
    %c0_20 = arith.constant 0 : index
    %c0_21 = arith.constant 0 : index
    %c0_22 = arith.constant 0 : index
    %17 = vector.load %arg4[%c0_19, %c0_20, %c0_21, %c0_22] : memref<1x9x9x4xbf16, #tpu.memory_space<vmem>>, vector<1x1x8x4xbf16>
    %18 = vector.shape_cast %17 : vector<1x1x8x4xbf16> to vector<8x4xbf16>
    %c12 = arith.constant 12 : index
    %c0_23 = arith.constant 0 : index
    %19 = vector.load %arg6[%c12, %c0_23] : memref<36x128xbf16, #tpu.memory_space<vmem>>, vector<4x128xbf16>
    %cst_24 = arith.constant dense<0.000000e+00> : vector<8x128xf32>
    %20 = tpu.matmul %18, %19, %cst_24 {dimension_numbers = #tpu.dot_dimension_numbers<[1], [0], [0], [1], [0, 0, 1, 1], [], []>} : vector<8x4xbf16>, vector<4x128xbf16>, vector<8x128xf32> -> vector<8x128xf32>
    %21 = arith.addf %16, %20 : vector<8x128xf32>
    %c0_25 = arith.constant 0 : index
    %c0_26 = arith.constant 0 : index
    %c0_27 = arith.constant 0 : index
    %c0_28 = arith.constant 0 : index
    %22 = vector.load %arg5[%c0_25, %c0_26, %c0_27, %c0_28] : memref<1x9x9x4xbf16, #tpu.memory_space<vmem>>, vector<1x1x8x4xbf16>
    %23 = vector.shape_cast %22 : vector<1x1x8x4xbf16> to vector<8x4xbf16>
    %c16 = arith.constant 16 : index
    %c0_29 = arith.constant 0 : index
    %24 = vector.load %arg6[%c16, %c0_29] : memref<36x128xbf16, #tpu.memory_space<vmem>>, vector<4x128xbf16>
    %cst_30 = arith.constant dense<0.000000e+00> : vector<8x128xf32>
    %25 = tpu.matmul %23, %24, %cst_30 {dimension_numbers = #tpu.dot_dimension_numbers<[1], [0], [0], [1], [0, 0, 1, 1], [], []>} : vector<8x4xbf16>, vector<4x128xbf16>, vector<8x128xf32> -> vector<8x128xf32>
    %26 = arith.addf %21, %25 : vector<8x128xf32>
    %c0_31 = arith.constant 0 : index
    %c0_32 = arith.constant 0 : index
    %c1_33 = arith.constant 1 : index
    %c0_34 = arith.constant 0 : index
    %27 = vector.load %arg4[%c0_31, %c0_32, %c1_33, %c0_34] : memref<1x9x9x4xbf16, #tpu.memory_space<vmem>>, vector<1x1x8x4xbf16>
    %28 = vector.shape_cast %27 : vector<1x1x8x4xbf16> to vector<8x4xbf16>
    %c20 = arith.constant 20 : index
    %c0_35 = arith.constant 0 : index
    %29 = vector.load %arg6[%c20, %c0_35] : memref<36x128xbf16, #tpu.memory_space<vmem>>, vector<4x128xbf16>
    %cst_36 = arith.constant dense<0.000000e+00> : vector<8x128xf32>
    %30 = tpu.matmul %28, %29, %cst_36 {dimension_numbers = #tpu.dot_dimension_numbers<[1], [0], [0], [1], [0, 0, 1, 1], [], []>} : vector<8x4xbf16>, vector<4x128xbf16>, vector<8x128xf32> -> vector<8x128xf32>
    %31 = arith.addf %26, %30 : vector<8x128xf32>
    %c0_37 = arith.constant 0 : index
    %c1_38 = arith.constant 1 : index
    %c0_39 = arith.constant 0 : index
    %c0_40 = arith.constant 0 : index
    %32 = vector.load %arg2[%c0_37, %c1_38, %c0_39, %c0_40] : memref<1x9x9x4xbf16, #tpu.memory_space<vmem>>, vector<1x1x8x4xbf16>
    %33 = vector.shape_cast %32 : vector<1x1x8x4xbf16> to vector<8x4xbf16>
    %c24 = arith.constant 24 : index
    %c0_41 = arith.constant 0 : index
    %34 = vector.load %arg6[%c24, %c0_41] : memref<36x128xbf16, #tpu.memory_space<vmem>>, vector<4x128xbf16>
    %cst_42 = arith.constant dense<0.000000e+00> : vector<8x128xf32>
    %35 = tpu.matmul %33, %34, %cst_42 {dimension_numbers = #tpu.dot_dimension_numbers<[1], [0], [0], [1], [0, 0, 1, 1], [], []>} : vector<8x4xbf16>, vector<4x128xbf16>, vector<8x128xf32> -> vector<8x128xf32>
    %36 = arith.addf %31, %35 : vector<8x128xf32>
    %c0_43 = arith.constant 0 : index
    %c1_44 = arith.constant 1 : index
    %c0_45 = arith.constant 0 : index
    %c0_46 = arith.constant 0 : index
    %37 = vector.load %arg3[%c0_43, %c1_44, %c0_45, %c0_46] : memref<1x9x9x4xbf16, #tpu.memory_space<vmem>>, vector<1x1x8x4xbf16>
    %38 = vector.shape_cast %37 : vector<1x1x8x4xbf16> to vector<8x4xbf16>
    %c28 = arith.constant 28 : index
    %c0_47 = arith.constant 0 : index
    %39 = vector.load %arg6[%c28, %c0_47] : memref<36x128xbf16, #tpu.memory_space<vmem>>, vector<4x128xbf16>
    %cst_48 = arith.constant dense<0.000000e+00> : vector<8x128xf32>
    %40 = tpu.matmul %38, %39, %cst_48 {dimension_numbers = #tpu.dot_dimension_numbers<[1], [0], [0], [1], [0, 0, 1, 1], [], []>} : vector<8x4xbf16>, vector<4x128xbf16>, vector<8x128xf32> -> vector<8x128xf32>
    %41 = arith.addf %36, %40 : vector<8x128xf32>
    %c0_49 = arith.constant 0 : index
    %c1_50 = arith.constant 1 : index
    %c1_51 = arith.constant 1 : index
    %c0_52 = arith.constant 0 : index
    %42 = vector.load %arg2[%c0_49, %c1_50, %c1_51, %c0_52] : memref<1x9x9x4xbf16, #tpu.memory_space<vmem>>, vector<1x1x8x4xbf16>
    %43 = vector.shape_cast %42 : vector<1x1x8x4xbf16> to vector<8x4xbf16>
    %c32 = arith.constant 32 : index
    %c0_53 = arith.constant 0 : index
    %44 = vector.load %arg6[%c32, %c0_53] : memref<36x128xbf16, #tpu.memory_space<vmem>>, vector<4x128xbf16>
    %cst_54 = arith.constant dense<0.000000e+00> : vector<8x128xf32>
    %45 = tpu.matmul %43, %44, %cst_54 {dimension_numbers = #tpu.dot_dimension_numbers<[1], [0], [0], [1], [0, 0, 1, 1], [], []>} : vector<8x4xbf16>, vector<4x128xbf16>, vector<8x128xf32> -> vector<8x128xf32>
    %46 = arith.addf %41, %45 : vector<8x128xf32>
    %47 = vector.broadcast %0 : vector<1x128xf32> to vector<8x128xf32>
    %48 = arith.addf %46, %47 : vector<8x128xf32>
    %cst_55 = arith.constant 0.000000e+00 : f32
    %49 = vector.broadcast %cst_55 : f32 to vector<8x128xf32>
    %50 = arith.cmpf oge, %48, %49 : vector<8x128xf32>
    %cst_56 = arith.constant 0.00999999977 : f32
    %51 = vector.broadcast %cst_56 : f32 to vector<8x128xf32>
    %52 = arith.mulf %51, %48 : vector<8x128xf32>
    %53 = arith.select %50, %48, %52 : vector<8x128xi1>, vector<8x128xf32>
    %54 = arith.truncf %53 : vector<8x128xf32> to vector<8x128xbf16>
    %c0_57 = arith.constant 0 : index
    %c0_58 = arith.constant 0 : index
    %c0_59 = arith.constant 0 : index
    %c0_60 = arith.constant 0 : index
    %55 = vector.load %arg8[%c0_57, %c0_58, %c0_59, %c0_60] : memref<1x8x8x128xbf16, #tpu.memory_space<vmem>>, vector<1x1x8x128xbf16>
    %56 = vector.shape_cast %55 : vector<1x1x8x128xbf16> to vector<8x128xbf16>
    %57 = vector.shape_cast %54 : vector<8x128xbf16> to vector<1x1x8x128xbf16>
    tpu.vector_store %arg8[%c0_57, %c0_58, %c0_59, %c0_60], %57 {strides = array<i32>} : memref<1x8x8x128xbf16, #tpu.memory_space<vmem>>, vector<1x1x8x128xbf16>,
    %cst_61 = arith.constant 0.000000e+00 : f32
    %58 = vector.broadcast %cst_61 : f32 to vector<8x128xf32>
    %c0_62 = arith.constant 0 : index
    %c1_63 = arith.constant 1 : index
    %c0_64 = arith.constant 0 : index
    %c0_65 = arith.constant 0 : index
    %59 = vector.load %arg2[%c0_62, %c1_63, %c0_64, %c0_65] : memref<1x9x9x4xbf16, #tpu.memory_space<vmem>>, vector<1x1x8x4xbf16>
    %60 = vector.shape_cast %59 : vector<1x1x8x4xbf16> to vector<8x4xbf16>
    %c0_66 = arith.constant 0 : index
    %c0_67 = arith.constant 0 : index
    %61 = vector.load %arg6[%c0_66, %c0_67] : memref<36x128xbf16, #tpu.memory_space<vmem>>, vector<4x128xbf16>
    %cst_68 = arith.constant dense<0.000000e+00> : vector<8x128xf32>
    %62 = tpu.matmul %60, %61, %cst_68 {dimension_numbers = #tpu.dot_dimension_numbers<[1], [0], [0], [1], [0, 0, 1, 1], [], []>} : vector<8x4xbf16>, vector<4x128xbf16>, vector<8x128xf32> -> vector<8x128xf32>
    %63 = arith.addf %58, %62 : vector<8x128xf32>
    %c0_69 = arith.constant 0 : index
    %c1_70 = arith.constant 1 : index
    %c0_71 = arith.constant 0 : index
    %c0_72 = arith.constant 0 : index
    %64 = vector.load %arg3[%c0_69, %c1_70, %c0_71, %c0_72] : memref<1x9x9x4xbf16, #tpu.memory_space<vmem>>, vector<1x1x8x4xbf16>
    %65 = vector.shape_cast %64 : vector<1x1x8x4xbf16> to vector<8x4xbf16>
    %c4_73 = arith.constant 4 : index
    %c0_74 = arith.constant 0 : index
    %66 = vector.load %arg6[%c4_73, %c0_74] : memref<36x128xbf16, #tpu.memory_space<vmem>>, vector<4x128xbf16>
    %cst_75 = arith.constant dense<0.000000e+00> : vector<8x128xf32>
    %67 = tpu.matmul %65, %66, %cst_75 {dimension_numbers = #tpu.dot_dimension_numbers<[1], [0], [0], [1], [0, 0, 1, 1], [], []>} : vector<8x4xbf16>, vector<4x128xbf16>, vector<8x128xf32> -> vector<8x128xf32>
    %68 = arith.addf %63, %67 : vector<8x128xf32>
    %c0_76 = arith.constant 0 : index
    %c1_77 = arith.constant 1 : index
    %c1_78 = arith.constant 1 : index
    %c0_79 = arith.constant 0 : index
    %69 = vector.load %arg2[%c0_76, %c1_77, %c1_78, %c0_79] : memref<1x9x9x4xbf16, #tpu.memory_space<vmem>>, vector<1x1x8x4xbf16>
    %70 = vector.shape_cast %69 : vector<1x1x8x4xbf16> to vector<8x4xbf16>
    %c8_80 = arith.constant 8 : index
    %c0_81 = arith.constant 0 : index
    %71 = vector.load %arg6[%c8_80, %c0_81] : memref<36x128xbf16, #tpu.memory_space<vmem>>, vector<4x128xbf16>
    %cst_82 = arith.constant dense<0.000000e+00> : vector<8x128xf32>
    %72 = tpu.matmul %70, %71, %cst_82 {dimension_numbers = #tpu.dot_dimension_numbers<[1], [0], [0], [1], [0, 0, 1, 1], [], []>} : vector<8x4xbf16>, vector<4x128xbf16>, vector<8x128xf32> -> vector<8x128xf32>
    %73 = arith.addf %68, %72 : vector<8x128xf32>
    %c0_83 = arith.constant 0 : index
    %c1_84 = arith.constant 1 : index
    %c0_85 = arith.constant 0 : index
    %c0_86 = arith.constant 0 : index
    %74 = vector.load %arg4[%c0_83, %c1_84, %c0_85, %c0_86] : memref<1x9x9x4xbf16, #tpu.memory_space<vmem>>, vector<1x1x8x4xbf16>
    %75 = vector.shape_cast %74 : vector<1x1x8x4xbf16> to vector<8x4xbf16>
    %c12_87 = arith.constant 12 : index
    %c0_88 = arith.constant 0 : index
    %76 = vector.load %arg6[%c12_87, %c0_88] : memref<36x128xbf16, #tpu.memory_space<vmem>>, vector<4x128xbf16>
    %cst_89 = arith.constant dense<0.000000e+00> : vector<8x128xf32>
    %77 = tpu.matmul %75, %76, %cst_89 {dimension_numbers = #tpu.dot_dimension_numbers<[1], [0], [0], [1], [0, 0, 1, 1], [], []>} : vector<8x4xbf16>, vector<4x128xbf16>, vector<8x128xf32> -> vector<8x128xf32>
    %78 = arith.addf %73, %77 : vector<8x128xf32>
    %c0_90 = arith.constant 0 : index
    %c1_91 = arith.constant 1 : index
    %c0_92 = arith.constant 0 : index
    %c0_93 = arith.constant 0 : index
    %79 = vector.load %arg5[%c0_90, %c1_91, %c0_92, %c0_93] : memref<1x9x9x4xbf16, #tpu.memory_space<vmem>>, vector<1x1x8x4xbf16>
    %80 = vector.shape_cast %79 : vector<1x1x8x4xbf16> to vector<8x4xbf16>
    %c16_94 = arith.constant 16 : index
    %c0_95 = arith.constant 0 : index
    %81 = vector.load %arg6[%c16_94, %c0_95] : memref<36x128xbf16, #tpu.memory_space<vmem>>, vector<4x128xbf16>
    %cst_96 = arith.constant dense<0.000000e+00> : vector<8x128xf32>
    %82 = tpu.matmul %80, %81, %cst_96 {dimension_numbers = #tpu.dot_dimension_numbers<[1], [0], [0], [1], [0, 0, 1, 1], [], []>} : vector<8x4xbf16>, vector<4x128xbf16>, vector<8x128xf32> -> vector<8x128xf32>
    %83 = arith.addf %78, %82 : vector<8x128xf32>
    %c0_97 = arith.constant 0 : index
    %c1_98 = arith.constant 1 : index
    %c1_99 = arith.constant 1 : index
    %c0_100 = arith.constant 0 : index
    %84 = vector.load %arg4[%c0_97, %c1_98, %c1_99, %c0_100] : memref<1x9x9x4xbf16, #tpu.memory_space<vmem>>, vector<1x1x8x4xbf16>
    %85 = vector.shape_cast %84 : vector<1x1x8x4xbf16> to vector<8x4xbf16>
    %c20_101 = arith.constant 20 : index
    %c0_102 = arith.constant 0 : index
    %86 = vector.load %arg6[%c20_101, %c0_102] : memref<36x128xbf16, #tpu.memory_space<vmem>>, vector<4x128xbf16>
    %cst_103 = arith.constant dense<0.000000e+00> : vector<8x128xf32>
    %87 = tpu.matmul %85, %86, %cst_103 {dimension_numbers = #tpu.dot_dimension_numbers<[1], [0], [0], [1], [0, 0, 1, 1], [], []>} : vector<8x4xbf16>, vector<4x128xbf16>, vector<8x128xf32> -> vector<8x128xf32>
    %88 = arith.addf %83, %87 : vector<8x128xf32>
    %c0_104 = arith.constant 0 : index
    %c2 = arith.constant 2 : index
    %c0_105 = arith.constant 0 : index
    %c0_106 = arith.constant 0 : index
    %89 = vector.load %arg2[%c0_104, %c2, %c0_105, %c0_106] : memref<1x9x9x4xbf16, #tpu.memory_space<vmem>>, vector<1x1x8x4xbf16>
    %90 = vector.shape_cast %89 : vector<1x1x8x4xbf16> to vector<8x4xbf16>
    %c24_107 = arith.constant 24 : index
    %c0_108 = arith.constant 0 : index
    %91 = vector.load %arg6[%c24_107, %c0_108] : memref<36x128xbf16, #tpu.memory_space<vmem>>, vector<4x128xbf16>
    %cst_109 = arith.constant dense<0.000000e+00> : vector<8x128xf32>
    %92 = tpu.matmul %90, %91, %cst_109 {dimension_numbers = #tpu.dot_dimension_numbers<[1], [0], [0], [1], [0, 0, 1, 1], [], []>} : vector<8x4xbf16>, vector<4x128xbf16>, vector<8x128xf32> -> vector<8x128xf32>
    %93 = arith.addf %88, %92 : vector<8x128xf32>
    %c0_110 = arith.constant 0 : index
    %c2_111 = arith.constant 2 : index
    %c0_112 = arith.constant 0 : index
    %c0_113 = arith.constant 0 : index
    %94 = vector.load %arg3[%c0_110, %c2_111, %c0_112, %c0_113] : memref<1x9x9x4xbf16, #tpu.memory_space<vmem>>, vector<1x1x8x4xbf16>
    %95 = vector.shape_cast %94 : vector<1x1x8x4xbf16> to vector<8x4xbf16>
    %c28_114 = arith.constant 28 : index
    %c0_115 = arith.constant 0 : index
    %96 = vector.load %arg6[%c28_114, %c0_115] : memref<36x128xbf16, #tpu.memory_space<vmem>>, vector<4x128xbf16>
    %cst_116 = arith.constant dense<0.000000e+00> : vector<8x128xf32>
    %97 = tpu.matmul %95, %96, %cst_116 {dimension_numbers = #tpu.dot_dimension_numbers<[1], [0], [0], [1], [0, 0, 1, 1], [], []>} : vector<8x4xbf16>, vector<4x128xbf16>, vector<8x128xf32> -> vector<8x128xf32>
    %98 = arith.addf %93, %97 : vector<8x128xf32>
    %c0_117 = arith.constant 0 : index
    %c2_118 = arith.constant 2 : index
    %c1_119 = arith.constant 1 : index
    %c0_120 = arith.constant 0 : index
    %99 = vector.load %arg2[%c0_117, %c2_118, %c1_119, %c0_120] : memref<1x9x9x4xbf16, #tpu.memory_space<vmem>>, vector<1x1x8x4xbf16>
    %100 = vector.shape_cast %99 : vector<1x1x8x4xbf16> to vector<8x4xbf16>
    %c32_121 = arith.constant 32 : index
    %c0_122 = arith.constant 0 : index
    %101 = vector.load %arg6[%c32_121, %c0_122] : memref<36x128xbf16, #tpu.memory_space<vmem>>, vector<4x128xbf16>
    %cst_123 = arith.constant dense<0.000000e+00> : vector<8x128xf32>
    %102 = tpu.matmul %100, %101, %cst_123 {dimension_numbers = #tpu.dot_dimension_numbers<[1], [0], [0], [1], [0, 0, 1, 1], [], []>} : vector<8x4xbf16>, vector<4x128xbf16>, vector<8x128xf32> -> vector<8x128xf32>
    %103 = arith.addf %98, %102 : vector<8x128xf32>
    %104 = vector.broadcast %0 : vector<1x128xf32> to vector<8x128xf32>
    %105 = arith.addf %103, %104 : vector<8x128xf32>
    %cst_124 = arith.constant 0.000000e+00 : f32
    %106 = vector.broadcast %cst_124 : f32 to vector<8x128xf32>
    %107 = arith.cmpf oge, %105, %106 : vector<8x128xf32>
    %cst_125 = arith.constant 0.00999999977 : f32
    %108 = vector.broadcast %cst_125 : f32 to vector<8x128xf32>
    %109 = arith.mulf %108, %105 : vector<8x128xf32>
    %110 = arith.select %107, %105, %109 : vector<8x128xi1>, vector<8x128xf32>
    %111 = arith.truncf %110 : vector<8x128xf32> to vector<8x128xbf16>
    %c0_126 = arith.constant 0 : index
    %c1_127 = arith.constant 1 : index
    %c0_128 = arith.constant 0 : index
    %c0_129 = arith.constant 0 : index
    %112 = vector.load %arg8[%c0_126, %c1_127, %c0_128, %c0_129] : memref<1x8x8x128xbf16, #tpu.memory_space<vmem>>, vector<1x1x8x128xbf16>
    %113 = vector.shape_cast %112 : vector<1x1x8x128xbf16> to vector<8x128xbf16>
    %114 = vector.shape_cast %111 : vector<8x128xbf16> to vector<1x1x8x128xbf16>
    tpu.vector_store %arg8[%c0_126, %c1_127, %c0_128, %c0_129], %114 {strides = array<i32>} : memref<1x8x8x128xbf16, #tpu.memory_space<vmem>>, vector<1x1x8x128xbf16>,
    %cst_130 = arith.constant 0.000000e+00 : f32
    %115 = vector.broadcast %cst_130 : f32 to vector<8x128xf32>
    %c0_131 = arith.constant 0 : index
    %c2_132 = arith.constant 2 : index
    %c0_133 = arith.constant 0 : index
    %c0_134 = arith.constant 0 : index
    %116 = vector.load %arg2[%c0_131, %c2_132, %c0_133, %c0_134] : memref<1x9x9x4xbf16, #tpu.memory_space<vmem>>, vector<1x1x8x4xbf16>
    %117 = vector.shape_cast %116 : vector<1x1x8x4xbf16> to vector<8x4xbf16>
    %c0_135 = arith.constant 0 : index
    %c0_136 = arith.constant 0 : index
    %118 = vector.load %arg6[%c0_135, %c0_136] : memref<36x128xbf16, #tpu.memory_space<vmem>>, vector<4x128xbf16>
    %cst_137 = arith.constant dense<0.000000e+00> : vector<8x128xf32>
    %119 = tpu.matmul %117, %118, %cst_137 {dimension_numbers = #tpu.dot_dimension_numbers<[1], [0], [0], [1], [0, 0, 1, 1], [], []>} : vector<8x4xbf16>, vector<4x128xbf16>, vector<8x128xf32> -> vector<8x128xf32>
    %120 = arith.addf %115, %119 : vector<8x128xf32>
    %c0_138 = arith.constant 0 : index
    %c2_139 = arith.constant 2 : index
    %c0_140 = arith.constant 0 : index
    %c0_141 = arith.constant 0 : index
    %121 = vector.load %arg3[%c0_138, %c2_139, %c0_140, %c0_141] : memref<1x9x9x4xbf16, #tpu.memory_space<vmem>>, vector<1x1x8x4xbf16>
    %122 = vector.shape_cast %121 : vector<1x1x8x4xbf16> to vector<8x4xbf16>
    %c4_142 = arith.constant 4 : index
    %c0_143 = arith.constant 0 : index
    %123 = vector.load %arg6[%c4_142, %c0_143] : memref<36x128xbf16, #tpu.memory_space<vmem>>, vector<4x128xbf16>
    %cst_144 = arith.constant dense<0.000000e+00> : vector<8x128xf32>
    %124 = tpu.matmul %122, %123, %cst_144 {dimension_numbers = #tpu.dot_dimension_numbers<[1], [0], [0], [1], [0, 0, 1, 1], [], []>} : vector<8x4xbf16>, vector<4x128xbf16>, vector<8x128xf32> -> vector<8x128xf32>
    %125 = arith.addf %120, %124 : vector<8x128xf32>
    %c0_145 = arith.constant 0 : index
    %c2_146 = arith.constant 2 : index
    %c1_147 = arith.constant 1 : index
    %c0_148 = arith.constant 0 : index
    %126 = vector.load %arg2[%c0_145, %c2_146, %c1_147, %c0_148] : memref<1x9x9x4xbf16, #tpu.memory_space<vmem>>, vector<1x1x8x4xbf16>
    %127 = vector.shape_cast %126 : vector<1x1x8x4xbf16> to vector<8x4xbf16>
    %c8_149 = arith.constant 8 : index
    %c0_150 = arith.constant 0 : index
    %128 = vector.load %arg6[%c8_149, %c0_150] : memref<36x128xbf16, #tpu.memory_space<vmem>>, vector<4x128xbf16>
    %cst_151 = arith.constant dense<0.000000e+00> : vector<8x128xf32>
    %129 = tpu.matmul %127, %128, %cst_151 {dimension_numbers = #tpu.dot_dimension_numbers<[1], [0], [0], [1], [0, 0, 1, 1], [], []>} : vector<8x4xbf16>, vector<4x128xbf16>, vector<8x128xf32> -> vector<8x128xf32>
    %130 = arith.addf %125, %129 : vector<8x128xf32>
    %c0_152 = arith.constant 0 : index
    %c2_153 = arith.constant 2 : index
    %c0_154 = arith.constant 0 : index
    %c0_155 = arith.constant 0 : index
    %131 = vector.load %arg4[%c0_152, %c2_153, %c0_154, %c0_155] : memref<1x9x9x4xbf16, #tpu.memory_space<vmem>>, vector<1x1x8x4xbf16>
    %132 = vector.shape_cast %131 : vector<1x1x8x4xbf16> to vector<8x4xbf16>
    %c12_156 = arith.constant 12 : index
    %c0_157 = arith.constant 0 : index
    %133 = vector.load %arg6[%c12_156, %c0_157] : memref<36x128xbf16, #tpu.memory_space<vmem>>, vector<4x128xbf16>
    %cst_158 = arith.constant dense<0.000000e+00> : vector<8x128xf32>
    %134 = tpu.matmul %132, %133, %cst_158 {dimension_numbers = #tpu.dot_dimension_numbers<[1], [0], [0], [1], [0, 0, 1, 1], [], []>} : vector<8x4xbf16>, vector<4x128xbf16>, vector<8x128xf32> -> vector<8x128xf32>
    %135 = arith.addf %130, %134 : vector<8x128xf32>
    %c0_159 = arith.constant 0 : index
    %c2_160 = arith.constant 2 : index
    %c0_161 = arith.constant 0 : index
    %c0_162 = arith.constant 0 : index
    %136 = vector.load %arg5[%c0_159, %c2_160, %c0_161, %c0_162] : memref<1x9x9x4xbf16, #tpu.memory_space<vmem>>, vector<1x1x8x4xbf16>
    %137 = vector.shape_cast %136 : vector<1x1x8x4xbf16> to vector<8x4xbf16>
    %c16_163 = arith.constant 16 : index
    %c0_164 = arith.constant 0 : index
    %138 = vector.load %arg6[%c16_163, %c0_164] : memref<36x128xbf16, #tpu.memory_space<vmem>>, vector<4x128xbf16>
    %cst_165 = arith.constant dense<0.000000e+00> : vector<8x128xf32>
    %139 = tpu.matmul %137, %138, %cst_165 {dimension_numbers = #tpu.dot_dimension_numbers<[1], [0], [0], [1], [0, 0, 1, 1], [], []>} : vector<8x4xbf16>, vector<4x128xbf16>, vector<8x128xf32> -> vector<8x128xf32>
    %140 = arith.addf %135, %139 : vector<8x128xf32>
    %c0_166 = arith.constant 0 : index
    %c2_167 = arith.constant 2 : index
    %c1_168 = arith.constant 1 : index
    %c0_169 = arith.constant 0 : index
    %141 = vector.load %arg4[%c0_166, %c2_167, %c1_168, %c0_169] : memref<1x9x9x4xbf16, #tpu.memory_space<vmem>>, vector<1x1x8x4xbf16>
    %142 = vector.shape_cast %141 : vector<1x1x8x4xbf16> to vector<8x4xbf16>
    %c20_170 = arith.constant 20 : index
    %c0_171 = arith.constant 0 : index
    %143 = vector.load %arg6[%c20_170, %c0_171] : memref<36x128xbf16, #tpu.memory_space<vmem>>, vector<4x128xbf16>
    %cst_172 = arith.constant dense<0.000000e+00> : vector<8x128xf32>
    %144 = tpu.matmul %142, %143, %cst_172 {dimension_numbers = #tpu.dot_dimension_numbers<[1], [0], [0], [1], [0, 0, 1, 1], [], []>} : vector<8x4xbf16>, vector<4x128xbf16>, vector<8x128xf32> -> vector<8x128xf32>
    %145 = arith.addf %140, %144 : vector<8x128xf32>
    %c0_173 = arith.constant 0 : index
    %c3 = arith.constant 3 : index
    %c0_174 = arith.constant 0 : index
    %c0_175 = arith.constant 0 : index
    %146 = vector.load %arg2[%c0_173, %c3, %c0_174, %c0_175] : memref<1x9x9x4xbf16, #tpu.memory_space<vmem>>, vector<1x1x8x4xbf16>
    %147 = vector.shape_cast %146 : vector<1x1x8x4xbf16> to vector<8x4xbf16>
    %c24_176 = arith.constant 24 : index
    %c0_177 = arith.constant 0 : index
    %148 = vector.load %arg6[%c24_176, %c0_177] : memref<36x128xbf16, #tpu.memory_space<vmem>>, vector<4x128xbf16>
    %cst_178 = arith.constant dense<0.000000e+00> : vector<8x128xf32>
    %149 = tpu.matmul %147, %148, %cst_178 {dimension_numbers = #tpu.dot_dimension_numbers<[1], [0], [0], [1], [0, 0, 1, 1], [], []>} : vector<8x4xbf16>, vector<4x128xbf16>, vector<8x128xf32> -> vector<8x128xf32>
    %150 = arith.addf %145, %149 : vector<8x128xf32>
    %c0_179 = arith.constant 0 : index
    %c3_180 = arith.constant 3 : index
    %c0_181 = arith.constant 0 : index
    %c0_182 = arith.constant 0 : index
    %151 = vector.load %arg3[%c0_179, %c3_180, %c0_181, %c0_182] : memref<1x9x9x4xbf16, #tpu.memory_space<vmem>>, vector<1x1x8x4xbf16>
    %152 = vector.shape_cast %151 : vector<1x1x8x4xbf16> to vector<8x4xbf16>
    %c28_183 = arith.constant 28 : index
    %c0_184 = arith.constant 0 : index
    %153 = vector.load %arg6[%c28_183, %c0_184] : memref<36x128xbf16, #tpu.memory_space<vmem>>, vector<4x128xbf16>
    %cst_185 = arith.constant dense<0.000000e+00> : vector<8x128xf32>
    %154 = tpu.matmul %152, %153, %cst_185 {dimension_numbers = #tpu.dot_dimension_numbers<[1], [0], [0], [1], [0, 0, 1, 1], [], []>} : vector<8x4xbf16>, vector<4x128xbf16>, vector<8x128xf32> -> vector<8x128xf32>
    %155 = arith.addf %150, %154 : vector<8x128xf32>
    %c0_186 = arith.constant 0 : index
    %c3_187 = arith.constant 3 : index
    %c1_188 = arith.constant 1 : index
    %c0_189 = arith.constant 0 : index
    %156 = vector.load %arg2[%c0_186, %c3_187, %c1_188, %c0_189] : memref<1x9x9x4xbf16, #tpu.memory_space<vmem>>, vector<1x1x8x4xbf16>
    %157 = vector.shape_cast %156 : vector<1x1x8x4xbf16> to vector<8x4xbf16>
    %c32_190 = arith.constant 32 : index
    %c0_191 = arith.constant 0 : index
    %158 = vector.load %arg6[%c32_190, %c0_191] : memref<36x128xbf16, #tpu.memory_space<vmem>>, vector<4x128xbf16>
    %cst_192 = arith.constant dense<0.000000e+00> : vector<8x128xf32>
    %159 = tpu.matmul %157, %158, %cst_192 {dimension_numbers = #tpu.dot_dimension_numbers<[1], [0], [0], [1], [0, 0, 1, 1], [], []>} : vector<8x4xbf16>, vector<4x128xbf16>, vector<8x128xf32> -> vector<8x128xf32>
    %160 = arith.addf %155, %159 : vector<8x128xf32>
    %161 = vector.broadcast %0 : vector<1x128xf32> to vector<8x128xf32>
    %162 = arith.addf %160, %161 : vector<8x128xf32>
    %cst_193 = arith.constant 0.000000e+00 : f32
    %163 = vector.broadcast %cst_193 : f32 to vector<8x128xf32>
    %164 = arith.cmpf oge, %162, %163 : vector<8x128xf32>
    %cst_194 = arith.constant 0.00999999977 : f32
    %165 = vector.broadcast %cst_194 : f32 to vector<8x128xf32>
    %166 = arith.mulf %165, %162 : vector<8x128xf32>
    %167 = arith.select %164, %162, %166 : vector<8x128xi1>, vector<8x128xf32>
    %168 = arith.truncf %167 : vector<8x128xf32> to vector<8x128xbf16>
    %c0_195 = arith.constant 0 : index
    %c2_196 = arith.constant 2 : index
    %c0_197 = arith.constant 0 : index
    %c0_198 = arith.constant 0 : index
    %169 = vector.load %arg8[%c0_195, %c2_196, %c0_197, %c0_198] : memref<1x8x8x128xbf16, #tpu.memory_space<vmem>>, vector<1x1x8x128xbf16>
    %170 = vector.shape_cast %169 : vector<1x1x8x128xbf16> to vector<8x128xbf16>
    %171 = vector.shape_cast %168 : vector<8x128xbf16> to vector<1x1x8x128xbf16>
    tpu.vector_store %arg8[%c0_195, %c2_196, %c0_197, %c0_198], %171 {strides = array<i32>} : memref<1x8x8x128xbf16, #tpu.memory_space<vmem>>, vector<1x1x8x128xbf16>,
    %cst_199 = arith.constant 0.000000e+00 : f32
    %172 = vector.broadcast %cst_199 : f32 to vector<8x128xf32>
    %c0_200 = arith.constant 0 : index
    %c3_201 = arith.constant 3 : index
    %c0_202 = arith.constant 0 : index
    %c0_203 = arith.constant 0 : index
    %173 = vector.load %arg2[%c0_200, %c3_201, %c0_202, %c0_203] : memref<1x9x9x4xbf16, #tpu.memory_space<vmem>>, vector<1x1x8x4xbf16>
    %174 = vector.shape_cast %173 : vector<1x1x8x4xbf16> to vector<8x4xbf16>
    %c0_204 = arith.constant 0 : index
    %c0_205 = arith.constant 0 : index
    %175 = vector.load %arg6[%c0_204, %c0_205] : memref<36x128xbf16, #tpu.memory_space<vmem>>, vector<4x128xbf16>
    %cst_206 = arith.constant dense<0.000000e+00> : vector<8x128xf32>
    %176 = tpu.matmul %174, %175, %cst_206 {dimension_numbers = #tpu.dot_dimension_numbers<[1], [0], [0], [1], [0, 0, 1, 1], [], []>} : vector<8x4xbf16>, vector<4x128xbf16>, vector<8x128xf32> -> vector<8x128xf32>
    %177 = arith.addf %172, %176 : vector<8x128xf32>
    %c0_207 = arith.constant 0 : index
    %c3_208 = arith.constant 3 : index
    %c0_209 = arith.constant 0 : index
    %c0_210 = arith.constant 0 : index
    %178 = vector.load %arg3[%c0_207, %c3_208, %c0_209, %c0_210] : memref<1x9x9x4xbf16, #tpu.memory_space<vmem>>, vector<1x1x8x4xbf16>
    %179 = vector.shape_cast %178 : vector<1x1x8x4xbf16> to vector<8x4xbf16>
    %c4_211 = arith.constant 4 : index
    %c0_212 = arith.constant 0 : index
    %180 = vector.load %arg6[%c4_211, %c0_212] : memref<36x128xbf16, #tpu.memory_space<vmem>>, vector<4x128xbf16>
    %cst_213 = arith.constant dense<0.000000e+00> : vector<8x128xf32>
    %181 = tpu.matmul %179, %180, %cst_213 {dimension_numbers = #tpu.dot_dimension_numbers<[1], [0], [0], [1], [0, 0, 1, 1], [], []>} : vector<8x4xbf16>, vector<4x128xbf16>, vector<8x128xf32> -> vector<8x128xf32>
    %182 = arith.addf %177, %181 : vector<8x128xf32>
    %c0_214 = arith.constant 0 : index
    %c3_215 = arith.constant 3 : index
    %c1_216 = arith.constant 1 : index
    %c0_217 = arith.constant 0 : index
    %183 = vector.load %arg2[%c0_214, %c3_215, %c1_216, %c0_217] : memref<1x9x9x4xbf16, #tpu.memory_space<vmem>>, vector<1x1x8x4xbf16>
    %184 = vector.shape_cast %183 : vector<1x1x8x4xbf16> to vector<8x4xbf16>
    %c8_218 = arith.constant 8 : index
    %c0_219 = arith.constant 0 : index
    %185 = vector.load %arg6[%c8_218, %c0_219] : memref<36x128xbf16, #tpu.memory_space<vmem>>, vector<4x128xbf16>
    %cst_220 = arith.constant dense<0.000000e+00> : vector<8x128xf32>
    %186 = tpu.matmul %184, %185, %cst_220 {dimension_numbers = #tpu.dot_dimension_numbers<[1], [0], [0], [1], [0, 0, 1, 1], [], []>} : vector<8x4xbf16>, vector<4x128xbf16>, vector<8x128xf32> -> vector<8x128xf32>
    %187 = arith.addf %182, %186 : vector<8x128xf32>
    %c0_221 = arith.constant 0 : index
    %c3_222 = arith.constant 3 : index
    %c0_223 = arith.constant 0 : index
    %c0_224 = arith.constant 0 : index
    %188 = vector.load %arg4[%c0_221, %c3_222, %c0_223, %c0_224] : memref<1x9x9x4xbf16, #tpu.memory_space<vmem>>, vector<1x1x8x4xbf16>
    %189 = vector.shape_cast %188 : vector<1x1x8x4xbf16> to vector<8x4xbf16>
    %c12_225 = arith.constant 12 : index
    %c0_226 = arith.constant 0 : index
    %190 = vector.load %arg6[%c12_225, %c0_226] : memref<36x128xbf16, #tpu.memory_space<vmem>>, vector<4x128xbf16>
    %cst_227 = arith.constant dense<0.000000e+00> : vector<8x128xf32>
    %191 = tpu.matmul %189, %190, %cst_227 {dimension_numbers = #tpu.dot_dimension_numbers<[1], [0], [0], [1], [0, 0, 1, 1], [], []>} : vector<8x4xbf16>, vector<4x128xbf16>, vector<8x128xf32> -> vector<8x128xf32>
    %192 = arith.addf %187, %191 : vector<8x128xf32>
    %c0_228 = arith.constant 0 : index
    %c3_229 = arith.constant 3 : index
    %c0_230 = arith.constant 0 : index
    %c0_231 = arith.constant 0 : index
    %193 = vector.load %arg5[%c0_228, %c3_229, %c0_230, %c0_231] : memref<1x9x9x4xbf16, #tpu.memory_space<vmem>>, vector<1x1x8x4xbf16>
    %194 = vector.shape_cast %193 : vector<1x1x8x4xbf16> to vector<8x4xbf16>
    %c16_232 = arith.constant 16 : index
    %c0_233 = arith.constant 0 : index
    %195 = vector.load %arg6[%c16_232, %c0_233] : memref<36x128xbf16, #tpu.memory_space<vmem>>, vector<4x128xbf16>
    %cst_234 = arith.constant dense<0.000000e+00> : vector<8x128xf32>
    %196 = tpu.matmul %194, %195, %cst_234 {dimension_numbers = #tpu.dot_dimension_numbers<[1], [0], [0], [1], [0, 0, 1, 1], [], []>} : vector<8x4xbf16>, vector<4x128xbf16>, vector<8x128xf32> -> vector<8x128xf32>
    %197 = arith.addf %192, %196 : vector<8x128xf32>
    %c0_235 = arith.constant 0 : index
    %c3_236 = arith.constant 3 : index
    %c1_237 = arith.constant 1 : index
    %c0_238 = arith.constant 0 : index
    %198 = vector.load %arg4[%c0_235, %c3_236, %c1_237, %c0_238] : memref<1x9x9x4xbf16, #tpu.memory_space<vmem>>, vector<1x1x8x4xbf16>
    %199 = vector.shape_cast %198 : vector<1x1x8x4xbf16> to vector<8x4xbf16>
    %c20_239 = arith.constant 20 : index
    %c0_240 = arith.constant 0 : index
    %200 = vector.load %arg6[%c20_239, %c0_240] : memref<36x128xbf16, #tpu.memory_space<vmem>>, vector<4x128xbf16>
    %cst_241 = arith.constant dense<0.000000e+00> : vector<8x128xf32>
    %201 = tpu.matmul %199, %200, %cst_241 {dimension_numbers = #tpu.dot_dimension_numbers<[1], [0], [0], [1], [0, 0, 1, 1], [], []>} : vector<8x4xbf16>, vector<4x128xbf16>, vector<8x128xf32> -> vector<8x128xf32>
    %202 = arith.addf %197, %201 : vector<8x128xf32>
    %c0_242 = arith.constant 0 : index
    %c4_243 = arith.constant 4 : index
    %c0_244 = arith.constant 0 : index
    %c0_245 = arith.constant 0 : index
    %203 = vector.load %arg2[%c0_242, %c4_243, %c0_244, %c0_245] : memref<1x9x9x4xbf16, #tpu.memory_space<vmem>>, vector<1x1x8x4xbf16>
    %204 = vector.shape_cast %203 : vector<1x1x8x4xbf16> to vector<8x4xbf16>
    %c24_246 = arith.constant 24 : index
    %c0_247 = arith.constant 0 : index
    %205 = vector.load %arg6[%c24_246, %c0_247] : memref<36x128xbf16, #tpu.memory_space<vmem>>, vector<4x128xbf16>
    %cst_248 = arith.constant dense<0.000000e+00> : vector<8x128xf32>
    %206 = tpu.matmul %204, %205, %cst_248 {dimension_numbers = #tpu.dot_dimension_numbers<[1], [0], [0], [1], [0, 0, 1, 1], [], []>} : vector<8x4xbf16>, vector<4x128xbf16>, vector<8x128xf32> -> vector<8x128xf32>
    %207 = arith.addf %202, %206 : vector<8x128xf32>
    %c0_249 = arith.constant 0 : index
    %c4_250 = arith.constant 4 : index
    %c0_251 = arith.constant 0 : index
    %c0_252 = arith.constant 0 : index
    %208 = vector.load %arg3[%c0_249, %c4_250, %c0_251, %c0_252] : memref<1x9x9x4xbf16, #tpu.memory_space<vmem>>, vector<1x1x8x4xbf16>
    %209 = vector.shape_cast %208 : vector<1x1x8x4xbf16> to vector<8x4xbf16>
    %c28_253 = arith.constant 28 : index
    %c0_254 = arith.constant 0 : index
    %210 = vector.load %arg6[%c28_253, %c0_254] : memref<36x128xbf16, #tpu.memory_space<vmem>>, vector<4x128xbf16>
    %cst_255 = arith.constant dense<0.000000e+00> : vector<8x128xf32>
    %211 = tpu.matmul %209, %210, %cst_255 {dimension_numbers = #tpu.dot_dimension_numbers<[1], [0], [0], [1], [0, 0, 1, 1], [], []>} : vector<8x4xbf16>, vector<4x128xbf16>, vector<8x128xf32> -> vector<8x128xf32>
    %212 = arith.addf %207, %211 : vector<8x128xf32>
    %c0_256 = arith.constant 0 : index
    %c4_257 = arith.constant 4 : index
    %c1_258 = arith.constant 1 : index
    %c0_259 = arith.constant 0 : index
    %213 = vector.load %arg2[%c0_256, %c4_257, %c1_258, %c0_259] : memref<1x9x9x4xbf16, #tpu.memory_space<vmem>>, vector<1x1x8x4xbf16>
    %214 = vector.shape_cast %213 : vector<1x1x8x4xbf16> to vector<8x4xbf16>
    %c32_260 = arith.constant 32 : index
    %c0_261 = arith.constant 0 : index
    %215 = vector.load %arg6[%c32_260, %c0_261] : memref<36x128xbf16, #tpu.memory_space<vmem>>, vector<4x128xbf16>
    %cst_262 = arith.constant dense<0.000000e+00> : vector<8x128xf32>
    %216 = tpu.matmul %214, %215, %cst_262 {dimension_numbers = #tpu.dot_dimension_numbers<[1], [0], [0], [1], [0, 0, 1, 1], [], []>} : vector<8x4xbf16>, vector<4x128xbf16>, vector<8x128xf32> -> vector<8x128xf32>
    %217 = arith.addf %212, %216 : vector<8x128xf32>
    %218 = vector.broadcast %0 : vector<1x128xf32> to vector<8x128xf32>
    %219 = arith.addf %217, %218 : vector<8x128xf32>
    %cst_263 = arith.constant 0.000000e+00 : f32
    %220 = vector.broadcast %cst_263 : f32 to vector<8x128xf32>
    %221 = arith.cmpf oge, %219, %220 : vector<8x128xf32>
    %cst_264 = arith.constant 0.00999999977 : f32
    %222 = vector.broadcast %cst_264 : f32 to vector<8x128xf32>
    %223 = arith.mulf %222, %219 : vector<8x128xf32>
    %224 = arith.select %221, %219, %223 : vector<8x128xi1>, vector<8x128xf32>
    %225 = arith.truncf %224 : vector<8x128xf32> to vector<8x128xbf16>
    %c0_265 = arith.constant 0 : index
    %c3_266 = arith.constant 3 : index
    %c0_267 = arith.constant 0 : index
    %c0_268 = arith.constant 0 : index
    %226 = vector.load %arg8[%c0_265, %c3_266, %c0_267, %c0_268] : memref<1x8x8x128xbf16, #tpu.memory_space<vmem>>, vector<1x1x8x128xbf16>
    %227 = vector.shape_cast %226 : vector<1x1x8x128xbf16> to vector<8x128xbf16>
    %228 = vector.shape_cast %225 : vector<8x128xbf16> to vector<1x1x8x128xbf16>
    tpu.vector_store %arg8[%c0_265, %c3_266, %c0_267, %c0_268], %228 {strides = array<i32>} : memref<1x8x8x128xbf16, #tpu.memory_space<vmem>>, vector<1x1x8x128xbf16>,
    %cst_269 = arith.constant 0.000000e+00 : f32
    %229 = vector.broadcast %cst_269 : f32 to vector<8x128xf32>
    %c0_270 = arith.constant 0 : index
    %c4_271 = arith.constant 4 : index
    %c0_272 = arith.constant 0 : index
    %c0_273 = arith.constant 0 : index
    %230 = vector.load %arg2[%c0_270, %c4_271, %c0_272, %c0_273] : memref<1x9x9x4xbf16, #tpu.memory_space<vmem>>, vector<1x1x8x4xbf16>
    %231 = vector.shape_cast %230 : vector<1x1x8x4xbf16> to vector<8x4xbf16>
    %c0_274 = arith.constant 0 : index
    %c0_275 = arith.constant 0 : index
    %232 = vector.load %arg6[%c0_274, %c0_275] : memref<36x128xbf16, #tpu.memory_space<vmem>>, vector<4x128xbf16>
    %cst_276 = arith.constant dense<0.000000e+00> : vector<8x128xf32>
    %233 = tpu.matmul %231, %232, %cst_276 {dimension_numbers = #tpu.dot_dimension_numbers<[1], [0], [0], [1], [0, 0, 1, 1], [], []>} : vector<8x4xbf16>, vector<4x128xbf16>, vector<8x128xf32> -> vector<8x128xf32>
    %234 = arith.addf %229, %233 : vector<8x128xf32>
    %c0_277 = arith.constant 0 : index
    %c4_278 = arith.constant 4 : index
    %c0_279 = arith.constant 0 : index
    %c0_280 = arith.constant 0 : index
    %235 = vector.load %arg3[%c0_277, %c4_278, %c0_279, %c0_280] : memref<1x9x9x4xbf16, #tpu.memory_space<vmem>>, vector<1x1x8x4xbf16>
    %236 = vector.shape_cast %235 : vector<1x1x8x4xbf16> to vector<8x4xbf16>
    %c4_281 = arith.constant 4 : index
    %c0_282 = arith.constant 0 : index
    %237 = vector.load %arg6[%c4_281, %c0_282] : memref<36x128xbf16, #tpu.memory_space<vmem>>, vector<4x128xbf16>
    %cst_283 = arith.constant dense<0.000000e+00> : vector<8x128xf32>
    %238 = tpu.matmul %236, %237, %cst_283 {dimension_numbers = #tpu.dot_dimension_numbers<[1], [0], [0], [1], [0, 0, 1, 1], [], []>} : vector<8x4xbf16>, vector<4x128xbf16>, vector<8x128xf32> -> vector<8x128xf32>
    %239 = arith.addf %234, %238 : vector<8x128xf32>
    %c0_284 = arith.constant 0 : index
    %c4_285 = arith.constant 4 : index
    %c1_286 = arith.constant 1 : index
    %c0_287 = arith.constant 0 : index
    %240 = vector.load %arg2[%c0_284, %c4_285, %c1_286, %c0_287] : memref<1x9x9x4xbf16, #tpu.memory_space<vmem>>, vector<1x1x8x4xbf16>
    %241 = vector.shape_cast %240 : vector<1x1x8x4xbf16> to vector<8x4xbf16>
    %c8_288 = arith.constant 8 : index
    %c0_289 = arith.constant 0 : index
    %242 = vector.load %arg6[%c8_288, %c0_289] : memref<36x128xbf16, #tpu.memory_space<vmem>>, vector<4x128xbf16>
    %cst_290 = arith.constant dense<0.000000e+00> : vector<8x128xf32>
    %243 = tpu.matmul %241, %242, %cst_290 {dimension_numbers = #tpu.dot_dimension_numbers<[1], [0], [0], [1], [0, 0, 1, 1], [], []>} : vector<8x4xbf16>, vector<4x128xbf16>, vector<8x128xf32> -> vector<8x128xf32>
    %244 = arith.addf %239, %243 : vector<8x128xf32>
    %c0_291 = arith.constant 0 : index
    %c4_292 = arith.constant 4 : index
    %c0_293 = arith.constant 0 : index
    %c0_294 = arith.constant 0 : index
    %245 = vector.load %arg4[%c0_291, %c4_292, %c0_293, %c0_294] : memref<1x9x9x4xbf16, #tpu.memory_space<vmem>>, vector<1x1x8x4xbf16>
    %246 = vector.shape_cast %245 : vector<1x1x8x4xbf16> to vector<8x4xbf16>
    %c12_295 = arith.constant 12 : index
    %c0_296 = arith.constant 0 : index
    %247 = vector.load %arg6[%c12_295, %c0_296] : memref<36x128xbf16, #tpu.memory_space<vmem>>, vector<4x128xbf16>
    %cst_297 = arith.constant dense<0.000000e+00> : vector<8x128xf32>
    %248 = tpu.matmul %246, %247, %cst_297 {dimension_numbers = #tpu.dot_dimension_numbers<[1], [0], [0], [1], [0, 0, 1, 1], [], []>} : vector<8x4xbf16>, vector<4x128xbf16>, vector<8x128xf32> -> vector<8x128xf32>
    %249 = arith.addf %244, %248 : vector<8x128xf32>
    %c0_298 = arith.constant 0 : index
    %c4_299 = arith.constant 4 : index
    %c0_300 = arith.constant 0 : index
    %c0_301 = arith.constant 0 : index
    %250 = vector.load %arg5[%c0_298, %c4_299, %c0_300, %c0_301] : memref<1x9x9x4xbf16, #tpu.memory_space<vmem>>, vector<1x1x8x4xbf16>
    %251 = vector.shape_cast %250 : vector<1x1x8x4xbf16> to vector<8x4xbf16>
    %c16_302 = arith.constant 16 : index
    %c0_303 = arith.constant 0 : index
    %252 = vector.load %arg6[%c16_302, %c0_303] : memref<36x128xbf16, #tpu.memory_space<vmem>>, vector<4x128xbf16>
    %cst_304 = arith.constant dense<0.000000e+00> : vector<8x128xf32>
    %253 = tpu.matmul %251, %252, %cst_304 {dimension_numbers = #tpu.dot_dimension_numbers<[1], [0], [0], [1], [0, 0, 1, 1], [], []>} : vector<8x4xbf16>, vector<4x128xbf16>, vector<8x128xf32> -> vector<8x128xf32>
    %254 = arith.addf %249, %253 : vector<8x128xf32>
    %c0_305 = arith.constant 0 : index
    %c4_306 = arith.constant 4 : index
    %c1_307 = arith.constant 1 : index
    %c0_308 = arith.constant 0 : index
    %255 = vector.load %arg4[%c0_305, %c4_306, %c1_307, %c0_308] : memref<1x9x9x4xbf16, #tpu.memory_space<vmem>>, vector<1x1x8x4xbf16>
    %256 = vector.shape_cast %255 : vector<1x1x8x4xbf16> to vector<8x4xbf16>
    %c20_309 = arith.constant 20 : index
    %c0_310 = arith.constant 0 : index
    %257 = vector.load %arg6[%c20_309, %c0_310] : memref<36x128xbf16, #tpu.memory_space<vmem>>, vector<4x128xbf16>
    %cst_311 = arith.constant dense<0.000000e+00> : vector<8x128xf32>
    %258 = tpu.matmul %256, %257, %cst_311 {dimension_numbers = #tpu.dot_dimension_numbers<[1], [0], [0], [1], [0, 0, 1, 1], [], []>} : vector<8x4xbf16>, vector<4x128xbf16>, vector<8x128xf32> -> vector<8x128xf32>
    %259 = arith.addf %254, %258 : vector<8x128xf32>
    %c0_312 = arith.constant 0 : index
    %c5 = arith.constant 5 : index
    %c0_313 = arith.constant 0 : index
    %c0_314 = arith.constant 0 : index
    %260 = vector.load %arg2[%c0_312, %c5, %c0_313, %c0_314] : memref<1x9x9x4xbf16, #tpu.memory_space<vmem>>, vector<1x1x8x4xbf16>
    %261 = vector.shape_cast %260 : vector<1x1x8x4xbf16> to vector<8x4xbf16>
    %c24_315 = arith.constant 24 : index
    %c0_316 = arith.constant 0 : index
    %262 = vector.load %arg6[%c24_315, %c0_316] : memref<36x128xbf16, #tpu.memory_space<vmem>>, vector<4x128xbf16>
    %cst_317 = arith.constant dense<0.000000e+00> : vector<8x128xf32>
    %263 = tpu.matmul %261, %262, %cst_317 {dimension_numbers = #tpu.dot_dimension_numbers<[1], [0], [0], [1], [0, 0, 1, 1], [], []>} : vector<8x4xbf16>, vector<4x128xbf16>, vector<8x128xf32> -> vector<8x128xf32>
    %264 = arith.addf %259, %263 : vector<8x128xf32>
    %c0_318 = arith.constant 0 : index
    %c5_319 = arith.constant 5 : index
    %c0_320 = arith.constant 0 : index
    %c0_321 = arith.constant 0 : index
    %265 = vector.load %arg3[%c0_318, %c5_319, %c0_320, %c0_321] : memref<1x9x9x4xbf16, #tpu.memory_space<vmem>>, vector<1x1x8x4xbf16>
    %266 = vector.shape_cast %265 : vector<1x1x8x4xbf16> to vector<8x4xbf16>
    %c28_322 = arith.constant 28 : index
    %c0_323 = arith.constant 0 : index
    %267 = vector.load %arg6[%c28_322, %c0_323] : memref<36x128xbf16, #tpu.memory_space<vmem>>, vector<4x128xbf16>
    %cst_324 = arith.constant dense<0.000000e+00> : vector<8x128xf32>
    %268 = tpu.matmul %266, %267, %cst_324 {dimension_numbers = #tpu.dot_dimension_numbers<[1], [0], [0], [1], [0, 0, 1, 1], [], []>} : vector<8x4xbf16>, vector<4x128xbf16>, vector<8x128xf32> -> vector<8x128xf32>
    %269 = arith.addf %264, %268 : vector<8x128xf32>
    %c0_325 = arith.constant 0 : index
    %c5_326 = arith.constant 5 : index
    %c1_327 = arith.constant 1 : index
    %c0_328 = arith.constant 0 : index
    %270 = vector.load %arg2[%c0_325, %c5_326, %c1_327, %c0_328] : memref<1x9x9x4xbf16, #tpu.memory_space<vmem>>, vector<1x1x8x4xbf16>
    %271 = vector.shape_cast %270 : vector<1x1x8x4xbf16> to vector<8x4xbf16>
    %c32_329 = arith.constant 32 : index
    %c0_330 = arith.constant 0 : index
    %272 = vector.load %arg6[%c32_329, %c0_330] : memref<36x128xbf16, #tpu.memory_space<vmem>>, vector<4x128xbf16>
    %cst_331 = arith.constant dense<0.000000e+00> : vector<8x128xf32>
    %273 = tpu.matmul %271, %272, %cst_331 {dimension_numbers = #tpu.dot_dimension_numbers<[1], [0], [0], [1], [0, 0, 1, 1], [], []>} : vector<8x4xbf16>, vector<4x128xbf16>, vector<8x128xf32> -> vector<8x128xf32>
    %274 = arith.addf %269, %273 : vector<8x128xf32>
    %275 = vector.broadcast %0 : vector<1x128xf32> to vector<8x128xf32>
    %276 = arith.addf %274, %275 : vector<8x128xf32>
    %cst_332 = arith.constant 0.000000e+00 : f32
    %277 = vector.broadcast %cst_332 : f32 to vector<8x128xf32>
    %278 = arith.cmpf oge, %276, %277 : vector<8x128xf32>
    %cst_333 = arith.constant 0.00999999977 : f32
    %279 = vector.broadcast %cst_333 : f32 to vector<8x128xf32>
    %280 = arith.mulf %279, %276 : vector<8x128xf32>
    %281 = arith.select %278, %276, %280 : vector<8x128xi1>, vector<8x128xf32>
    %282 = arith.truncf %281 : vector<8x128xf32> to vector<8x128xbf16>
    %c0_334 = arith.constant 0 : index
    %c4_335 = arith.constant 4 : index
    %c0_336 = arith.constant 0 : index
    %c0_337 = arith.constant 0 : index
    %283 = vector.load %arg8[%c0_334, %c4_335, %c0_336, %c0_337] : memref<1x8x8x128xbf16, #tpu.memory_space<vmem>>, vector<1x1x8x128xbf16>
    %284 = vector.shape_cast %283 : vector<1x1x8x128xbf16> to vector<8x128xbf16>
    %285 = vector.shape_cast %282 : vector<8x128xbf16> to vector<1x1x8x128xbf16>
    tpu.vector_store %arg8[%c0_334, %c4_335, %c0_336, %c0_337], %285 {strides = array<i32>} : memref<1x8x8x128xbf16, #tpu.memory_space<vmem>>, vector<1x1x8x128xbf16>,
    %cst_338 = arith.constant 0.000000e+00 : f32
    %286 = vector.broadcast %cst_338 : f32 to vector<8x128xf32>
    %c0_339 = arith.constant 0 : index
    %c5_340 = arith.constant 5 : index
    %c0_341 = arith.constant 0 : index
    %c0_342 = arith.constant 0 : index
    %287 = vector.load %arg2[%c0_339, %c5_340, %c0_341, %c0_342] : memref<1x9x9x4xbf16, #tpu.memory_space<vmem>>, vector<1x1x8x4xbf16>
    %288 = vector.shape_cast %287 : vector<1x1x8x4xbf16> to vector<8x4xbf16>
    %c0_343 = arith.constant 0 : index
    %c0_344 = arith.constant 0 : index
    %289 = vector.load %arg6[%c0_343, %c0_344] : memref<36x128xbf16, #tpu.memory_space<vmem>>, vector<4x128xbf16>
    %cst_345 = arith.constant dense<0.000000e+00> : vector<8x128xf32>
    %290 = tpu.matmul %288, %289, %cst_345 {dimension_numbers = #tpu.dot_dimension_numbers<[1], [0], [0], [1], [0, 0, 1, 1], [], []>} : vector<8x4xbf16>, vector<4x128xbf16>, vector<8x128xf32> -> vector<8x128xf32>
    %291 = arith.addf %286, %290 : vector<8x128xf32>
    %c0_346 = arith.constant 0 : index
    %c5_347 = arith.constant 5 : index
    %c0_348 = arith.constant 0 : index
    %c0_349 = arith.constant 0 : index
    %292 = vector.load %arg3[%c0_346, %c5_347, %c0_348, %c0_349] : memref<1x9x9x4xbf16, #tpu.memory_space<vmem>>, vector<1x1x8x4xbf16>
    %293 = vector.shape_cast %292 : vector<1x1x8x4xbf16> to vector<8x4xbf16>
    %c4_350 = arith.constant 4 : index
    %c0_351 = arith.constant 0 : index
    %294 = vector.load %arg6[%c4_350, %c0_351] : memref<36x128xbf16, #tpu.memory_space<vmem>>, vector<4x128xbf16>
    %cst_352 = arith.constant dense<0.000000e+00> : vector<8x128xf32>
    %295 = tpu.matmul %293, %294, %cst_352 {dimension_numbers = #tpu.dot_dimension_numbers<[1], [0], [0], [1], [0, 0, 1, 1], [], []>} : vector<8x4xbf16>, vector<4x128xbf16>, vector<8x128xf32> -> vector<8x128xf32>
    %296 = arith.addf %291, %295 : vector<8x128xf32>
    %c0_353 = arith.constant 0 : index
    %c5_354 = arith.constant 5 : index
    %c1_355 = arith.constant 1 : index
    %c0_356 = arith.constant 0 : index
    %297 = vector.load %arg2[%c0_353, %c5_354, %c1_355, %c0_356] : memref<1x9x9x4xbf16, #tpu.memory_space<vmem>>, vector<1x1x8x4xbf16>
    %298 = vector.shape_cast %297 : vector<1x1x8x4xbf16> to vector<8x4xbf16>
    %c8_357 = arith.constant 8 : index
    %c0_358 = arith.constant 0 : index
    %299 = vector.load %arg6[%c8_357, %c0_358] : memref<36x128xbf16, #tpu.memory_space<vmem>>, vector<4x128xbf16>
    %cst_359 = arith.constant dense<0.000000e+00> : vector<8x128xf32>
    %300 = tpu.matmul %298, %299, %cst_359 {dimension_numbers = #tpu.dot_dimension_numbers<[1], [0], [0], [1], [0, 0, 1, 1], [], []>} : vector<8x4xbf16>, vector<4x128xbf16>, vector<8x128xf32> -> vector<8x128xf32>
    %301 = arith.addf %296, %300 : vector<8x128xf32>
    %c0_360 = arith.constant 0 : index
    %c5_361 = arith.constant 5 : index
    %c0_362 = arith.constant 0 : index
    %c0_363 = arith.constant 0 : index
    %302 = vector.load %arg4[%c0_360, %c5_361, %c0_362, %c0_363] : memref<1x9x9x4xbf16, #tpu.memory_space<vmem>>, vector<1x1x8x4xbf16>
    %303 = vector.shape_cast %302 : vector<1x1x8x4xbf16> to vector<8x4xbf16>
    %c12_364 = arith.constant 12 : index
    %c0_365 = arith.constant 0 : index
    %304 = vector.load %arg6[%c12_364, %c0_365] : memref<36x128xbf16, #tpu.memory_space<vmem>>, vector<4x128xbf16>
    %cst_366 = arith.constant dense<0.000000e+00> : vector<8x128xf32>
    %305 = tpu.matmul %303, %304, %cst_366 {dimension_numbers = #tpu.dot_dimension_numbers<[1], [0], [0], [1], [0, 0, 1, 1], [], []>} : vector<8x4xbf16>, vector<4x128xbf16>, vector<8x128xf32> -> vector<8x128xf32>
    %306 = arith.addf %301, %305 : vector<8x128xf32>
    %c0_367 = arith.constant 0 : index
    %c5_368 = arith.constant 5 : index
    %c0_369 = arith.constant 0 : index
    %c0_370 = arith.constant 0 : index
    %307 = vector.load %arg5[%c0_367, %c5_368, %c0_369, %c0_370] : memref<1x9x9x4xbf16, #tpu.memory_space<vmem>>, vector<1x1x8x4xbf16>
    %308 = vector.shape_cast %307 : vector<1x1x8x4xbf16> to vector<8x4xbf16>
    %c16_371 = arith.constant 16 : index
    %c0_372 = arith.constant 0 : index
    %309 = vector.load %arg6[%c16_371, %c0_372] : memref<36x128xbf16, #tpu.memory_space<vmem>>, vector<4x128xbf16>
    %cst_373 = arith.constant dense<0.000000e+00> : vector<8x128xf32>
    %310 = tpu.matmul %308, %309, %cst_373 {dimension_numbers = #tpu.dot_dimension_numbers<[1], [0], [0], [1], [0, 0, 1, 1], [], []>} : vector<8x4xbf16>, vector<4x128xbf16>, vector<8x128xf32> -> vector<8x128xf32>
    %311 = arith.addf %306, %310 : vector<8x128xf32>
    %c0_374 = arith.constant 0 : index
    %c5_375 = arith.constant 5 : index
    %c1_376 = arith.constant 1 : index
    %c0_377 = arith.constant 0 : index
    %312 = vector.load %arg4[%c0_374, %c5_375, %c1_376, %c0_377] : memref<1x9x9x4xbf16, #tpu.memory_space<vmem>>, vector<1x1x8x4xbf16>
    %313 = vector.shape_cast %312 : vector<1x1x8x4xbf16> to vector<8x4xbf16>
    %c20_378 = arith.constant 20 : index
    %c0_379 = arith.constant 0 : index
    %314 = vector.load %arg6[%c20_378, %c0_379] : memref<36x128xbf16, #tpu.memory_space<vmem>>, vector<4x128xbf16>
    %cst_380 = arith.constant dense<0.000000e+00> : vector<8x128xf32>
    %315 = tpu.matmul %313, %314, %cst_380 {dimension_numbers = #tpu.dot_dimension_numbers<[1], [0], [0], [1], [0, 0, 1, 1], [], []>} : vector<8x4xbf16>, vector<4x128xbf16>, vector<8x128xf32> -> vector<8x128xf32>
    %316 = arith.addf %311, %315 : vector<8x128xf32>
    %c0_381 = arith.constant 0 : index
    %c6 = arith.constant 6 : index
    %c0_382 = arith.constant 0 : index
    %c0_383 = arith.constant 0 : index
    %317 = vector.load %arg2[%c0_381, %c6, %c0_382, %c0_383] : memref<1x9x9x4xbf16, #tpu.memory_space<vmem>>, vector<1x1x8x4xbf16>
    %318 = vector.shape_cast %317 : vector<1x1x8x4xbf16> to vector<8x4xbf16>
    %c24_384 = arith.constant 24 : index
    %c0_385 = arith.constant 0 : index
    %319 = vector.load %arg6[%c24_384, %c0_385] : memref<36x128xbf16, #tpu.memory_space<vmem>>, vector<4x128xbf16>
    %cst_386 = arith.constant dense<0.000000e+00> : vector<8x128xf32>
    %320 = tpu.matmul %318, %319, %cst_386 {dimension_numbers = #tpu.dot_dimension_numbers<[1], [0], [0], [1], [0, 0, 1, 1], [], []>} : vector<8x4xbf16>, vector<4x128xbf16>, vector<8x128xf32> -> vector<8x128xf32>
    %321 = arith.addf %316, %320 : vector<8x128xf32>
    %c0_387 = arith.constant 0 : index
    %c6_388 = arith.constant 6 : index
    %c0_389 = arith.constant 0 : index
    %c0_390 = arith.constant 0 : index
    %322 = vector.load %arg3[%c0_387, %c6_388, %c0_389, %c0_390] : memref<1x9x9x4xbf16, #tpu.memory_space<vmem>>, vector<1x1x8x4xbf16>
    %323 = vector.shape_cast %322 : vector<1x1x8x4xbf16> to vector<8x4xbf16>
    %c28_391 = arith.constant 28 : index
    %c0_392 = arith.constant 0 : index
    %324 = vector.load %arg6[%c28_391, %c0_392] : memref<36x128xbf16, #tpu.memory_space<vmem>>, vector<4x128xbf16>
    %cst_393 = arith.constant dense<0.000000e+00> : vector<8x128xf32>
    %325 = tpu.matmul %323, %324, %cst_393 {dimension_numbers = #tpu.dot_dimension_numbers<[1], [0], [0], [1], [0, 0, 1, 1], [], []>} : vector<8x4xbf16>, vector<4x128xbf16>, vector<8x128xf32> -> vector<8x128xf32>
    %326 = arith.addf %321, %325 : vector<8x128xf32>
    %c0_394 = arith.constant 0 : index
    %c6_395 = arith.constant 6 : index
    %c1_396 = arith.constant 1 : index
    %c0_397 = arith.constant 0 : index
    %327 = vector.load %arg2[%c0_394, %c6_395, %c1_396, %c0_397] : memref<1x9x9x4xbf16, #tpu.memory_space<vmem>>, vector<1x1x8x4xbf16>
    %328 = vector.shape_cast %327 : vector<1x1x8x4xbf16> to vector<8x4xbf16>
    %c32_398 = arith.constant 32 : index
    %c0_399 = arith.constant 0 : index
    %329 = vector.load %arg6[%c32_398, %c0_399] : memref<36x128xbf16, #tpu.memory_space<vmem>>, vector<4x128xbf16>
    %cst_400 = arith.constant dense<0.000000e+00> : vector<8x128xf32>
    %330 = tpu.matmul %328, %329, %cst_400 {dimension_numbers = #tpu.dot_dimension_numbers<[1], [0], [0], [1], [0, 0, 1, 1], [], []>} : vector<8x4xbf16>, vector<4x128xbf16>, vector<8x128xf32> -> vector<8x128xf32>
    %331 = arith.addf %326, %330 : vector<8x128xf32>
    %332 = vector.broadcast %0 : vector<1x128xf32> to vector<8x128xf32>
    %333 = arith.addf %331, %332 : vector<8x128xf32>
    %cst_401 = arith.constant 0.000000e+00 : f32
    %334 = vector.broadcast %cst_401 : f32 to vector<8x128xf32>
    %335 = arith.cmpf oge, %333, %334 : vector<8x128xf32>
    %cst_402 = arith.constant 0.00999999977 : f32
    %336 = vector.broadcast %cst_402 : f32 to vector<8x128xf32>
    %337 = arith.mulf %336, %333 : vector<8x128xf32>
    %338 = arith.select %335, %333, %337 : vector<8x128xi1>, vector<8x128xf32>
    %339 = arith.truncf %338 : vector<8x128xf32> to vector<8x128xbf16>
    %c0_403 = arith.constant 0 : index
    %c5_404 = arith.constant 5 : index
    %c0_405 = arith.constant 0 : index
    %c0_406 = arith.constant 0 : index
    %340 = vector.load %arg8[%c0_403, %c5_404, %c0_405, %c0_406] : memref<1x8x8x128xbf16, #tpu.memory_space<vmem>>, vector<1x1x8x128xbf16>
    %341 = vector.shape_cast %340 : vector<1x1x8x128xbf16> to vector<8x128xbf16>
    %342 = vector.shape_cast %339 : vector<8x128xbf16> to vector<1x1x8x128xbf16>
    tpu.vector_store %arg8[%c0_403, %c5_404, %c0_405, %c0_406], %342 {strides = array<i32>} : memref<1x8x8x128xbf16, #tpu.memory_space<vmem>>, vector<1x1x8x128xbf16>,
    %cst_407 = arith.constant 0.000000e+00 : f32
    %343 = vector.broadcast %cst_407 : f32 to vector<8x128xf32>
    %c0_408 = arith.constant 0 : index
    %c6_409 = arith.constant 6 : index
    %c0_410 = arith.constant 0 : index
    %c0_411 = arith.constant 0 : index
    %344 = vector.load %arg2[%c0_408, %c6_409, %c0_410, %c0_411] : memref<1x9x9x4xbf16, #tpu.memory_space<vmem>>, vector<1x1x8x4xbf16>
    %345 = vector.shape_cast %344 : vector<1x1x8x4xbf16> to vector<8x4xbf16>
    %c0_412 = arith.constant 0 : index
    %c0_413 = arith.constant 0 : index
    %346 = vector.load %arg6[%c0_412, %c0_413] : memref<36x128xbf16, #tpu.memory_space<vmem>>, vector<4x128xbf16>
    %cst_414 = arith.constant dense<0.000000e+00> : vector<8x128xf32>
    %347 = tpu.matmul %345, %346, %cst_414 {dimension_numbers = #tpu.dot_dimension_numbers<[1], [0], [0], [1], [0, 0, 1, 1], [], []>} : vector<8x4xbf16>, vector<4x128xbf16>, vector<8x128xf32> -> vector<8x128xf32>
    %348 = arith.addf %343, %347 : vector<8x128xf32>
    %c0_415 = arith.constant 0 : index
    %c6_416 = arith.constant 6 : index
    %c0_417 = arith.constant 0 : index
    %c0_418 = arith.constant 0 : index
    %349 = vector.load %arg3[%c0_415, %c6_416, %c0_417, %c0_418] : memref<1x9x9x4xbf16, #tpu.memory_space<vmem>>, vector<1x1x8x4xbf16>
    %350 = vector.shape_cast %349 : vector<1x1x8x4xbf16> to vector<8x4xbf16>
    %c4_419 = arith.constant 4 : index
    %c0_420 = arith.constant 0 : index
    %351 = vector.load %arg6[%c4_419, %c0_420] : memref<36x128xbf16, #tpu.memory_space<vmem>>, vector<4x128xbf16>
    %cst_421 = arith.constant dense<0.000000e+00> : vector<8x128xf32>
    %352 = tpu.matmul %350, %351, %cst_421 {dimension_numbers = #tpu.dot_dimension_numbers<[1], [0], [0], [1], [0, 0, 1, 1], [], []>} : vector<8x4xbf16>, vector<4x128xbf16>, vector<8x128xf32> -> vector<8x128xf32>
    %353 = arith.addf %348, %352 : vector<8x128xf32>
    %c0_422 = arith.constant 0 : index
    %c6_423 = arith.constant 6 : index
    %c1_424 = arith.constant 1 : index
    %c0_425 = arith.constant 0 : index
    %354 = vector.load %arg2[%c0_422, %c6_423, %c1_424, %c0_425] : memref<1x9x9x4xbf16, #tpu.memory_space<vmem>>, vector<1x1x8x4xbf16>
    %355 = vector.shape_cast %354 : vector<1x1x8x4xbf16> to vector<8x4xbf16>
    %c8_426 = arith.constant 8 : index
    %c0_427 = arith.constant 0 : index
    %356 = vector.load %arg6[%c8_426, %c0_427] : memref<36x128xbf16, #tpu.memory_space<vmem>>, vector<4x128xbf16>
    %cst_428 = arith.constant dense<0.000000e+00> : vector<8x128xf32>
    %357 = tpu.matmul %355, %356, %cst_428 {dimension_numbers = #tpu.dot_dimension_numbers<[1], [0], [0], [1], [0, 0, 1, 1], [], []>} : vector<8x4xbf16>, vector<4x128xbf16>, vector<8x128xf32> -> vector<8x128xf32>
    %358 = arith.addf %353, %357 : vector<8x128xf32>
    %c0_429 = arith.constant 0 : index
    %c6_430 = arith.constant 6 : index
    %c0_431 = arith.constant 0 : index
    %c0_432 = arith.constant 0 : index
    %359 = vector.load %arg4[%c0_429, %c6_430, %c0_431, %c0_432] : memref<1x9x9x4xbf16, #tpu.memory_space<vmem>>, vector<1x1x8x4xbf16>
    %360 = vector.shape_cast %359 : vector<1x1x8x4xbf16> to vector<8x4xbf16>
    %c12_433 = arith.constant 12 : index
    %c0_434 = arith.constant 0 : index
    %361 = vector.load %arg6[%c12_433, %c0_434] : memref<36x128xbf16, #tpu.memory_space<vmem>>, vector<4x128xbf16>
    %cst_435 = arith.constant dense<0.000000e+00> : vector<8x128xf32>
    %362 = tpu.matmul %360, %361, %cst_435 {dimension_numbers = #tpu.dot_dimension_numbers<[1], [0], [0], [1], [0, 0, 1, 1], [], []>} : vector<8x4xbf16>, vector<4x128xbf16>, vector<8x128xf32> -> vector<8x128xf32>
    %363 = arith.addf %358, %362 : vector<8x128xf32>
    %c0_436 = arith.constant 0 : index
    %c6_437 = arith.constant 6 : index
    %c0_438 = arith.constant 0 : index
    %c0_439 = arith.constant 0 : index
    %364 = vector.load %arg5[%c0_436, %c6_437, %c0_438, %c0_439] : memref<1x9x9x4xbf16, #tpu.memory_space<vmem>>, vector<1x1x8x4xbf16>
    %365 = vector.shape_cast %364 : vector<1x1x8x4xbf16> to vector<8x4xbf16>
    %c16_440 = arith.constant 16 : index
    %c0_441 = arith.constant 0 : index
    %366 = vector.load %arg6[%c16_440, %c0_441] : memref<36x128xbf16, #tpu.memory_space<vmem>>, vector<4x128xbf16>
    %cst_442 = arith.constant dense<0.000000e+00> : vector<8x128xf32>
    %367 = tpu.matmul %365, %366, %cst_442 {dimension_numbers = #tpu.dot_dimension_numbers<[1], [0], [0], [1], [0, 0, 1, 1], [], []>} : vector<8x4xbf16>, vector<4x128xbf16>, vector<8x128xf32> -> vector<8x128xf32>
    %368 = arith.addf %363, %367 : vector<8x128xf32>
    %c0_443 = arith.constant 0 : index
    %c6_444 = arith.constant 6 : index
    %c1_445 = arith.constant 1 : index
    %c0_446 = arith.constant 0 : index
    %369 = vector.load %arg4[%c0_443, %c6_444, %c1_445, %c0_446] : memref<1x9x9x4xbf16, #tpu.memory_space<vmem>>, vector<1x1x8x4xbf16>
    %370 = vector.shape_cast %369 : vector<1x1x8x4xbf16> to vector<8x4xbf16>
    %c20_447 = arith.constant 20 : index
    %c0_448 = arith.constant 0 : index
    %371 = vector.load %arg6[%c20_447, %c0_448] : memref<36x128xbf16, #tpu.memory_space<vmem>>, vector<4x128xbf16>
    %cst_449 = arith.constant dense<0.000000e+00> : vector<8x128xf32>
    %372 = tpu.matmul %370, %371, %cst_449 {dimension_numbers = #tpu.dot_dimension_numbers<[1], [0], [0], [1], [0, 0, 1, 1], [], []>} : vector<8x4xbf16>, vector<4x128xbf16>, vector<8x128xf32> -> vector<8x128xf32>
    %373 = arith.addf %368, %372 : vector<8x128xf32>
    %c0_450 = arith.constant 0 : index
    %c7 = arith.constant 7 : index
    %c0_451 = arith.constant 0 : index
    %c0_452 = arith.constant 0 : index
    %374 = vector.load %arg2[%c0_450, %c7, %c0_451, %c0_452] : memref<1x9x9x4xbf16, #tpu.memory_space<vmem>>, vector<1x1x8x4xbf16>
    %375 = vector.shape_cast %374 : vector<1x1x8x4xbf16> to vector<8x4xbf16>
    %c24_453 = arith.constant 24 : index
    %c0_454 = arith.constant 0 : index
    %376 = vector.load %arg6[%c24_453, %c0_454] : memref<36x128xbf16, #tpu.memory_space<vmem>>, vector<4x128xbf16>
    %cst_455 = arith.constant dense<0.000000e+00> : vector<8x128xf32>
    %377 = tpu.matmul %375, %376, %cst_455 {dimension_numbers = #tpu.dot_dimension_numbers<[1], [0], [0], [1], [0, 0, 1, 1], [], []>} : vector<8x4xbf16>, vector<4x128xbf16>, vector<8x128xf32> -> vector<8x128xf32>
    %378 = arith.addf %373, %377 : vector<8x128xf32>
    %c0_456 = arith.constant 0 : index
    %c7_457 = arith.constant 7 : index
    %c0_458 = arith.constant 0 : index
    %c0_459 = arith.constant 0 : index
    %379 = vector.load %arg3[%c0_456, %c7_457, %c0_458, %c0_459] : memref<1x9x9x4xbf16, #tpu.memory_space<vmem>>, vector<1x1x8x4xbf16>
    %380 = vector.shape_cast %379 : vector<1x1x8x4xbf16> to vector<8x4xbf16>
    %c28_460 = arith.constant 28 : index
    %c0_461 = arith.constant 0 : index
    %381 = vector.load %arg6[%c28_460, %c0_461] : memref<36x128xbf16, #tpu.memory_space<vmem>>, vector<4x128xbf16>
    %cst_462 = arith.constant dense<0.000000e+00> : vector<8x128xf32>
    %382 = tpu.matmul %380, %381, %cst_462 {dimension_numbers = #tpu.dot_dimension_numbers<[1], [0], [0], [1], [0, 0, 1, 1], [], []>} : vector<8x4xbf16>, vector<4x128xbf16>, vector<8x128xf32> -> vector<8x128xf32>
    %383 = arith.addf %378, %382 : vector<8x128xf32>
    %c0_463 = arith.constant 0 : index
    %c7_464 = arith.constant 7 : index
    %c1_465 = arith.constant 1 : index
    %c0_466 = arith.constant 0 : index
    %384 = vector.load %arg2[%c0_463, %c7_464, %c1_465, %c0_466] : memref<1x9x9x4xbf16, #tpu.memory_space<vmem>>, vector<1x1x8x4xbf16>
    %385 = vector.shape_cast %384 : vector<1x1x8x4xbf16> to vector<8x4xbf16>
    %c32_467 = arith.constant 32 : index
    %c0_468 = arith.constant 0 : index
    %386 = vector.load %arg6[%c32_467, %c0_468] : memref<36x128xbf16, #tpu.memory_space<vmem>>, vector<4x128xbf16>
    %cst_469 = arith.constant dense<0.000000e+00> : vector<8x128xf32>
    %387 = tpu.matmul %385, %386, %cst_469 {dimension_numbers = #tpu.dot_dimension_numbers<[1], [0], [0], [1], [0, 0, 1, 1], [], []>} : vector<8x4xbf16>, vector<4x128xbf16>, vector<8x128xf32> -> vector<8x128xf32>
    %388 = arith.addf %383, %387 : vector<8x128xf32>
    %389 = vector.broadcast %0 : vector<1x128xf32> to vector<8x128xf32>
    %390 = arith.addf %388, %389 : vector<8x128xf32>
    %cst_470 = arith.constant 0.000000e+00 : f32
    %391 = vector.broadcast %cst_470 : f32 to vector<8x128xf32>
    %392 = arith.cmpf oge, %390, %391 : vector<8x128xf32>
    %cst_471 = arith.constant 0.00999999977 : f32
    %393 = vector.broadcast %cst_471 : f32 to vector<8x128xf32>
    %394 = arith.mulf %393, %390 : vector<8x128xf32>
    %395 = arith.select %392, %390, %394 : vector<8x128xi1>, vector<8x128xf32>
    %396 = arith.truncf %395 : vector<8x128xf32> to vector<8x128xbf16>
    %c0_472 = arith.constant 0 : index
    %c6_473 = arith.constant 6 : index
    %c0_474 = arith.constant 0 : index
    %c0_475 = arith.constant 0 : index
    %397 = vector.load %arg8[%c0_472, %c6_473, %c0_474, %c0_475] : memref<1x8x8x128xbf16, #tpu.memory_space<vmem>>, vector<1x1x8x128xbf16>
    %398 = vector.shape_cast %397 : vector<1x1x8x128xbf16> to vector<8x128xbf16>
    %399 = vector.shape_cast %396 : vector<8x128xbf16> to vector<1x1x8x128xbf16>
    tpu.vector_store %arg8[%c0_472, %c6_473, %c0_474, %c0_475], %399 {strides = array<i32>} : memref<1x8x8x128xbf16, #tpu.memory_space<vmem>>, vector<1x1x8x128xbf16>,
    %cst_476 = arith.constant 0.000000e+00 : f32
    %400 = vector.broadcast %cst_476 : f32 to vector<8x128xf32>
    %c0_477 = arith.constant 0 : index
    %c7_478 = arith.constant 7 : index
    %c0_479 = arith.constant 0 : index
    %c0_480 = arith.constant 0 : index
    %401 = vector.load %arg2[%c0_477, %c7_478, %c0_479, %c0_480] : memref<1x9x9x4xbf16, #tpu.memory_space<vmem>>, vector<1x1x8x4xbf16>
    %402 = vector.shape_cast %401 : vector<1x1x8x4xbf16> to vector<8x4xbf16>
    %c0_481 = arith.constant 0 : index
    %c0_482 = arith.constant 0 : index
    %403 = vector.load %arg6[%c0_481, %c0_482] : memref<36x128xbf16, #tpu.memory_space<vmem>>, vector<4x128xbf16>
    %cst_483 = arith.constant dense<0.000000e+00> : vector<8x128xf32>
    %404 = tpu.matmul %402, %403, %cst_483 {dimension_numbers = #tpu.dot_dimension_numbers<[1], [0], [0], [1], [0, 0, 1, 1], [], []>} : vector<8x4xbf16>, vector<4x128xbf16>, vector<8x128xf32> -> vector<8x128xf32>
    %405 = arith.addf %400, %404 : vector<8x128xf32>
    %c0_484 = arith.constant 0 : index
    %c7_485 = arith.constant 7 : index
    %c0_486 = arith.constant 0 : index
    %c0_487 = arith.constant 0 : index
    %406 = vector.load %arg3[%c0_484, %c7_485, %c0_486, %c0_487] : memref<1x9x9x4xbf16, #tpu.memory_space<vmem>>, vector<1x1x8x4xbf16>
    %407 = vector.shape_cast %406 : vector<1x1x8x4xbf16> to vector<8x4xbf16>
    %c4_488 = arith.constant 4 : index
    %c0_489 = arith.constant 0 : index
    %408 = vector.load %arg6[%c4_488, %c0_489] : memref<36x128xbf16, #tpu.memory_space<vmem>>, vector<4x128xbf16>
    %cst_490 = arith.constant dense<0.000000e+00> : vector<8x128xf32>
    %409 = tpu.matmul %407, %408, %cst_490 {dimension_numbers = #tpu.dot_dimension_numbers<[1], [0], [0], [1], [0, 0, 1, 1], [], []>} : vector<8x4xbf16>, vector<4x128xbf16>, vector<8x128xf32> -> vector<8x128xf32>
    %410 = arith.addf %405, %409 : vector<8x128xf32>
    %c0_491 = arith.constant 0 : index
    %c7_492 = arith.constant 7 : index
    %c1_493 = arith.constant 1 : index
    %c0_494 = arith.constant 0 : index
    %411 = vector.load %arg2[%c0_491, %c7_492, %c1_493, %c0_494] : memref<1x9x9x4xbf16, #tpu.memory_space<vmem>>, vector<1x1x8x4xbf16>
    %412 = vector.shape_cast %411 : vector<1x1x8x4xbf16> to vector<8x4xbf16>
    %c8_495 = arith.constant 8 : index
    %c0_496 = arith.constant 0 : index
    %413 = vector.load %arg6[%c8_495, %c0_496] : memref<36x128xbf16, #tpu.memory_space<vmem>>, vector<4x128xbf16>
    %cst_497 = arith.constant dense<0.000000e+00> : vector<8x128xf32>
    %414 = tpu.matmul %412, %413, %cst_497 {dimension_numbers = #tpu.dot_dimension_numbers<[1], [0], [0], [1], [0, 0, 1, 1], [], []>} : vector<8x4xbf16>, vector<4x128xbf16>, vector<8x128xf32> -> vector<8x128xf32>
    %415 = arith.addf %410, %414 : vector<8x128xf32>
    %c0_498 = arith.constant 0 : index
    %c7_499 = arith.constant 7 : index
    %c0_500 = arith.constant 0 : index
    %c0_501 = arith.constant 0 : index
    %416 = vector.load %arg4[%c0_498, %c7_499, %c0_500, %c0_501] : memref<1x9x9x4xbf16, #tpu.memory_space<vmem>>, vector<1x1x8x4xbf16>
    %417 = vector.shape_cast %416 : vector<1x1x8x4xbf16> to vector<8x4xbf16>
    %c12_502 = arith.constant 12 : index
    %c0_503 = arith.constant 0 : index
    %418 = vector.load %arg6[%c12_502, %c0_503] : memref<36x128xbf16, #tpu.memory_space<vmem>>, vector<4x128xbf16>
    %cst_504 = arith.constant dense<0.000000e+00> : vector<8x128xf32>
    %419 = tpu.matmul %417, %418, %cst_504 {dimension_numbers = #tpu.dot_dimension_numbers<[1], [0], [0], [1], [0, 0, 1, 1], [], []>} : vector<8x4xbf16>, vector<4x128xbf16>, vector<8x128xf32> -> vector<8x128xf32>
    %420 = arith.addf %415, %419 : vector<8x128xf32>
    %c0_505 = arith.constant 0 : index
    %c7_506 = arith.constant 7 : index
    %c0_507 = arith.constant 0 : index
    %c0_508 = arith.constant 0 : index
    %421 = vector.load %arg5[%c0_505, %c7_506, %c0_507, %c0_508] : memref<1x9x9x4xbf16, #tpu.memory_space<vmem>>, vector<1x1x8x4xbf16>
    %422 = vector.shape_cast %421 : vector<1x1x8x4xbf16> to vector<8x4xbf16>
    %c16_509 = arith.constant 16 : index
    %c0_510 = arith.constant 0 : index
    %423 = vector.load %arg6[%c16_509, %c0_510] : memref<36x128xbf16, #tpu.memory_space<vmem>>, vector<4x128xbf16>
    %cst_511 = arith.constant dense<0.000000e+00> : vector<8x128xf32>
    %424 = tpu.matmul %422, %423, %cst_511 {dimension_numbers = #tpu.dot_dimension_numbers<[1], [0], [0], [1], [0, 0, 1, 1], [], []>} : vector<8x4xbf16>, vector<4x128xbf16>, vector<8x128xf32> -> vector<8x128xf32>
    %425 = arith.addf %420, %424 : vector<8x128xf32>
    %c0_512 = arith.constant 0 : index
    %c7_513 = arith.constant 7 : index
    %c1_514 = arith.constant 1 : index
    %c0_515 = arith.constant 0 : index
    %426 = vector.load %arg4[%c0_512, %c7_513, %c1_514, %c0_515] : memref<1x9x9x4xbf16, #tpu.memory_space<vmem>>, vector<1x1x8x4xbf16>
    %427 = vector.shape_cast %426 : vector<1x1x8x4xbf16> to vector<8x4xbf16>
    %c20_516 = arith.constant 20 : index
    %c0_517 = arith.constant 0 : index
    %428 = vector.load %arg6[%c20_516, %c0_517] : memref<36x128xbf16, #tpu.memory_space<vmem>>, vector<4x128xbf16>
    %cst_518 = arith.constant dense<0.000000e+00> : vector<8x128xf32>
    %429 = tpu.matmul %427, %428, %cst_518 {dimension_numbers = #tpu.dot_dimension_numbers<[1], [0], [0], [1], [0, 0, 1, 1], [], []>} : vector<8x4xbf16>, vector<4x128xbf16>, vector<8x128xf32> -> vector<8x128xf32>
    %430 = arith.addf %425, %429 : vector<8x128xf32>
    %c0_519 = arith.constant 0 : index
    %c8_520 = arith.constant 8 : index
    %c0_521 = arith.constant 0 : index
    %c0_522 = arith.constant 0 : index
    %431 = vector.load %arg2[%c0_519, %c8_520, %c0_521, %c0_522] : memref<1x9x9x4xbf16, #tpu.memory_space<vmem>>, vector<1x1x8x4xbf16>
    %432 = vector.shape_cast %431 : vector<1x1x8x4xbf16> to vector<8x4xbf16>
    %c24_523 = arith.constant 24 : index
    %c0_524 = arith.constant 0 : index
    %433 = vector.load %arg6[%c24_523, %c0_524] : memref<36x128xbf16, #tpu.memory_space<vmem>>, vector<4x128xbf16>
    %cst_525 = arith.constant dense<0.000000e+00> : vector<8x128xf32>
    %434 = tpu.matmul %432, %433, %cst_525 {dimension_numbers = #tpu.dot_dimension_numbers<[1], [0], [0], [1], [0, 0, 1, 1], [], []>} : vector<8x4xbf16>, vector<4x128xbf16>, vector<8x128xf32> -> vector<8x128xf32>
    %435 = arith.addf %430, %434 : vector<8x128xf32>
    %c0_526 = arith.constant 0 : index
    %c8_527 = arith.constant 8 : index
    %c0_528 = arith.constant 0 : index
    %c0_529 = arith.constant 0 : index
    %436 = vector.load %arg3[%c0_526, %c8_527, %c0_528, %c0_529] : memref<1x9x9x4xbf16, #tpu.memory_space<vmem>>, vector<1x1x8x4xbf16>
    %437 = vector.shape_cast %436 : vector<1x1x8x4xbf16> to vector<8x4xbf16>
    %c28_530 = arith.constant 28 : index
    %c0_531 = arith.constant 0 : index
    %438 = vector.load %arg6[%c28_530, %c0_531] : memref<36x128xbf16, #tpu.memory_space<vmem>>, vector<4x128xbf16>
    %cst_532 = arith.constant dense<0.000000e+00> : vector<8x128xf32>
    %439 = tpu.matmul %437, %438, %cst_532 {dimension_numbers = #tpu.dot_dimension_numbers<[1], [0], [0], [1], [0, 0, 1, 1], [], []>} : vector<8x4xbf16>, vector<4x128xbf16>, vector<8x128xf32> -> vector<8x128xf32>
    %440 = arith.addf %435, %439 : vector<8x128xf32>
    %c0_533 = arith.constant 0 : index
    %c8_534 = arith.constant 8 : index
    %c1_535 = arith.constant 1 : index
    %c0_536 = arith.constant 0 : index
    %441 = vector.load %arg2[%c0_533, %c8_534, %c1_535, %c0_536] : memref<1x9x9x4xbf16, #tpu.memory_space<vmem>>, vector<1x1x8x4xbf16>
    %442 = vector.shape_cast %441 : vector<1x1x8x4xbf16> to vector<8x4xbf16>
    %c32_537 = arith.constant 32 : index
    %c0_538 = arith.constant 0 : index
    %443 = vector.load %arg6[%c32_537, %c0_538] : memref<36x128xbf16, #tpu.memory_space<vmem>>, vector<4x128xbf16>
    %cst_539 = arith.constant dense<0.000000e+00> : vector<8x128xf32>
    %444 = tpu.matmul %442, %443, %cst_539 {dimension_numbers = #tpu.dot_dimension_numbers<[1], [0], [0], [1], [0, 0, 1, 1], [], []>} : vector<8x4xbf16>, vector<4x128xbf16>, vector<8x128xf32> -> vector<8x128xf32>
    %445 = arith.addf %440, %444 : vector<8x128xf32>
    %446 = vector.broadcast %0 : vector<1x128xf32> to vector<8x128xf32>
    %447 = arith.addf %445, %446 : vector<8x128xf32>
    %cst_540 = arith.constant 0.000000e+00 : f32
    %448 = vector.broadcast %cst_540 : f32 to vector<8x128xf32>
    %449 = arith.cmpf oge, %447, %448 : vector<8x128xf32>
    %cst_541 = arith.constant 0.00999999977 : f32
    %450 = vector.broadcast %cst_541 : f32 to vector<8x128xf32>
    %451 = arith.mulf %450, %447 : vector<8x128xf32>
    %452 = arith.select %449, %447, %451 : vector<8x128xi1>, vector<8x128xf32>
    %453 = arith.truncf %452 : vector<8x128xf32> to vector<8x128xbf16>
    %c0_542 = arith.constant 0 : index
    %c7_543 = arith.constant 7 : index
    %c0_544 = arith.constant 0 : index
    %c0_545 = arith.constant 0 : index
    %454 = vector.load %arg8[%c0_542, %c7_543, %c0_544, %c0_545] : memref<1x8x8x128xbf16, #tpu.memory_space<vmem>>, vector<1x1x8x128xbf16>
    %455 = vector.shape_cast %454 : vector<1x1x8x128xbf16> to vector<8x128xbf16>
    %456 = vector.shape_cast %453 : vector<8x128xbf16> to vector<1x1x8x128xbf16>
    tpu.vector_store %arg8[%c0_542, %c7_543, %c0_544, %c0_545], %456 {strides = array<i32>} : memref<1x8x8x128xbf16, #tpu.memory_space<vmem>>, vector<1x1x8x128xbf16>,
    return
  }
  func.func @transform_0(%arg0: i32, %arg1: i32) -> (i32, i32, i32, i32) {
    %c0_i32 = arith.constant 0 : i32
    %c0_i32_0 = arith.constant 0 : i32
    %c0_i32_1 = arith.constant 0 : i32
    %c0_i32_2 = arith.constant 0 : i32
    return %arg1, %c0_i32, %c0_i32_0, %c0_i32_1 : i32, i32, i32, i32
  }
  func.func @transform_1(%arg0: i32, %arg1: i32) -> (i32, i32, i32, i32) {
    %c0_i32 = arith.constant 0 : i32
    %c0_i32_0 = arith.constant 0 : i32
    %c0_i32_1 = arith.constant 0 : i32
    %c0_i32_2 = arith.constant 0 : i32
    return %arg1, %c0_i32, %c0_i32_0, %c0_i32_1 : i32, i32, i32, i32
  }
  func.func @transform_2(%arg0: i32, %arg1: i32) -> (i32, i32, i32, i32) {
    %c0_i32 = arith.constant 0 : i32
    %c0_i32_0 = arith.constant 0 : i32
    %c0_i32_1 = arith.constant 0 : i32
    %c0_i32_2 = arith.constant 0 : i32
    return %arg1, %c0_i32, %c0_i32_0, %c0_i32_1 : i32, i32, i32, i32
  }
  func.func @transform_3(%arg0: i32, %arg1: i32) -> (i32, i32, i32, i32) {
    %c0_i32 = arith.constant 0 : i32
    %c0_i32_0 = arith.constant 0 : i32
    %c0_i32_1 = arith.constant 0 : i32
    %c0_i32_2 = arith.constant 0 : i32
    return %arg1, %c0_i32, %c0_i32_0, %c0_i32_1 : i32, i32, i32, i32
  }
  func.func @transform_4(%arg0: i32, %arg1: i32) -> (i32, i32) {
    %c0_i32 = arith.constant 0 : i32
    %c0_i32_0 = arith.constant 0 : i32
    return %c0_i32, %arg0 : i32, i32
  }
  func.func @transform_5(%arg0: i32, %arg1: i32) -> (i32, i32) {
    %c0_i32 = arith.constant 0 : i32
    %c0_i32_0 = arith.constant 0 : i32
    return %c0_i32, %arg0 : i32, i32
  }
  func.func @transform_6(%arg0: i32, %arg1: i32) -> (i32, i32, i32, i32) {
    %c0_i32 = arith.constant 0 : i32
    %c0_i32_0 = arith.constant 0 : i32
    %c0_i32_1 = arith.constant 0 : i32
    return %arg1, %c0_i32, %c0_i32_0, %arg0 : i32, i32, i32, i32
  }
}

module attributes {stable_mosaic.version = 11 : i64} {
  func.func @_conv3x3s2_kernel(%arg0: i32, %arg1: i32, %arg2: memref<1x3x3x128xbf16, #tpu.memory_space<vmem>>, %arg3: memref<1x3x3x128xbf16, #tpu.memory_space<vmem>>, %arg4: memref<1x3x3x128xbf16, #tpu.memory_space<vmem>>, %arg5: memref<1x3x3x128xbf16, #tpu.memory_space<vmem>>, %arg6: memref<1152x128xbf16, #tpu.memory_space<vmem>>, %arg7: memref<1x128xf32, #tpu.memory_space<vmem>>, %arg8: memref<1x2x2x128xbf16, #tpu.memory_space<vmem>>) attributes {dimension_semantics = [#tpu.dimension_semantics<parallel>, #tpu.dimension_semantics<parallel>], iteration_bounds = array<i64: 1, 2>, scalar_prefetch = 0 : i64, scratch_operands = 0 : i64, tpu.core_type = #tpu.core_type<tc>, window_params = [{transform_indices = @transform_0, window_bounds = array<i64: 1, 3, 3, 128>}, {transform_indices = @transform_1, window_bounds = array<i64: 1, 3, 3, 128>}, {transform_indices = @transform_2, window_bounds = array<i64: 1, 3, 3, 128>}, {transform_indices = @transform_3, window_bounds = array<i64: 1, 3, 3, 128>}, {pipeline_mode = #tpu.pipeline_mode<synchronous>, transform_indices = @transform_4, window_bounds = array<i64: 1152, 128>}, {pipeline_mode = #tpu.pipeline_mode<synchronous>, transform_indices = @transform_5, window_bounds = array<i64: 1, 128>}, {transform_indices = @transform_6, window_bounds = array<i64: 1, 2, 2, 128>}]} {
    %c0 = arith.constant 0 : index
    %c0_0 = arith.constant 0 : index
    %0 = vector.load %arg7[%c0, %c0_0] : memref<1x128xf32, #tpu.memory_space<vmem>>, vector<1x128xf32>
    %cst = arith.constant 0.000000e+00 : f32
    %1 = vector.broadcast %cst : f32 to vector<2x128xf32>
    %c0_1 = arith.constant 0 : index
    %c0_2 = arith.constant 0 : index
    %c0_3 = arith.constant 0 : index
    %c0_4 = arith.constant 0 : index
    %2 = vector.load %arg2[%c0_1, %c0_2, %c0_3, %c0_4] : memref<1x3x3x128xbf16, #tpu.memory_space<vmem>>, vector<1x1x2x128xbf16>
    %3 = vector.shape_cast %2 : vector<1x1x2x128xbf16> to vector<2x128xbf16>
    %c0_5 = arith.constant 0 : index
    %c0_6 = arith.constant 0 : index
    %4 = vector.load %arg6[%c0_5, %c0_6] : memref<1152x128xbf16, #tpu.memory_space<vmem>>, vector<128x128xbf16>
    %cst_7 = arith.constant dense<0.000000e+00> : vector<2x128xf32>
    %5 = tpu.matmul %3, %4, %cst_7 {dimension_numbers = #tpu.dot_dimension_numbers<[1], [0], [0], [1], [0, 0, 1, 1], [], []>} : vector<2x128xbf16>, vector<128x128xbf16>, vector<2x128xf32> -> vector<2x128xf32>
    %6 = arith.addf %1, %5 : vector<2x128xf32>
    %c0_8 = arith.constant 0 : index
    %c0_9 = arith.constant 0 : index
    %c0_10 = arith.constant 0 : index
    %c0_11 = arith.constant 0 : index
    %7 = vector.load %arg3[%c0_8, %c0_9, %c0_10, %c0_11] : memref<1x3x3x128xbf16, #tpu.memory_space<vmem>>, vector<1x1x2x128xbf16>
    %8 = vector.shape_cast %7 : vector<1x1x2x128xbf16> to vector<2x128xbf16>
    %c128 = arith.constant 128 : index
    %c0_12 = arith.constant 0 : index
    %9 = vector.load %arg6[%c128, %c0_12] : memref<1152x128xbf16, #tpu.memory_space<vmem>>, vector<128x128xbf16>
    %cst_13 = arith.constant dense<0.000000e+00> : vector<2x128xf32>
    %10 = tpu.matmul %8, %9, %cst_13 {dimension_numbers = #tpu.dot_dimension_numbers<[1], [0], [0], [1], [0, 0, 1, 1], [], []>} : vector<2x128xbf16>, vector<128x128xbf16>, vector<2x128xf32> -> vector<2x128xf32>
    %11 = arith.addf %6, %10 : vector<2x128xf32>
    %c0_14 = arith.constant 0 : index
    %c0_15 = arith.constant 0 : index
    %c1 = arith.constant 1 : index
    %c0_16 = arith.constant 0 : index
    %12 = vector.load %arg2[%c0_14, %c0_15, %c1, %c0_16] : memref<1x3x3x128xbf16, #tpu.memory_space<vmem>>, vector<1x1x2x128xbf16>
    %13 = vector.shape_cast %12 : vector<1x1x2x128xbf16> to vector<2x128xbf16>
    %c256 = arith.constant 256 : index
    %c0_17 = arith.constant 0 : index
    %14 = vector.load %arg6[%c256, %c0_17] : memref<1152x128xbf16, #tpu.memory_space<vmem>>, vector<128x128xbf16>
    %cst_18 = arith.constant dense<0.000000e+00> : vector<2x128xf32>
    %15 = tpu.matmul %13, %14, %cst_18 {dimension_numbers = #tpu.dot_dimension_numbers<[1], [0], [0], [1], [0, 0, 1, 1], [], []>} : vector<2x128xbf16>, vector<128x128xbf16>, vector<2x128xf32> -> vector<2x128xf32>
    %16 = arith.addf %11, %15 : vector<2x128xf32>
    %c0_19 = arith.constant 0 : index
    %c0_20 = arith.constant 0 : index
    %c0_21 = arith.constant 0 : index
    %c0_22 = arith.constant 0 : index
    %17 = vector.load %arg4[%c0_19, %c0_20, %c0_21, %c0_22] : memref<1x3x3x128xbf16, #tpu.memory_space<vmem>>, vector<1x1x2x128xbf16>
    %18 = vector.shape_cast %17 : vector<1x1x2x128xbf16> to vector<2x128xbf16>
    %c384 = arith.constant 384 : index
    %c0_23 = arith.constant 0 : index
    %19 = vector.load %arg6[%c384, %c0_23] : memref<1152x128xbf16, #tpu.memory_space<vmem>>, vector<128x128xbf16>
    %cst_24 = arith.constant dense<0.000000e+00> : vector<2x128xf32>
    %20 = tpu.matmul %18, %19, %cst_24 {dimension_numbers = #tpu.dot_dimension_numbers<[1], [0], [0], [1], [0, 0, 1, 1], [], []>} : vector<2x128xbf16>, vector<128x128xbf16>, vector<2x128xf32> -> vector<2x128xf32>
    %21 = arith.addf %16, %20 : vector<2x128xf32>
    %c0_25 = arith.constant 0 : index
    %c0_26 = arith.constant 0 : index
    %c0_27 = arith.constant 0 : index
    %c0_28 = arith.constant 0 : index
    %22 = vector.load %arg5[%c0_25, %c0_26, %c0_27, %c0_28] : memref<1x3x3x128xbf16, #tpu.memory_space<vmem>>, vector<1x1x2x128xbf16>
    %23 = vector.shape_cast %22 : vector<1x1x2x128xbf16> to vector<2x128xbf16>
    %c512 = arith.constant 512 : index
    %c0_29 = arith.constant 0 : index
    %24 = vector.load %arg6[%c512, %c0_29] : memref<1152x128xbf16, #tpu.memory_space<vmem>>, vector<128x128xbf16>
    %cst_30 = arith.constant dense<0.000000e+00> : vector<2x128xf32>
    %25 = tpu.matmul %23, %24, %cst_30 {dimension_numbers = #tpu.dot_dimension_numbers<[1], [0], [0], [1], [0, 0, 1, 1], [], []>} : vector<2x128xbf16>, vector<128x128xbf16>, vector<2x128xf32> -> vector<2x128xf32>
    %26 = arith.addf %21, %25 : vector<2x128xf32>
    %c0_31 = arith.constant 0 : index
    %c0_32 = arith.constant 0 : index
    %c1_33 = arith.constant 1 : index
    %c0_34 = arith.constant 0 : index
    %27 = vector.load %arg4[%c0_31, %c0_32, %c1_33, %c0_34] : memref<1x3x3x128xbf16, #tpu.memory_space<vmem>>, vector<1x1x2x128xbf16>
    %28 = vector.shape_cast %27 : vector<1x1x2x128xbf16> to vector<2x128xbf16>
    %c640 = arith.constant 640 : index
    %c0_35 = arith.constant 0 : index
    %29 = vector.load %arg6[%c640, %c0_35] : memref<1152x128xbf16, #tpu.memory_space<vmem>>, vector<128x128xbf16>
    %cst_36 = arith.constant dense<0.000000e+00> : vector<2x128xf32>
    %30 = tpu.matmul %28, %29, %cst_36 {dimension_numbers = #tpu.dot_dimension_numbers<[1], [0], [0], [1], [0, 0, 1, 1], [], []>} : vector<2x128xbf16>, vector<128x128xbf16>, vector<2x128xf32> -> vector<2x128xf32>
    %31 = arith.addf %26, %30 : vector<2x128xf32>
    %c0_37 = arith.constant 0 : index
    %c1_38 = arith.constant 1 : index
    %c0_39 = arith.constant 0 : index
    %c0_40 = arith.constant 0 : index
    %32 = vector.load %arg2[%c0_37, %c1_38, %c0_39, %c0_40] : memref<1x3x3x128xbf16, #tpu.memory_space<vmem>>, vector<1x1x2x128xbf16>
    %33 = vector.shape_cast %32 : vector<1x1x2x128xbf16> to vector<2x128xbf16>
    %c768 = arith.constant 768 : index
    %c0_41 = arith.constant 0 : index
    %34 = vector.load %arg6[%c768, %c0_41] : memref<1152x128xbf16, #tpu.memory_space<vmem>>, vector<128x128xbf16>
    %cst_42 = arith.constant dense<0.000000e+00> : vector<2x128xf32>
    %35 = tpu.matmul %33, %34, %cst_42 {dimension_numbers = #tpu.dot_dimension_numbers<[1], [0], [0], [1], [0, 0, 1, 1], [], []>} : vector<2x128xbf16>, vector<128x128xbf16>, vector<2x128xf32> -> vector<2x128xf32>
    %36 = arith.addf %31, %35 : vector<2x128xf32>
    %c0_43 = arith.constant 0 : index
    %c1_44 = arith.constant 1 : index
    %c0_45 = arith.constant 0 : index
    %c0_46 = arith.constant 0 : index
    %37 = vector.load %arg3[%c0_43, %c1_44, %c0_45, %c0_46] : memref<1x3x3x128xbf16, #tpu.memory_space<vmem>>, vector<1x1x2x128xbf16>
    %38 = vector.shape_cast %37 : vector<1x1x2x128xbf16> to vector<2x128xbf16>
    %c896 = arith.constant 896 : index
    %c0_47 = arith.constant 0 : index
    %39 = vector.load %arg6[%c896, %c0_47] : memref<1152x128xbf16, #tpu.memory_space<vmem>>, vector<128x128xbf16>
    %cst_48 = arith.constant dense<0.000000e+00> : vector<2x128xf32>
    %40 = tpu.matmul %38, %39, %cst_48 {dimension_numbers = #tpu.dot_dimension_numbers<[1], [0], [0], [1], [0, 0, 1, 1], [], []>} : vector<2x128xbf16>, vector<128x128xbf16>, vector<2x128xf32> -> vector<2x128xf32>
    %41 = arith.addf %36, %40 : vector<2x128xf32>
    %c0_49 = arith.constant 0 : index
    %c1_50 = arith.constant 1 : index
    %c1_51 = arith.constant 1 : index
    %c0_52 = arith.constant 0 : index
    %42 = vector.load %arg2[%c0_49, %c1_50, %c1_51, %c0_52] : memref<1x3x3x128xbf16, #tpu.memory_space<vmem>>, vector<1x1x2x128xbf16>
    %43 = vector.shape_cast %42 : vector<1x1x2x128xbf16> to vector<2x128xbf16>
    %c1024 = arith.constant 1024 : index
    %c0_53 = arith.constant 0 : index
    %44 = vector.load %arg6[%c1024, %c0_53] : memref<1152x128xbf16, #tpu.memory_space<vmem>>, vector<128x128xbf16>
    %cst_54 = arith.constant dense<0.000000e+00> : vector<2x128xf32>
    %45 = tpu.matmul %43, %44, %cst_54 {dimension_numbers = #tpu.dot_dimension_numbers<[1], [0], [0], [1], [0, 0, 1, 1], [], []>} : vector<2x128xbf16>, vector<128x128xbf16>, vector<2x128xf32> -> vector<2x128xf32>
    %46 = arith.addf %41, %45 : vector<2x128xf32>
    %47 = vector.broadcast %0 : vector<1x128xf32> to vector<2x128xf32>
    %48 = arith.addf %46, %47 : vector<2x128xf32>
    %cst_55 = arith.constant 0.000000e+00 : f32
    %49 = vector.broadcast %cst_55 : f32 to vector<2x128xf32>
    %50 = arith.cmpf oge, %48, %49 : vector<2x128xf32>
    %cst_56 = arith.constant 0.00999999977 : f32
    %51 = vector.broadcast %cst_56 : f32 to vector<2x128xf32>
    %52 = arith.mulf %51, %48 : vector<2x128xf32>
    %53 = arith.select %50, %48, %52 : vector<2x128xi1>, vector<2x128xf32>
    %54 = arith.truncf %53 : vector<2x128xf32> to vector<2x128xbf16>
    %c0_57 = arith.constant 0 : index
    %c0_58 = arith.constant 0 : index
    %c0_59 = arith.constant 0 : index
    %c0_60 = arith.constant 0 : index
    %55 = vector.load %arg8[%c0_57, %c0_58, %c0_59, %c0_60] : memref<1x2x2x128xbf16, #tpu.memory_space<vmem>>, vector<1x1x2x128xbf16>
    %56 = vector.shape_cast %55 : vector<1x1x2x128xbf16> to vector<2x128xbf16>
    %57 = vector.shape_cast %54 : vector<2x128xbf16> to vector<1x1x2x128xbf16>
    tpu.vector_store %arg8[%c0_57, %c0_58, %c0_59, %c0_60], %57 {strides = array<i32>} : memref<1x2x2x128xbf16, #tpu.memory_space<vmem>>, vector<1x1x2x128xbf16>,
    %cst_61 = arith.constant 0.000000e+00 : f32
    %58 = vector.broadcast %cst_61 : f32 to vector<2x128xf32>
    %c0_62 = arith.constant 0 : index
    %c1_63 = arith.constant 1 : index
    %c0_64 = arith.constant 0 : index
    %c0_65 = arith.constant 0 : index
    %59 = vector.load %arg2[%c0_62, %c1_63, %c0_64, %c0_65] : memref<1x3x3x128xbf16, #tpu.memory_space<vmem>>, vector<1x1x2x128xbf16>
    %60 = vector.shape_cast %59 : vector<1x1x2x128xbf16> to vector<2x128xbf16>
    %c0_66 = arith.constant 0 : index
    %c0_67 = arith.constant 0 : index
    %61 = vector.load %arg6[%c0_66, %c0_67] : memref<1152x128xbf16, #tpu.memory_space<vmem>>, vector<128x128xbf16>
    %cst_68 = arith.constant dense<0.000000e+00> : vector<2x128xf32>
    %62 = tpu.matmul %60, %61, %cst_68 {dimension_numbers = #tpu.dot_dimension_numbers<[1], [0], [0], [1], [0, 0, 1, 1], [], []>} : vector<2x128xbf16>, vector<128x128xbf16>, vector<2x128xf32> -> vector<2x128xf32>
    %63 = arith.addf %58, %62 : vector<2x128xf32>
    %c0_69 = arith.constant 0 : index
    %c1_70 = arith.constant 1 : index
    %c0_71 = arith.constant 0 : index
    %c0_72 = arith.constant 0 : index
    %64 = vector.load %arg3[%c0_69, %c1_70, %c0_71, %c0_72] : memref<1x3x3x128xbf16, #tpu.memory_space<vmem>>, vector<1x1x2x128xbf16>
    %65 = vector.shape_cast %64 : vector<1x1x2x128xbf16> to vector<2x128xbf16>
    %c128_73 = arith.constant 128 : index
    %c0_74 = arith.constant 0 : index
    %66 = vector.load %arg6[%c128_73, %c0_74] : memref<1152x128xbf16, #tpu.memory_space<vmem>>, vector<128x128xbf16>
    %cst_75 = arith.constant dense<0.000000e+00> : vector<2x128xf32>
    %67 = tpu.matmul %65, %66, %cst_75 {dimension_numbers = #tpu.dot_dimension_numbers<[1], [0], [0], [1], [0, 0, 1, 1], [], []>} : vector<2x128xbf16>, vector<128x128xbf16>, vector<2x128xf32> -> vector<2x128xf32>
    %68 = arith.addf %63, %67 : vector<2x128xf32>
    %c0_76 = arith.constant 0 : index
    %c1_77 = arith.constant 1 : index
    %c1_78 = arith.constant 1 : index
    %c0_79 = arith.constant 0 : index
    %69 = vector.load %arg2[%c0_76, %c1_77, %c1_78, %c0_79] : memref<1x3x3x128xbf16, #tpu.memory_space<vmem>>, vector<1x1x2x128xbf16>
    %70 = vector.shape_cast %69 : vector<1x1x2x128xbf16> to vector<2x128xbf16>
    %c256_80 = arith.constant 256 : index
    %c0_81 = arith.constant 0 : index
    %71 = vector.load %arg6[%c256_80, %c0_81] : memref<1152x128xbf16, #tpu.memory_space<vmem>>, vector<128x128xbf16>
    %cst_82 = arith.constant dense<0.000000e+00> : vector<2x128xf32>
    %72 = tpu.matmul %70, %71, %cst_82 {dimension_numbers = #tpu.dot_dimension_numbers<[1], [0], [0], [1], [0, 0, 1, 1], [], []>} : vector<2x128xbf16>, vector<128x128xbf16>, vector<2x128xf32> -> vector<2x128xf32>
    %73 = arith.addf %68, %72 : vector<2x128xf32>
    %c0_83 = arith.constant 0 : index
    %c1_84 = arith.constant 1 : index
    %c0_85 = arith.constant 0 : index
    %c0_86 = arith.constant 0 : index
    %74 = vector.load %arg4[%c0_83, %c1_84, %c0_85, %c0_86] : memref<1x3x3x128xbf16, #tpu.memory_space<vmem>>, vector<1x1x2x128xbf16>
    %75 = vector.shape_cast %74 : vector<1x1x2x128xbf16> to vector<2x128xbf16>
    %c384_87 = arith.constant 384 : index
    %c0_88 = arith.constant 0 : index
    %76 = vector.load %arg6[%c384_87, %c0_88] : memref<1152x128xbf16, #tpu.memory_space<vmem>>, vector<128x128xbf16>
    %cst_89 = arith.constant dense<0.000000e+00> : vector<2x128xf32>
    %77 = tpu.matmul %75, %76, %cst_89 {dimension_numbers = #tpu.dot_dimension_numbers<[1], [0], [0], [1], [0, 0, 1, 1], [], []>} : vector<2x128xbf16>, vector<128x128xbf16>, vector<2x128xf32> -> vector<2x128xf32>
    %78 = arith.addf %73, %77 : vector<2x128xf32>
    %c0_90 = arith.constant 0 : index
    %c1_91 = arith.constant 1 : index
    %c0_92 = arith.constant 0 : index
    %c0_93 = arith.constant 0 : index
    %79 = vector.load %arg5[%c0_90, %c1_91, %c0_92, %c0_93] : memref<1x3x3x128xbf16, #tpu.memory_space<vmem>>, vector<1x1x2x128xbf16>
    %80 = vector.shape_cast %79 : vector<1x1x2x128xbf16> to vector<2x128xbf16>
    %c512_94 = arith.constant 512 : index
    %c0_95 = arith.constant 0 : index
    %81 = vector.load %arg6[%c512_94, %c0_95] : memref<1152x128xbf16, #tpu.memory_space<vmem>>, vector<128x128xbf16>
    %cst_96 = arith.constant dense<0.000000e+00> : vector<2x128xf32>
    %82 = tpu.matmul %80, %81, %cst_96 {dimension_numbers = #tpu.dot_dimension_numbers<[1], [0], [0], [1], [0, 0, 1, 1], [], []>} : vector<2x128xbf16>, vector<128x128xbf16>, vector<2x128xf32> -> vector<2x128xf32>
    %83 = arith.addf %78, %82 : vector<2x128xf32>
    %c0_97 = arith.constant 0 : index
    %c1_98 = arith.constant 1 : index
    %c1_99 = arith.constant 1 : index
    %c0_100 = arith.constant 0 : index
    %84 = vector.load %arg4[%c0_97, %c1_98, %c1_99, %c0_100] : memref<1x3x3x128xbf16, #tpu.memory_space<vmem>>, vector<1x1x2x128xbf16>
    %85 = vector.shape_cast %84 : vector<1x1x2x128xbf16> to vector<2x128xbf16>
    %c640_101 = arith.constant 640 : index
    %c0_102 = arith.constant 0 : index
    %86 = vector.load %arg6[%c640_101, %c0_102] : memref<1152x128xbf16, #tpu.memory_space<vmem>>, vector<128x128xbf16>
    %cst_103 = arith.constant dense<0.000000e+00> : vector<2x128xf32>
    %87 = tpu.matmul %85, %86, %cst_103 {dimension_numbers = #tpu.dot_dimension_numbers<[1], [0], [0], [1], [0, 0, 1, 1], [], []>} : vector<2x128xbf16>, vector<128x128xbf16>, vector<2x128xf32> -> vector<2x128xf32>
    %88 = arith.addf %83, %87 : vector<2x128xf32>
    %c0_104 = arith.constant 0 : index
    %c2 = arith.constant 2 : index
    %c0_105 = arith.constant 0 : index
    %c0_106 = arith.constant 0 : index
    %89 = vector.load %arg2[%c0_104, %c2, %c0_105, %c0_106] : memref<1x3x3x128xbf16, #tpu.memory_space<vmem>>, vector<1x1x2x128xbf16>
    %90 = vector.shape_cast %89 : vector<1x1x2x128xbf16> to vector<2x128xbf16>
    %c768_107 = arith.constant 768 : index
    %c0_108 = arith.constant 0 : index
    %91 = vector.load %arg6[%c768_107, %c0_108] : memref<1152x128xbf16, #tpu.memory_space<vmem>>, vector<128x128xbf16>
    %cst_109 = arith.constant dense<0.000000e+00> : vector<2x128xf32>
    %92 = tpu.matmul %90, %91, %cst_109 {dimension_numbers = #tpu.dot_dimension_numbers<[1], [0], [0], [1], [0, 0, 1, 1], [], []>} : vector<2x128xbf16>, vector<128x128xbf16>, vector<2x128xf32> -> vector<2x128xf32>
    %93 = arith.addf %88, %92 : vector<2x128xf32>
    %c0_110 = arith.constant 0 : index
    %c2_111 = arith.constant 2 : index
    %c0_112 = arith.constant 0 : index
    %c0_113 = arith.constant 0 : index
    %94 = vector.load %arg3[%c0_110, %c2_111, %c0_112, %c0_113] : memref<1x3x3x128xbf16, #tpu.memory_space<vmem>>, vector<1x1x2x128xbf16>
    %95 = vector.shape_cast %94 : vector<1x1x2x128xbf16> to vector<2x128xbf16>
    %c896_114 = arith.constant 896 : index
    %c0_115 = arith.constant 0 : index
    %96 = vector.load %arg6[%c896_114, %c0_115] : memref<1152x128xbf16, #tpu.memory_space<vmem>>, vector<128x128xbf16>
    %cst_116 = arith.constant dense<0.000000e+00> : vector<2x128xf32>
    %97 = tpu.matmul %95, %96, %cst_116 {dimension_numbers = #tpu.dot_dimension_numbers<[1], [0], [0], [1], [0, 0, 1, 1], [], []>} : vector<2x128xbf16>, vector<128x128xbf16>, vector<2x128xf32> -> vector<2x128xf32>
    %98 = arith.addf %93, %97 : vector<2x128xf32>
    %c0_117 = arith.constant 0 : index
    %c2_118 = arith.constant 2 : index
    %c1_119 = arith.constant 1 : index
    %c0_120 = arith.constant 0 : index
    %99 = vector.load %arg2[%c0_117, %c2_118, %c1_119, %c0_120] : memref<1x3x3x128xbf16, #tpu.memory_space<vmem>>, vector<1x1x2x128xbf16>
    %100 = vector.shape_cast %99 : vector<1x1x2x128xbf16> to vector<2x128xbf16>
    %c1024_121 = arith.constant 1024 : index
    %c0_122 = arith.constant 0 : index
    %101 = vector.load %arg6[%c1024_121, %c0_122] : memref<1152x128xbf16, #tpu.memory_space<vmem>>, vector<128x128xbf16>
    %cst_123 = arith.constant dense<0.000000e+00> : vector<2x128xf32>
    %102 = tpu.matmul %100, %101, %cst_123 {dimension_numbers = #tpu.dot_dimension_numbers<[1], [0], [0], [1], [0, 0, 1, 1], [], []>} : vector<2x128xbf16>, vector<128x128xbf16>, vector<2x128xf32> -> vector<2x128xf32>
    %103 = arith.addf %98, %102 : vector<2x128xf32>
    %104 = vector.broadcast %0 : vector<1x128xf32> to vector<2x128xf32>
    %105 = arith.addf %103, %104 : vector<2x128xf32>
    %cst_124 = arith.constant 0.000000e+00 : f32
    %106 = vector.broadcast %cst_124 : f32 to vector<2x128xf32>
    %107 = arith.cmpf oge, %105, %106 : vector<2x128xf32>
    %cst_125 = arith.constant 0.00999999977 : f32
    %108 = vector.broadcast %cst_125 : f32 to vector<2x128xf32>
    %109 = arith.mulf %108, %105 : vector<2x128xf32>
    %110 = arith.select %107, %105, %109 : vector<2x128xi1>, vector<2x128xf32>
    %111 = arith.truncf %110 : vector<2x128xf32> to vector<2x128xbf16>
    %c0_126 = arith.constant 0 : index
    %c1_127 = arith.constant 1 : index
    %c0_128 = arith.constant 0 : index
    %c0_129 = arith.constant 0 : index
    %112 = vector.load %arg8[%c0_126, %c1_127, %c0_128, %c0_129] : memref<1x2x2x128xbf16, #tpu.memory_space<vmem>>, vector<1x1x2x128xbf16>
    %113 = vector.shape_cast %112 : vector<1x1x2x128xbf16> to vector<2x128xbf16>
    %114 = vector.shape_cast %111 : vector<2x128xbf16> to vector<1x1x2x128xbf16>
    tpu.vector_store %arg8[%c0_126, %c1_127, %c0_128, %c0_129], %114 {strides = array<i32>} : memref<1x2x2x128xbf16, #tpu.memory_space<vmem>>, vector<1x1x2x128xbf16>,
    return
  }
  func.func @transform_0(%arg0: i32, %arg1: i32) -> (i32, i32, i32, i32) {
    %c0_i32 = arith.constant 0 : i32
    %c0_i32_0 = arith.constant 0 : i32
    %c0_i32_1 = arith.constant 0 : i32
    %c0_i32_2 = arith.constant 0 : i32
    return %arg1, %c0_i32, %c0_i32_0, %c0_i32_1 : i32, i32, i32, i32
  }
  func.func @transform_1(%arg0: i32, %arg1: i32) -> (i32, i32, i32, i32) {
    %c0_i32 = arith.constant 0 : i32
    %c0_i32_0 = arith.constant 0 : i32
    %c0_i32_1 = arith.constant 0 : i32
    %c0_i32_2 = arith.constant 0 : i32
    return %arg1, %c0_i32, %c0_i32_0, %c0_i32_1 : i32, i32, i32, i32
  }
  func.func @transform_2(%arg0: i32, %arg1: i32) -> (i32, i32, i32, i32) {
    %c0_i32 = arith.constant 0 : i32
    %c0_i32_0 = arith.constant 0 : i32
    %c0_i32_1 = arith.constant 0 : i32
    %c0_i32_2 = arith.constant 0 : i32
    return %arg1, %c0_i32, %c0_i32_0, %c0_i32_1 : i32, i32, i32, i32
  }
  func.func @transform_3(%arg0: i32, %arg1: i32) -> (i32, i32, i32, i32) {
    %c0_i32 = arith.constant 0 : i32
    %c0_i32_0 = arith.constant 0 : i32
    %c0_i32_1 = arith.constant 0 : i32
    %c0_i32_2 = arith.constant 0 : i32
    return %arg1, %c0_i32, %c0_i32_0, %c0_i32_1 : i32, i32, i32, i32
  }
  func.func @transform_4(%arg0: i32, %arg1: i32) -> (i32, i32) {
    %c0_i32 = arith.constant 0 : i32
    %c0_i32_0 = arith.constant 0 : i32
    return %c0_i32, %arg0 : i32, i32
  }
  func.func @transform_5(%arg0: i32, %arg1: i32) -> (i32, i32) {
    %c0_i32 = arith.constant 0 : i32
    %c0_i32_0 = arith.constant 0 : i32
    return %c0_i32, %arg0 : i32, i32
  }
  func.func @transform_6(%arg0: i32, %arg1: i32) -> (i32, i32, i32, i32) {
    %c0_i32 = arith.constant 0 : i32
    %c0_i32_0 = arith.constant 0 : i32
    %c0_i32_1 = arith.constant 0 : i32
    return %arg1, %c0_i32, %c0_i32_0, %arg0 : i32, i32, i32, i32
  }
}

module attributes {stable_mosaic.version = 11 : i64} {
  func.func @_tail_kernel(%arg0: i32, %arg1: memref<2x512xbf16, #tpu.memory_space<vmem>>, %arg2: memref<512x128xbf16, #tpu.memory_space<vmem>>, %arg3: memref<1x128xf32, #tpu.memory_space<vmem>>, %arg4: memref<128x128xbf16, #tpu.memory_space<vmem>>, %arg5: memref<1x128xf32, #tpu.memory_space<vmem>>, %arg6: memref<2x128xf32, #tpu.memory_space<vmem>>) attributes {dimension_semantics = [#tpu.dimension_semantics<arbitrary>], iteration_bounds = array<i64: 1>, scalar_prefetch = 0 : i64, scratch_operands = 0 : i64, tpu.core_type = #tpu.core_type<tc>, window_params = [{pipeline_mode = #tpu.pipeline_mode<synchronous>, transform_indices = @transform_0, window_bounds = array<i64: 2, 512>}, {pipeline_mode = #tpu.pipeline_mode<synchronous>, transform_indices = @transform_1, window_bounds = array<i64: 512, 128>}, {pipeline_mode = #tpu.pipeline_mode<synchronous>, transform_indices = @transform_2, window_bounds = array<i64: 1, 128>}, {pipeline_mode = #tpu.pipeline_mode<synchronous>, transform_indices = @transform_3, window_bounds = array<i64: 128, 128>}, {pipeline_mode = #tpu.pipeline_mode<synchronous>, transform_indices = @transform_4, window_bounds = array<i64: 1, 128>}, {pipeline_mode = #tpu.pipeline_mode<synchronous>, transform_indices = @transform_5, window_bounds = array<i64: 2, 128>}]} {
    %c0 = arith.constant 0 : index
    %c0_0 = arith.constant 0 : index
    %0 = vector.load %arg1[%c0, %c0_0] : memref<2x512xbf16, #tpu.memory_space<vmem>>, vector<2x512xbf16>
    %c0_1 = arith.constant 0 : index
    %c0_2 = arith.constant 0 : index
    %1 = vector.load %arg2[%c0_1, %c0_2] : memref<512x128xbf16, #tpu.memory_space<vmem>>, vector<512x128xbf16>
    %cst = arith.constant dense<0.000000e+00> : vector<2x128xf32>
    %2 = tpu.matmul %0, %1, %cst {dimension_numbers = #tpu.dot_dimension_numbers<[1], [0], [0], [1], [0, 0, 1, 1], [], []>} : vector<2x512xbf16>, vector<512x128xbf16>, vector<2x128xf32> -> vector<2x128xf32>
    %c0_3 = arith.constant 0 : index
    %c0_4 = arith.constant 0 : index
    %3 = vector.load %arg3[%c0_3, %c0_4] : memref<1x128xf32, #tpu.memory_space<vmem>>, vector<1x128xf32>
    %4 = vector.broadcast %3 : vector<1x128xf32> to vector<2x128xf32>
    %5 = arith.addf %2, %4 : vector<2x128xf32>
    %cst_5 = arith.constant 0.000000e+00 : f32
    %6 = vector.broadcast %cst_5 : f32 to vector<2x128xf32>
    %7 = arith.cmpf oge, %5, %6 : vector<2x128xf32>
    %cst_6 = arith.constant 0.00999999977 : f32
    %8 = vector.broadcast %cst_6 : f32 to vector<2x128xf32>
    %9 = arith.mulf %8, %5 : vector<2x128xf32>
    %10 = arith.select %7, %5, %9 : vector<2x128xi1>, vector<2x128xf32>
    %11 = arith.truncf %10 : vector<2x128xf32> to vector<2x128xbf16>
    %c0_7 = arith.constant 0 : index
    %c0_8 = arith.constant 0 : index
    %12 = vector.load %arg4[%c0_7, %c0_8] : memref<128x128xbf16, #tpu.memory_space<vmem>>, vector<128x128xbf16>
    %cst_9 = arith.constant dense<0.000000e+00> : vector<2x128xf32>
    %13 = tpu.matmul %11, %12, %cst_9 {dimension_numbers = #tpu.dot_dimension_numbers<[1], [0], [0], [1], [0, 0, 1, 1], [], []>} : vector<2x128xbf16>, vector<128x128xbf16>, vector<2x128xf32> -> vector<2x128xf32>
    %c0_10 = arith.constant 0 : index
    %c0_11 = arith.constant 0 : index
    %14 = vector.load %arg5[%c0_10, %c0_11] : memref<1x128xf32, #tpu.memory_space<vmem>>, vector<1x128xf32>
    %15 = vector.broadcast %14 : vector<1x128xf32> to vector<2x128xf32>
    %16 = arith.addf %13, %15 : vector<2x128xf32>
    %c0_12 = arith.constant 0 : index
    %c0_13 = arith.constant 0 : index
    %17 = vector.load %arg6[%c0_12, %c0_13] : memref<2x128xf32, #tpu.memory_space<vmem>>, vector<2x128xf32>
    tpu.vector_store %arg6[%c0_12, %c0_13], %16 {strides = array<i32>} : memref<2x128xf32, #tpu.memory_space<vmem>>, vector<2x128xf32>,
    return
  }
  func.func @transform_0(%arg0: i32) -> (i32, i32) {
    %c0_i32 = arith.constant 0 : i32
    %c0_i32_0 = arith.constant 0 : i32
    %c0_i32_1 = arith.constant 0 : i32
    return %c0_i32, %c0_i32_0 : i32, i32
  }
  func.func @transform_1(%arg0: i32) -> (i32, i32) {
    %c0_i32 = arith.constant 0 : i32
    %c0_i32_0 = arith.constant 0 : i32
    %c0_i32_1 = arith.constant 0 : i32
    return %c0_i32, %c0_i32_0 : i32, i32
  }
  func.func @transform_2(%arg0: i32) -> (i32, i32) {
    %c0_i32 = arith.constant 0 : i32
    %c0_i32_0 = arith.constant 0 : i32
    %c0_i32_1 = arith.constant 0 : i32
    return %c0_i32, %c0_i32_0 : i32, i32
  }
  func.func @transform_3(%arg0: i32) -> (i32, i32) {
    %c0_i32 = arith.constant 0 : i32
    %c0_i32_0 = arith.constant 0 : i32
    %c0_i32_1 = arith.constant 0 : i32
    return %c0_i32, %c0_i32_0 : i32, i32
  }
  func.func @transform_4(%arg0: i32) -> (i32, i32) {
    %c0_i32 = arith.constant 0 : i32
    %c0_i32_0 = arith.constant 0 : i32
    %c0_i32_1 = arith.constant 0 : i32
    return %c0_i32, %c0_i32_0 : i32, i32
  }
  func.func @transform_5(%arg0: i32) -> (i32, i32) {
    %c0_i32 = arith.constant 0 : i32
    %c0_i32_0 = arith.constant 0 : i32
    %c0_i32_1 = arith.constant 0 : i32
    return %c0_i32, %c0_i32_0 : i32, i32
  }
}

</mosaic_0001>

<bundles_post_ra>
// kernel: gradual_style_block_forward.7
= control target key start
LH: loop header
LB: loop body
LE: loop exit
PB: predicated region body
PF: predicated region fallthrough
CT: control target
= control target key end

     0   :  { %v106_v30 = vlaneseq  ;;  %v709_v34 = vmov 1966171168   ;;  %v710_v37 = vmov 0.0   ;;  %s884_s0 = inlined_call_operand.vmem [shape: bf16[2,512], index: 0, kind: input, shape index: {}]   ;;  %s885_s1 = inlined_call_operand.vmem [shape: bf16[512,128], index: 1, kind: input, shape index: {}]   ;;  %s886_s2 = inlined_call_operand.vmem [shape: f32[1,128], index: 2, kind: input, shape index: {}]   ;;  %s887_s3 = inlined_call_operand.vmem [shape: bf16[128,128], index: 3, kind: input, shape index: {}]   ;;  %s888_s4 = inlined_call_operand.vmem [shape: f32[1,128], index: 4, kind: input, shape index: {}]   ;;  %s889_s5 = inlined_call_operand.hbm [shape: f32[2,128], index: 5, kind: output, shape index: {}]  }
   0x1   :  { %v645_v0 = vld [vmem:[%s885_s1 + $0x40] sm:$0xff]   ;;  %v649_v4 = vld [vmem:[%s885_s1 + $0x48] sm:$0xff]   ;;  %v653_v8 = vld [vmem:[%s885_s1 + $0x50] sm:$0xff]   ;;  %v104_v35 = vunpack.c.l.s4 %v709_v34 }
   0x2   :  { %v646_v1 = vld [vmem:[%s885_s1 + $0xc0] sm:$0xff]   ;;  %568 = vmatprep.subr.bf16.mxu0 %v645_v0  ;;  %v650_v5 = vld [vmem:[%s885_s1 + $0xc8] sm:$0xff]   ;;  %v654_v9 = vld [vmem:[%s885_s1 + $0xd0] sm:$0xff]   ;;  %v107_v36 = vshrl.u32 %v106_v30, 7 }
   0x3   :  { %v647_v2 = vld [vmem:[%s885_s1] sm:$0xff]   ;;  %590 = vmatprep.subr.bf16.mxu1 %v646_v1  ;;  %v651_v6 = vld [vmem:[%s885_s1 + $0x8] sm:$0xff]   ;;  %v655_v10 = vld [vmem:[%s885_s1 + $0x10] sm:$0xff]   ;;  %v105_v39 = vunpack.c.0.s8 %v104_v35 }
   0x4   :  { %v648_v3 = vld [vmem:[%s885_s1 + $0x80] sm:$0xff]   ;;  %569 = vmatpush3.bf16.msra.mxu0 %v647_v2  ;;  %v652_v7 = vld [vmem:[%s885_s1 + $0x88] sm:$0xff]   ;;  %v656_v11 = vld [vmem:[%s885_s1 + $0x90] sm:$0xff]  }
   0x5   :  { %591 = vmatpush3.bf16.msra.mxu1 %v648_v3  ;;  %570 = vmatprep.subr.bf16.mxu0 %v649_v4  ;;  %v657_v12 = vld [vmem:[%s885_s1 + $0x58] sm:$0xff]   ;;  %v661_v16 = vld [vmem:[%s885_s1 + $0x60] sm:$0xff]   ;;  %v665_v20 = vld [vmem:[%s885_s1 + $0x68] sm:$0xff]   ;;  %v108_v40 = vsub.s32 %v105_v39, %v107_v36 }
   0x6   :  { %592 = vmatprep.subr.bf16.mxu1 %v650_v5  ;;  %v658_v13 = vld [vmem:[%s885_s1 + $0xd8] sm:$0xff]   ;;  %v662_v17 = vld [vmem:[%s885_s1 + $0xe0] sm:$0xff]   ;;  %v666_v21 = vld [vmem:[%s885_s1 + $0xe8] sm:$0xff]  }
   0x7   :  { %v659_v14 = vld [vmem:[%s885_s1 + $0x18] sm:$0xff]   ;;  %v663_v18 = vld [vmem:[%s885_s1 + $0x20] sm:$0xff]   ;;  %v667_v22 = vld [vmem:[%s885_s1 + $0x28] sm:$0xff]  }
   0x8   :  { %571 = vmatpush3.bf16.msra.mxu0 %v651_v6  ;;  %v660_v15 = vld [vmem:[%s885_s1 + $0x98] sm:$0xff]   ;;  %v664_v19 = vld [vmem:[%s885_s1 + $0xa0] sm:$0xff]   ;;  %v668_v23 = vld [vmem:[%s885_s1 + $0xa8] sm:$0xff]  }
   0x9   :  { %593 = vmatpush3.bf16.msra.mxu1 %v652_v7  ;;  %572 = vmatprep.subr.bf16.mxu0 %v653_v8  ;;  %v669_v24 = vld [vmem:[%s885_s1 + $0x70] sm:$0xff]   ;;  %v673_v28 = vld [vmem:[%s885_s1 + $0x78] sm:$0xff]   ;;  %v526_v33 = vld.sshfl [vmem:[%s884_s0] sm:$0x33 pattern:$0x75316420] }
   0xa   :  { %594 = vmatprep.subr.bf16.mxu1 %v654_v9  ;;  %v670_v25 = vld [vmem:[%s885_s1 + $0xf0] sm:$0xff]   ;;  %v674_v29 = vld [vmem:[%s885_s1 + $0xf8] sm:$0xff]   ;;  %v102_v38 = vcombine.high %v526_v33, %v526_v33  ;;  %v677_v41 = vld [vmem:[%s887_s3] sm:$0xff]   ;;  %v109_v43 = vrot.slane %v526_v33, %v108_v40 }
   0xb   :  { %v671_v26 = vld [vmem:[%s885_s1 + $0x30] sm:$0xff]   ;;  %v675_v31 = vld [vmem:[%s885_s1 + $0x38] sm:$0xff]  }
   0xc   :  { %573 = vmatpush3.bf16.msra.mxu0 %v655_v10  ;;  %v672_v27 = vld [vmem:[%s885_s1 + $0xb0] sm:$0xff]   ;;  %v676_v32 = vld [vmem:[%s885_s1 + $0xb8] sm:$0xff]   ;;  %v116_v42 = vrot.slane %v102_v38, %v108_v40 }
   0xd   :  { %595 = vmatpush3.bf16.msra.mxu1 %v656_v11  ;;  %574 = vmatprep.subr.bf16.mxu0 %v657_v12 }
   0xe   :  { %596 = vmatprep.subr.bf16.mxu1 %v658_v13 }
  0x10   :  { %575 = vmatpush3.bf16.msra.mxu0 %v659_v14 }
  0x11   :  { %597 = vmatpush3.bf16.msra.mxu1 %v660_v15  ;;  %576 = vmatprep.subr.bf16.mxu0 %v661_v16 }
  0x12   :  { %598 = vmatprep.subr.bf16.mxu1 %v662_v17 }
  0x14   :  { %577 = vmatpush3.bf16.msra.mxu0 %v663_v18 }
  0x15   :  { %599 = vmatpush3.bf16.msra.mxu1 %v664_v19  ;;  %578 = vmatprep.subr.bf16.mxu0 %v665_v20 }
  0x16   :  { %600 = vmatprep.subr.bf16.mxu1 %v666_v21 }
  0x18   :  { %579 = vmatpush3.bf16.msra.mxu0 %v667_v22 }
  0x19   :  { %601 = vmatpush3.bf16.msra.mxu1 %v668_v23  ;;  %580 = vmatprep.subr.bf16.mxu0 %v669_v24 }
  0x1a   :  { %602 = vmatprep.subr.bf16.mxu1 %v670_v25 }
  0x1c   :  { %581 = vmatpush3.bf16.msra.mxu0 %v671_v26 }
  0x1d   :  { %603 = vmatpush3.bf16.msra.mxu1 %v672_v27  ;;  %582 = vmatprep.subr.bf16.mxu0 %v673_v28 }
  0x1e   :  { %604 = vmatprep.subr.bf16.mxu1 %v674_v29 }
  0x20   :  { %583 = vmatpush3.bf16.msra.mxu0 %v675_v31 }
  0x21   :  { %605 = vmatpush3.bf16.msra.mxu1 %v676_v32  ;;  %621 = vmatprep.subr.bf16.mxu0 %v710_v37 }
  0x22   :  { %10 = vsyncpa [#allocation3], 0  ;;  %347 = vmatprep.mubr.bf16.mxu0 %v116_v42  ;;  %v118_v44 = vcombine.high %v116_v42, %v116_v42  ;;  %v117_v45 = vcombine.high %v109_v43, %v109_v43  ;;  %v678_v46 = vld [vmem:[%s887_s3 + $0x8] sm:$0xff]   ;;  %v679_v47 = vld [vmem:[%s887_s3 + $0x10] sm:$0xff]   ;;  %vm711_vm0 = vmmov 0  }
  0x23   :  { %348 = vmatmul.mubr.bf16.vlgmr.msra.gmra.mrb[0].mxu0 %v109_v43  ;;  %v680_v48 = vld [vmem:[%s887_s3 + $0x18] sm:$0xff]   ;;  %v681_v49 = vld [vmem:[%s887_s3 + $0x20] sm:$0xff]   ;;  %v682_v50 = vld [vmem:[%s887_s3 + $0x28] sm:$0xff]  }
  0x24   :  { %387 = vmatprep.mubr.bf16.mxu1 %v118_v44  ;;  %622 = vmatpush3.bf16.msra.mxu0 %v677_v41  ;;  %v683_v51 = vld [vmem:[%s887_s3 + $0x30] sm:$0xff]   ;;  %v684_v52 = vld [vmem:[%s887_s3 + $0x38] sm:$0xff]   ;;  %v525_v54 = vld [vmem:[%s886_s2] ss:$0 sm:$0xff]  ;;  %s712_s2 = smov [#allocation2]  }
  0x25   :  { %388 = vmatmul.mubr.bf16.vlgmr.msra.gmra.mrb[0].mxu1 %v117_v45  ;;  %623 = vmatprep.subr.bf16.mxu0 %v710_v37  ;;  %v559_v5 = vld [vmem:[%s888_s4] ss:$0 sm:$0xff]  ;;  %s517_s26 = sshll.u32 %s712_s2, 4  ;;  %s518_s26 = int_to_ptr.vmem [resolvable:$true] %s517_s26 }
  0x26   :  { %637 = vmatprep.mubr.msk.bf16.mxu0 %vm711_vm0, %v710_v37  ;;  %s685_s27 = scalar_lea.vmem %s518_s26, 32  ;;  %p690_p1 = scmp.lt.s32.totalorder %s518_s26, %s518_s26 }
  0x27   :  { %p686_p0 = scmp.ne.s32.totalorder %s518_s26, %s685_s27  ;;  %p691_p2 = scmp.lt.s32.totalorder %s685_s27, %s685_s27 }
  0x28   :  { %624 = vmatpush3.bf16.msra.mxu0 %v678_v46 }
  0x29   :  { %625 = vmatprep.subr.bf16.mxu0 %v710_v37  ;;  %p692_p3 = por %p691_p2, %p690_p1 }
  0x2b   :  { %p693_p4 = pnand %p692_p3, %p686_p0 }
  0x2c   :  { %626 = vmatpush3.bf16.msra.mxu0 %v679_v47 }
  0x2d   :  { %627 = vmatprep.subr.bf16.mxu0 %v710_v37 }
  0x30   :  { %628 = vmatpush3.bf16.msra.mxu0 %v680_v48 }
  0x31   :  { %629 = vmatprep.subr.bf16.mxu0 %v710_v37 }
  0x34   :  { %630 = vmatpush3.bf16.msra.mxu0 %v681_v49 }
  0x35   :  { %631 = vmatprep.subr.bf16.mxu0 %v710_v37 }
  0x38   :  { %632 = vmatpush3.bf16.msra.mxu0 %v682_v50 }
  0x39   :  { %633 = vmatprep.subr.bf16.mxu0 %v710_v37 }
  0x3c   :  { %634 = vmatpush3.bf16.msra.mxu0 %v683_v51 }
  0x3d   :  { %635 = vmatprep.subr.bf16.mxu0 %v710_v37 }
  0x40   :  { %636 = vmatpush3.bf16.msra.mxu0 %v684_v52 }
  0xf6   :  { %v584_v53 = vpop.f32.mrb[0].mxu0 }
  0xf7   :  { %v585_v55 = vpop.f32.mrb[1].mxu0 }
  0xf8   :  { %v606_v56 = vpop.f32.mrb[0].mxu1  ;;  %v586_v57 = vadd.f32 %v585_v55, %v584_v53  ;;  %v587_v58 = vpop.f32.mrb[2].mxu0 }
  0xf9   :  { %v607_v59 = vpop.f32.mrb[1].mxu1  ;;  %v588_v60 = vpop.f32.mrb[3].mxu0 }
  0xfa   :  { %v350_v61 = vadd.f32 %v586_v57, %v525_v54  ;;  %v608_v62 = vadd.f32 %v607_v59, %v606_v56  ;;  %v609_v63 = vpop.f32.mrb[2].mxu1 }
  0xfb   :  { %v610_v0 = vpop.f32.mrb[3].mxu1 }
  0xfc   :  { %v390_v1 = vadd.f32 %v608_v62, %v350_v61 }
  0xfe   :  { %vm395_vm1 = vcmp.ge.f32.partialorder %v390_v1, 0.0  ;;  %v396_v2 = vmul.f32 0.01, %v390_v1 }
 0x100   :  { %v397_v3 = vsel %vm395_vm1, %v390_v1, %v396_v2 }
 0x101   :  { %v398_v4 = vpack.c.bf16 %v397_v3, %v397_v3 }
 0x103   :  { %638 = vmatmul.mubr.bf16.vlgmr.msra.gmra.mrb[4].mxu0 %v398_v4 }
 0x1d6   :  { %v504_v6 = vpop.f32.mrb[4].mxu0 }
 0x1d7   :  { %v505_v7 = vadd.f32 %v559_v5, %v504_v6  ;;  %v639_v8 = vpop.f32.mrb[5].mxu0 }
 0x1d8   :  { %v507_v9 = vpop.f32.mrb[6].mxu0 }
 0x1d9   :  { %510 = vst [vmem:[#allocation2] sm:$0x3] %v505_v7  ;;  %v640_v10 = vpop.f32.mrb[7].mxu0 }
 0x1da   :  { %696 = shalt.err (!%p693_p4)
}
 0x1db   :  { %s697_s4 = scalar_lea.hbm %s889_s5, 32 }
 0x1dc   :  { %p698_p5 = scmp.ne.s32.totalorder %s889_s5, %s697_s4  ;;  %p701_p6 = scmp.lt.u32.totalorder %s697_s4, %s889_s5 }
 0x1de   :  { %p703_p7 = pnand %p701_p6, %p698_p5 }
 0x1e0   :  { %706 = shalt.err (!%p703_p7)
}
 0x1e1   :  { %520 = dma.vmem_to_hbm [thread:$0]  %s518_s26, 32, %s889_s5, [#allocation3]  }
 0x1e2   :  { %707 = dma.done.wait [#allocation3], 32  }
 0x1e3   :  { %708 = vsyncadd [#allocation3], 4294967264 }
 0x1e4   :  { %524 = vsyncpa [#allocation3], 1 }

// kernel: gradual_style_block_forward.6
= control target key start
LH: loop header
LB: loop body
LE: loop exit
PB: predicated region body
PF: predicated region fallthrough
CT: control target
= control target key end

     0   :  { %s3455_s21 = smov 0   ;;  %s3457_s22 = smov 0   ;;  %s4158_s0 = inlined_call_operand.vmem [shape: bf16[2,3,3,128], index: 0, kind: input, shape index: {}]   ;;  %s4159_s1 = inlined_call_operand.vmem [shape: bf16[2,3,3,128], index: 1, kind: input, shape index: {}]   ;;  %s4160_s2 = inlined_call_operand.vmem [shape: bf16[2,3,3,128], index: 2, kind: input, shape index: {}]   ;;  %s4161_s3 = inlined_call_operand.vmem [shape: bf16[2,3,3,128], index: 3, kind: input, shape index: {}]   ;;  %s4162_s4 = inlined_call_operand.vmem [shape: bf16[1152,128], index: 4, kind: input, shape index: {}]   ;;  %s4163_s5 = inlined_call_operand.vmem [shape: f32[1,128], index: 5, kind: input, shape index: {}]   ;;  %s4164_s6 = inlined_call_operand.vmem [shape: bf16[2,2,2,128], index: 6, kind: output, shape index: {}]  }
   0x1   :  { %s3459_s23 = smov 0  }
   0x2 LB: > { %s25_s24 = sadd.s32 1, %s3412_s22  ;;  %p2529_p0 = scmp.ge.s32.totalorder %s3416_s23, 1  ;;  %s3416_s23 = sphi %s3459_s23, %s16_s23   ;;  %s3412_s22 = sphi %s3457_s22, %s4166_s22   ;;  %s3408_s21 = sphi %s3455_s21, %s4165_s21  }
   0x3   : > { %p26_p1 = scmp.ge.s32.totalorder %s25_s24, 2  ;;  %p273_p2 = scmp.lt.s32.totalorder %s3416_s23, 3 }
   0x5   : > { %s4168_s24 = smov (%p26_p1, %s25_s24), 0  ;;  %p274_p3 = pnand %p2529_p0, %p273_p2 }
   0x6   : > { %v3250_v0 = vld [vmem:[%s4162_s4 + $0x40] sm:$0xff] (!%p274_p3)   ;;  %v3418_v1 = vmov (!%p274_p3), 0.0   ;;  %v3252_v3 = vld [vmem:[%s4162_s4 + $0x48] sm:$0xff] (!%p274_p3)   ;;  %vm3419_vm0 = vmmov (!%p274_p3), 0   ;;  %v3254_v5 = vld [vmem:[%s4162_s4 + $0x50] sm:$0xff] (!%p274_p3)   ;;  %p327_p4 = scmp.lt.s32.totalorder (!%p274_p3), %s3408_s21, 1 }
   0x7   : > { %277 = sbr.rel (%p274_p3) target bundleno = 519 (0x207), region = 44  ;;  %2863 = vmatprep.subr.bf16.mxu0 (!%p274_p3), %v3418_v1  ;;  %2883 = vmatprep.subr.bf16.mxu1 (!%p274_p3), %v3418_v1  ;;  %v3251_v2 = vld [vmem:[%s4162_s4] sm:$0xff] (!%p274_p3)   ;;  %v3253_v4 = vld [vmem:[%s4162_s4 + $0x8] sm:$0xff] (!%p274_p3)   ;;  %v3255_v6 = vld [vmem:[%s4162_s4 + $0x10] sm:$0xff] (!%p274_p3)  }
   0x8   : > { %2864 = vmatpush3.bf16.msra.mxu0 (!%p274_p3), %v3250_v0  ;;  %2879 = vmatprep.mubr.msk.bf16.mxu0 (!%p274_p3), %vm3419_vm0, %v3418_v1  ;;  %v3256_v7 = vld [vmem:[%s4162_s4 + $0x58] sm:$0xff] (!%p274_p3)   ;;  %v3258_v9 = vld [vmem:[%s4162_s4 + $0x60] sm:$0xff] (!%p274_p3)   ;;  %v3260_v11 = vld [vmem:[%s4162_s4 + $0x68] sm:$0xff] (!%p274_p3)  }
   0x9   : > { %2884 = vmatpush3.bf16.msra.mxu1 (!%p274_p3), %v3251_v2  ;;  %2865 = vmatprep.subr.bf16.mxu0 (!%p274_p3), %v3418_v1  ;;  %v3257_v8 = vld [vmem:[%s4162_s4 + $0x18] sm:$0xff] (!%p274_p3)   ;;  %v3259_v10 = vld [vmem:[%s4162_s4 + $0x20] sm:$0xff] (!%p274_p3)   ;;  %v3261_v12 = vld [vmem:[%s4162_s4 + $0x28] sm:$0xff] (!%p274_p3)  }
   0xa   : > { %2885 = vmatprep.subr.bf16.mxu1 (!%p274_p3), %v3418_v1  ;;  %2899 = vmatprep.mubr.msk.bf16.mxu1 (!%p274_p3), %vm3419_vm0, %v3418_v1  ;;  %v3262_v13 = vld [vmem:[%s4162_s4 + $0x70] sm:$0xff] (!%p274_p3)   ;;  %v3264_v15 = vld [vmem:[%s4162_s4 + $0x78] sm:$0xff] (!%p274_p3)   ;;  %v3266_v19 = vld [vmem:[%s4162_s4 + $0x80] sm:$0xff] (!%p274_p3)  }
   0xb   : > { %v3263_v14 = vld [vmem:[%s4162_s4 + $0x30] sm:$0xff] (!%p274_p3)   ;;  %v3265_v16 = vld [vmem:[%s4162_s4 + $0x38] sm:$0xff] (!%p274_p3)   ;;  %v3267_v20 = vld [vmem:[%s4162_s4 + $0xc0] sm:$0xff] (!%p274_p3)  }
   0xc   : > { %2866 = vmatpush3.bf16.msra.mxu0 (!%p274_p3), %v3252_v3  ;;  %v3268_v21 = vld [vmem:[%s4162_s4 + $0x88] sm:$0xff] (!%p274_p3)   ;;  %v3270_v23 = vld [vmem:[%s4162_s4 + $0x90] sm:$0xff] (!%p274_p3)   ;;  %v3272_v25 = vld [vmem:[%s4162_s4 + $0x98] sm:$0xff] (!%p274_p3)  }
   0xd   : > { %2886 = vmatpush3.bf16.msra.mxu1 (!%p274_p3), %v3253_v4  ;;  %2867 = vmatprep.subr.bf16.mxu0 (!%p274_p3), %v3418_v1  ;;  %v3269_v22 = vld [vmem:[%s4162_s4 + $0xc8] sm:$0xff] (!%p274_p3)   ;;  %v3271_v24 = vld [vmem:[%s4162_s4 + $0xd0] sm:$0xff] (!%p274_p3)   ;;  %v3273_v26 = vld [vmem:[%s4162_s4 + $0xd8] sm:$0xff] (!%p274_p3)  }
   0xe   : > { %2887 = vmatprep.subr.bf16.mxu1 %v3418_v1  ;;  %s4170_s21 = smov (!%p327_p4, %s3408_s21), 1  ;;  %v3274_v27 = vld [vmem:[%s4162_s4 + $0xa0] sm:$0xff]   ;;  %v3276_v29 = vld [vmem:[%s4162_s4 + $0xa8] sm:$0xff]   ;;  %v3278_v33 = vld [vmem:[%s4162_s4 + $0xb0] sm:$0xff]  }
   0xf   : > { %s3532_s29 = smul.u32 6, %s4170_s21  ;;  %v3275_v28 = vld [vmem:[%s4162_s4 + $0xe0] sm:$0xff]   ;;  %v3277_v31 = vld [vmem:[%s4162_s4 + $0xe8] sm:$0xff]   ;;  %v3279_v34 = vld [vmem:[%s4162_s4 + $0xf0] sm:$0xff]   ;;  %s2534_s14 = sshll.u32 %s4170_s21, 1 }
  0x10   : > { %2868 = vmatpush3.bf16.msra.mxu0 %v3254_v5  ;;  %v3280_v37 = vld [vmem:[%s4162_s4 + $0xb8] sm:$0xff]   ;;  %v3282_v41 = vld [vmem:[%s4162_s4 + $0x100] sm:$0xff]   ;;  %v3284_v43 = vld [vmem:[%s4162_s4 + $0x108] sm:$0xff]   ;;  %s4145_s19 = scalar_lea.vmem %s4164_s6, %s2534_s14 }
  0x11   : > { %2888 = vmatpush3.bf16.msra.mxu1 %v3255_v6  ;;  %2869 = vmatprep.subr.bf16.mxu0 %v3418_v1  ;;  %s3546_s12 = scalar_lea.vmem %s4159_s1, %s3532_s29  ;;  %s3555_s17 = scalar_lea.vmem %s4158_s0, %s3532_s29  ;;  %v3281_v38 = vld [vmem:[%s4162_s4 + $0xf8] sm:$0xff]   ;;  %v3283_v42 = vld [vmem:[%s4162_s4 + $0x140] sm:$0xff]   ;;  %v3285_v44 = vld [vmem:[%s4162_s4 + $0x148] sm:$0xff]  }
  0x12   : > { %2889 = vmatprep.subr.bf16.mxu1 %v3418_v1  ;;  %v380_v17 = vld [vmem:[%s3546_s12] sm:$0x1]  ;;  %s3632_s18 = scalar_lea.vmem %s4160_s2, %s3532_s29  ;;  %v3286_v45 = vld [vmem:[%s4162_s4 + $0x110] sm:$0xff]   ;;  %v3288_v47 = vld [vmem:[%s4162_s4 + $0x118] sm:$0xff]   ;;  %s3708_s25 = scalar_lea.vmem %s4161_s3, %s3532_s29 }
  0x13   : > { %v363_v18 = vld [vmem:[%s3555_s17] sm:$0x1]  ;;  %v3287_v46 = vld [vmem:[%s4162_s4 + $0x150] sm:$0xff]   ;;  %v3289_v48 = vld [vmem:[%s4162_s4 + $0x158] sm:$0xff]  }
  0x14   : > { %2870 = vmatpush3.bf16.msra.mxu0 %v3256_v7  ;;  %v2551_v30 = vld.sshfl [vmem:[%s3555_s17] sm:$0x3 pattern:$0x76325410]  ;;  %v3292_v51 = vld [vmem:[%s4162_s4 + $0x128] sm:$0xff]   ;;  %v3294_v54 = vld [vmem:[%s4162_s4 + $0x130] sm:$0xff]  }
  0x15   : > { %2890 = vmatpush3.bf16.msra.mxu1 %v3257_v8  ;;  %2871 = vmatprep.subr.bf16.mxu0 %v3418_v1  ;;  %v601_v32 = vshll.u32 %v2551_v30, 16  ;;  %v599_v35 = vshrl.u32 %v2551_v30, 16  ;;  %v695_v40 = vld [vmem:[%s3632_s18] sm:$0x1]  ;;  %v3293_v52 = vld [vmem:[%s4162_s4 + $0x168] sm:$0xff]   ;;  %v3295_v56 = vld [vmem:[%s4162_s4 + $0x170] sm:$0xff]  }
  0x16   : > { %2891 = vmatprep.subr.bf16.mxu1 %v3418_v1  ;;  %v3290_v49 = vld [vmem:[%s4162_s4 + $0x120] sm:$0xff]   ;;  %v3296_v57 = vld [vmem:[%s4162_s4 + $0x138] sm:$0xff]   ;;  %v3300_v2 = vld [vmem:[%s4162_s4 + $0x188] sm:$0xff]  }
  0x17   : > { %v603_v36 = vrot.slane %v601_v32, 1  ;;  %v3291_v50 = vld [vmem:[%s4162_s4 + $0x160] sm:$0xff]   ;;  %v3297_v60 = vld [vmem:[%s4162_s4 + $0x178] sm:$0xff]   ;;  %v3301_v3 = vld [vmem:[%s4162_s4 + $0x1c8] sm:$0xff]  }
  0x18   : > { %2872 = vmatpush3.bf16.msra.mxu0 %v3258_v9  ;;  %v2576_v53 = vld.sshfl [vmem:[%s3632_s18] sm:$0x3 pattern:$0x76325410]  ;;  %v3302_v4 = vld [vmem:[%s4162_s4 + $0x190] sm:$0xff]   ;;  %v3304_v6 = vld [vmem:[%s4162_s4 + $0x198] sm:$0xff]  }
  0x19   : > { %2892 = vmatpush3.bf16.msra.mxu1 %v3259_v10  ;;  %2873 = vmatprep.subr.bf16.mxu0 %v3418_v1  ;;  %v604_v39 = vor.u32 %v603_v36, %v599_v35  ;;  %v935_v55 = vshll.u32 %v2576_v53, 16  ;;  %v933_v58 = vshrl.u32 %v2576_v53, 16  ;;  %v801_v61 = vld [vmem:[%s3708_s25] sm:$0x1]  ;;  %v3303_v5 = vld [vmem:[%s4162_s4 + $0x1d0] sm:$0xff]   ;;  %v3305_v7 = vld [vmem:[%s4162_s4 + $0x1d8] sm:$0xff]  }
  0x1a   : > { %2893 = vmatprep.subr.bf16.mxu1 %v3418_v1  ;;  %v3298_v63 = vld [vmem:[%s4162_s4 + $0x180] sm:$0xff]   ;;  %v3308_v10 = vld [vmem:[%s4162_s4 + $0x1a8] sm:$0xff]   ;;  %v3326_v32 = vld [vmem:[%s4162_s4 + $0x230] sm:$0xff]  }
  0x1b   : > { %v937_v59 = vrot.slane %v935_v55, 1  ;;  %v3299_v0 = vld [vmem:[%s4162_s4 + $0x1c0] sm:$0xff]   ;;  %v3325_v30 = vld [vmem:[%s4162_s4 + $0x68] sm:$0xff]   ;;  %v3328_v36 = vld [vmem:[%s4162_s4 + $0x238] sm:$0xff]  }
  0x1c   : > { %2874 = vmatpush3.bf16.msra.mxu0 %v3260_v11  ;;  %v3306_v8 = vld [vmem:[%s4162_s4 + $0x1a0] sm:$0xff]   ;;  %v3309_v11 = vld [vmem:[%s4162_s4 + $0x1e8] sm:$0xff]   ;;  %v3343_v53 = vld [vmem:[%s4162_s4 + $0xb0] sm:$0xff]  }
  0x1d   : > { %2894 = vmatpush3.bf16.msra.mxu1 %v3261_v12  ;;  %2875 = vmatprep.subr.bf16.mxu0 %v3418_v1  ;;  %v938_v62 = vor.u32 %v937_v59, %v933_v58  ;;  %v3307_v9 = vld [vmem:[%s4162_s4 + $0x1e0] sm:$0xff]   ;;  %v3310_v12 = vld [vmem:[%s4162_s4 + $0x1b0] sm:$0xff]   ;;  %v3345_v55 = vld [vmem:[%s4162_s4 + $0xb8] sm:$0xff]  }
  0x1e   : > { %2895 = vmatprep.subr.bf16.mxu1 %v3418_v1  ;;  %v3347_v58 = vld [vmem:[%s4162_s4 + $0x100] sm:$0xff]   ;;  %v3348_v59 = vld [vmem:[%s4162_s4 + $0xc8] sm:$0xff]  }
  0x20   : > { %2876 = vmatpush3.bf16.msra.mxu0 %v3262_v13  ;;  %v3311_v13 = vld [vmem:[%s4162_s4 + $0x1f0] sm:$0xff]  }
  0x21   : > { %2896 = vmatpush3.bf16.msra.mxu1 %v3263_v14  ;;  %2877 = vmatprep.subr.bf16.mxu0 %v3418_v1  ;;  %v3312_v14 = vld [vmem:[%s4162_s4 + $0x1b8] sm:$0xff]  }
  0x22   : > { %2897 = vmatprep.subr.bf16.mxu1 %v3418_v1 }
  0x24   : > { %2878 = vmatpush3.bf16.msra.mxu0 %v3264_v15  ;;  %v3313_v15 = vld [vmem:[%s4162_s4 + $0x1f8] sm:$0xff]  }
  0x25   : > { %2898 = vmatpush3.bf16.msra.mxu1 %v3265_v16  ;;  %2903 = vmatprep.subr.bf16.mxu0 %v3418_v1  ;;  %v2585_v16 = vld [vmem:[%s3555_s17 + $0x2] sm:$0x1] }
  0x26   : > { %2923 = vmatprep.subr.bf16.mxu1 %v3418_v1 }
  0x27   : > { %2880 = vmatmul.mubr.bf16.vlgmr.msra.gmra.mrb[0].mxu0 %v380_v17  ;;  %v2594_v17 = vld [vmem:[%s3546_s12 + $0x2] sm:$0x1] }
  0x28   : > { %2900 = vmatmul.mubr.bf16.vlgmr.msra.gmra.mrb[0].mxu1 %v363_v18  ;;  %2904 = vmatpush3.bf16.msra.mxu0 %v3266_v19  ;;  %v3314_v18 = vld [vmem:[%s4162_s4 + $0x200] sm:$0xff]  }
  0x29   : > { %2924 = vmatpush3.bf16.msra.mxu1 %v3267_v20  ;;  %2905 = vmatprep.subr.bf16.mxu0 %v3418_v1  ;;  %v3315_v19 = vld [vmem:[%s4162_s4 + $0x40] sm:$0xff]   ;;  %v3316_v20 = vld [vmem:[%s4162_s4 + $0x208] sm:$0xff]  }
  0x2a   : > { %2925 = vmatprep.subr.bf16.mxu1 %v3418_v1  ;;  %2919 = vmatprep.mubr.msk.bf16.mxu0 %vm3419_vm0, %v3418_v1 }
  0x2b   : > { %2939 = vmatprep.mubr.msk.bf16.mxu1 %vm3419_vm0, %v3418_v1 }
  0x2c   : > { %2906 = vmatpush3.bf16.msra.mxu0 %v3268_v21  ;;  %v3317_v21 = vld [vmem:[%s4162_s4 + $0x48] sm:$0xff]  }
  0x2d   : > { %2926 = vmatpush3.bf16.msra.mxu1 %v3269_v22  ;;  %2907 = vmatprep.subr.bf16.mxu0 %v3418_v1  ;;  %v3318_v22 = vld [vmem:[%s4162_s4 + $0x210] sm:$0xff]  }
  0x2e   : > { %2927 = vmatprep.subr.bf16.mxu1 %v3418_v1 }
  0x30   : > { %2908 = vmatpush3.bf16.msra.mxu0 %v3270_v23  ;;  %v3319_v23 = vld [vmem:[%s4162_s4 + $0x50] sm:$0xff]  }
  0x31   : > { %2928 = vmatpush3.bf16.msra.mxu1 %v3271_v24  ;;  %2909 = vmatprep.subr.bf16.mxu0 %v3418_v1  ;;  %v3320_v24 = vld [vmem:[%s4162_s4 + $0x218] sm:$0xff]  }
  0x32   : > { %2929 = vmatprep.subr.bf16.mxu1 %v3418_v1 }
  0x34   : > { %2910 = vmatpush3.bf16.msra.mxu0 %v3272_v25  ;;  %v3321_v25 = vld [vmem:[%s4162_s4 + $0x58] sm:$0xff]  }
  0x35   : > { %2930 = vmatpush3.bf16.msra.mxu1 %v3273_v26  ;;  %2911 = vmatprep.subr.bf16.mxu0 %v3418_v1  ;;  %v3322_v26 = vld [vmem:[%s4162_s4 + $0x220] sm:$0xff]  }
  0x36   : > { %2931 = vmatprep.subr.bf16.mxu1 %v3418_v1 }
  0x38   : > { %2912 = vmatpush3.bf16.msra.mxu0 %v3274_v27  ;;  %v3323_v27 = vld [vmem:[%s4162_s4 + $0x60] sm:$0xff]  }
  0x39   : > { %2932 = vmatpush3.bf16.msra.mxu1 %v3275_v28  ;;  %2913 = vmatprep.subr.bf16.mxu0 %v3418_v1  ;;  %v3324_v28 = vld [vmem:[%s4162_s4 + $0x228] sm:$0xff]  }
  0x3a   : > { %2933 = vmatprep.subr.bf16.mxu1 %v3418_v1 }
  0x3c   : > { %2914 = vmatpush3.bf16.msra.mxu0 %v3276_v29  ;;  %v2604_v29 = vld.sshfl [vmem:[%s3555_s17 + $0x2] sm:$0x3 pattern:$0x76325410] }
  0x3d   : > { %2934 = vmatpush3.bf16.msra.mxu1 %v3277_v31  ;;  %2915 = vmatprep.subr.bf16.mxu0 %v3418_v1  ;;  %v1271_v31 = vshll.u32 %v2604_v29, 16 }
  0x3e   : > { %2935 = vmatprep.subr.bf16.mxu1 %v3418_v1 }
  0x3f   : > { %v1273_v35 = vrot.slane %v1271_v31, 1 }
  0x40   : > { %2916 = vmatpush3.bf16.msra.mxu0 %v3278_v33  ;;  %v3327_v33 = vld [vmem:[%s4162_s4 + $0x70] sm:$0xff]  }
  0x41   : > { %2936 = vmatpush3.bf16.msra.mxu1 %v3279_v34  ;;  %2917 = vmatprep.subr.bf16.mxu0 %v3418_v1  ;;  %v1269_v34 = vshrl.u32 %v2604_v29, 16 }
  0x42   : > { %2937 = vmatprep.subr.bf16.mxu1 %v3418_v1 }
  0x44   : > { %2918 = vmatpush3.bf16.msra.mxu0 %v3280_v37  ;;  %v3329_v37 = vld [vmem:[%s4162_s4 + $0x78] sm:$0xff]  }
  0x45   : > { %2938 = vmatpush3.bf16.msra.mxu1 %v3281_v38  ;;  %2943 = vmatprep.subr.bf16.mxu0 %v3418_v1  ;;  %v1274_v38 = vor.u32 %v1273_v35, %v1269_v34  ;;  %v3375_v35 = vld [vmem:[%s4162_s4 + $0x1b0] sm:$0xff]  }
  0x46   : > { %2963 = vmatprep.subr.bf16.mxu1 %v3418_v1 }
  0x47   : > { %2920 = vmatmul.mubr.bf16.vlgmr.msra.gmra.mrb[4].mxu0 %v604_v39  ;;  %v3330_v39 = vld [vmem:[%s4162_s4] sm:$0xff]  }
  0x48   : > { %2940 = vmatmul.mubr.bf16.vlgmr.msra.gmra.mrb[4].mxu1 %v695_v40  ;;  %2944 = vmatpush3.bf16.msra.mxu0 %v3282_v41  ;;  %v2615_v40 = vld [vmem:[%s3546_s12 + $0x2] sm:$0x1] }
  0x49   : > { %2964 = vmatpush3.bf16.msra.mxu1 %v3283_v42  ;;  %2945 = vmatprep.subr.bf16.mxu0 %v3418_v1  ;;  %v3331_v41 = vld [vmem:[%s4162_s4 + $0x80] sm:$0xff]   ;;  %v3332_v42 = vld [vmem:[%s4162_s4 + $0x8] sm:$0xff]  }
  0x4a   : > { %2965 = vmatprep.subr.bf16.mxu1 %v3418_v1  ;;  %2959 = vmatprep.mubr.msk.bf16.mxu0 %vm3419_vm0, %v3418_v1 }
  0x4b   : > { %2979 = vmatprep.mubr.msk.bf16.mxu1 %vm3419_vm0, %v3418_v1 }
  0x4c   : > { %2946 = vmatpush3.bf16.msra.mxu0 %v3284_v43  ;;  %v3333_v43 = vld [vmem:[%s4162_s4 + $0x88] sm:$0xff]  }
  0x4d   : > { %2966 = vmatpush3.bf16.msra.mxu1 %v3285_v44  ;;  %2947 = vmatprep.subr.bf16.mxu0 %v3418_v1  ;;  %v3334_v44 = vld [vmem:[%s4162_s4 + $0x10] sm:$0xff]  }
  0x4e   : > { %2967 = vmatprep.subr.bf16.mxu1 %v3418_v1 }
  0x50   : > { %2948 = vmatpush3.bf16.msra.mxu0 %v3286_v45  ;;  %v3335_v45 = vld [vmem:[%s4162_s4 + $0x90] sm:$0xff]  }
  0x51   : > { %2968 = vmatpush3.bf16.msra.mxu1 %v3287_v46  ;;  %2949 = vmatprep.subr.bf16.mxu0 %v3418_v1  ;;  %v3336_v46 = vld [vmem:[%s4162_s4 + $0x18] sm:$0xff]  }
  0x52   : > { %2969 = vmatprep.subr.bf16.mxu1 %v3418_v1 }
  0x54   : > { %2950 = vmatpush3.bf16.msra.mxu0 %v3288_v47  ;;  %v3337_v47 = vld [vmem:[%s4162_s4 + $0x98] sm:$0xff]  }
  0x55   : > { %2970 = vmatpush3.bf16.msra.mxu1 %v3289_v48  ;;  %2951 = vmatprep.subr.bf16.mxu0 %v3418_v1  ;;  %v3338_v48 = vld [vmem:[%s4162_s4 + $0x20] sm:$0xff]  }
  0x56   : > { %2971 = vmatprep.subr.bf16.mxu1 %v3418_v1 }
  0x58   : > { %2952 = vmatpush3.bf16.msra.mxu0 %v3290_v49  ;;  %v3339_v49 = vld [vmem:[%s4162_s4 + $0xa0] sm:$0xff]  }
  0x59   : > { %2972 = vmatpush3.bf16.msra.mxu1 %v3291_v50  ;;  %2953 = vmatprep.subr.bf16.mxu0 %v3418_v1  ;;  %v3340_v50 = vld [vmem:[%s4162_s4 + $0x28] sm:$0xff]  }
  0x5a   : > { %2973 = vmatprep.subr.bf16.mxu1 %v3418_v1 }
  0x5c   : > { %2954 = vmatpush3.bf16.msra.mxu0 %v3292_v51  ;;  %v3341_v51 = vld [vmem:[%s4162_s4 + $0xa8] sm:$0xff]  }
  0x5d   : > { %2974 = vmatpush3.bf16.msra.mxu1 %v3293_v52  ;;  %2955 = vmatprep.subr.bf16.mxu0 %v3418_v1  ;;  %v3342_v52 = vld [vmem:[%s4162_s4 + $0x30] sm:$0xff]  }
  0x5e   : > { %2975 = vmatprep.subr.bf16.mxu1 %v3418_v1 }
  0x60   : > { %2956 = vmatpush3.bf16.msra.mxu0 %v3294_v54  ;;  %v3344_v54 = vld [vmem:[%s4162_s4 + $0x38] sm:$0xff]  }
  0x61   : > { %2976 = vmatpush3.bf16.msra.mxu1 %v3295_v56  ;;  %2957 = vmatprep.subr.bf16.mxu0 %v3418_v1  ;;  %v2614_v56 = vld [vmem:[%s3555_s17 + $0x2] sm:$0x1] }
  0x62   : > { %2977 = vmatprep.subr.bf16.mxu1 %v3418_v1 }
  0x64   : > { %2958 = vmatpush3.bf16.msra.mxu0 %v3296_v57  ;;  %v3346_v57 = vld [vmem:[%s4162_s4 + $0xc0] sm:$0xff]  }
  0x65   : > { %2978 = vmatpush3.bf16.msra.mxu1 %v3297_v60  ;;  %2983 = vmatprep.subr.bf16.mxu0 %v3418_v1  ;;  %v3349_v60 = vld [vmem:[%s4162_s4 + $0x108] sm:$0xff]  }
  0x66   : > { %3003 = vmatprep.subr.bf16.mxu1 %v3418_v1 }
  0x67   : > { %2960 = vmatmul.mubr.bf16.vlgmr.msra.gmra.mrb[8].mxu0 %v801_v61  ;;  %v3350_v61 = vld [vmem:[%s4162_s4 + $0xd0] sm:$0xff]  }
  0x68   : > { %2980 = vmatmul.mubr.bf16.vlgmr.msra.gmra.mrb[8].mxu1 %v938_v62  ;;  %2984 = vmatpush3.bf16.msra.mxu0 %v3298_v63  ;;  %v3351_v62 = vld [vmem:[%s4162_s4 + $0x110] sm:$0xff]   ;;  %v3352_v63 = vld [vmem:[%s4162_s4 + $0xd8] sm:$0xff]  }
  0x69   : > { %3004 = vmatpush3.bf16.msra.mxu1 %v3299_v0  ;;  %2985 = vmatprep.subr.bf16.mxu0 %v3418_v1  ;;  %v3353_v0 = vld [vmem:[%s4162_s4 + $0x118] sm:$0xff]  }
  0x6a   : > { %3005 = vmatprep.subr.bf16.mxu1 %v3418_v1  ;;  %2999 = vmatprep.mubr.msk.bf16.mxu0 %vm3419_vm0, %v3418_v1 }
  0x6b   : > { %3019 = vmatprep.mubr.msk.bf16.mxu1 %vm3419_vm0, %v3418_v1 }
  0x6c   : > { %2986 = vmatpush3.bf16.msra.mxu0 %v3300_v2  ;;  %v3354_v2 = vld [vmem:[%s4162_s4 + $0xe0] sm:$0xff]  }
  0x6d   : > { %3006 = vmatpush3.bf16.msra.mxu1 %v3301_v3  ;;  %2987 = vmatprep.subr.bf16.mxu0 %v3418_v1  ;;  %v3355_v3 = vld [vmem:[%s4162_s4 + $0x120] sm:$0xff]  }
  0x6e   : > { %3007 = vmatprep.subr.bf16.mxu1 %v3418_v1 }
  0x70   : > { %2988 = vmatpush3.bf16.msra.mxu0 %v3302_v4  ;;  %v3356_v4 = vld [vmem:[%s4162_s4 + $0xe8] sm:$0xff]  }
  0x71   : > { %3008 = vmatpush3.bf16.msra.mxu1 %v3303_v5  ;;  %2989 = vmatprep.subr.bf16.mxu0 %v3418_v1  ;;  %v3357_v5 = vld [vmem:[%s4162_s4 + $0x128] sm:$0xff]  }
  0x72   : > { %3009 = vmatprep.subr.bf16.mxu1 %v3418_v1 }
  0x74   : > { %2990 = vmatpush3.bf16.msra.mxu0 %v3304_v6  ;;  %v3358_v6 = vld [vmem:[%s4162_s4 + $0xf0] sm:$0xff]  }
  0x75   : > { %3010 = vmatpush3.bf16.msra.mxu1 %v3305_v7  ;;  %2991 = vmatprep.subr.bf16.mxu0 %v3418_v1  ;;  %v3359_v7 = vld [vmem:[%s4162_s4 + $0x130] sm:$0xff]  }
  0x76   : > { %3011 = vmatprep.subr.bf16.mxu1 %v3418_v1 }
  0x78   : > { %2992 = vmatpush3.bf16.msra.mxu0 %v3306_v8  ;;  %v3360_v8 = vld [vmem:[%s4162_s4 + $0xf8] sm:$0xff]  }
  0x79   : > { %3012 = vmatpush3.bf16.msra.mxu1 %v3307_v9  ;;  %2993 = vmatprep.subr.bf16.mxu0 %v3418_v1  ;;  %v3361_v9 = vld [vmem:[%s4162_s4 + $0x138] sm:$0xff]  }
  0x7a   : > { %3013 = vmatprep.subr.bf16.mxu1 %v3418_v1 }
  0x7c   : > { %2994 = vmatpush3.bf16.msra.mxu0 %v3308_v10  ;;  %v2642_v10 = vld [vmem:[%s3632_s18 + $0x2] sm:$0x1] }
  0x7d   : > { %3014 = vmatpush3.bf16.msra.mxu1 %v3309_v11  ;;  %2995 = vmatprep.subr.bf16.mxu0 %v3418_v1  ;;  %v3362_v11 = vld [vmem:[%s4162_s4 + $0x140] sm:$0xff]  }
  0x7e   : > { %3015 = vmatprep.subr.bf16.mxu1 %v3418_v1 }
  0x80   : > { %2996 = vmatpush3.bf16.msra.mxu0 %v3310_v12  ;;  %v2651_v12 = vld [vmem:[%s3708_s25 + $0x2] sm:$0x1] }
  0x81   : > { %3016 = vmatpush3.bf16.msra.mxu1 %v3311_v13  ;;  %2997 = vmatprep.subr.bf16.mxu0 %v3418_v1  ;;  %v3363_v13 = vld [vmem:[%s4162_s4 + $0x180] sm:$0xff]  }
  0x82   : > { %3017 = vmatprep.subr.bf16.mxu1 %v3418_v1 }
  0x84   : > { %2998 = vmatpush3.bf16.msra.mxu0 %v3312_v14  ;;  %v3364_v14 = vld [vmem:[%s4162_s4 + $0x148] sm:$0xff]  }
  0x85   : > { %3018 = vmatpush3.bf16.msra.mxu1 %v3313_v15  ;;  %3023 = vmatprep.subr.bf16.mxu0 %v3418_v1  ;;  %v3365_v15 = vld [vmem:[%s4162_s4 + $0x188] sm:$0xff]  }
  0x86   : > { %3043 = vmatprep.subr.bf16.mxu1 %v3418_v1 }
  0x87   : > { %3000 = vmatmul.mubr.bf16.vlgmr.msra.gmra.mrb[12].mxu0 %v2585_v16  ;;  %v3366_v16 = vld [vmem:[%s4162_s4 + $0x150] sm:$0xff]  }
  0x88   : > { %3020 = vmatmul.mubr.bf16.vlgmr.msra.gmra.mrb[12].mxu1 %v2594_v17  ;;  %3024 = vmatpush3.bf16.msra.mxu0 %v3314_v18  ;;  %v3367_v17 = vld [vmem:[%s4162_s4 + $0x190] sm:$0xff]   ;;  %v3368_v18 = vld [vmem:[%s4162_s4 + $0x158] sm:$0xff]  }
  0x89   : > { %3044 = vmatpush3.bf16.msra.mxu1 %v3315_v19  ;;  %3025 = vmatprep.subr.bf16.mxu0 %v3418_v1  ;;  %v3369_v19 = vld [vmem:[%s4162_s4 + $0x198] sm:$0xff]  }
  0x8a   : > { %3045 = vmatprep.subr.bf16.mxu1 %v3418_v1  ;;  %3039 = vmatprep.mubr.msk.bf16.mxu0 %vm3419_vm0, %v3418_v1 }
  0x8b   : > { %3059 = vmatprep.mubr.msk.bf16.mxu1 %vm3419_vm0, %v3418_v1 }
  0x8c   : > { %3026 = vmatpush3.bf16.msra.mxu0 %v3316_v20  ;;  %v3370_v20 = vld [vmem:[%s4162_s4 + $0x160] sm:$0xff]  }
  0x8d   : > { %3046 = vmatpush3.bf16.msra.mxu1 %v3317_v21  ;;  %3027 = vmatprep.subr.bf16.mxu0 %v3418_v1  ;;  %v3371_v21 = vld [vmem:[%s4162_s4 + $0x1a0] sm:$0xff]  }
  0x8e   : > { %3047 = vmatprep.subr.bf16.mxu1 %v3418_v1 }
  0x90   : > { %3028 = vmatpush3.bf16.msra.mxu0 %v3318_v22  ;;  %v3372_v22 = vld [vmem:[%s4162_s4 + $0x168] sm:$0xff]  }
  0x91   : > { %3048 = vmatpush3.bf16.msra.mxu1 %v3319_v23  ;;  %3029 = vmatprep.subr.bf16.mxu0 %v3418_v1  ;;  %v2661_v23 = vld.sshfl [vmem:[%s3632_s18 + $0x2] sm:$0x3 pattern:$0x76325410] }
  0x92   : > { %3049 = vmatprep.subr.bf16.mxu1 %v3418_v1 }
  0x94   : > { %3030 = vmatpush3.bf16.msra.mxu0 %v3320_v24  ;;  %v3373_v24 = vld [vmem:[%s4162_s4 + $0x1a8] sm:$0xff]  }
  0x95   : > { %3050 = vmatpush3.bf16.msra.mxu1 %v3321_v25  ;;  %3031 = vmatprep.subr.bf16.mxu0 %v3418_v1 }
  0x96   : > { %3051 = vmatprep.subr.bf16.mxu1 %v3418_v1 }
  0x98   : > { %3032 = vmatpush3.bf16.msra.mxu0 %v3322_v26 }
  0x99   : > { %3052 = vmatpush3.bf16.msra.mxu1 %v3323_v27  ;;  %3033 = vmatprep.subr.bf16.mxu0 %v3418_v1 }
  0x9a   : > { %3053 = vmatprep.subr.bf16.mxu1 %v3418_v1 }
  0x9c   : > { %3034 = vmatpush3.bf16.msra.mxu0 %v3324_v28  ;;  %v1951_v28 = vshll.u32 %v2661_v23, 16 }
  0x9d   : > { %3054 = vmatpush3.bf16.msra.mxu1 %v3325_v30  ;;  %3035 = vmatprep.subr.bf16.mxu0 %v3418_v1 }
  0x9e   : > { %3055 = vmatprep.subr.bf16.mxu1 %v3418_v1 }
  0xa0   : > { %3036 = vmatpush3.bf16.msra.mxu0 %v3326_v32  ;;  %v3374_v32 = vld [vmem:[%s4162_s4 + $0x170] sm:$0xff]  }
  0xa1   : > { %3056 = vmatpush3.bf16.msra.mxu1 %v3327_v33  ;;  %3037 = vmatprep.subr.bf16.mxu0 %v3418_v1 }
  0xa2   : > { %3057 = vmatprep.subr.bf16.mxu1 %v3418_v1 }
  0xa4   : > { %3038 = vmatpush3.bf16.msra.mxu0 %v3328_v36 }
  0xa5   : > { %3058 = vmatpush3.bf16.msra.mxu1 %v3329_v37  ;;  %3063 = vmatprep.subr.bf16.mxu0 %v3418_v1  ;;  %v1949_v37 = vshrl.u32 %v2661_v23, 16 }
  0xa6   : > { %3083 = vmatprep.subr.bf16.mxu1 %v3418_v1 }
  0xa7   : > { %3040 = vmatmul.mubr.bf16.vlgmr.msra.gmra.mrb[16].mxu0 %v1274_v38 }
  0xa8   : > { %3060 = vmatmul.mubr.bf16.vlgmr.msra.gmra.mrb[16].mxu1 %v2615_v40  ;;  %3064 = vmatpush3.bf16.msra.mxu0 %v3330_v39  ;;  %v3376_v39 = vld [vmem:[%s4162_s4 + $0x178] sm:$0xff]  }
  0xa9   : > { %3084 = vmatpush3.bf16.msra.mxu1 %v3331_v41  ;;  %3065 = vmatprep.subr.bf16.mxu0 %v3418_v1  ;;  %v3377_v40 = vld [vmem:[%s4162_s4 + $0x1b8] sm:$0xff]  }
  0xaa   : > { %3085 = vmatprep.subr.bf16.mxu1 %v3418_v1  ;;  %3079 = vmatprep.mubr.msk.bf16.mxu0 %vm3419_vm0, %v3418_v1 }
  0xab   : > { %3099 = vmatprep.mubr.msk.bf16.mxu1 %vm3419_vm0, %v3418_v1 }
  0xac   : > { %3066 = vmatpush3.bf16.msra.mxu0 %v3332_v42  ;;  %v3378_v42 = vld [vmem:[%s4162_s4 + $0x1c0] sm:$0xff]  }
  0xad   : > { %3086 = vmatpush3.bf16.msra.mxu1 %v3333_v43  ;;  %3067 = vmatprep.subr.bf16.mxu0 %v3418_v1  ;;  %v2670_v43 = vld [vmem:[%s3555_s17 + $0x4] sm:$0x1] }
  0xae   : > { %3087 = vmatprep.subr.bf16.mxu1 %v3418_v1 }
  0xb0   : > { %3068 = vmatpush3.bf16.msra.mxu0 %v3334_v44  ;;  %v3379_v44 = vld [vmem:[%s4162_s4 + $0x200] sm:$0xff]  }
  0xb1   : > { %3088 = vmatpush3.bf16.msra.mxu1 %v3335_v45  ;;  %3069 = vmatprep.subr.bf16.mxu0 %v3418_v1  ;;  %v3380_v45 = vld [vmem:[%s4162_s4 + $0x1c8] sm:$0xff]  }
  0xb2   : > { %3089 = vmatprep.subr.bf16.mxu1 %v3418_v1 }
  0xb4   : > { %3070 = vmatpush3.bf16.msra.mxu0 %v3336_v46  ;;  %v3381_v46 = vld [vmem:[%s4162_s4 + $0x208] sm:$0xff]  }
  0xb5   : > { %3090 = vmatpush3.bf16.msra.mxu1 %v3337_v47  ;;  %3071 = vmatprep.subr.bf16.mxu0 %v3418_v1  ;;  %v3382_v47 = vld [vmem:[%s4162_s4 + $0x1d0] sm:$0xff]  }
  0xb6   : > { %3091 = vmatprep.subr.bf16.mxu1 %v3418_v1 }
  0xb8   : > { %3072 = vmatpush3.bf16.msra.mxu0 %v3338_v48  ;;  %v3383_v48 = vld [vmem:[%s4162_s4 + $0x210] sm:$0xff]  }
  0xb9   : > { %3092 = vmatpush3.bf16.msra.mxu1 %v3339_v49  ;;  %3073 = vmatprep.subr.bf16.mxu0 %v3418_v1  ;;  %v3384_v49 = vld [vmem:[%s4162_s4 + $0x1d8] sm:$0xff]  }
  0xba   : > { %3093 = vmatprep.subr.bf16.mxu1 %v3418_v1 }
  0xbc   : > { %3074 = vmatpush3.bf16.msra.mxu0 %v3340_v50  ;;  %v3385_v50 = vld [vmem:[%s4162_s4 + $0x218] sm:$0xff]  }
  0xbd   : > { %3094 = vmatpush3.bf16.msra.mxu1 %v3341_v51  ;;  %3075 = vmatprep.subr.bf16.mxu0 %v3418_v1  ;;  %v3386_v51 = vld [vmem:[%s4162_s4 + $0x1e0] sm:$0xff]  }
  0xbe   : > { %3095 = vmatprep.subr.bf16.mxu1 %v3418_v1 }
  0xc0   : > { %3076 = vmatpush3.bf16.msra.mxu0 %v3342_v52  ;;  %v3387_v52 = vld [vmem:[%s4162_s4 + $0x220] sm:$0xff]  }
  0xc1   : > { %3096 = vmatpush3.bf16.msra.mxu1 %v3343_v53  ;;  %3077 = vmatprep.subr.bf16.mxu0 %v3418_v1  ;;  %v3388_v53 = vld [vmem:[%s4162_s4 + $0x1e8] sm:$0xff]  }
  0xc2   : > { %3097 = vmatprep.subr.bf16.mxu1 %v3418_v1 }
  0xc4   : > { %3078 = vmatpush3.bf16.msra.mxu0 %v3344_v54  ;;  %v3389_v54 = vld [vmem:[%s4162_s4 + $0x228] sm:$0xff]  }
  0xc5   : > { %3098 = vmatpush3.bf16.msra.mxu1 %v3345_v55  ;;  %3103 = vmatprep.subr.bf16.mxu0 %v3418_v1  ;;  %v2689_v55 = vld.sshfl [vmem:[%s3555_s17 + $0x4] sm:$0x3 pattern:$0x76325410] }
  0xc6   : > { %3123 = vmatprep.subr.bf16.mxu1 %v3418_v1 }
  0xc7   : > { %3080 = vmatmul.mubr.bf16.vlgmr.msra.gmra.mrb[20].mxu0 %v2614_v56 }
  0xc8   : > { %3100 = vmatmul.mubr.bf16.vlgmr.msra.gmra.mrb[20].mxu1 %v1274_v38  ;;  %3104 = vmatpush3.bf16.msra.mxu0 %v3346_v57  ;;  %v1953_v38 = vrot.slane %v1951_v28, 1 }
  0xc9   : > { %3124 = vmatpush3.bf16.msra.mxu1 %v3347_v58  ;;  %3105 = vmatprep.subr.bf16.mxu0 %v3418_v1 }
  0xca   : > { %3125 = vmatprep.subr.bf16.mxu1 %v3418_v1  ;;  %3119 = vmatprep.mubr.msk.bf16.mxu0 %vm3419_vm0, %v3418_v1  ;;  %v1954_v41 = vor.u32 %v1953_v38, %v1949_v37 }
  0xcb   : > { %3139 = vmatprep.mubr.msk.bf16.mxu1 %vm3419_vm0, %v3418_v1 }
  0xcc   : > { %3106 = vmatpush3.bf16.msra.mxu0 %v3348_v59 }
  0xcd   : > { %3126 = vmatpush3.bf16.msra.mxu1 %v3349_v60  ;;  %3107 = vmatprep.subr.bf16.mxu0 %v3418_v1 }
  0xce   : > { %3127 = vmatprep.subr.bf16.mxu1 %v3418_v1 }
  0xd0   : > { %3108 = vmatpush3.bf16.msra.mxu0 %v3350_v61 }
  0xd1   : > { %3128 = vmatpush3.bf16.msra.mxu1 %v3351_v62  ;;  %3109 = vmatprep.subr.bf16.mxu0 %v3418_v1  ;;  %v3390_v62 = vld [vmem:[%s4162_s4 + $0x1f0] sm:$0xff]  }
  0xd2   : > { %3129 = vmatprep.subr.bf16.mxu1 %v3418_v1 }
  0xd4   : > { %3110 = vmatpush3.bf16.msra.mxu0 %v3352_v63  ;;  %v2287_v63 = vshll.u32 %v2689_v55, 16 }
  0xd5   : > { %3130 = vmatpush3.bf16.msra.mxu1 %v3353_v0  ;;  %3111 = vmatprep.subr.bf16.mxu0 %v3418_v1 }
  0xd6   : > { %3131 = vmatprep.subr.bf16.mxu1 %v3418_v1 }
  0xd8   : > { %3112 = vmatpush3.bf16.msra.mxu0 %v3354_v2 }
  0xd9   : > { %3132 = vmatpush3.bf16.msra.mxu1 %v3355_v3  ;;  %3113 = vmatprep.subr.bf16.mxu0 %v3418_v1 }
  0xda   : > { %3133 = vmatprep.subr.bf16.mxu1 %v3418_v1 }
  0xdc   : > { %3114 = vmatpush3.bf16.msra.mxu0 %v3356_v4  ;;  %v3391_v4 = vld [vmem:[%s4162_s4 + $0x230] sm:$0xff]  }
  0xdd   : > { %3134 = vmatpush3.bf16.msra.mxu1 %v3357_v5  ;;  %3115 = vmatprep.subr.bf16.mxu0 %v3418_v1 }
  0xde   : > { %3135 = vmatprep.subr.bf16.mxu1 %v3418_v1 }
  0xe0   : > { %3116 = vmatpush3.bf16.msra.mxu0 %v3358_v6  ;;  %v3392_v6 = vld [vmem:[%s4162_s4 + $0x1f8] sm:$0xff]  }
  0xe1   : > { %3136 = vmatpush3.bf16.msra.mxu1 %v3359_v7  ;;  %3117 = vmatprep.subr.bf16.mxu0 %v3418_v1  ;;  %v2285_v7 = vshrl.u32 %v2689_v55, 16 }
  0xe2   : > { %3137 = vmatprep.subr.bf16.mxu1 %v3418_v1 }
  0xe4   : > { %3118 = vmatpush3.bf16.msra.mxu0 %v3360_v8  ;;  %v2289_v8 = vrot.slane %v2287_v63, 1 }
  0xe5   : > { %3138 = vmatpush3.bf16.msra.mxu1 %v3361_v9  ;;  %3143 = vmatprep.subr.bf16.mxu0 %v3418_v1  ;;  %v3393_v9 = vld [vmem:[%s4162_s4 + $0x238] sm:$0xff]  }
  0xe6   : > { %3163 = vmatprep.subr.bf16.mxu1 %v3418_v1 }
  0xe7   : > { %3120 = vmatmul.mubr.bf16.vlgmr.msra.gmra.mrb[24].mxu0 %v2642_v10  ;;  %v2679_v10 = vld [vmem:[%s3546_s12 + $0x4] sm:$0x1] }
  0xe8   : > { %3140 = vmatmul.mubr.bf16.vlgmr.msra.gmra.mrb[24].mxu1 %v2651_v12  ;;  %3144 = vmatpush3.bf16.msra.mxu0 %v3362_v11  ;;  %v2290_v11 = vor.u32 %v2289_v8, %v2285_v7 }
  0xe9   : > { %3164 = vmatpush3.bf16.msra.mxu1 %v3363_v13  ;;  %3145 = vmatprep.subr.bf16.mxu0 %v3418_v1 }
  0xea   : > { %3165 = vmatprep.subr.bf16.mxu1 %v3418_v1  ;;  %3159 = vmatprep.mubr.msk.bf16.mxu0 %vm3419_vm0, %v3418_v1 }
  0xeb   : > { %3179 = vmatprep.mubr.msk.bf16.mxu1 %vm3419_vm0, %v3418_v1 }
  0xec   : > { %3146 = vmatpush3.bf16.msra.mxu0 %v3364_v14 }
  0xed   : > { %3166 = vmatpush3.bf16.msra.mxu1 %v3365_v15  ;;  %3147 = vmatprep.subr.bf16.mxu0 %v3418_v1 }
  0xee   : > { %3167 = vmatprep.subr.bf16.mxu1 %v3418_v1 }
  0xf0   : > { %3148 = vmatpush3.bf16.msra.mxu0 %v3366_v16 }
  0xf1   : > { %3168 = vmatpush3.bf16.msra.mxu1 %v3367_v17  ;;  %3149 = vmatprep.subr.bf16.mxu0 %v3418_v1 }
  0xf2   : > { %3169 = vmatprep.subr.bf16.mxu1 %v3418_v1 }
  0xf4   : > { %3150 = vmatpush3.bf16.msra.mxu0 %v3368_v18 }
  0xf5   : > { %3170 = vmatpush3.bf16.msra.mxu1 %v3369_v19  ;;  %3151 = vmatprep.subr.bf16.mxu0 %v3418_v1 }
  0xf6   : > { %3171 = vmatprep.subr.bf16.mxu1 %v3418_v1 }
  0xf8   : > { %3152 = vmatpush3.bf16.msra.mxu0 %v3370_v20 }
  0xf9   : > { %3172 = vmatpush3.bf16.msra.mxu1 %v3371_v21  ;;  %3153 = vmatprep.subr.bf16.mxu0 %v3418_v1 }
  0xfa   : > { %v479_v25 = vpop.f32.mrb[0].mxu0  ;;  %3173 = vmatprep.subr.bf16.mxu1 %v3418_v1 }
  0xfb   : > { %v567_v26 = vpop.f32.mrb[0].mxu1  ;;  %v2881_v27 = vpop.f32.mrb[1].mxu0 }
  0xfc   : > { %v4048_v29 = vadd.f32 %v567_v26, %v479_v25  ;;  %v2901_v30 = vpop.f32.mrb[1].mxu1  ;;  %v482_v31 = vpop.f32.mrb[2].mxu0  ;;  %3154 = vmatpush3.bf16.msra.mxu0 %v3372_v22 }
  0xfd   : > { %v570_v33 = vpop.f32.mrb[2].mxu1  ;;  %3174 = vmatpush3.bf16.msra.mxu1 %v3373_v24  ;;  %v2882_v34 = vpop.f32.mrb[3].mxu0  ;;  %3155 = vmatprep.subr.bf16.mxu0 %v3418_v1  ;;  %v2613_v31 = vld [vmem:[%s4163_s5] ss:$0 sm:$0xff] }
  0xfe   : > { %v2902_v36 = vpop.f32.mrb[3].mxu1  ;;  %3175 = vmatprep.subr.bf16.mxu1 %v3418_v1 }
 0x100   : > { %3156 = vmatpush3.bf16.msra.mxu0 %v3374_v32 }
 0x101   : > { %3176 = vmatpush3.bf16.msra.mxu1 %v3375_v35  ;;  %3157 = vmatprep.subr.bf16.mxu0 %v3418_v1 }
 0x102   : > { %3177 = vmatprep.subr.bf16.mxu1 %v3418_v1 }
 0x104   : > { %3158 = vmatpush3.bf16.msra.mxu0 %v3376_v39 }
 0x105   : > { %3178 = vmatpush3.bf16.msra.mxu1 %v3377_v40  ;;  %3183 = vmatprep.subr.bf16.mxu0 %v3418_v1 }
 0x106   : > { %3203 = vmatprep.subr.bf16.mxu1 %v3418_v1 }
 0x107   : > { %3160 = vmatmul.mubr.bf16.vlgmr.msra.gmra.mrb[28].mxu0 %v1954_v41 }
 0x108   : > { %3180 = vmatmul.mubr.bf16.vlgmr.msra.gmra.mrb[28].mxu1 %v2670_v43  ;;  %3184 = vmatpush3.bf16.msra.mxu0 %v3378_v42 }
 0x109   : > { %3204 = vmatpush3.bf16.msra.mxu1 %v3379_v44  ;;  %3185 = vmatprep.subr.bf16.mxu0 %v3418_v1 }
 0x10a   : > { %3205 = vmatprep.subr.bf16.mxu1 %v3418_v1  ;;  %3199 = vmatprep.mubr.msk.bf16.mxu0 %vm3419_vm0, %v3418_v1 }
 0x10b   : > { %3219 = vmatprep.mubr.msk.bf16.mxu1 %vm3419_vm0, %v3418_v1 }
 0x10c   : > { %3186 = vmatpush3.bf16.msra.mxu0 %v3380_v45 }
 0x10d   : > { %3206 = vmatpush3.bf16.msra.mxu1 %v3381_v46  ;;  %3187 = vmatprep.subr.bf16.mxu0 %v3418_v1 }
 0x10e   : > { %3207 = vmatprep.subr.bf16.mxu1 %v3418_v1 }
 0x110   : > { %3188 = vmatpush3.bf16.msra.mxu0 %v3382_v47 }
 0x111   : > { %3208 = vmatpush3.bf16.msra.mxu1 %v3383_v48  ;;  %3189 = vmatprep.subr.bf16.mxu0 %v3418_v1 }
 0x112   : > { %3209 = vmatprep.subr.bf16.mxu1 %v3418_v1 }
 0x114   : > { %3190 = vmatpush3.bf16.msra.mxu0 %v3384_v49 }
 0x115   : > { %3210 = vmatpush3.bf16.msra.mxu1 %v3385_v50  ;;  %3191 = vmatprep.subr.bf16.mxu0 %v3418_v1 }
 0x116   : > { %3211 = vmatprep.subr.bf16.mxu1 %v3418_v1 }
 0x118   : > { %3192 = vmatpush3.bf16.msra.mxu0 %v3386_v51 }
 0x119   : > { %3212 = vmatpush3.bf16.msra.mxu1 %v3387_v52  ;;  %3193 = vmatprep.subr.bf16.mxu0 %v3418_v1 }
 0x11a   : > { %v688_v56 = vpop.f32.mrb[4].mxu0  ;;  %3213 = vmatprep.subr.bf16.mxu1 %v3418_v1 }
 0x11b   : > { %v694_v57 = vadd.f32 %v688_v56, %v4048_v29  ;;  %v794_v58 = vpop.f32.mrb[4].mxu1  ;;  %v2921_v59 = vpop.f32.mrb[5].mxu0 }
 0x11c   : > { %v2941_v60 = vpop.f32.mrb[5].mxu1  ;;  %v691_v61 = vpop.f32.mrb[6].mxu0  ;;  %3194 = vmatpush3.bf16.msra.mxu0 %v3388_v53 }
 0x11d   : > { %v800_v0 = vadd.f32 %v794_v58, %v694_v57  ;;  %v797_v2 = vpop.f32.mrb[6].mxu1  ;;  %3214 = vmatpush3.bf16.msra.mxu1 %v3389_v54  ;;  %v2922_v3 = vpop.f32.mrb[7].mxu0  ;;  %3195 = vmatprep.subr.bf16.mxu0 %v3418_v1 }
 0x11e   : > { %v2942_v5 = vpop.f32.mrb[7].mxu1  ;;  %3215 = vmatprep.subr.bf16.mxu1 %v3418_v1 }
 0x120   : > { %3196 = vmatpush3.bf16.msra.mxu0 %v3390_v62 }
 0x121   : > { %3216 = vmatpush3.bf16.msra.mxu1 %v3391_v4  ;;  %3197 = vmatprep.subr.bf16.mxu0 %v3418_v1 }
 0x122   : > { %3217 = vmatprep.subr.bf16.mxu1 %v3418_v1 }
 0x124   : > { %3198 = vmatpush3.bf16.msra.mxu0 %v3392_v6 }
 0x125   : > { %3218 = vmatpush3.bf16.msra.mxu1 %v3393_v9 }
 0x127   : > { %3200 = vmatmul.mubr.bf16.vlgmr.msra.gmra.mrb[32].mxu0 %v2679_v10 }
 0x128   : > { %3220 = vmatmul.mubr.bf16.vlgmr.msra.gmra.mrb[32].mxu1 %v2290_v11 }
 0x13a   : > { %v900_v12 = vpop.f32.mrb[8].mxu0 }
 0x13b   : > { %v906_v13 = vadd.f32 %v900_v12, %v800_v0  ;;  %v1022_v14 = vpop.f32.mrb[8].mxu1  ;;  %v2961_v15 = vpop.f32.mrb[9].mxu0 }
 0x13c   : > { %v2981_v16 = vpop.f32.mrb[9].mxu1  ;;  %v903_v17 = vpop.f32.mrb[10].mxu0 }
 0x13d   : > { %v1028_v18 = vadd.f32 %v1022_v14, %v906_v13  ;;  %v1025_v19 = vpop.f32.mrb[10].mxu1  ;;  %v2962_v20 = vpop.f32.mrb[11].mxu0 }
 0x13e   : > { %v2982_v21 = vpop.f32.mrb[11].mxu1 }
 0x15a   : > { %v1129_v22 = vpop.f32.mrb[12].mxu0 }
 0x15b   : > { %v1135_v23 = vadd.f32 %v1129_v22, %v1028_v18  ;;  %v1236_v24 = vpop.f32.mrb[12].mxu1  ;;  %v3001_v1 = vpop.f32.mrb[13].mxu0 }
 0x15c   : > { %v3021_v25 = vpop.f32.mrb[13].mxu1  ;;  %v1132_v26 = vpop.f32.mrb[14].mxu0 }
 0x15d   : > { %v1242_v27 = vadd.f32 %v1236_v24, %v1135_v23  ;;  %v1239_v28 = vpop.f32.mrb[14].mxu1  ;;  %v3002_v29 = vpop.f32.mrb[15].mxu0 }
 0x15e   : > { %v3022_v30 = vpop.f32.mrb[15].mxu1 }
 0x17a   : > { %v1358_v32 = vpop.f32.mrb[16].mxu0 }
 0x17b   : > { %v1364_v33 = vadd.f32 %v1358_v32, %v1242_v27  ;;  %v1493_v34 = vpop.f32.mrb[16].mxu1  ;;  %v3041_v35 = vpop.f32.mrb[17].mxu0 }
 0x17c   : > { %v3061_v36 = vpop.f32.mrb[17].mxu1  ;;  %v1361_v37 = vpop.f32.mrb[18].mxu0 }
 0x17d   : > { %v1371_v38 = vadd.f32 %v2613_v31, %v1364_v33  ;;  %v1496_v39 = vpop.f32.mrb[18].mxu1  ;;  %v3042_v40 = vpop.f32.mrb[19].mxu0 }
 0x17e   : > { %v3062_v41 = vpop.f32.mrb[19].mxu1 }
 0x17f   : > { %vm1372_vm1 = vcmp.ge.f32.partialorder %v1371_v38, 0.0  ;;  %v1373_v42 = vmul.f32 0.01, %v1371_v38 }
 0x181   : > { %v1374_v43 = vsel %vm1372_vm1, %v1371_v38, %v1373_v42 }
 0x182   : > { %v1375_v44 = vpack.c.bf16 %v1374_v43, %v1374_v43 }
 0x184   : > { %1376 = vst [vmem:[%s4145_s19] sm:$0x1] %v1375_v44 }
 0x19a   : > { %v1581_v45 = vpop.f32.mrb[20].mxu0 }
 0x19b   : > { %v1582_v46 = vadd.f32 %v1581_v45, %v1493_v34  ;;  %v1702_v47 = vpop.f32.mrb[20].mxu1  ;;  %v3081_v48 = vpop.f32.mrb[21].mxu0 }
 0x19c   : > { %v3101_v49 = vpop.f32.mrb[21].mxu1  ;;  %v1584_v50 = vpop.f32.mrb[22].mxu0 }
 0x19d   : > { %v1708_v51 = vadd.f32 %v1702_v47, %v1582_v46  ;;  %v1705_v52 = vpop.f32.mrb[22].mxu1  ;;  %v3082_v53 = vpop.f32.mrb[23].mxu0 }
 0x19e   : > { %v3102_v54 = vpop.f32.mrb[23].mxu1 }
 0x1ba   : > { %v1809_v55 = vpop.f32.mrb[24].mxu0 }
 0x1bb   : > { %v1815_v56 = vadd.f32 %v1809_v55, %v1708_v51  ;;  %v1916_v57 = vpop.f32.mrb[24].mxu1  ;;  %v3121_v58 = vpop.f32.mrb[25].mxu0 }
 0x1bc   : > { %v3141_v59 = vpop.f32.mrb[25].mxu1  ;;  %v1812_v60 = vpop.f32.mrb[26].mxu0 }
 0x1bd   : > { %v1922_v61 = vadd.f32 %v1916_v57, %v1815_v56  ;;  %v1919_v62 = vpop.f32.mrb[26].mxu1  ;;  %v3122_v63 = vpop.f32.mrb[27].mxu0 }
 0x1be   : > { %v3142_v0 = vpop.f32.mrb[27].mxu1 }
 0x1da   : > { %v2038_v2 = vpop.f32.mrb[28].mxu0 }
 0x1db   : > { %v2044_v3 = vadd.f32 %v2038_v2, %v1922_v61  ;;  %v2145_v4 = vpop.f32.mrb[28].mxu1  ;;  %v3161_v5 = vpop.f32.mrb[29].mxu0 }
 0x1dc   : > { %v3181_v6 = vpop.f32.mrb[29].mxu1  ;;  %v2041_v7 = vpop.f32.mrb[30].mxu0 }
 0x1dd   : > { %v2151_v8 = vadd.f32 %v2145_v4, %v2044_v3  ;;  %v2148_v9 = vpop.f32.mrb[30].mxu1  ;;  %v3162_v10 = vpop.f32.mrb[31].mxu0 }
 0x1de   : > { %v3182_v11 = vpop.f32.mrb[31].mxu1 }
 0x1fa   : > { %v2252_v12 = vpop.f32.mrb[32].mxu0 }
 0x1fb   : > { %v2258_v13 = vadd.f32 %v2252_v12, %v2151_v8  ;;  %v2374_v14 = vpop.f32.mrb[32].mxu1  ;;  %v3201_v15 = vpop.f32.mrb[33].mxu0 }
 0x1fc   : > { %v3221_v16 = vpop.f32.mrb[33].mxu1  ;;  %v2255_v17 = vpop.f32.mrb[34].mxu0 }
 0x1fd   : > { %v2380_v18 = vadd.f32 %v2374_v14, %v2258_v13  ;;  %v2377_v19 = vpop.f32.mrb[34].mxu1  ;;  %v3202_v20 = vpop.f32.mrb[35].mxu0 }
 0x1fe   : > { %v3222_v21 = vpop.f32.mrb[35].mxu1 }
 0x1ff   : > { %v2381_v22 = vadd.f32 %v2613_v31, %v2380_v18 }
 0x201   : > { %vm2382_vm2 = vcmp.ge.f32.partialorder %v2381_v22, 0.0  ;;  %v2383_v23 = vmul.f32 0.01, %v2381_v22 }
 0x203   : > { %v2384_v24 = vsel %vm2382_vm2, %v2381_v22, %v2383_v23 }
 0x204   : > { %v2385_v1 = vpack.c.bf16 %v2384_v24, %v2384_v24 }
 0x206   : > { %2698 = vst [vmem:[%s4145_s19 + $0x1] sm:$0x1] %v2385_v1 }
 0x207 PF: > { %s16_s23 = sadd.s32 1, %s3416_s23   ;;  %s4165_s21 = smov %s3412_s22 }
 0x208   : > { %p13_p5 = scmp.ge.s32.totalorder %s16_s23, 4   ;;  %s4166_s22 = smov %s4168_s24 }
 0x20a   :  { %15 = sbr.rel (!%p13_p5) target bundleno = 2 (0x2), region = 96 }

// kernel: gradual_style_block_forward.4
= control target key start
LH: loop header
LB: loop body
LE: loop exit
PB: predicated region body
PF: predicated region fallthrough
CT: control target
= control target key end

     0   :  { %s5511_s21 = smov 0   ;;  %s5513_s22 = smov 0   ;;  %s6242_s0 = inlined_call_operand.vmem [shape: bf16[2,9,9,4], index: 0, kind: input, shape index: {}]   ;;  %s6243_s1 = inlined_call_operand.vmem [shape: bf16[2,9,9,4], index: 1, kind: input, shape index: {}]   ;;  %s6244_s2 = inlined_call_operand.vmem [shape: bf16[2,9,9,4], index: 2, kind: input, shape index: {}]   ;;  %s6245_s3 = inlined_call_operand.vmem [shape: bf16[2,9,9,4], index: 3, kind: input, shape index: {}]   ;;  %s6246_s4 = inlined_call_operand.vmem [shape: bf16[36,128], index: 4, kind: input, shape index: {}]   ;;  %s6247_s5 = inlined_call_operand.vmem [shape: f32[1,128], index: 5, kind: input, shape index: {}]   ;;  %s6248_s6 = inlined_call_operand.vmem [shape: bf16[2,8,8,128], index: 6, kind: output, shape index: {}]  }
   0x1   :  { %s5515_s23 = smov 0  }
   0x2 LB: > { %s25_s24 = sadd.s32 1, %s5468_s22  ;;  %p4557_p0 = scmp.ge.s32.totalorder %s5472_s23, 1  ;;  %s5472_s23 = sphi %s5515_s23, %s16_s23   ;;  %s5468_s22 = sphi %s5513_s22, %s6250_s22   ;;  %s5464_s21 = sphi %s5511_s21, %s6249_s21  }
   0x3   : > { %p26_p1 = scmp.ge.s32.totalorder %s25_s24, 2  ;;  %p273_p2 = scmp.lt.s32.totalorder %s5472_s23, 3 }
   0x5   : > { %s6252_s24 = smov (%p26_p1, %s25_s24), 0  ;;  %p274_p3 = pnand %p4557_p0, %p273_p2 }
   0x6   : > { %v5394_v0 = vld [vmem:[%s6246_s4] ss:$0 sps:$4 sm:$0xcc] (!%p274_p3)   ;;  %v5474_v1 = vmov (!%p274_p3), 0.0   ;;  %vm377_vm0 = vcmask (!%p274_p3), 1041408   ;;  %p328_p4 = scmp.lt.s32.totalorder (!%p274_p3), %s5464_s21, 1 }
   0x7   : > { %277 = sbr.rel (%p274_p3) target bundleno = 523 (0x20b), region = 44  ;;  %4935 = vmatprep.subr.bf16.mxu0 (!%p274_p3), %v5474_v1  ;;  %4941 = vmatprep.subr.bf16.mxu1 (!%p274_p3), %v5474_v1  ;;  %v366_v2 = vld [vmem:[%s6246_s4] sm:$0x3] (!%p274_p3)  ;;  %v372_v3 = vrot.slane (!%p274_p3), %v5394_v0, 2  ;;  %vm5475_vm1 = vmmov (!%p274_p3), 0   ;;  %vm373_vm2 = vcmask (!%p274_p3), 31744  }
   0x8   : > { %v425_v4 = vsel (!%p274_p3), %vm377_vm0, %v366_v2, 0  ;;  %4937 = vmatprep.mubr.msk.bf16.mxu0 (!%p274_p3), %vm5475_vm1, %v5474_v1  ;;  %4943 = vmatprep.mubr.msk.bf16.mxu1 (!%p274_p3), %vm5475_vm1, %v5474_v1  ;;  %v5395_v5 = vld [vmem:[%s6246_s4 + $0x4] ss:$0 sps:$4 sm:$0xcc] (!%p274_p3)   ;;  %v583_v15 = vld [vmem:[%s6246_s4 + $0x8] sm:$0x3] (!%p274_p3) }
   0x9   : > { %4942 = vmatpush3.bf16.msra.mxu1 (!%p274_p3), %v425_v4  ;;  %v379_v6 = vsel (!%p274_p3), %vm377_vm0, %v372_v3, 0  ;;  %v469_v7 = vld [vmem:[%s6246_s4 + $0x4] sm:$0x3] (!%p274_p3)  ;;  %v534_v8 = vrot.slane (!%p274_p3), %v5395_v5, 2  ;;  %v588_v23 = vsel (!%p274_p3), %vm377_vm0, %v583_v15, 0 }
   0xa   : > { %4953 = vmatprep.subr.bf16.mxu1 (!%p274_p3), %v5474_v1  ;;  %4936 = vmatpush3.bf16.msra.mxu0 (!%p274_p3), %v379_v6  ;;  %v5397_v9 = vld [vmem:[%s6246_s4 + $0x8] ss:$0 sps:$4 sm:$0xcc] (!%p274_p3)   ;;  %v486_v10 = vsel (!%p274_p3), %vm377_vm0, %v469_v7, 0  ;;  %v699_v30 = vld [vmem:[%s6246_s4 + $0xc] sm:$0x3] (!%p274_p3) }
   0xb   : > { %4947 = vmatprep.subr.bf16.mxu0 (!%p274_p3), %v5474_v1  ;;  %v539_v11 = vsel (!%p274_p3), %vm377_vm0, %v534_v8, 0  ;;  %v649_v16 = vrot.slane (!%p274_p3), %v5397_v9, 2  ;;  %v5399_v26 = vld [vmem:[%s6246_s4 + $0xc] ss:$0 sps:$4 sm:$0xcc] (!%p274_p3)   ;;  %v704_v33 = vsel (!%p274_p3), %vm377_vm0, %v699_v30, 0 }
   0xc   : > { %v753_v29 = vrot.slane (!%p274_p3), %v5399_v26, 2  ;;  %v5400_v35 = vld [vmem:[%s6246_s4] ss:$0 sps:$4 sm:$0xcc] (!%p274_p3)   ;;  %v803_v38 = vld [vmem:[%s6246_s4 + $0x10] sm:$0x3] (!%p274_p3) }
   0xd   : > { %v654_v25 = vsel (!%p274_p3), %vm377_vm0, %v649_v16, 0  ;;  %v882_v37 = vrot.slane (!%p274_p3), %v5400_v35, 2  ;;  %v820_v42 = vsel (!%p274_p3), %vm377_vm0, %v803_v38, 0  ;;  %v876_v47 = vld [vmem:[%s6246_s4] sm:$0x3] (!%p274_p3) }
   0xe   : > { %s6254_s21 = smov (!%p328_p4, %s5464_s21), 1  ;;  %v758_v34 = vsel %vm377_vm0, %v753_v29, 0  ;;  %v977_v48 = vld [vmem:[%s6246_s4 + $0x4] sm:$0x3]  ;;  %v933_v52 = vsel %vm377_vm0, %v876_v47, 0 }
   0xf   : > { %s5553_s9 = smul.u32 72, %s6254_s21  ;;  %v887_v43 = vsel %vm377_vm0, %v882_v37, 0  ;;  %v994_v53 = vsel %vm377_vm0, %v977_v48, 0  ;;  %v5403_v54 = vld [vmem:[%s6246_s4 + $0x4] ss:$0 sps:$4 sm:$0xcc]  }
  0x10   : > { %v1093_v57 = vld [vmem:[%s6246_s4 + $0x8] sm:$0x3]  ;;  %v1043_v58 = vrot.slane %v5403_v54, 2  ;;  %v1209_v3 = vld [vmem:[%s6246_s4 + $0xc] sm:$0x3]  ;;  %s4790_s25 = sshll.u32 %s6254_s21, 5 }
  0x11   : > { %s5563_s14 = scalar_lea.vmem %s6242_s0, %s5553_s9  ;;  %s5569_s17 = scalar_lea.vmem %s6243_s1, %s5553_s9  ;;  %v1098_v61 = vsel %vm377_vm0, %v1093_v57, 0  ;;  %v5404_v63 = vld [vmem:[%s6246_s4 + $0x8] ss:$0 sps:$4 sm:$0xcc]   ;;  %v1214_v7 = vsel %vm377_vm0, %v1209_v3, 0 }
  0x12   : > { %s5577_s20 = scalar_lea.vmem %s6244_s2, %s5553_s9  ;;  %v367_v12 = vld [vmem:[%s5569_s17] sm:$0xf]  ;;  %s5610_s7 = scalar_lea.vmem %s6245_s3, %s5553_s9  ;;  %v5401_v36 = vld [vmem:[%s5563_s14 + $0x8] sm:$0x1f]   ;;  %v1048_v62 = vsel %vm377_vm0, %v1043_v58, 0  ;;  %v1159_v2 = vrot.slane %v5404_v63, 2 }
  0x13   : > { %v365_v13 = vld [vmem:[%s5563_s14] sm:$0xf]  ;;  %4938 = vmatmul.mubr.msk.bf16.vlgmr.msra.gmra.mrb[0].mxu0 %vm373_vm2, %v367_v12  ;;  %v812_v39 = vshll.u32 %v5401_v36, 16  ;;  %v4575_v40 = vld [vmem:[%s5563_s14 + $0x8] sm:$0xf]  ;;  %v810_v44 = vshrl.u32 %v5401_v36, 16  ;;  %s6158_s28 = scalar_lea.vmem %s6248_s6, %s4790_s25 }
  0x14   : > { %4944 = vmatmul.mubr.msk.bf16.vlgmr.msra.gmra.mrb[0].mxu1 %vm373_vm2, %v365_v13  ;;  %v5396_v14 = vld [vmem:[%s5563_s14] sm:$0x1f]   ;;  %4948 = vmatpush3.bf16.msra.mxu0 %v486_v10  ;;  %v4577_v41 = vld [vmem:[%s5569_s17 + $0x8] sm:$0xf]  ;;  %v1164_v8 = vsel %vm377_vm0, %v1159_v2, 0 }
  0x15   : > { %4954 = vmatpush3.bf16.msra.mxu1 %v539_v11  ;;  %4949 = vmatprep.mubr.msk.bf16.mxu0 %vm5475_vm1, %v5474_v1  ;;  %v476_v17 = vshrl.u32 %v5396_v14, 16  ;;  %v478_v18 = vshll.u32 %v5396_v14, 16  ;;  %v5398_v19 = vld [vmem:[%s5577_s20] sm:$0x1f]   ;;  %v814_v45 = vrot.slane %v812_v39, 1 }
  0x16   : > { %4955 = vmatprep.mubr.msk.bf16.mxu1 %vm5475_vm1, %v5474_v1  ;;  %4959 = vmatprep.subr.bf16.mxu0 %v5474_v1  ;;  %v642_v21 = vshll.u32 %v5398_v19, 16  ;;  %v529_v22 = vld [vmem:[%s5577_s20] sm:$0xf]  ;;  %v640_v27 = vshrl.u32 %v5398_v19, 16  ;;  %v5402_v46 = vld [vmem:[%s5563_s14 + $0x8] sm:$0x1f]  }
  0x17   : > { %4965 = vmatprep.subr.bf16.mxu1 %v5474_v1  ;;  %v480_v20 = vrot.slane %v478_v18, 1  ;;  %v582_v32 = vld [vmem:[%s5610_s7] sm:$0xf]  ;;  %v815_v49 = vor.u32 %v814_v45, %v810_v44  ;;  %v986_v50 = vshll.u32 %v5402_v46, 16  ;;  %v4586_v51 = vld [vmem:[%s5569_s17 + $0x8] sm:$0xf] }
  0x18   : > { %v644_v28 = vrot.slane %v642_v21, 1  ;;  %v984_v55 = vshrl.u32 %v5402_v46, 16  ;;  %v4585_v60 = vld [vmem:[%s5563_s14 + $0x8] sm:$0xf]  ;;  %v5407_v12 = vld [vmem:[%s5563_s14 + $0x10] sm:$0x1f]  }
  0x19   : > { %v481_v24 = vor.u32 %v480_v20, %v476_v17  ;;  %v988_v56 = vrot.slane %v986_v50, 1  ;;  %v5405_v0 = vld [vmem:[%s5577_s20 + $0x8] sm:$0x1f]   ;;  %v1313_v14 = vld [vmem:[%s6246_s4 + $0x10] sm:$0x3]  ;;  %v1322_v17 = vshll.u32 %v5407_v12, 16 }
  0x1a   : > { %v645_v31 = vor.u32 %v644_v28, %v640_v27  ;;  %v1152_v4 = vshll.u32 %v5405_v0, 16  ;;  %v4594_v5 = vld [vmem:[%s5577_s20 + $0x8] sm:$0xf]  ;;  %v5406_v9 = vld [vmem:[%s6246_s4 + $0xc] ss:$0 sps:$4 sm:$0xcc]  }
  0x1b   : > { %4950 = vmatmul.mubr.msk.bf16.vlgmr.msra.gmra.mrb[4].mxu0 %vm373_vm2, %v481_v24  ;;  %v989_v59 = vor.u32 %v988_v56, %v984_v55  ;;  %v4597_v6 = vld [vmem:[%s5610_s7 + $0x8] sm:$0xf]  ;;  %v1150_v10 = vshrl.u32 %v5405_v0, 16  ;;  %v1263_v13 = vrot.slane %v5406_v9, 2  ;;  %v4604_v16 = vld [vmem:[%s5563_s14 + $0x10] sm:$0xf] }
  0x1c   : > { %4956 = vmatmul.mubr.msk.bf16.vlgmr.msra.gmra.mrb[4].mxu1 %vm373_vm2, %v529_v22  ;;  %4960 = vmatpush3.bf16.msra.mxu0 %v588_v23  ;;  %v1154_v11 = vrot.slane %v1152_v4, 1  ;;  %v1330_v18 = vsel %vm377_vm0, %v1313_v14, 0  ;;  %v5408_v20 = vld [vmem:[%s6246_s4] ss:$0 sps:$4 sm:$0xcc]   ;;  %v1320_v21 = vshrl.u32 %v5407_v12, 16 }
  0x1d   : > { %4966 = vmatpush3.bf16.msra.mxu1 %v654_v25  ;;  %4961 = vmatprep.mubr.msk.bf16.mxu0 %vm5475_vm1, %v5474_v1  ;;  %v1268_v19 = vsel %vm377_vm0, %v1263_v13, 0  ;;  %v1324_v22 = vrot.slane %v1322_v17, 1  ;;  %v1387_v23 = vrot.slane %v5408_v20, 2  ;;  %v1381_v24 = vld [vmem:[%s6246_s4] sm:$0x3] }
  0x1e   : > { %4967 = vmatprep.mubr.msk.bf16.mxu1 %vm5475_vm1, %v5474_v1  ;;  %4971 = vmatprep.subr.bf16.mxu0 %v5474_v1  ;;  %v1155_v15 = vor.u32 %v1154_v11, %v1150_v10  ;;  %v4606_v26 = vld [vmem:[%s5569_s17 + $0x10] sm:$0xf]  ;;  %v1438_v28 = vsel %vm377_vm0, %v1381_v24, 0  ;;  %v5409_v29 = vld [vmem:[%s6246_s4 + $0x4] ss:$0 sps:$4 sm:$0xcc]  }
  0x1f   : > { %4977 = vmatprep.subr.bf16.mxu1 %v5474_v1  ;;  %v1325_v25 = vor.u32 %v1324_v22, %v1320_v21  ;;  %v1392_v27 = vsel %vm377_vm0, %v1387_v23, 0  ;;  %v5410_v30 = vld [vmem:[%s5563_s14 + $0x10] sm:$0x1f]   ;;  %v5411_v38 = vld [vmem:[%s6246_s4 + $0x8] ss:$0 sps:$4 sm:$0xcc]  }
  0x20   : > { %v4614_v35 = vld [vmem:[%s5563_s14 + $0x10] sm:$0xf]  ;;  %v1489_v39 = vshrl.u32 %v5410_v30, 16  ;;  %v5414_v56 = vld [vmem:[%s6246_s4] ss:$0 sps:$4 sm:$0xcc]  }
  0x21   : > { %v4623_v46 = vld [vmem:[%s5577_s20 + $0x10] sm:$0xf]  ;;  %v4633_v63 = vld [vmem:[%s5563_s14 + $0x18] sm:$0xf] }
  0x22   : > { %v4626_v54 = vld [vmem:[%s5610_s7 + $0x10] sm:$0xf]  ;;  %v4635_v0 = vld [vmem:[%s5569_s17 + $0x18] sm:$0xf] }
  0x23   : > { %4962 = vmatmul.mubr.msk.bf16.vlgmr.msra.gmra.mrb[8].mxu0 %vm373_vm2, %v582_v32  ;;  %v1482_v32 = vld [vmem:[%s6246_s4 + $0x4] sm:$0x3]  ;;  %v4644_v11 = vld [vmem:[%s5569_s17 + $0x18] sm:$0xf] }
  0x24   : > { %4968 = vmatmul.mubr.msk.bf16.vlgmr.msra.gmra.mrb[8].mxu1 %vm373_vm2, %v645_v31  ;;  %4972 = vmatpush3.bf16.msra.mxu0 %v704_v33  ;;  %v1548_v31 = vrot.slane %v5409_v29, 2  ;;  %v1491_v33 = vshll.u32 %v5410_v30, 16  ;;  %v1499_v36 = vsel %vm377_vm0, %v1482_v32, 0  ;;  %v5417_v14 = vld [vmem:[%s6246_s4 + $0x4] ss:$0 sps:$4 sm:$0xcc]  }
  0x25   : > { %4978 = vmatpush3.bf16.msra.mxu1 %v758_v34  ;;  %4973 = vmatprep.mubr.msk.bf16.mxu0 %vm5475_vm1, %v5474_v1  ;;  %v4615_v34 = vld [vmem:[%s5569_s17 + $0x10] sm:$0xf]  ;;  %v2053_v17 = vrot.slane %v5417_v14, 2  ;;  %v4643_v20 = vld [vmem:[%s5563_s14 + $0x18] sm:$0xf] }
  0x26   : > { %4979 = vmatprep.mubr.msk.bf16.mxu1 %vm5475_vm1, %v5474_v1  ;;  %4983 = vmatprep.subr.bf16.mxu0 %v5474_v1  ;;  %v1553_v37 = vsel %vm377_vm0, %v1548_v31, 0  ;;  %v5418_v23 = vld [vmem:[%s6246_s4 + $0x8] ss:$0 sps:$4 sm:$0xcc]   ;;  %v5419_v24 = vld [vmem:[%s5577_s20 + $0x18] sm:$0x1f]  }
  0x27   : > { %4989 = vmatprep.subr.bf16.mxu1 %v5474_v1  ;;  %v2058_v21 = vsel %vm377_vm0, %v2053_v17, 0  ;;  %v4655_v29 = vld [vmem:[%s5610_s7 + $0x18] sm:$0xf]  ;;  %v5420_v32 = vld [vmem:[%s6246_s4 + $0xc] ss:$0 sps:$4 sm:$0xcc]  }
  0x2b   : > { %4974 = vmatmul.mubr.msk.bf16.vlgmr.msra.gmra.mrb[12].mxu0 %vm373_vm2, %v4575_v40  ;;  %v1493_v40 = vrot.slane %v1491_v33, 1  ;;  %v2160_v33 = vshrl.u32 %v5419_v24, 16 }
  0x2c   : > { %4980 = vmatmul.mubr.msk.bf16.vlgmr.msra.gmra.mrb[12].mxu1 %vm373_vm2, %v4577_v41  ;;  %4984 = vmatpush3.bf16.msra.mxu0 %v820_v42  ;;  %v5412_v41 = vld [vmem:[%s5577_s20 + $0x10] sm:$0x1f]   ;;  %v1598_v42 = vld [vmem:[%s6246_s4 + $0x8] sm:$0x3] }
  0x2d   : > { %4990 = vmatpush3.bf16.msra.mxu1 %v887_v43  ;;  %4985 = vmatprep.mubr.msk.bf16.mxu0 %vm5475_vm1, %v5474_v1  ;;  %v1664_v43 = vrot.slane %v5411_v38, 2  ;;  %v1494_v44 = vor.u32 %v1493_v40, %v1489_v39  ;;  %v1657_v45 = vshll.u32 %v5412_v41, 16  ;;  %v1603_v47 = vsel %vm377_vm0, %v1598_v42, 0  ;;  %v4662_v40 = vld [vmem:[%s5563_s14 + $0x20] sm:$0xf] }
  0x2e   : > { %4991 = vmatprep.mubr.msk.bf16.mxu1 %vm5475_vm1, %v5474_v1  ;;  %4995 = vmatprep.subr.bf16.mxu0 %v5474_v1  ;;  %v1655_v50 = vshrl.u32 %v5412_v41, 16 }
  0x2f   : > { %5001 = vmatprep.subr.bf16.mxu1 %v5474_v1  ;;  %v1669_v48 = vsel %vm377_vm0, %v1664_v43, 0  ;;  %v5422_v43 = vld [vmem:[%s6246_s4] ss:$0 sps:$4 sm:$0xcc]  }
  0x33   : > { %4986 = vmatmul.mubr.msk.bf16.vlgmr.msra.gmra.mrb[16].mxu0 %vm373_vm2, %v815_v49  ;;  %v5413_v49 = vld [vmem:[%s6246_s4 + $0xc] ss:$0 sps:$4 sm:$0xcc]  }
  0x34   : > { %4992 = vmatmul.mubr.msk.bf16.vlgmr.msra.gmra.mrb[16].mxu1 %vm373_vm2, %v4586_v51  ;;  %4996 = vmatpush3.bf16.msra.mxu0 %v933_v52  ;;  %v1659_v51 = vrot.slane %v1657_v45, 1  ;;  %v1768_v52 = vrot.slane %v5413_v49, 2  ;;  %v4664_v49 = vld [vmem:[%s5569_s17 + $0x20] sm:$0xf] }
  0x35   : > { %5002 = vmatpush3.bf16.msra.mxu1 %v994_v53  ;;  %4997 = vmatprep.mubr.msk.bf16.mxu0 %vm5475_vm1, %v5474_v1  ;;  %v1714_v53 = vld [vmem:[%s6246_s4 + $0xc] sm:$0x3] }
  0x36   : > { %5003 = vmatprep.mubr.msk.bf16.mxu1 %vm5475_vm1, %v5474_v1  ;;  %5007 = vmatprep.subr.bf16.mxu0 %v5474_v1  ;;  %v1660_v55 = vor.u32 %v1659_v51, %v1655_v50  ;;  %v1719_v57 = vsel %vm377_vm0, %v1714_v53, 0  ;;  %v1773_v58 = vsel %vm377_vm0, %v1768_v52, 0  ;;  %v5423_v52 = vld [vmem:[%s6246_s4 + $0x4] ss:$0 sps:$4 sm:$0xcc]  }
  0x37   : > { %5013 = vmatprep.subr.bf16.mxu1 %v5474_v1  ;;  %v5424_v53 = vld [vmem:[%s5563_s14 + $0x20] sm:$0x1f]  }
  0x3b   : > { %4998 = vmatmul.mubr.msk.bf16.vlgmr.msra.gmra.mrb[20].mxu0 %vm373_vm2, %v4585_v60  ;;  %v1892_v60 = vrot.slane %v5414_v56, 2  ;;  %v2501_v56 = vshll.u32 %v5424_v53, 16 }
  0x3c   : > { %5004 = vmatmul.mubr.msk.bf16.vlgmr.msra.gmra.mrb[20].mxu1 %vm373_vm2, %v989_v59  ;;  %5008 = vmatpush3.bf16.msra.mxu0 %v1048_v62  ;;  %v5415_v59 = vld [vmem:[%s5563_s14 + $0x18] sm:$0x1f]  }
  0x3d   : > { %5014 = vmatpush3.bf16.msra.mxu1 %v1098_v61  ;;  %5009 = vmatprep.mubr.msk.bf16.mxu0 %vm5475_vm1, %v5474_v1  ;;  %v1818_v61 = vld [vmem:[%s6246_s4 + $0x10] sm:$0x3]  ;;  %v1827_v62 = vshll.u32 %v5415_v59, 16  ;;  %v1897_v3 = vsel %vm377_vm0, %v1892_v60, 0  ;;  %v1825_v4 = vshrl.u32 %v5415_v59, 16 }
  0x3e   : > { %5015 = vmatprep.mubr.msk.bf16.mxu1 %vm5475_vm1, %v5474_v1  ;;  %5019 = vmatprep.subr.bf16.mxu0 %v5474_v1  ;;  %v1835_v2 = vsel %vm377_vm0, %v1818_v61, 0  ;;  %v5425_v61 = vld [vmem:[%s6246_s4 + $0x8] ss:$0 sps:$4 sm:$0xcc]  }
  0x3f   : > { %5025 = vmatprep.subr.bf16.mxu1 %v5474_v1 }
  0x43   : > { %5010 = vmatmul.mubr.msk.bf16.vlgmr.msra.gmra.mrb[24].mxu0 %vm373_vm2, %v4594_v5  ;;  %v1829_v5 = vrot.slane %v1827_v62, 1  ;;  %v2499_v62 = vshrl.u32 %v5424_v53, 16 }
  0x44   : > { %5016 = vmatmul.mubr.msk.bf16.vlgmr.msra.gmra.mrb[24].mxu1 %vm373_vm2, %v4597_v6  ;;  %5020 = vmatpush3.bf16.msra.mxu0 %v1164_v8  ;;  %v5416_v6 = vld [vmem:[%s5563_s14 + $0x18] sm:$0x1f]   ;;  %v1987_v8 = vld [vmem:[%s6246_s4 + $0x4] sm:$0x3] }
  0x45   : > { %5026 = vmatpush3.bf16.msra.mxu1 %v1214_v7  ;;  %5021 = vmatprep.mubr.msk.bf16.mxu0 %vm5475_vm1, %v5474_v1  ;;  %v1886_v7 = vld [vmem:[%s6246_s4] sm:$0x3]  ;;  %v1830_v9 = vor.u32 %v1829_v5, %v1825_v4  ;;  %v1996_v10 = vshll.u32 %v5416_v6, 16  ;;  %v2004_v13 = vsel %vm377_vm0, %v1987_v8, 0 }
  0x46   : > { %5027 = vmatprep.mubr.msk.bf16.mxu1 %vm5475_vm1, %v5474_v1  ;;  %5031 = vmatprep.subr.bf16.mxu0 %v5474_v1  ;;  %v1943_v12 = vsel %vm377_vm0, %v1886_v7, 0 }
  0x47   : > { %5037 = vmatprep.subr.bf16.mxu1 %v5474_v1 }
  0x4b   : > { %5022 = vmatmul.mubr.msk.bf16.vlgmr.msra.gmra.mrb[28].mxu0 %vm373_vm2, %v1155_v15  ;;  %v1994_v15 = vshrl.u32 %v5416_v6, 16  ;;  %v4681_v6 = vld [vmem:[%s5577_s20 + $0x20] sm:$0xf] }
  0x4c   : > { %5028 = vmatmul.mubr.msk.bf16.vlgmr.msra.gmra.mrb[28].mxu1 %vm373_vm2, %v4604_v16  ;;  %5032 = vmatpush3.bf16.msra.mxu0 %v1268_v19  ;;  %v1998_v16 = vrot.slane %v1996_v10, 1 }
  0x4d   : > { %5038 = vmatpush3.bf16.msra.mxu1 %v1330_v18  ;;  %5033 = vmatprep.mubr.msk.bf16.mxu0 %vm5475_vm1, %v5474_v1  ;;  %v2103_v18 = vld [vmem:[%s6246_s4 + $0x8] sm:$0x3] }
  0x4e   : > { %5039 = vmatprep.mubr.msk.bf16.mxu1 %vm5475_vm1, %v5474_v1  ;;  %5043 = vmatprep.subr.bf16.mxu0 %v5474_v1  ;;  %v1999_v19 = vor.u32 %v1998_v16, %v1994_v15  ;;  %v2108_v22 = vsel %vm377_vm0, %v2103_v18, 0  ;;  %v4684_v15 = vld [vmem:[%s5610_s7 + $0x20] sm:$0xf] }
  0x4f   : > { %5049 = vmatprep.subr.bf16.mxu1 %v5474_v1  ;;  %v5428_v18 = vld [vmem:[%s6246_s4] ss:$0 sps:$4 sm:$0xcc]  }
  0x53   : > { %5034 = vmatmul.mubr.msk.bf16.vlgmr.msra.gmra.mrb[32].mxu0 %vm373_vm2, %v4606_v26  ;;  %v2219_v26 = vld [vmem:[%s6246_s4 + $0xc] sm:$0x3] }
  0x54   : > { %5040 = vmatmul.mubr.msk.bf16.vlgmr.msra.gmra.mrb[32].mxu1 %vm373_vm2, %v1325_v25  ;;  %5044 = vmatpush3.bf16.msra.mxu0 %v1392_v27  ;;  %v2169_v25 = vrot.slane %v5418_v23, 2  ;;  %v2162_v27 = vshll.u32 %v5419_v24, 16  ;;  %v2224_v31 = vsel %vm377_vm0, %v2219_v26, 0  ;;  %v4691_v23 = vld [vmem:[%s5563_s14 + $0x28] sm:$0xf] }
  0x55   : > { %5050 = vmatpush3.bf16.msra.mxu1 %v1438_v28  ;;  %5045 = vmatprep.mubr.msk.bf16.mxu0 %vm5475_vm1, %v5474_v1  ;;  %v4652_v28 = vld [vmem:[%s5577_s20 + $0x18] sm:$0xf]  ;;  %v4693_v24 = vld [vmem:[%s5569_s17 + $0x28] sm:$0xf] }
  0x56   : > { %5051 = vmatprep.mubr.msk.bf16.mxu1 %vm5475_vm1, %v5474_v1  ;;  %5055 = vmatprep.subr.bf16.mxu0 %v5474_v1  ;;  %v2174_v30 = vsel %vm377_vm0, %v2169_v25, 0 }
  0x57   : > { %5061 = vmatprep.subr.bf16.mxu1 %v5474_v1 }
  0x5b   : > { %5046 = vmatmul.mubr.msk.bf16.vlgmr.msra.gmra.mrb[36].mxu0 %vm373_vm2, %v4615_v34  ;;  %v2164_v34 = vrot.slane %v2162_v27, 1 }
  0x5c   : > { %5052 = vmatmul.mubr.msk.bf16.vlgmr.msra.gmra.mrb[36].mxu1 %vm373_vm2, %v4614_v35  ;;  %5056 = vmatpush3.bf16.msra.mxu0 %v1499_v36  ;;  %v5421_v35 = vld [vmem:[%s5563_s14 + $0x20] sm:$0x1f]   ;;  %v2273_v36 = vrot.slane %v5420_v32, 2 }
  0x5d   : > { %5062 = vmatpush3.bf16.msra.mxu1 %v1553_v37  ;;  %5057 = vmatprep.mubr.msk.bf16.mxu0 %vm5475_vm1, %v5474_v1  ;;  %v2323_v37 = vld [vmem:[%s6246_s4 + $0x10] sm:$0x3]  ;;  %v2165_v38 = vor.u32 %v2164_v34, %v2160_v33  ;;  %v2332_v39 = vshll.u32 %v5421_v35, 16  ;;  %v4702_v34 = vld [vmem:[%s5569_s17 + $0x28] sm:$0xf] }
  0x5e   : > { %5063 = vmatprep.mubr.msk.bf16.mxu1 %vm5475_vm1, %v5474_v1  ;;  %5067 = vmatprep.subr.bf16.mxu0 %v5474_v1  ;;  %v2278_v41 = vsel %vm377_vm0, %v2273_v36, 0  ;;  %v2340_v42 = vsel %vm377_vm0, %v2323_v37, 0  ;;  %v5431_v37 = vld [vmem:[%s6246_s4 + $0x4] ss:$0 sps:$4 sm:$0xcc]  }
  0x5f   : > { %5073 = vmatprep.subr.bf16.mxu1 %v5474_v1  ;;  %v2334_v45 = vrot.slane %v2332_v39, 1 }
  0x63   : > { %5058 = vmatmul.mubr.msk.bf16.vlgmr.msra.gmra.mrb[40].mxu0 %vm373_vm2, %v1494_v44  ;;  %v2330_v44 = vshrl.u32 %v5421_v35, 16 }
  0x64   : > { %5064 = vmatmul.mubr.msk.bf16.vlgmr.msra.gmra.mrb[40].mxu1 %vm373_vm2, %v4623_v46  ;;  %5068 = vmatpush3.bf16.msra.mxu0 %v1603_v47  ;;  %v2397_v46 = vrot.slane %v5422_v43, 2  ;;  %v2391_v47 = vld [vmem:[%s6246_s4] sm:$0x3]  ;;  %v4701_v43 = vld [vmem:[%s5563_s14 + $0x28] sm:$0xf] }
  0x65   : > { %5074 = vmatpush3.bf16.msra.mxu1 %v1669_v48  ;;  %5069 = vmatprep.mubr.msk.bf16.mxu0 %vm5475_vm1, %v5474_v1  ;;  %v2335_v48 = vor.u32 %v2334_v45, %v2330_v44  ;;  %v2448_v51 = vsel %vm377_vm0, %v2391_v47, 0  ;;  %v5433_v47 = vld [vmem:[%s5577_s20 + $0x28] sm:$0x1f]  }
  0x66   : > { %5075 = vmatprep.mubr.msk.bf16.mxu1 %vm5475_vm1, %v5474_v1  ;;  %5079 = vmatprep.subr.bf16.mxu0 %v5474_v1  ;;  %v2402_v50 = vsel %vm377_vm0, %v2397_v46, 0  ;;  %v5432_v46 = vld [vmem:[%s6246_s4 + $0x8] ss:$0 sps:$4 sm:$0xcc]  }
  0x67   : > { %5085 = vmatprep.subr.bf16.mxu1 %v5474_v1 }
  0x6b   : > { %5070 = vmatmul.mubr.msk.bf16.vlgmr.msra.gmra.mrb[44].mxu0 %vm373_vm2, %v4626_v54  ;;  %v2558_v54 = vrot.slane %v5423_v52, 2  ;;  %v4713_v52 = vld [vmem:[%s5610_s7 + $0x28] sm:$0xf] }
  0x6c   : > { %5076 = vmatmul.mubr.msk.bf16.vlgmr.msra.gmra.mrb[44].mxu1 %vm373_vm2, %v1660_v55  ;;  %5080 = vmatpush3.bf16.msra.mxu0 %v1719_v57  ;;  %v2492_v55 = vld [vmem:[%s6246_s4 + $0x4] sm:$0x3]  ;;  %v4673_v57 = vld [vmem:[%s5569_s17 + $0x20] sm:$0xf] }
  0x6d   : > { %5086 = vmatpush3.bf16.msra.mxu1 %v1773_v58  ;;  %5081 = vmatprep.mubr.msk.bf16.mxu0 %vm5475_vm1, %v5474_v1  ;;  %v4672_v58 = vld [vmem:[%s5563_s14 + $0x20] sm:$0xf]  ;;  %v2509_v59 = vsel %vm377_vm0, %v2492_v55, 0  ;;  %v2563_v60 = vsel %vm377_vm0, %v2558_v54, 0 }
  0x6e   : > { %5087 = vmatprep.mubr.msk.bf16.mxu1 %vm5475_vm1, %v5474_v1  ;;  %5091 = vmatprep.subr.bf16.mxu0 %v5474_v1  ;;  %v5434_v55 = vld [vmem:[%s6246_s4 + $0xc] ss:$0 sps:$4 sm:$0xcc]  }
  0x6f   : > { %5097 = vmatprep.subr.bf16.mxu1 %v5474_v1 }
  0x73   : > { %5082 = vmatmul.mubr.msk.bf16.vlgmr.msra.gmra.mrb[48].mxu0 %vm373_vm2, %v4633_v63  ;;  %v2503_v63 = vrot.slane %v2501_v56, 1  ;;  %v3170_v56 = vshrl.u32 %v5433_v47, 16 }
  0x74   : > { %5088 = vmatmul.mubr.msk.bf16.vlgmr.msra.gmra.mrb[48].mxu1 %vm373_vm2, %v4635_v0  ;;  %5092 = vmatpush3.bf16.msra.mxu0 %v1835_v2  ;;  %v5426_v0 = vld [vmem:[%s5577_s20 + $0x20] sm:$0x1f]   ;;  %v2674_v2 = vrot.slane %v5425_v61, 2 }
  0x75   : > { %5098 = vmatpush3.bf16.msra.mxu1 %v1897_v3  ;;  %5093 = vmatprep.mubr.msk.bf16.mxu0 %vm5475_vm1, %v5474_v1  ;;  %v2608_v3 = vld [vmem:[%s6246_s4 + $0x8] sm:$0x3]  ;;  %v2504_v4 = vor.u32 %v2503_v63, %v2499_v62  ;;  %v2667_v5 = vshll.u32 %v5426_v0, 16  ;;  %v2665_v10 = vshrl.u32 %v5426_v0, 16  ;;  %v4720_v63 = vld [vmem:[%s5563_s14 + $0x30] sm:$0xf] }
  0x76   : > { %5099 = vmatprep.mubr.msk.bf16.mxu1 %vm5475_vm1, %v5474_v1  ;;  %5103 = vmatprep.subr.bf16.mxu0 %v5474_v1  ;;  %v2613_v7 = vsel %vm377_vm0, %v2608_v3, 0  ;;  %v2679_v8 = vsel %vm377_vm0, %v2674_v2, 0  ;;  %v5436_v3 = vld [vmem:[%s6246_s4] ss:$0 sps:$4 sm:$0xcc]  }
  0x77   : > { %5109 = vmatprep.subr.bf16.mxu1 %v5474_v1 }
  0x7b   : > { %5094 = vmatmul.mubr.msk.bf16.vlgmr.msra.gmra.mrb[52].mxu0 %vm373_vm2, %v1830_v9  ;;  %v5427_v9 = vld [vmem:[%s6246_s4 + $0xc] ss:$0 sps:$4 sm:$0xcc]  }
  0x7c   : > { %5100 = vmatmul.mubr.msk.bf16.vlgmr.msra.gmra.mrb[52].mxu1 %vm373_vm2, %v4644_v11  ;;  %5104 = vmatpush3.bf16.msra.mxu0 %v1943_v12  ;;  %v2669_v11 = vrot.slane %v2667_v5, 1  ;;  %v2778_v12 = vrot.slane %v5427_v9, 2  ;;  %v4722_v9 = vld [vmem:[%s5569_s17 + $0x30] sm:$0xf] }
  0x7d   : > { %5110 = vmatpush3.bf16.msra.mxu1 %v2004_v13  ;;  %5105 = vmatprep.mubr.msk.bf16.mxu0 %vm5475_vm1, %v5474_v1  ;;  %v2724_v13 = vld [vmem:[%s6246_s4 + $0xc] sm:$0x3] }
  0x7e   : > { %5111 = vmatprep.mubr.msk.bf16.mxu1 %vm5475_vm1, %v5474_v1  ;;  %5115 = vmatprep.subr.bf16.mxu0 %v5474_v1  ;;  %v2670_v14 = vor.u32 %v2669_v11, %v2665_v10  ;;  %v2729_v16 = vsel %vm377_vm0, %v2724_v13, 0  ;;  %v2783_v17 = vsel %vm377_vm0, %v2778_v12, 0  ;;  %v5437_v12 = vld [vmem:[%s6246_s4 + $0x4] ss:$0 sps:$4 sm:$0xcc]  }
  0x7f   : > { %5121 = vmatprep.subr.bf16.mxu1 %v5474_v1  ;;  %v5438_v13 = vld [vmem:[%s5563_s14 + $0x30] sm:$0x1f]  }
  0x83   : > { %5106 = vmatmul.mubr.msk.bf16.vlgmr.msra.gmra.mrb[56].mxu0 %vm373_vm2, %v4643_v20  ;;  %v2902_v20 = vrot.slane %v5428_v18, 2 }
  0x84   : > { %5112 = vmatmul.mubr.msk.bf16.vlgmr.msra.gmra.mrb[56].mxu1 %vm373_vm2, %v1999_v19  ;;  %5116 = vmatpush3.bf16.msra.mxu0 %v2058_v21  ;;  %v5429_v19 = vld [vmem:[%s5563_s14 + $0x28] sm:$0x1f]   ;;  %v2828_v21 = vld [vmem:[%s6246_s4 + $0x10] sm:$0x3] }
  0x85   : > { %5122 = vmatpush3.bf16.msra.mxu1 %v2108_v22  ;;  %5117 = vmatprep.mubr.msk.bf16.mxu0 %vm5475_vm1, %v5474_v1  ;;  %v2837_v22 = vshll.u32 %v5429_v19, 16  ;;  %v2845_v25 = vsel %vm377_vm0, %v2828_v21, 0  ;;  %v2907_v26 = vsel %vm377_vm0, %v2902_v20, 0  ;;  %v2835_v27 = vshrl.u32 %v5429_v19, 16  ;;  %v4731_v21 = vld [vmem:[%s5569_s17 + $0x30] sm:$0xf] }
  0x86   : > { %5123 = vmatprep.mubr.msk.bf16.mxu1 %vm5475_vm1, %v5474_v1  ;;  %5127 = vmatprep.subr.bf16.mxu0 %v5474_v1 }
  0x87   : > { %5133 = vmatprep.subr.bf16.mxu1 %v5474_v1 }
  0x8b   : > { %5118 = vmatmul.mubr.msk.bf16.vlgmr.msra.gmra.mrb[60].mxu0 %vm373_vm2, %v4652_v28  ;;  %v2839_v28 = vrot.slane %v2837_v22, 1  ;;  %v3511_v22 = vshll.u32 %v5438_v13, 16 }
  0x8c   : > { %5124 = vmatmul.mubr.msk.bf16.vlgmr.msra.gmra.mrb[60].mxu1 %vm373_vm2, %v4655_v29  ;;  %5128 = vmatpush3.bf16.msra.mxu0 %v2174_v30  ;;  %v5430_v29 = vld [vmem:[%s5563_s14 + $0x28] sm:$0x1f]   ;;  %v2896_v30 = vld [vmem:[%s6246_s4] sm:$0x3] }
  0x8d   : > { %5134 = vmatpush3.bf16.msra.mxu1 %v2224_v31  ;;  %5129 = vmatprep.mubr.msk.bf16.mxu0 %vm5475_vm1, %v5474_v1  ;;  %v2997_v31 = vld [vmem:[%s6246_s4 + $0x4] sm:$0x3]  ;;  %v2840_v32 = vor.u32 %v2839_v28, %v2835_v27  ;;  %v3006_v33 = vshll.u32 %v5430_v29, 16  ;;  %v2953_v35 = vsel %vm377_vm0, %v2896_v30, 0 }
  0x8e   : > { %5135 = vmatprep.mubr.msk.bf16.mxu1 %vm5475_vm1, %v5474_v1  ;;  %5139 = vmatprep.subr.bf16.mxu0 %v5474_v1  ;;  %v3014_v36 = vsel %vm377_vm0, %v2997_v31, 0  ;;  %v5439_v30 = vld [vmem:[%s6246_s4 + $0x8] ss:$0 sps:$4 sm:$0xcc]   ;;  %v3509_v31 = vshrl.u32 %v5438_v13, 16 }
  0x8f   : > { %5145 = vmatprep.subr.bf16.mxu1 %v5474_v1  ;;  %v3008_v39 = vrot.slane %v3006_v33, 1  ;;  %v5440_v33 = vld [vmem:[%s5577_s20 + $0x30] sm:$0x1f]  }
  0x93   : > { %5130 = vmatmul.mubr.msk.bf16.vlgmr.msra.gmra.mrb[64].mxu0 %vm373_vm2, %v2165_v38  ;;  %v3004_v38 = vshrl.u32 %v5430_v29, 16 }
  0x94   : > { %5136 = vmatmul.mubr.msk.bf16.vlgmr.msra.gmra.mrb[64].mxu1 %vm373_vm2, %v4662_v40  ;;  %5140 = vmatpush3.bf16.msra.mxu0 %v2278_v41  ;;  %v3063_v40 = vrot.slane %v5431_v37, 2  ;;  %v3113_v41 = vld [vmem:[%s6246_s4 + $0x8] sm:$0x3] }
  0x95   : > { %5146 = vmatpush3.bf16.msra.mxu1 %v2340_v42  ;;  %5141 = vmatprep.mubr.msk.bf16.mxu0 %vm5475_vm1, %v5474_v1  ;;  %v3009_v42 = vor.u32 %v3008_v39, %v3004_v38  ;;  %v3118_v45 = vsel %vm377_vm0, %v3113_v41, 0 }
  0x96   : > { %5147 = vmatprep.mubr.msk.bf16.mxu1 %vm5475_vm1, %v5474_v1  ;;  %5151 = vmatprep.subr.bf16.mxu0 %v5474_v1  ;;  %v3068_v44 = vsel %vm377_vm0, %v3063_v40, 0 }
  0x97   : > { %5157 = vmatprep.subr.bf16.mxu1 %v5474_v1 }
  0x9b   : > { %5142 = vmatmul.mubr.msk.bf16.vlgmr.msra.gmra.mrb[68].mxu0 %vm373_vm2, %v4664_v49  ;;  %v3229_v49 = vld [vmem:[%s6246_s4 + $0xc] sm:$0x3] }
  0x9c   : > { %5148 = vmatmul.mubr.msk.bf16.vlgmr.msra.gmra.mrb[68].mxu1 %vm373_vm2, %v2335_v48  ;;  %5152 = vmatpush3.bf16.msra.mxu0 %v2402_v50  ;;  %v3179_v48 = vrot.slane %v5432_v46, 2  ;;  %v3172_v50 = vshll.u32 %v5433_v47, 16  ;;  %v3234_v54 = vsel %vm377_vm0, %v3229_v49, 0 }
  0x9d   : > { %5158 = vmatpush3.bf16.msra.mxu1 %v2448_v51  ;;  %5153 = vmatprep.mubr.msk.bf16.mxu0 %vm5475_vm1, %v5474_v1  ;;  %v4710_v51 = vld [vmem:[%s5577_s20 + $0x28] sm:$0xf] }
  0x9e   : > { %5159 = vmatprep.mubr.msk.bf16.mxu1 %vm5475_vm1, %v5474_v1  ;;  %5163 = vmatprep.subr.bf16.mxu0 %v5474_v1  ;;  %v3184_v53 = vsel %vm377_vm0, %v3179_v48, 0 }
  0x9f   : > { %5169 = vmatprep.subr.bf16.mxu1 %v5474_v1 }
  0xa3   : > { %5154 = vmatmul.mubr.msk.bf16.vlgmr.msra.gmra.mrb[72].mxu0 %vm373_vm2, %v4673_v57  ;;  %v3174_v57 = vrot.slane %v3172_v50, 1 }
  0xa4   : > { %5160 = vmatmul.mubr.msk.bf16.vlgmr.msra.gmra.mrb[72].mxu1 %vm373_vm2, %v4672_v58  ;;  %5164 = vmatpush3.bf16.msra.mxu0 %v2509_v59  ;;  %v5435_v58 = vld [vmem:[%s5563_s14 + $0x30] sm:$0x1f]   ;;  %v3283_v59 = vrot.slane %v5434_v55, 2 }
  0xa5   : > { %5170 = vmatpush3.bf16.msra.mxu1 %v2563_v60  ;;  %5165 = vmatprep.mubr.msk.bf16.mxu0 %vm5475_vm1, %v5474_v1  ;;  %v3333_v60 = vld [vmem:[%s6246_s4 + $0x10] sm:$0x3]  ;;  %v3175_v61 = vor.u32 %v3174_v57, %v3170_v56  ;;  %v3342_v62 = vshll.u32 %v5435_v58, 16 }
  0xa6   : > { %5171 = vmatprep.mubr.msk.bf16.mxu1 %vm5475_vm1, %v5474_v1  ;;  %5175 = vmatprep.subr.bf16.mxu0 %v5474_v1  ;;  %v3288_v0 = vsel %vm377_vm0, %v3283_v59, 0  ;;  %v3350_v2 = vsel %vm377_vm0, %v3333_v60, 0 }
  0xa7   : > { %5181 = vmatprep.subr.bf16.mxu1 %v5474_v1  ;;  %v3344_v5 = vrot.slane %v3342_v62, 1 }
  0xab   : > { %5166 = vmatmul.mubr.msk.bf16.vlgmr.msra.gmra.mrb[76].mxu0 %vm373_vm2, %v2504_v4  ;;  %v3340_v4 = vshrl.u32 %v5435_v58, 16 }
  0xac   : > { %5172 = vmatmul.mubr.msk.bf16.vlgmr.msra.gmra.mrb[76].mxu1 %vm373_vm2, %v4681_v6  ;;  %5176 = vmatpush3.bf16.msra.mxu0 %v2613_v7  ;;  %v3407_v6 = vrot.slane %v5436_v3, 2  ;;  %v3401_v7 = vld [vmem:[%s6246_s4] sm:$0x3] }
  0xad   : > { %5182 = vmatpush3.bf16.msra.mxu1 %v2679_v8  ;;  %5177 = vmatprep.mubr.msk.bf16.mxu0 %vm5475_vm1, %v5474_v1  ;;  %v3345_v8 = vor.u32 %v3344_v5, %v3340_v4  ;;  %v3458_v11 = vsel %vm377_vm0, %v3401_v7, 0  ;;  %v5442_v7 = vld [vmem:[%s6246_s4] ss:$0 sps:$4 sm:$0xcc]  }
  0xae   : > { %5183 = vmatprep.mubr.msk.bf16.mxu1 %vm5475_vm1, %v5474_v1  ;;  %5187 = vmatprep.subr.bf16.mxu0 %v5474_v1  ;;  %v3412_v10 = vsel %vm377_vm0, %v3407_v6, 0 }
  0xaf   : > { %5193 = vmatprep.subr.bf16.mxu1 %v5474_v1 }
  0xb3   : > { %5178 = vmatmul.mubr.msk.bf16.vlgmr.msra.gmra.mrb[80].mxu0 %vm373_vm2, %v4684_v15  ;;  %v3568_v15 = vrot.slane %v5437_v12, 2  ;;  %v3838_v12 = vld [vmem:[%s6246_s4 + $0x10] sm:$0x3] }
  0xb4   : > { %5184 = vmatmul.mubr.msk.bf16.vlgmr.msra.gmra.mrb[80].mxu1 %vm373_vm2, %v2670_v14  ;;  %5188 = vmatpush3.bf16.msra.mxu0 %v2729_v16  ;;  %v3502_v14 = vld [vmem:[%s6246_s4 + $0x4] sm:$0x3] }
  0xb5   : > { %5194 = vmatpush3.bf16.msra.mxu1 %v2783_v17  ;;  %5189 = vmatprep.mubr.msk.bf16.mxu0 %vm5475_vm1, %v5474_v1  ;;  %v3573_v29 = vsel %vm377_vm0, %v3568_v15, 0 }
  0xb6   : > { %5195 = vmatprep.mubr.msk.bf16.mxu1 %vm5475_vm1, %v5474_v1  ;;  %5199 = vmatprep.subr.bf16.mxu0 %v5474_v1 }
  0xb7   : > { %5205 = vmatprep.subr.bf16.mxu1 %v5474_v1 }
  0xbb   : > { %5190 = vmatmul.mubr.msk.bf16.vlgmr.msra.gmra.mrb[84].mxu0 %vm373_vm2, %v4691_v23 }
  0xbc   : > { %5196 = vmatmul.mubr.msk.bf16.vlgmr.msra.gmra.mrb[84].mxu1 %vm373_vm2, %v4693_v24  ;;  %5200 = vmatpush3.bf16.msra.mxu0 %v2845_v25  ;;  %v4730_v25 = vld [vmem:[%s5563_s14 + $0x30] sm:$0xf] }
  0xbd   : > { %5206 = vmatpush3.bf16.msra.mxu1 %v2907_v26  ;;  %5201 = vmatprep.mubr.msk.bf16.mxu0 %vm5475_vm1, %v5474_v1  ;;  %v3519_v26 = vsel %vm377_vm0, %v3502_v14, 0 }
  0xbe   : > { %5207 = vmatprep.mubr.msk.bf16.mxu1 %vm5475_vm1, %v5474_v1  ;;  %5211 = vmatprep.subr.bf16.mxu0 %v5474_v1 }
  0xbf   : > { %5217 = vmatprep.subr.bf16.mxu1 %v5474_v1 }
  0xc3   : > { %5202 = vmatmul.mubr.msk.bf16.vlgmr.msra.gmra.mrb[88].mxu0 %vm373_vm2, %v2840_v32  ;;  %v3513_v32 = vrot.slane %v3511_v22, 1 }
  0xc4   : > { %5208 = vmatmul.mubr.msk.bf16.vlgmr.msra.gmra.mrb[88].mxu1 %vm373_vm2, %v4702_v34  ;;  %5212 = vmatpush3.bf16.msra.mxu0 %v2953_v35  ;;  %v3618_v34 = vld [vmem:[%s6246_s4 + $0x8] sm:$0x3]  ;;  %v3684_v35 = vrot.slane %v5439_v30, 2  ;;  %v6138_v30 = vld [vmem:[%s6247_s5] ss:$0 sm:$0xff] }
  0xc5   : > { %5218 = vmatpush3.bf16.msra.mxu1 %v3014_v36  ;;  %5213 = vmatprep.mubr.msk.bf16.mxu0 %vm5475_vm1, %v5474_v1  ;;  %v3514_v41 = vor.u32 %v3513_v32, %v3509_v31  ;;  %v3623_v46 = vsel %vm377_vm0, %v3618_v34, 0 }
  0xc6   : > { %5219 = vmatprep.mubr.msk.bf16.mxu1 %vm5475_vm1, %v5474_v1  ;;  %5223 = vmatprep.subr.bf16.mxu0 %v5474_v1  ;;  %v3689_v50 = vsel %vm377_vm0, %v3684_v35, 0 }
  0xc7   : > { %5229 = vmatprep.subr.bf16.mxu1 %v5474_v1 }
  0xcb   : > { %5214 = vmatmul.mubr.msk.bf16.vlgmr.msra.gmra.mrb[92].mxu0 %vm373_vm2, %v4701_v43 }
  0xcc   : > { %5220 = vmatmul.mubr.msk.bf16.vlgmr.msra.gmra.mrb[92].mxu1 %vm373_vm2, %v3009_v42  ;;  %5224 = vmatpush3.bf16.msra.mxu0 %v3068_v44  ;;  %v3677_v42 = vshll.u32 %v5440_v33, 16 }
  0xcd   : > { %5230 = vmatpush3.bf16.msra.mxu1 %v3118_v45  ;;  %5225 = vmatprep.mubr.msk.bf16.mxu0 %vm5475_vm1, %v5474_v1  ;;  %v4739_v45 = vld [vmem:[%s5577_s20 + $0x30] sm:$0xf] }
  0xce   : > { %5231 = vmatprep.mubr.msk.bf16.mxu1 %vm5475_vm1, %v5474_v1  ;;  %5235 = vmatprep.subr.bf16.mxu0 %v5474_v1 }
  0xcf   : > { %5241 = vmatprep.subr.bf16.mxu1 %v5474_v1 }
  0xd3   : > { %5226 = vmatmul.mubr.msk.bf16.vlgmr.msra.gmra.mrb[96].mxu0 %vm373_vm2, %v4710_v51  ;;  %v5441_v51 = vld [vmem:[%s6246_s4 + $0xc] ss:$0 sps:$4 sm:$0xcc]  }
  0xd4   : > { %5232 = vmatmul.mubr.msk.bf16.vlgmr.msra.gmra.mrb[96].mxu1 %vm373_vm2, %v4713_v52  ;;  %5236 = vmatpush3.bf16.msra.mxu0 %v3184_v53  ;;  %v3675_v52 = vshrl.u32 %v5440_v33, 16  ;;  %v3679_v53 = vrot.slane %v3677_v42, 1  ;;  %v3788_v55 = vrot.slane %v5441_v51, 2  ;;  %v4007_v33 = vld [vmem:[%s6246_s4 + $0x4] sm:$0x3] }
  0xd5   : > { %5242 = vmatpush3.bf16.msra.mxu1 %v3234_v54  ;;  %5237 = vmatprep.mubr.msk.bf16.mxu0 %vm5475_vm1, %v5474_v1  ;;  %v3734_v54 = vld [vmem:[%s6246_s4 + $0xc] sm:$0x3] }
  0xd6   : > { %5243 = vmatprep.mubr.msk.bf16.mxu1 %vm5475_vm1, %v5474_v1  ;;  %5247 = vmatprep.subr.bf16.mxu0 %v5474_v1  ;;  %v3793_v6 = vsel %vm377_vm0, %v3788_v55, 0 }
  0xd7   : > { %5253 = vmatprep.subr.bf16.mxu1 %v5474_v1 }
  0xdb   : > { %5238 = vmatmul.mubr.msk.bf16.vlgmr.msra.gmra.mrb[100].mxu0 %vm373_vm2, %v3175_v61  ;;  %v3680_v61 = vor.u32 %v3679_v53, %v3675_v52 }
  0xdc   : > { %5244 = vmatmul.mubr.msk.bf16.vlgmr.msra.gmra.mrb[100].mxu1 %vm373_vm2, %v4720_v63  ;;  %5248 = vmatpush3.bf16.msra.mxu0 %v3288_v0  ;;  %v4742_v0 = vld [vmem:[%s5610_s7 + $0x30] sm:$0xf] }
  0xdd   : > { %5254 = vmatpush3.bf16.msra.mxu1 %v3350_v2  ;;  %5249 = vmatprep.mubr.msk.bf16.mxu0 %vm5475_vm1, %v5474_v1  ;;  %v3739_v2 = vsel %vm377_vm0, %v3734_v54, 0 }
  0xde   : > { %5255 = vmatprep.mubr.msk.bf16.mxu1 %vm5475_vm1, %v5474_v1  ;;  %5259 = vmatprep.subr.bf16.mxu0 %v5474_v1 }
  0xdf   : > { %5265 = vmatprep.subr.bf16.mxu1 %v5474_v1 }
  0xe3   : > { %5250 = vmatmul.mubr.msk.bf16.vlgmr.msra.gmra.mrb[104].mxu0 %vm373_vm2, %v4722_v9  ;;  %v3912_v9 = vrot.slane %v5442_v7, 2  ;;  %v5447_v7 = vld [vmem:[%s5577_s20 + $0x38] sm:$0x1f]  }
  0xe4   : > { %5256 = vmatmul.mubr.msk.bf16.vlgmr.msra.gmra.mrb[104].mxu1 %vm373_vm2, %v3345_v8  ;;  %5260 = vmatpush3.bf16.msra.mxu0 %v3412_v10  ;;  %v5443_v8 = vld [vmem:[%s5563_s14 + $0x38] sm:$0x1f]  }
  0xe5   : > { %5266 = vmatpush3.bf16.msra.mxu1 %v3458_v11  ;;  %5261 = vmatprep.mubr.msk.bf16.mxu0 %vm5475_vm1, %v5474_v1 }
  0xe6   : > { %5267 = vmatprep.mubr.msk.bf16.mxu1 %vm5475_vm1, %v5474_v1  ;;  %v415_v16 = vpop.f32.mrb[0].mxu0  ;;  %5271 = vmatprep.subr.bf16.mxu0 %v5474_v1 }
  0xe7   : > { %v461_v17 = vpop.f32.mrb[0].mxu1  ;;  %5277 = vmatprep.subr.bf16.mxu1 %v5474_v1  ;;  %v4939_v19 = vpop.f32.mrb[1].mxu0 }
  0xe8   : > { %v462_v18 = vadd.f32 %v461_v17, %v415_v16  ;;  %v4945_v20 = vpop.f32.mrb[1].mxu1  ;;  %v418_v23 = vpop.f32.mrb[2].mxu0  ;;  %v3847_v16 = vshll.u32 %v5443_v8, 16  ;;  %v4749_v19 = vld [vmem:[%s5563_s14 + $0x38] sm:$0xf] }
  0xe9   : > { %v464_v24 = vpop.f32.mrb[2].mxu1  ;;  %v4940_v27 = vpop.f32.mrb[3].mxu0  ;;  %v4751_v20 = vld [vmem:[%s5569_s17 + $0x38] sm:$0xf] }
  0xea   : > { %v4946_v28 = vpop.f32.mrb[3].mxu1  ;;  %v3855_v24 = vsel %vm377_vm0, %v3838_v12, 0  ;;  %v3849_v27 = vrot.slane %v3847_v16, 1  ;;  %v4182_v16 = vshll.u32 %v5447_v7, 16 }
  0xeb   : > { %5262 = vmatmul.mubr.msk.bf16.vlgmr.msra.gmra.mrb[108].mxu0 %vm373_vm2, %v4731_v21  ;;  %v5444_v28 = vld [vmem:[%s5563_s14 + $0x38] sm:$0x1f]  }
  0xec   : > { %5268 = vmatmul.mubr.msk.bf16.vlgmr.msra.gmra.mrb[108].mxu1 %vm373_vm2, %v4730_v25  ;;  %5272 = vmatpush3.bf16.msra.mxu0 %v3519_v26  ;;  %v3917_v25 = vsel %vm377_vm0, %v3912_v9, 0  ;;  %v3845_v26 = vshrl.u32 %v5443_v8, 16 }
  0xed   : > { %5278 = vmatpush3.bf16.msra.mxu1 %v3573_v29  ;;  %5273 = vmatprep.mubr.msk.bf16.mxu0 %vm5475_vm1, %v5474_v1  ;;  %v3906_v29 = vld [vmem:[%s6246_s4] sm:$0x3] }
  0xee   : > { %5279 = vmatprep.mubr.msk.bf16.mxu1 %vm5475_vm1, %v5474_v1  ;;  %v522_v36 = vpop.f32.mrb[4].mxu0  ;;  %5283 = vmatprep.subr.bf16.mxu0 %v5474_v1  ;;  %v3963_v42 = vsel %vm377_vm0, %v3906_v29, 0 }
  0xef   : > { %v575_v37 = vpop.f32.mrb[4].mxu1  ;;  %5289 = vmatprep.subr.bf16.mxu1 %v5474_v1  ;;  %v528_v38 = vadd.f32 %v522_v36, %v462_v18  ;;  %v4951_v39 = vpop.f32.mrb[5].mxu0 }
  0xf0   : > { %v4957_v40 = vpop.f32.mrb[5].mxu1  ;;  %v525_v43 = vpop.f32.mrb[6].mxu0 }
  0xf1   : > { %v578_v44 = vpop.f32.mrb[6].mxu1  ;;  %v581_v47 = vadd.f32 %v575_v37, %v528_v38  ;;  %v4952_v48 = vpop.f32.mrb[7].mxu0  ;;  %v3850_v37 = vor.u32 %v3849_v27, %v3845_v26  ;;  %v4016_v38 = vshll.u32 %v5444_v28, 16  ;;  %v4180_v26 = vshrl.u32 %v5447_v7, 16 }
  0xf2   : > { %v4958_v49 = vpop.f32.mrb[7].mxu1  ;;  %v4184_v27 = vrot.slane %v4182_v16, 1 }
  0xf3   : > { %5274 = vmatmul.mubr.msk.bf16.vlgmr.msra.gmra.mrb[112].mxu0 %vm373_vm2, %v3514_v41  ;;  %v4760_v41 = vld [vmem:[%s5569_s17 + $0x38] sm:$0xf]  ;;  %v4014_v49 = vshrl.u32 %v5444_v28, 16  ;;  %v5449_v28 = vld [vmem:[%s5563_s14 + $0x40] sm:$0x1f]  }
  0xf4   : > { %5280 = vmatmul.mubr.msk.bf16.vlgmr.msra.gmra.mrb[112].mxu1 %vm373_vm2, %v4739_v45  ;;  %5284 = vmatpush3.bf16.msra.mxu0 %v3623_v46  ;;  %v4024_v46 = vsel %vm377_vm0, %v4007_v33, 0  ;;  %v4343_v33 = vld [vmem:[%s6246_s4 + $0x10] sm:$0x3] }
  0xf5   : > { %5290 = vmatpush3.bf16.msra.mxu1 %v3689_v50  ;;  %5285 = vmatprep.mubr.msk.bf16.mxu0 %vm5475_vm1, %v5474_v1  ;;  %v4018_v50 = vrot.slane %v4016_v38, 1  ;;  %v4352_v38 = vshll.u32 %v5449_v28, 16 }
  0xf6   : > { %5291 = vmatprep.mubr.msk.bf16.mxu1 %vm5475_vm1, %v5474_v1  ;;  %v624_v56 = vpop.f32.mrb[8].mxu0  ;;  %5295 = vmatprep.subr.bf16.mxu0 %v5474_v1 }
  0xf7   : > { %v690_v57 = vpop.f32.mrb[8].mxu1  ;;  %5301 = vmatprep.subr.bf16.mxu1 %v5474_v1  ;;  %v630_v58 = vadd.f32 %v624_v56, %v581_v47  ;;  %v4963_v59 = vpop.f32.mrb[9].mxu0  ;;  %v5445_v47 = vld [vmem:[%s6246_s4 + $0x4] ss:$0 sps:$4 sm:$0xcc]  }
  0xf8   : > { %v4969_v60 = vpop.f32.mrb[9].mxu1  ;;  %v627_v62 = vpop.f32.mrb[10].mxu0  ;;  %v4073_v52 = vrot.slane %v5445_v47, 2  ;;  %v4123_v56 = vld [vmem:[%s6246_s4 + $0x8] sm:$0x3]  ;;  %v4350_v47 = vshrl.u32 %v5449_v28, 16 }
  0xf9   : > { %v693_v63 = vpop.f32.mrb[10].mxu1  ;;  %v696_v3 = vadd.f32 %v690_v57, %v630_v58  ;;  %v4964_v4 = vpop.f32.mrb[11].mxu0  ;;  %v4759_v60 = vld [vmem:[%s5563_s14 + $0x38] sm:$0xf] }
  0xfa   : > { %v4970_v5 = vpop.f32.mrb[11].mxu1 }
  0xfb   : > { %5286 = vmatmul.mubr.msk.bf16.vlgmr.msra.gmra.mrb[116].mxu0 %vm373_vm2, %v4742_v0  ;;  %v5446_v0 = vld [vmem:[%s6246_s4 + $0x8] ss:$0 sps:$4 sm:$0xcc]   ;;  %v4078_v5 = vsel %vm377_vm0, %v4073_v52, 0 }
  0xfc   : > { %5292 = vmatmul.mubr.msk.bf16.vlgmr.msra.gmra.mrb[116].mxu1 %vm373_vm2, %v3680_v61  ;;  %5296 = vmatpush3.bf16.msra.mxu0 %v3739_v2  ;;  %v4019_v61 = vor.u32 %v4018_v50, %v4014_v49  ;;  %v4189_v8 = vrot.slane %v5446_v0, 2 }
  0xfd   : > { %5302 = vmatpush3.bf16.msra.mxu1 %v3793_v6  ;;  %5297 = vmatprep.mubr.msk.bf16.mxu0 %vm5475_vm1, %v5474_v1  ;;  %v4128_v6 = vsel %vm377_vm0, %v4123_v56, 0 }
  0xfe   : > { %5303 = vmatprep.mubr.msk.bf16.mxu1 %vm5475_vm1, %v5474_v1  ;;  %v740_v10 = vpop.f32.mrb[12].mxu0  ;;  %5307 = vmatprep.subr.bf16.mxu0 %v5474_v1 }
  0xff   : > { %v794_v11 = vpop.f32.mrb[12].mxu1  ;;  %5313 = vmatprep.subr.bf16.mxu1 %v5474_v1  ;;  %v746_v13 = vadd.f32 %v740_v10, %v696_v3  ;;  %v4975_v14 = vpop.f32.mrb[13].mxu0 }
 0x100   : > { %v4981_v15 = vpop.f32.mrb[13].mxu1  ;;  %v743_v17 = vpop.f32.mrb[14].mxu0 }
 0x101   : > { %v797_v18 = vpop.f32.mrb[14].mxu1  ;;  %v800_v21 = vadd.f32 %v794_v11, %v746_v13  ;;  %v4976_v22 = vpop.f32.mrb[15].mxu0  ;;  %v4239_v11 = vld [vmem:[%s6246_s4 + $0xc] sm:$0x3]  ;;  %v4768_v15 = vld [vmem:[%s5577_s20 + $0x38] sm:$0xf] }
 0x102   : > { %v4982_v23 = vpop.f32.mrb[15].mxu1 }
 0x103   : > { %5298 = vmatmul.mubr.msk.bf16.vlgmr.msra.gmra.mrb[120].mxu0 %vm373_vm2, %v4749_v19  ;;  %v4771_v19 = vld [vmem:[%s5610_s7 + $0x38] sm:$0xf] }
 0x104   : > { %5304 = vmatmul.mubr.msk.bf16.vlgmr.msra.gmra.mrb[120].mxu1 %vm373_vm2, %v4751_v20  ;;  %5308 = vmatpush3.bf16.msra.mxu0 %v3855_v24  ;;  %v4194_v20 = vsel %vm377_vm0, %v4189_v8, 0  ;;  %v4244_v24 = vsel %vm377_vm0, %v4239_v11, 0 }
 0x105   : > { %5314 = vmatpush3.bf16.msra.mxu1 %v3917_v25  ;;  %5309 = vmatprep.mubr.msk.bf16.mxu0 %vm5475_vm1, %v5474_v1  ;;  %v5448_v25 = vld [vmem:[%s6246_s4 + $0xc] ss:$0 sps:$4 sm:$0xcc]  }
 0x106   : > { %5315 = vmatprep.mubr.msk.bf16.mxu1 %vm5475_vm1, %v5474_v1  ;;  %v856_v31 = vpop.f32.mrb[16].mxu0  ;;  %5319 = vmatprep.subr.bf16.mxu0 %v5474_v1  ;;  %v4293_v29 = vrot.slane %v5448_v25, 2 }
 0x107   : > { %v923_v32 = vpop.f32.mrb[16].mxu1  ;;  %5325 = vmatprep.subr.bf16.mxu1 %v5474_v1  ;;  %v862_v34 = vadd.f32 %v856_v31, %v800_v21  ;;  %v4987_v35 = vpop.f32.mrb[17].mxu0 }
 0x108   : > { %v4993_v36 = vpop.f32.mrb[17].mxu1  ;;  %v859_v39 = vpop.f32.mrb[18].mxu0 }
 0x109   : > { %v926_v40 = vpop.f32.mrb[18].mxu1  ;;  %v869_v43 = vadd.f32 %v6138_v30, %v862_v34  ;;  %v4988_v44 = vpop.f32.mrb[19].mxu0 }
 0x10a   : > { %v4994_v45 = vpop.f32.mrb[19].mxu1 }
 0x10b   : > { %vm870_vm3 = vcmp.ge.f32.partialorder %v869_v43, 0.0  ;;  %v871_v48 = vmul.f32 0.01, %v869_v43  ;;  %5310 = vmatmul.mubr.msk.bf16.vlgmr.msra.gmra.mrb[124].mxu0 %vm373_vm2, %v3850_v37  ;;  %v4185_v37 = vor.u32 %v4184_v27, %v4180_v26  ;;  %v4298_v45 = vsel %vm377_vm0, %v4293_v29, 0 }
 0x10c   : > { %5316 = vmatmul.mubr.msk.bf16.vlgmr.msra.gmra.mrb[124].mxu1 %vm373_vm2, %v4760_v41  ;;  %5320 = vmatpush3.bf16.msra.mxu0 %v3963_v42  ;;  %v4778_v41 = vld [vmem:[%s5563_s14 + $0x40] sm:$0xf] }
 0x10d   : > { %5326 = vmatpush3.bf16.msra.mxu1 %v4024_v46  ;;  %v872_v51 = vsel %vm870_vm3, %v869_v43, %v871_v48  ;;  %5321 = vmatprep.mubr.msk.bf16.mxu0 %vm5475_vm1, %v5474_v1  ;;  %v4360_v46 = vsel %vm377_vm0, %v4343_v33, 0  ;;  %v4354_v48 = vrot.slane %v4352_v38, 1 }
 0x10e   : > { %5327 = vmatprep.mubr.msk.bf16.mxu1 %vm5475_vm1, %v5474_v1  ;;  %v873_v53 = vpack.c.bf16 %v872_v51, %v872_v51  ;;  %v969_v54 = vpop.f32.mrb[20].mxu0  ;;  %5331 = vmatprep.subr.bf16.mxu0 %v5474_v1 }
 0x10f   : > { %v1030_v55 = vpop.f32.mrb[20].mxu1  ;;  %5337 = vmatprep.subr.bf16.mxu1 %v5474_v1  ;;  %v970_v57 = vadd.f32 %v969_v54, %v923_v32  ;;  %v4999_v58 = vpop.f32.mrb[21].mxu0  ;;  %v4355_v54 = vor.u32 %v4354_v48, %v4350_v47 }
 0x110   : > { %v5005_v59 = vpop.f32.mrb[21].mxu1  ;;  %874 = vst [vmem:[%s6158_s28] sm:$0xf] %v873_v53  ;;  %v972_v62 = vpop.f32.mrb[22].mxu0 }
 0x111   : > { %v1033_v63 = vpop.f32.mrb[22].mxu1  ;;  %v1036_v2 = vadd.f32 %v1030_v55, %v970_v57  ;;  %v5000_v3 = vpop.f32.mrb[23].mxu0  ;;  %v4780_v57 = vld [vmem:[%s5569_s17 + $0x40] sm:$0xf] }
 0x112   : > { %v5006_v4 = vpop.f32.mrb[23].mxu1 }
 0x113   : > { %5322 = vmatmul.mubr.msk.bf16.vlgmr.msra.gmra.mrb[128].mxu0 %vm373_vm2, %v4759_v60 }
 0x114   : > { %5328 = vmatmul.mubr.msk.bf16.vlgmr.msra.gmra.mrb[128].mxu1 %vm373_vm2, %v4019_v61  ;;  %5332 = vmatpush3.bf16.msra.mxu0 %v4078_v5 }
 0x115   : > { %5338 = vmatpush3.bf16.msra.mxu1 %v4128_v6  ;;  %5333 = vmatprep.mubr.msk.bf16.mxu0 %vm5475_vm1, %v5474_v1 }
 0x116   : > { %5339 = vmatprep.mubr.msk.bf16.mxu1 %vm5475_vm1, %v5474_v1  ;;  %v1084_v9 = vpop.f32.mrb[24].mxu0  ;;  %5343 = vmatprep.subr.bf16.mxu0 %v5474_v1 }
 0x117   : > { %v1134_v10 = vpop.f32.mrb[24].mxu1  ;;  %5349 = vmatprep.subr.bf16.mxu1 %v5474_v1  ;;  %v1090_v12 = vadd.f32 %v1084_v9, %v1036_v2  ;;  %v5011_v13 = vpop.f32.mrb[25].mxu0 }
 0x118   : > { %v5017_v14 = vpop.f32.mrb[25].mxu1  ;;  %v1087_v17 = vpop.f32.mrb[26].mxu0 }
 0x119   : > { %v1137_v18 = vpop.f32.mrb[26].mxu1  ;;  %v1140_v21 = vadd.f32 %v1134_v10, %v1090_v12  ;;  %v5012_v22 = vpop.f32.mrb[27].mxu0 }
 0x11a   : > { %v5018_v23 = vpop.f32.mrb[27].mxu1 }
 0x11b   : > { %5334 = vmatmul.mubr.msk.bf16.vlgmr.msra.gmra.mrb[132].mxu0 %vm373_vm2, %v4768_v15 }
 0x11c   : > { %5340 = vmatmul.mubr.msk.bf16.vlgmr.msra.gmra.mrb[132].mxu1 %vm373_vm2, %v4771_v19  ;;  %5344 = vmatpush3.bf16.msra.mxu0 %v4194_v20 }
 0x11d   : > { %5350 = vmatpush3.bf16.msra.mxu1 %v4244_v24  ;;  %5345 = vmatprep.mubr.msk.bf16.mxu0 %vm5475_vm1, %v5474_v1 }
 0x11e   : > { %5351 = vmatprep.mubr.msk.bf16.mxu1 %vm5475_vm1, %v5474_v1  ;;  %v1200_v31 = vpop.f32.mrb[28].mxu0  ;;  %5355 = vmatprep.subr.bf16.mxu0 %v5474_v1 }
 0x11f   : > { %v1250_v32 = vpop.f32.mrb[28].mxu1  ;;  %5361 = vmatprep.subr.bf16.mxu1 %v5474_v1  ;;  %v1206_v34 = vadd.f32 %v1200_v31, %v1140_v21  ;;  %v5023_v35 = vpop.f32.mrb[29].mxu0 }
 0x120   : > { %v5029_v36 = vpop.f32.mrb[29].mxu1  ;;  %v1203_v39 = vpop.f32.mrb[30].mxu0 }
 0x121   : > { %v1253_v40 = vpop.f32.mrb[30].mxu1  ;;  %v1256_v42 = vadd.f32 %v1250_v32, %v1206_v34  ;;  %v5024_v43 = vpop.f32.mrb[31].mxu0 }
 0x122   : > { %v5030_v44 = vpop.f32.mrb[31].mxu1 }
 0x123   : > { %5346 = vmatmul.mubr.msk.bf16.vlgmr.msra.gmra.mrb[136].mxu0 %vm373_vm2, %v4185_v37 }
 0x124   : > { %5352 = vmatmul.mubr.msk.bf16.vlgmr.msra.gmra.mrb[136].mxu1 %vm373_vm2, %v4778_v41  ;;  %5356 = vmatpush3.bf16.msra.mxu0 %v4298_v45 }
 0x125   : > { %5362 = vmatpush3.bf16.msra.mxu1 %v4360_v46  ;;  %5357 = vmatprep.mubr.msk.bf16.mxu0 %vm5475_vm1, %v5474_v1 }
 0x126   : > { %5363 = vmatprep.mubr.msk.bf16.mxu1 %vm5475_vm1, %v5474_v1  ;;  %v1304_v49 = vpop.f32.mrb[32].mxu0 }
 0x127   : > { %v1366_v50 = vpop.f32.mrb[32].mxu1  ;;  %v1310_v51 = vadd.f32 %v1304_v49, %v1256_v42  ;;  %v5035_v52 = vpop.f32.mrb[33].mxu0 }
 0x128   : > { %v5041_v53 = vpop.f32.mrb[33].mxu1  ;;  %v1307_v55 = vpop.f32.mrb[34].mxu0 }
 0x129   : > { %v1369_v56 = vpop.f32.mrb[34].mxu1  ;;  %v1372_v58 = vadd.f32 %v1366_v50, %v1310_v51  ;;  %v5036_v59 = vpop.f32.mrb[35].mxu0 }
 0x12a   : > { %v5042_v60 = vpop.f32.mrb[35].mxu1 }
 0x12b   : > { %v1373_v61 = vadd.f32 %v6138_v30, %v1372_v58  ;;  %5358 = vmatmul.mubr.msk.bf16.vlgmr.msra.gmra.mrb[140].mxu0 %vm373_vm2, %v4780_v57 }
 0x12c   : > { %5364 = vmatmul.mubr.msk.bf16.vlgmr.msra.gmra.mrb[140].mxu1 %vm373_vm2, %v4355_v54 }
 0x12d   : > { %vm1374_vm4 = vcmp.ge.f32.partialorder %v1373_v61, 0.0  ;;  %v1375_v1 = vmul.f32 0.01, %v1373_v61 }
 0x12e   : > { %v1428_v62 = vpop.f32.mrb[36].mxu0 }
 0x12f   : > { %v1474_v63 = vpop.f32.mrb[36].mxu1  ;;  %v1376_v0 = vsel %vm1374_vm4, %v1373_v61, %v1375_v1  ;;  %v5047_v3 = vpop.f32.mrb[37].mxu0 }
 0x130   : > { %v1475_v2 = vadd.f32 %v1474_v63, %v1428_v62  ;;  %v5053_v4 = vpop.f32.mrb[37].mxu1  ;;  %v1377_v5 = vpack.c.bf16 %v1376_v0, %v1376_v0  ;;  %v1431_v6 = vpop.f32.mrb[38].mxu0 }
 0x131   : > { %v1477_v7 = vpop.f32.mrb[38].mxu1  ;;  %v5048_v8 = vpop.f32.mrb[39].mxu0 }
 0x132   : > { %v5054_v9 = vpop.f32.mrb[39].mxu1  ;;  %4613 = vst [vmem:[%s6158_s28 + $0x4] sm:$0xf] %v1377_v5 }
 0x136   : > { %v1535_v10 = vpop.f32.mrb[40].mxu0 }
 0x137   : > { %v1589_v11 = vpop.f32.mrb[40].mxu1  ;;  %v1541_v12 = vadd.f32 %v1535_v10, %v1475_v2  ;;  %v5059_v13 = vpop.f32.mrb[41].mxu0 }
 0x138   : > { %v5065_v14 = vpop.f32.mrb[41].mxu1  ;;  %v1538_v15 = vpop.f32.mrb[42].mxu0 }
 0x139   : > { %v1592_v16 = vpop.f32.mrb[42].mxu1  ;;  %v1595_v17 = vadd.f32 %v1589_v11, %v1541_v12  ;;  %v5060_v18 = vpop.f32.mrb[43].mxu0 }
 0x13a   : > { %v5066_v19 = vpop.f32.mrb[43].mxu1 }
 0x13e   : > { %v1639_v20 = vpop.f32.mrb[44].mxu0 }
 0x13f   : > { %v1705_v21 = vpop.f32.mrb[44].mxu1  ;;  %v1645_v22 = vadd.f32 %v1639_v20, %v1595_v17  ;;  %v5071_v23 = vpop.f32.mrb[45].mxu0 }
 0x140   : > { %v5077_v24 = vpop.f32.mrb[45].mxu1  ;;  %v1642_v25 = vpop.f32.mrb[46].mxu0 }
 0x141   : > { %v1708_v26 = vpop.f32.mrb[46].mxu1  ;;  %v1711_v27 = vadd.f32 %v1705_v21, %v1645_v22  ;;  %v5072_v28 = vpop.f32.mrb[47].mxu0 }
 0x142   : > { %v5078_v29 = vpop.f32.mrb[47].mxu1 }
 0x146   : > { %v1755_v31 = vpop.f32.mrb[48].mxu0 }
 0x147   : > { %v1809_v32 = vpop.f32.mrb[48].mxu1  ;;  %v1761_v33 = vadd.f32 %v1755_v31, %v1711_v27  ;;  %v5083_v34 = vpop.f32.mrb[49].mxu0 }
 0x148   : > { %v5089_v35 = vpop.f32.mrb[49].mxu1  ;;  %v1758_v36 = vpop.f32.mrb[50].mxu0 }
 0x149   : > { %v1812_v37 = vpop.f32.mrb[50].mxu1  ;;  %v1815_v38 = vadd.f32 %v1809_v32, %v1761_v33  ;;  %v5084_v39 = vpop.f32.mrb[51].mxu0 }
 0x14a   : > { %v5090_v40 = vpop.f32.mrb[51].mxu1 }
 0x14e   : > { %v1871_v41 = vpop.f32.mrb[52].mxu0 }
 0x14f   : > { %v1933_v42 = vpop.f32.mrb[52].mxu1  ;;  %v1877_v43 = vadd.f32 %v1871_v41, %v1815_v38  ;;  %v5095_v44 = vpop.f32.mrb[53].mxu0 }
 0x150   : > { %v5101_v45 = vpop.f32.mrb[53].mxu1  ;;  %v1874_v46 = vpop.f32.mrb[54].mxu0 }
 0x151   : > { %v1936_v47 = vpop.f32.mrb[54].mxu1  ;;  %v1878_v48 = vadd.f32 %v6138_v30, %v1877_v43  ;;  %v5096_v49 = vpop.f32.mrb[55].mxu0 }
 0x152   : > { %v5102_v50 = vpop.f32.mrb[55].mxu1 }
 0x153   : > { %vm1879_vm5 = vcmp.ge.f32.partialorder %v1878_v48, 0.0  ;;  %v1880_v51 = vmul.f32 0.01, %v1878_v48 }
 0x155   : > { %v1881_v52 = vsel %vm1879_vm5, %v1878_v48, %v1880_v51 }
 0x156   : > { %v1882_v53 = vpack.c.bf16 %v1881_v52, %v1881_v52  ;;  %v1979_v54 = vpop.f32.mrb[56].mxu0 }
 0x157   : > { %v2040_v55 = vpop.f32.mrb[56].mxu1  ;;  %v1980_v56 = vadd.f32 %v1979_v54, %v1933_v42  ;;  %v5107_v57 = vpop.f32.mrb[57].mxu0 }
 0x158   : > { %v5113_v58 = vpop.f32.mrb[57].mxu1  ;;  %4642 = vst [vmem:[%s6158_s28 + $0x8] sm:$0xf] %v1882_v53  ;;  %v1982_v59 = vpop.f32.mrb[58].mxu0 }
 0x159   : > { %v2043_v60 = vpop.f32.mrb[58].mxu1  ;;  %v2046_v61 = vadd.f32 %v2040_v55, %v1980_v56  ;;  %v5108_v1 = vpop.f32.mrb[59].mxu0 }
 0x15a   : > { %v5114_v62 = vpop.f32.mrb[59].mxu1 }
 0x15e   : > { %v2094_v63 = vpop.f32.mrb[60].mxu0 }
 0x15f   : > { %v2144_v0 = vpop.f32.mrb[60].mxu1  ;;  %v2100_v2 = vadd.f32 %v2094_v63, %v2046_v61  ;;  %v5119_v3 = vpop.f32.mrb[61].mxu0 }
 0x160   : > { %v5125_v4 = vpop.f32.mrb[61].mxu1  ;;  %v2097_v5 = vpop.f32.mrb[62].mxu0 }
 0x161   : > { %v2147_v6 = vpop.f32.mrb[62].mxu1  ;;  %v2150_v7 = vadd.f32 %v2144_v0, %v2100_v2  ;;  %v5120_v8 = vpop.f32.mrb[63].mxu0 }
 0x162   : > { %v5126_v9 = vpop.f32.mrb[63].mxu1 }
 0x166   : > { %v2210_v10 = vpop.f32.mrb[64].mxu0 }
 0x167   : > { %v2260_v11 = vpop.f32.mrb[64].mxu1  ;;  %v2216_v12 = vadd.f32 %v2210_v10, %v2150_v7  ;;  %v5131_v13 = vpop.f32.mrb[65].mxu0 }
 0x168   : > { %v5137_v14 = vpop.f32.mrb[65].mxu1  ;;  %v2213_v15 = vpop.f32.mrb[66].mxu0 }
 0x169   : > { %v2263_v16 = vpop.f32.mrb[66].mxu1  ;;  %v2266_v17 = vadd.f32 %v2260_v11, %v2216_v12  ;;  %v5132_v18 = vpop.f32.mrb[67].mxu0 }
 0x16a   : > { %v5138_v19 = vpop.f32.mrb[67].mxu1 }
 0x16e   : > { %v2314_v20 = vpop.f32.mrb[68].mxu0 }
 0x16f   : > { %v2376_v21 = vpop.f32.mrb[68].mxu1  ;;  %v2320_v22 = vadd.f32 %v2314_v20, %v2266_v17  ;;  %v5143_v23 = vpop.f32.mrb[69].mxu0 }
 0x170   : > { %v5149_v24 = vpop.f32.mrb[69].mxu1  ;;  %v2317_v25 = vpop.f32.mrb[70].mxu0 }
 0x171   : > { %v2379_v26 = vpop.f32.mrb[70].mxu1  ;;  %v2382_v27 = vadd.f32 %v2376_v21, %v2320_v22  ;;  %v5144_v28 = vpop.f32.mrb[71].mxu0 }
 0x172   : > { %v5150_v29 = vpop.f32.mrb[71].mxu1 }
 0x173   : > { %v2383_v31 = vadd.f32 %v6138_v30, %v2382_v27 }
 0x175   : > { %vm2384_vm6 = vcmp.ge.f32.partialorder %v2383_v31, 0.0  ;;  %v2385_v32 = vmul.f32 0.01, %v2383_v31 }
 0x176   : > { %v2438_v33 = vpop.f32.mrb[72].mxu0 }
 0x177   : > { %v2484_v34 = vpop.f32.mrb[72].mxu1  ;;  %v2386_v35 = vsel %vm2384_vm6, %v2383_v31, %v2385_v32  ;;  %v5155_v37 = vpop.f32.mrb[73].mxu0 }
 0x178   : > { %v2485_v36 = vadd.f32 %v2484_v34, %v2438_v33  ;;  %v5161_v38 = vpop.f32.mrb[73].mxu1  ;;  %v2387_v39 = vpack.c.bf16 %v2386_v35, %v2386_v35  ;;  %v2441_v40 = vpop.f32.mrb[74].mxu0 }
 0x179   : > { %v2487_v41 = vpop.f32.mrb[74].mxu1  ;;  %v5156_v42 = vpop.f32.mrb[75].mxu0 }
 0x17a   : > { %v5162_v43 = vpop.f32.mrb[75].mxu1  ;;  %4671 = vst [vmem:[%s6158_s28 + $0xc] sm:$0xf] %v2387_v39 }
 0x17e   : > { %v2545_v44 = vpop.f32.mrb[76].mxu0 }
 0x17f   : > { %v2599_v45 = vpop.f32.mrb[76].mxu1  ;;  %v2551_v46 = vadd.f32 %v2545_v44, %v2485_v36  ;;  %v5167_v47 = vpop.f32.mrb[77].mxu0 }
 0x180   : > { %v5173_v48 = vpop.f32.mrb[77].mxu1  ;;  %v2548_v49 = vpop.f32.mrb[78].mxu0 }
 0x181   : > { %v2602_v50 = vpop.f32.mrb[78].mxu1  ;;  %v2605_v51 = vadd.f32 %v2599_v45, %v2551_v46  ;;  %v5168_v52 = vpop.f32.mrb[79].mxu0 }
 0x182   : > { %v5174_v53 = vpop.f32.mrb[79].mxu1 }
 0x186   : > { %v2649_v54 = vpop.f32.mrb[80].mxu0 }
 0x187   : > { %v2715_v55 = vpop.f32.mrb[80].mxu1  ;;  %v2655_v56 = vadd.f32 %v2649_v54, %v2605_v51  ;;  %v5179_v57 = vpop.f32.mrb[81].mxu0 }
 0x188   : > { %v5185_v58 = vpop.f32.mrb[81].mxu1  ;;  %v2652_v59 = vpop.f32.mrb[82].mxu0 }
 0x189   : > { %v2718_v60 = vpop.f32.mrb[82].mxu1  ;;  %v2721_v61 = vadd.f32 %v2715_v55, %v2655_v56  ;;  %v5180_v1 = vpop.f32.mrb[83].mxu0 }
 0x18a   : > { %v5186_v62 = vpop.f32.mrb[83].mxu1 }
 0x18e   : > { %v2765_v63 = vpop.f32.mrb[84].mxu0 }
 0x18f   : > { %v2819_v0 = vpop.f32.mrb[84].mxu1  ;;  %v2771_v2 = vadd.f32 %v2765_v63, %v2721_v61  ;;  %v5191_v3 = vpop.f32.mrb[85].mxu0 }
 0x190   : > { %v5197_v4 = vpop.f32.mrb[85].mxu1  ;;  %v2768_v5 = vpop.f32.mrb[86].mxu0 }
 0x191   : > { %v2822_v6 = vpop.f32.mrb[86].mxu1  ;;  %v2825_v7 = vadd.f32 %v2819_v0, %v2771_v2  ;;  %v5192_v8 = vpop.f32.mrb[87].mxu0 }
 0x192   : > { %v5198_v9 = vpop.f32.mrb[87].mxu1 }
 0x196   : > { %v2881_v10 = vpop.f32.mrb[88].mxu0 }
 0x197   : > { %v2943_v11 = vpop.f32.mrb[88].mxu1  ;;  %v2887_v12 = vadd.f32 %v2881_v10, %v2825_v7  ;;  %v5203_v13 = vpop.f32.mrb[89].mxu0 }
 0x198   : > { %v5209_v14 = vpop.f32.mrb[89].mxu1  ;;  %v2884_v15 = vpop.f32.mrb[90].mxu0 }
 0x199   : > { %v2946_v16 = vpop.f32.mrb[90].mxu1  ;;  %v2888_v17 = vadd.f32 %v6138_v30, %v2887_v12  ;;  %v5204_v18 = vpop.f32.mrb[91].mxu0 }
 0x19a   : > { %v5210_v19 = vpop.f32.mrb[91].mxu1 }
 0x19b   : > { %vm2889_vm7 = vcmp.ge.f32.partialorder %v2888_v17, 0.0  ;;  %v2890_v20 = vmul.f32 0.01, %v2888_v17 }
 0x19d   : > { %v2891_v21 = vsel %vm2889_vm7, %v2888_v17, %v2890_v20 }
 0x19e   : > { %v2892_v22 = vpack.c.bf16 %v2891_v21, %v2891_v21  ;;  %v2989_v23 = vpop.f32.mrb[92].mxu0 }
 0x19f   : > { %v3050_v24 = vpop.f32.mrb[92].mxu1  ;;  %v2990_v25 = vadd.f32 %v2989_v23, %v2943_v11  ;;  %v5215_v26 = vpop.f32.mrb[93].mxu0 }
 0x1a0   : > { %v5221_v27 = vpop.f32.mrb[93].mxu1  ;;  %4700 = vst [vmem:[%s6158_s28 + $0x10] sm:$0xf] %v2892_v22  ;;  %v2992_v28 = vpop.f32.mrb[94].mxu0 }
 0x1a1   : > { %v3053_v29 = vpop.f32.mrb[94].mxu1  ;;  %v3056_v31 = vadd.f32 %v3050_v24, %v2990_v25  ;;  %v5216_v32 = vpop.f32.mrb[95].mxu0 }
 0x1a2   : > { %v5222_v33 = vpop.f32.mrb[95].mxu1 }
 0x1a6   : > { %v3104_v34 = vpop.f32.mrb[96].mxu0 }
 0x1a7   : > { %v3154_v35 = vpop.f32.mrb[96].mxu1  ;;  %v3110_v36 = vadd.f32 %v3104_v34, %v3056_v31  ;;  %v5227_v37 = vpop.f32.mrb[97].mxu0 }
 0x1a8   : > { %v5233_v38 = vpop.f32.mrb[97].mxu1  ;;  %v3107_v39 = vpop.f32.mrb[98].mxu0 }
 0x1a9   : > { %v3157_v40 = vpop.f32.mrb[98].mxu1  ;;  %v3160_v41 = vadd.f32 %v3154_v35, %v3110_v36  ;;  %v5228_v42 = vpop.f32.mrb[99].mxu0 }
 0x1aa   : > { %v5234_v43 = vpop.f32.mrb[99].mxu1 }
 0x1ae   : > { %v3220_v44 = vpop.f32.mrb[100].mxu0 }
 0x1af   : > { %v3270_v45 = vpop.f32.mrb[100].mxu1  ;;  %v3226_v46 = vadd.f32 %v3220_v44, %v3160_v41  ;;  %v5239_v47 = vpop.f32.mrb[101].mxu0 }
 0x1b0   : > { %v5245_v48 = vpop.f32.mrb[101].mxu1  ;;  %v3223_v49 = vpop.f32.mrb[102].mxu0 }
 0x1b1   : > { %v3273_v50 = vpop.f32.mrb[102].mxu1  ;;  %v3276_v51 = vadd.f32 %v3270_v45, %v3226_v46  ;;  %v5240_v52 = vpop.f32.mrb[103].mxu0 }
 0x1b2   : > { %v5246_v53 = vpop.f32.mrb[103].mxu1 }
 0x1b6   : > { %v3324_v54 = vpop.f32.mrb[104].mxu0 }
 0x1b7   : > { %v3386_v55 = vpop.f32.mrb[104].mxu1  ;;  %v3330_v56 = vadd.f32 %v3324_v54, %v3276_v51  ;;  %v5251_v57 = vpop.f32.mrb[105].mxu0 }
 0x1b8   : > { %v5257_v58 = vpop.f32.mrb[105].mxu1  ;;  %v3327_v59 = vpop.f32.mrb[106].mxu0 }
 0x1b9   : > { %v3389_v60 = vpop.f32.mrb[106].mxu1  ;;  %v3392_v61 = vadd.f32 %v3386_v55, %v3330_v56  ;;  %v5252_v1 = vpop.f32.mrb[107].mxu0 }
 0x1ba   : > { %v5258_v62 = vpop.f32.mrb[107].mxu1 }
 0x1bb   : > { %v3393_v63 = vadd.f32 %v6138_v30, %v3392_v61 }
 0x1bd   : > { %vm3394_vm8 = vcmp.ge.f32.partialorder %v3393_v63, 0.0  ;;  %v3395_v0 = vmul.f32 0.01, %v3393_v63 }
 0x1be   : > { %v3448_v2 = vpop.f32.mrb[108].mxu0 }
 0x1bf   : > { %v3494_v3 = vpop.f32.mrb[108].mxu1  ;;  %v3396_v4 = vsel %vm3394_vm8, %v3393_v63, %v3395_v0  ;;  %v5263_v6 = vpop.f32.mrb[109].mxu0 }
 0x1c0   : > { %v3495_v5 = vadd.f32 %v3494_v3, %v3448_v2  ;;  %v5269_v7 = vpop.f32.mrb[109].mxu1  ;;  %v3397_v8 = vpack.c.bf16 %v3396_v4, %v3396_v4  ;;  %v3451_v9 = vpop.f32.mrb[110].mxu0 }
 0x1c1   : > { %v3497_v10 = vpop.f32.mrb[110].mxu1  ;;  %v5264_v11 = vpop.f32.mrb[111].mxu0 }
 0x1c2   : > { %v5270_v12 = vpop.f32.mrb[111].mxu1  ;;  %4729 = vst [vmem:[%s6158_s28 + $0x14] sm:$0xf] %v3397_v8 }
 0x1c6   : > { %v3555_v13 = vpop.f32.mrb[112].mxu0 }
 0x1c7   : > { %v3609_v14 = vpop.f32.mrb[112].mxu1  ;;  %v3561_v15 = vadd.f32 %v3555_v13, %v3495_v5  ;;  %v5275_v16 = vpop.f32.mrb[113].mxu0 }
 0x1c8   : > { %v5281_v17 = vpop.f32.mrb[113].mxu1  ;;  %v3558_v18 = vpop.f32.mrb[114].mxu0 }
 0x1c9   : > { %v3612_v19 = vpop.f32.mrb[114].mxu1  ;;  %v3615_v20 = vadd.f32 %v3609_v14, %v3561_v15  ;;  %v5276_v21 = vpop.f32.mrb[115].mxu0 }
 0x1ca   : > { %v5282_v22 = vpop.f32.mrb[115].mxu1 }
 0x1ce   : > { %v3659_v23 = vpop.f32.mrb[116].mxu0 }
 0x1cf   : > { %v3725_v24 = vpop.f32.mrb[116].mxu1  ;;  %v3665_v25 = vadd.f32 %v3659_v23, %v3615_v20  ;;  %v5287_v26 = vpop.f32.mrb[117].mxu0 }
 0x1d0   : > { %v5293_v27 = vpop.f32.mrb[117].mxu1  ;;  %v3662_v28 = vpop.f32.mrb[118].mxu0 }
 0x1d1   : > { %v3728_v29 = vpop.f32.mrb[118].mxu1  ;;  %v3731_v31 = vadd.f32 %v3725_v24, %v3665_v25  ;;  %v5288_v32 = vpop.f32.mrb[119].mxu0 }
 0x1d2   : > { %v5294_v33 = vpop.f32.mrb[119].mxu1 }
 0x1d6   : > { %v3775_v34 = vpop.f32.mrb[120].mxu0 }
 0x1d7   : > { %v3829_v35 = vpop.f32.mrb[120].mxu1  ;;  %v3781_v36 = vadd.f32 %v3775_v34, %v3731_v31  ;;  %v5299_v37 = vpop.f32.mrb[121].mxu0 }
 0x1d8   : > { %v5305_v38 = vpop.f32.mrb[121].mxu1  ;;  %v3778_v39 = vpop.f32.mrb[122].mxu0 }
 0x1d9   : > { %v3832_v40 = vpop.f32.mrb[122].mxu1  ;;  %v3835_v41 = vadd.f32 %v3829_v35, %v3781_v36  ;;  %v5300_v42 = vpop.f32.mrb[123].mxu0 }
 0x1da   : > { %v5306_v43 = vpop.f32.mrb[123].mxu1 }
 0x1de   : > { %v3891_v44 = vpop.f32.mrb[124].mxu0 }
 0x1df   : > { %v3953_v45 = vpop.f32.mrb[124].mxu1  ;;  %v3897_v46 = vadd.f32 %v3891_v44, %v3835_v41  ;;  %v5311_v47 = vpop.f32.mrb[125].mxu0 }
 0x1e0   : > { %v5317_v48 = vpop.f32.mrb[125].mxu1  ;;  %v3894_v49 = vpop.f32.mrb[126].mxu0 }
 0x1e1   : > { %v3956_v50 = vpop.f32.mrb[126].mxu1  ;;  %v3898_v51 = vadd.f32 %v6138_v30, %v3897_v46  ;;  %v5312_v52 = vpop.f32.mrb[127].mxu0 }
 0x1e2   : > { %v5318_v53 = vpop.f32.mrb[127].mxu1 }
 0x1e3   : > { %vm3899_vm9 = vcmp.ge.f32.partialorder %v3898_v51, 0.0  ;;  %v3900_v54 = vmul.f32 0.01, %v3898_v51 }
 0x1e5   : > { %v3901_v55 = vsel %vm3899_vm9, %v3898_v51, %v3900_v54 }
 0x1e6   : > { %v3902_v56 = vpack.c.bf16 %v3901_v55, %v3901_v55  ;;  %v3999_v57 = vpop.f32.mrb[128].mxu0 }
 0x1e7   : > { %v4060_v58 = vpop.f32.mrb[128].mxu1  ;;  %v4000_v59 = vadd.f32 %v3999_v57, %v3953_v45  ;;  %v5323_v60 = vpop.f32.mrb[129].mxu0 }
 0x1e8   : > { %v5329_v61 = vpop.f32.mrb[129].mxu1  ;;  %4758 = vst [vmem:[%s6158_s28 + $0x18] sm:$0xf] %v3902_v56  ;;  %v4002_v1 = vpop.f32.mrb[130].mxu0 }
 0x1e9   : > { %v4063_v62 = vpop.f32.mrb[130].mxu1  ;;  %v4066_v63 = vadd.f32 %v4060_v58, %v4000_v59  ;;  %v5324_v0 = vpop.f32.mrb[131].mxu0 }
 0x1ea   : > { %v5330_v2 = vpop.f32.mrb[131].mxu1 }
 0x1ee   : > { %v4114_v3 = vpop.f32.mrb[132].mxu0 }
 0x1ef   : > { %v4164_v4 = vpop.f32.mrb[132].mxu1  ;;  %v4120_v5 = vadd.f32 %v4114_v3, %v4066_v63  ;;  %v5335_v6 = vpop.f32.mrb[133].mxu0 }
 0x1f0   : > { %v5341_v7 = vpop.f32.mrb[133].mxu1  ;;  %v4117_v8 = vpop.f32.mrb[134].mxu0 }
 0x1f1   : > { %v4167_v9 = vpop.f32.mrb[134].mxu1  ;;  %v4170_v10 = vadd.f32 %v4164_v4, %v4120_v5  ;;  %v5336_v11 = vpop.f32.mrb[135].mxu0 }
 0x1f2   : > { %v5342_v12 = vpop.f32.mrb[135].mxu1 }
 0x1f6   : > { %v4230_v13 = vpop.f32.mrb[136].mxu0 }
 0x1f7   : > { %v4280_v14 = vpop.f32.mrb[136].mxu1  ;;  %v4236_v15 = vadd.f32 %v4230_v13, %v4170_v10  ;;  %v5347_v16 = vpop.f32.mrb[137].mxu0 }
 0x1f8   : > { %v5353_v17 = vpop.f32.mrb[137].mxu1  ;;  %v4233_v18 = vpop.f32.mrb[138].mxu0 }
 0x1f9   : > { %v4283_v19 = vpop.f32.mrb[138].mxu1  ;;  %v4286_v20 = vadd.f32 %v4280_v14, %v4236_v15  ;;  %v5348_v21 = vpop.f32.mrb[139].mxu0 }
 0x1fa   : > { %v5354_v22 = vpop.f32.mrb[139].mxu1 }
 0x1fe   : > { %v4334_v23 = vpop.f32.mrb[140].mxu0 }
 0x1ff   : > { %v4396_v24 = vpop.f32.mrb[140].mxu1  ;;  %v4340_v25 = vadd.f32 %v4334_v23, %v4286_v20  ;;  %v5359_v26 = vpop.f32.mrb[141].mxu0 }
 0x200   : > { %v5365_v27 = vpop.f32.mrb[141].mxu1  ;;  %v4337_v28 = vpop.f32.mrb[142].mxu0 }
 0x201   : > { %v4399_v29 = vpop.f32.mrb[142].mxu1  ;;  %v4402_v31 = vadd.f32 %v4396_v24, %v4340_v25  ;;  %v5360_v32 = vpop.f32.mrb[143].mxu0 }
 0x202   : > { %v5366_v33 = vpop.f32.mrb[143].mxu1 }
 0x203   : > { %v4403_v34 = vadd.f32 %v6138_v30, %v4402_v31 }
 0x205   : > { %vm4404_vm10 = vcmp.ge.f32.partialorder %v4403_v34, 0.0  ;;  %v4405_v35 = vmul.f32 0.01, %v4403_v34 }
 0x207   : > { %v4406_v36 = vsel %vm4404_vm10, %v4403_v34, %v4405_v35 }
 0x208   : > { %v4407_v37 = vpack.c.bf16 %v4406_v36, %v4406_v36 }
 0x20a   : > { %4787 = vst [vmem:[%s6158_s28 + $0x1c] sm:$0xf] %v4407_v37 }
 0x20b PF: > { %s16_s23 = sadd.s32 1, %s5472_s23   ;;  %s6249_s21 = smov %s5468_s22 }
 0x20c   : > { %p13_p5 = scmp.ge.s32.totalorder %s16_s23, 4   ;;  %s6250_s22 = smov %s6252_s24 }
 0x20e   :  { %15 = sbr.rel (!%p13_p5) target bundleno = 2 (0x2), region = 126 }

// kernel: gradual_style_block_forward.5
= control target key start
LH: loop header
LB: loop body
LE: loop exit
PB: predicated region body
PF: predicated region fallthrough
CT: control target
= control target key end

     0   :  { %s6276_s21 = smov 0   ;;  %s6278_s22 = smov 0   ;;  %s7623_s0 = inlined_call_operand.vmem [shape: bf16[2,5,5,128], index: 0, kind: input, shape index: {}]   ;;  %s7624_s1 = inlined_call_operand.vmem [shape: bf16[2,5,5,128], index: 1, kind: input, shape index: {}]   ;;  %s7625_s2 = inlined_call_operand.vmem [shape: bf16[2,5,5,128], index: 2, kind: input, shape index: {}]   ;;  %s7626_s3 = inlined_call_operand.vmem [shape: bf16[2,5,5,128], index: 3, kind: input, shape index: {}]   ;;  %s7627_s4 = inlined_call_operand.vmem [shape: bf16[1152,128], index: 4, kind: input, shape index: {}]   ;;  %s7628_s5 = inlined_call_operand.vmem [shape: f32[1,128], index: 5, kind: input, shape index: {}]   ;;  %s7629_s6 = inlined_call_operand.vmem [shape: bf16[2,4,4,128], index: 6, kind: output, shape index: {}]  }
   0x1   :  { %s6280_s23 = smov 0  }
   0x2 LB: > { %s25_s24 = sadd.s32 1, %s6233_s22  ;;  %p4499_p0 = scmp.ge.s32.totalorder %s6237_s23, 1  ;;  %s6237_s23 = sphi %s6280_s23, %s16_s23   ;;  %s6233_s22 = sphi %s6278_s22, %s7631_s22   ;;  %s6229_s21 = sphi %s6276_s21, %s7630_s21  }
   0x3   : > { %p26_p1 = scmp.ge.s32.totalorder %s25_s24, 2  ;;  %p273_p2 = scmp.lt.s32.totalorder %s6237_s23, 3 }
   0x5   : > { %s7633_s24 = smov (%p26_p1, %s25_s24), 0  ;;  %p274_p3 = pnand %p4499_p0, %p273_p2 }
   0x6   : > { %v5914_v0 = vld [vmem:[%s7627_s4 + $0x40] sm:$0xff] (!%p274_p3)   ;;  %v6239_v1 = vmov (!%p274_p3), 0.0   ;;  %v5916_v3 = vld [vmem:[%s7627_s4 + $0x48] sm:$0xff] (!%p274_p3)   ;;  %vm6240_vm0 = vmmov (!%p274_p3), 0   ;;  %v5918_v5 = vld [vmem:[%s7627_s4 + $0x50] sm:$0xff] (!%p274_p3)   ;;  %p328_p4 = scmp.lt.s32.totalorder (!%p274_p3), %s6229_s21, 1 }
   0x7   : > { %277 = sbr.rel (%p274_p3) target bundleno = 807 (0x327), region = 44  ;;  %5167 = vmatprep.subr.bf16.mxu0 (!%p274_p3), %v6239_v1  ;;  %5187 = vmatprep.subr.bf16.mxu1 (!%p274_p3), %v6239_v1  ;;  %v5915_v2 = vld [vmem:[%s7627_s4] sm:$0xff] (!%p274_p3)   ;;  %v5917_v4 = vld [vmem:[%s7627_s4 + $0x8] sm:$0xff] (!%p274_p3)   ;;  %v5919_v6 = vld [vmem:[%s7627_s4 + $0x10] sm:$0xff] (!%p274_p3)  }
   0x8   : > { %5168 = vmatpush3.bf16.msra.mxu0 (!%p274_p3), %v5914_v0  ;;  %5183 = vmatprep.mubr.msk.bf16.mxu0 (!%p274_p3), %vm6240_vm0, %v6239_v1  ;;  %v5920_v7 = vld [vmem:[%s7627_s4 + $0x58] sm:$0xff] (!%p274_p3)   ;;  %v5922_v9 = vld [vmem:[%s7627_s4 + $0x60] sm:$0xff] (!%p274_p3)   ;;  %v5924_v11 = vld [vmem:[%s7627_s4 + $0x68] sm:$0xff] (!%p274_p3)  }
   0x9   : > { %5188 = vmatpush3.bf16.msra.mxu1 (!%p274_p3), %v5915_v2  ;;  %5169 = vmatprep.subr.bf16.mxu0 (!%p274_p3), %v6239_v1  ;;  %v5921_v8 = vld [vmem:[%s7627_s4 + $0x18] sm:$0xff] (!%p274_p3)   ;;  %v5923_v10 = vld [vmem:[%s7627_s4 + $0x20] sm:$0xff] (!%p274_p3)   ;;  %v5925_v12 = vld [vmem:[%s7627_s4 + $0x28] sm:$0xff] (!%p274_p3)  }
   0xa   : > { %5189 = vmatprep.subr.bf16.mxu1 (!%p274_p3), %v6239_v1  ;;  %5203 = vmatprep.mubr.msk.bf16.mxu1 (!%p274_p3), %vm6240_vm0, %v6239_v1  ;;  %v5926_v13 = vld [vmem:[%s7627_s4 + $0x70] sm:$0xff] (!%p274_p3)   ;;  %v5928_v15 = vld [vmem:[%s7627_s4 + $0x78] sm:$0xff] (!%p274_p3)   ;;  %v5930_v19 = vld [vmem:[%s7627_s4 + $0x80] sm:$0xff] (!%p274_p3)  }
   0xb   : > { %v5927_v14 = vld [vmem:[%s7627_s4 + $0x30] sm:$0xff] (!%p274_p3)   ;;  %v5929_v16 = vld [vmem:[%s7627_s4 + $0x38] sm:$0xff] (!%p274_p3)   ;;  %v5931_v20 = vld [vmem:[%s7627_s4 + $0xc0] sm:$0xff] (!%p274_p3)  }
   0xc   : > { %5170 = vmatpush3.bf16.msra.mxu0 (!%p274_p3), %v5916_v3  ;;  %v5932_v21 = vld [vmem:[%s7627_s4 + $0x88] sm:$0xff] (!%p274_p3)   ;;  %v5934_v23 = vld [vmem:[%s7627_s4 + $0x90] sm:$0xff] (!%p274_p3)   ;;  %v5936_v25 = vld [vmem:[%s7627_s4 + $0x98] sm:$0xff] (!%p274_p3)  }
   0xd   : > { %5190 = vmatpush3.bf16.msra.mxu1 (!%p274_p3), %v5917_v4  ;;  %5171 = vmatprep.subr.bf16.mxu0 (!%p274_p3), %v6239_v1  ;;  %v5933_v22 = vld [vmem:[%s7627_s4 + $0xc8] sm:$0xff] (!%p274_p3)   ;;  %v5935_v24 = vld [vmem:[%s7627_s4 + $0xd0] sm:$0xff] (!%p274_p3)   ;;  %v5937_v26 = vld [vmem:[%s7627_s4 + $0xd8] sm:$0xff] (!%p274_p3)  }
   0xe   : > { %5191 = vmatprep.subr.bf16.mxu1 %v6239_v1  ;;  %s7635_s21 = smov (!%p328_p4, %s6229_s21), 1  ;;  %v5938_v27 = vld [vmem:[%s7627_s4 + $0xa0] sm:$0xff]   ;;  %v5940_v30 = vld [vmem:[%s7627_s4 + $0xa8] sm:$0xff]   ;;  %v5942_v33 = vld [vmem:[%s7627_s4 + $0xb0] sm:$0xff]  }
   0xf   : > { %s6353_s29 = smul.u32 20, %s7635_s21  ;;  %v5939_v29 = vld [vmem:[%s7627_s4 + $0xe0] sm:$0xff]   ;;  %v5941_v31 = vld [vmem:[%s7627_s4 + $0xe8] sm:$0xff]   ;;  %v5943_v34 = vld [vmem:[%s7627_s4 + $0xf0] sm:$0xff]   ;;  %s4842_s26 = sshll.u32 %s7635_s21, 3 }
  0x10   : > { %5172 = vmatpush3.bf16.msra.mxu0 %v5918_v5  ;;  %v5944_v37 = vld [vmem:[%s7627_s4 + $0xb8] sm:$0xff]   ;;  %v5947_v41 = vld [vmem:[%s7627_s4 + $0x100] sm:$0xff]   ;;  %v5949_v43 = vld [vmem:[%s7627_s4 + $0x108] sm:$0xff]   ;;  %s7173_s8 = scalar_lea.vmem %s7629_s6, %s4842_s26 }
  0x11   : > { %5192 = vmatpush3.bf16.msra.mxu1 %v5919_v6  ;;  %5173 = vmatprep.subr.bf16.mxu0 %v6239_v1  ;;  %s6367_s12 = scalar_lea.vmem %s7624_s1, %s6353_s29  ;;  %s6376_s17 = scalar_lea.vmem %s7623_s0, %s6353_s29  ;;  %v5945_v38 = vld [vmem:[%s7627_s4 + $0xf8] sm:$0xff]   ;;  %v5948_v42 = vld [vmem:[%s7627_s4 + $0x140] sm:$0xff]   ;;  %v5950_v44 = vld [vmem:[%s7627_s4 + $0x148] sm:$0xff]  }
  0x12   : > { %5193 = vmatprep.subr.bf16.mxu1 %v6239_v1  ;;  %v382_v17 = vld [vmem:[%s6367_s12] sm:$0x3]  ;;  %s6434_s30 = scalar_lea.vmem %s7625_s2, %s6353_s29  ;;  %v5951_v45 = vld [vmem:[%s7627_s4 + $0x110] sm:$0xff]   ;;  %v5953_v47 = vld [vmem:[%s7627_s4 + $0x118] sm:$0xff]   ;;  %s6529_s25 = scalar_lea.vmem %s7626_s3, %s6353_s29 }
  0x13   : > { %v365_v18 = vld [vmem:[%s6376_s17] sm:$0x3]  ;;  %v5952_v46 = vld [vmem:[%s7627_s4 + $0x150] sm:$0xff]   ;;  %v5954_v48 = vld [vmem:[%s7627_s4 + $0x158] sm:$0xff]  }
  0x14   : > { %5174 = vmatpush3.bf16.msra.mxu0 %v5920_v7  ;;  %v5946_v28 = vld [vmem:[%s6376_s17] ss:$0 sps:$4 sm:$0x77]   ;;  %v5957_v52 = vld [vmem:[%s7627_s4 + $0x128] sm:$0xff]   ;;  %v5959_v54 = vld [vmem:[%s7627_s4 + $0x130] sm:$0xff]  }
  0x15   : > { %5194 = vmatpush3.bf16.msra.mxu1 %v5921_v8  ;;  %5175 = vmatprep.subr.bf16.mxu0 %v6239_v1  ;;  %v598_v32 = vshll.u32 %v5946_v28, 16  ;;  %v596_v35 = vshrl.u32 %v5946_v28, 16  ;;  %v692_v40 = vld [vmem:[%s6434_s30] sm:$0x3]  ;;  %v5958_v53 = vld [vmem:[%s7627_s4 + $0x168] sm:$0xff]   ;;  %v5960_v56 = vld [vmem:[%s7627_s4 + $0x170] sm:$0xff]  }
  0x16   : > { %5195 = vmatprep.subr.bf16.mxu1 %v6239_v1  ;;  %v5955_v49 = vld [vmem:[%s7627_s4 + $0x120] sm:$0xff]   ;;  %v5961_v57 = vld [vmem:[%s7627_s4 + $0x138] sm:$0xff]   ;;  %v5966_v2 = vld [vmem:[%s7627_s4 + $0x188] sm:$0xff]  }
  0x17   : > { %v600_v36 = vrot.slane %v598_v32, 1  ;;  %v5956_v50 = vld [vmem:[%s7627_s4 + $0x160] sm:$0xff]   ;;  %v5962_v60 = vld [vmem:[%s7627_s4 + $0x178] sm:$0xff]   ;;  %v5967_v3 = vld [vmem:[%s7627_s4 + $0x1c8] sm:$0xff]  }
  0x18   : > { %5176 = vmatpush3.bf16.msra.mxu0 %v5922_v9  ;;  %v5963_v51 = vld [vmem:[%s6434_s30] ss:$0 sps:$4 sm:$0x77]   ;;  %v5968_v4 = vld [vmem:[%s7627_s4 + $0x190] sm:$0xff]   ;;  %v5970_v6 = vld [vmem:[%s7627_s4 + $0x198] sm:$0xff]  }
  0x19   : > { %5196 = vmatpush3.bf16.msra.mxu1 %v5923_v10  ;;  %5177 = vmatprep.subr.bf16.mxu0 %v6239_v1  ;;  %v601_v39 = vor.u32 %v600_v36, %v596_v35  ;;  %v927_v55 = vshll.u32 %v5963_v51, 16  ;;  %v925_v58 = vshrl.u32 %v5963_v51, 16  ;;  %v798_v61 = vld [vmem:[%s6529_s25] sm:$0x3]  ;;  %v5969_v5 = vld [vmem:[%s7627_s4 + $0x1d0] sm:$0xff]   ;;  %v5971_v7 = vld [vmem:[%s7627_s4 + $0x1d8] sm:$0xff]  }
  0x1a   : > { %5197 = vmatprep.subr.bf16.mxu1 %v6239_v1  ;;  %v5964_v63 = vld [vmem:[%s7627_s4 + $0x180] sm:$0xff]   ;;  %v5974_v10 = vld [vmem:[%s7627_s4 + $0x1a8] sm:$0xff]   ;;  %v5993_v32 = vld [vmem:[%s7627_s4 + $0x70] sm:$0xff]  }
  0x1b   : > { %v929_v59 = vrot.slane %v927_v55, 1  ;;  %v5965_v0 = vld [vmem:[%s7627_s4 + $0x1c0] sm:$0xff]   ;;  %v5994_v36 = vld [vmem:[%s7627_s4 + $0x238] sm:$0xff]   ;;  %v6007_v51 = vld [vmem:[%s7627_s4 + $0x28] sm:$0xff]  }
  0x1c   : > { %5178 = vmatpush3.bf16.msra.mxu0 %v5924_v11  ;;  %v5972_v8 = vld [vmem:[%s7627_s4 + $0x1a0] sm:$0xff]   ;;  %v5975_v11 = vld [vmem:[%s7627_s4 + $0x1e8] sm:$0xff]  }
  0x1d   : > { %5198 = vmatpush3.bf16.msra.mxu1 %v5925_v12  ;;  %5179 = vmatprep.subr.bf16.mxu0 %v6239_v1  ;;  %v930_v62 = vor.u32 %v929_v59, %v925_v58  ;;  %v5973_v9 = vld [vmem:[%s7627_s4 + $0x1e0] sm:$0xff]   ;;  %v5976_v12 = vld [vmem:[%s7627_s4 + $0x1b0] sm:$0xff]  }
  0x1e   : > { %5199 = vmatprep.subr.bf16.mxu1 %v6239_v1  ;;  %v5996_v28 = vld [vmem:[%s6376_s17 + $0x4] ss:$0 sps:$4 sm:$0x77]  }
  0x20   : > { %5180 = vmatpush3.bf16.msra.mxu0 %v5926_v13  ;;  %v5977_v13 = vld [vmem:[%s7627_s4 + $0x1f0] sm:$0xff]  }
  0x21   : > { %5200 = vmatpush3.bf16.msra.mxu1 %v5927_v14  ;;  %5181 = vmatprep.subr.bf16.mxu0 %v6239_v1  ;;  %v5978_v14 = vld [vmem:[%s7627_s4 + $0x1b8] sm:$0xff]  }
  0x22   : > { %5201 = vmatprep.subr.bf16.mxu1 %v6239_v1 }
  0x24   : > { %5182 = vmatpush3.bf16.msra.mxu0 %v5928_v15  ;;  %v5979_v15 = vld [vmem:[%s7627_s4 + $0x1f8] sm:$0xff]  }
  0x25   : > { %5202 = vmatpush3.bf16.msra.mxu1 %v5929_v16  ;;  %5207 = vmatprep.subr.bf16.mxu0 %v6239_v1  ;;  %v4556_v16 = vld [vmem:[%s6376_s17 + $0x4] sm:$0x3] }
  0x26   : > { %5227 = vmatprep.subr.bf16.mxu1 %v6239_v1 }
  0x27   : > { %5184 = vmatmul.mubr.bf16.vlgmr.msra.gmra.mrb[0].mxu0 %v382_v17  ;;  %v4565_v17 = vld [vmem:[%s6367_s12 + $0x4] sm:$0x3] }
  0x28   : > { %5204 = vmatmul.mubr.bf16.vlgmr.msra.gmra.mrb[0].mxu1 %v365_v18  ;;  %5208 = vmatpush3.bf16.msra.mxu0 %v5930_v19  ;;  %v5980_v18 = vld [vmem:[%s7627_s4 + $0x200] sm:$0xff]  }
  0x29   : > { %5228 = vmatpush3.bf16.msra.mxu1 %v5931_v20  ;;  %5209 = vmatprep.subr.bf16.mxu0 %v6239_v1  ;;  %v5981_v19 = vld [vmem:[%s7627_s4 + $0x40] sm:$0xff]   ;;  %v5982_v20 = vld [vmem:[%s7627_s4 + $0x208] sm:$0xff]  }
  0x2a   : > { %5229 = vmatprep.subr.bf16.mxu1 %v6239_v1  ;;  %5223 = vmatprep.mubr.msk.bf16.mxu0 %vm6240_vm0, %v6239_v1 }
  0x2b   : > { %5243 = vmatprep.mubr.msk.bf16.mxu1 %vm6240_vm0, %v6239_v1 }
  0x2c   : > { %5210 = vmatpush3.bf16.msra.mxu0 %v5932_v21  ;;  %v5983_v21 = vld [vmem:[%s7627_s4 + $0x48] sm:$0xff]  }
  0x2d   : > { %5230 = vmatpush3.bf16.msra.mxu1 %v5933_v22  ;;  %5211 = vmatprep.subr.bf16.mxu0 %v6239_v1  ;;  %v5984_v22 = vld [vmem:[%s7627_s4 + $0x210] sm:$0xff]  }
  0x2e   : > { %5231 = vmatprep.subr.bf16.mxu1 %v6239_v1 }
  0x30   : > { %5212 = vmatpush3.bf16.msra.mxu0 %v5934_v23  ;;  %v5985_v23 = vld [vmem:[%s7627_s4 + $0x50] sm:$0xff]  }
  0x31   : > { %5232 = vmatpush3.bf16.msra.mxu1 %v5935_v24  ;;  %5213 = vmatprep.subr.bf16.mxu0 %v6239_v1  ;;  %v5986_v24 = vld [vmem:[%s7627_s4 + $0x218] sm:$0xff]  }
  0x32   : > { %5233 = vmatprep.subr.bf16.mxu1 %v6239_v1 }
  0x34   : > { %5214 = vmatpush3.bf16.msra.mxu0 %v5936_v25  ;;  %v5987_v25 = vld [vmem:[%s7627_s4 + $0x58] sm:$0xff]  }
  0x35   : > { %5234 = vmatpush3.bf16.msra.mxu1 %v5937_v26  ;;  %5215 = vmatprep.subr.bf16.mxu0 %v6239_v1  ;;  %v5988_v26 = vld [vmem:[%s7627_s4 + $0x220] sm:$0xff]  }
  0x36   : > { %5235 = vmatprep.subr.bf16.mxu1 %v6239_v1 }
  0x38   : > { %5216 = vmatpush3.bf16.msra.mxu0 %v5938_v27  ;;  %v5989_v27 = vld [vmem:[%s7627_s4 + $0x60] sm:$0xff]  }
  0x39   : > { %5236 = vmatpush3.bf16.msra.mxu1 %v5939_v29  ;;  %5217 = vmatprep.subr.bf16.mxu0 %v6239_v1  ;;  %v5990_v29 = vld [vmem:[%s7627_s4 + $0x228] sm:$0xff]  }
  0x3a   : > { %5237 = vmatprep.subr.bf16.mxu1 %v6239_v1 }
  0x3c   : > { %5218 = vmatpush3.bf16.msra.mxu0 %v5940_v30  ;;  %v5991_v30 = vld [vmem:[%s7627_s4 + $0x68] sm:$0xff]  }
  0x3d   : > { %5238 = vmatpush3.bf16.msra.mxu1 %v5941_v31  ;;  %5219 = vmatprep.subr.bf16.mxu0 %v6239_v1  ;;  %v5992_v31 = vld [vmem:[%s7627_s4 + $0x230] sm:$0xff]  }
  0x3e   : > { %5239 = vmatprep.subr.bf16.mxu1 %v6239_v1 }
  0x40   : > { %5220 = vmatpush3.bf16.msra.mxu0 %v5942_v33  ;;  %v1258_v33 = vshll.u32 %v5996_v28, 16 }
  0x41   : > { %5240 = vmatpush3.bf16.msra.mxu1 %v5943_v34  ;;  %5221 = vmatprep.subr.bf16.mxu0 %v6239_v1  ;;  %v1256_v34 = vshrl.u32 %v5996_v28, 16  ;;  %v6040_v28 = vld [vmem:[%s7627_s4 + $0x168] sm:$0xff]  }
  0x42   : > { %5241 = vmatprep.subr.bf16.mxu1 %v6239_v1  ;;  %v1260_v35 = vrot.slane %v1258_v33, 1 }
  0x44   : > { %5222 = vmatpush3.bf16.msra.mxu0 %v5944_v37  ;;  %v5995_v37 = vld [vmem:[%s7627_s4 + $0x78] sm:$0xff]  }
  0x45   : > { %5242 = vmatpush3.bf16.msra.mxu1 %v5945_v38  ;;  %5247 = vmatprep.subr.bf16.mxu0 %v6239_v1  ;;  %v1261_v38 = vor.u32 %v1260_v35, %v1256_v34  ;;  %v6043_v34 = vld [vmem:[%s7627_s4 + $0x1b0] sm:$0xff]  }
  0x46   : > { %5267 = vmatprep.subr.bf16.mxu1 %v6239_v1 }
  0x47   : > { %5224 = vmatmul.mubr.bf16.vlgmr.msra.gmra.mrb[4].mxu0 %v601_v39  ;;  %v4586_v39 = vld [vmem:[%s6367_s12 + $0x4] sm:$0x3] }
  0x48   : > { %5244 = vmatmul.mubr.bf16.vlgmr.msra.gmra.mrb[4].mxu1 %v692_v40  ;;  %5248 = vmatpush3.bf16.msra.mxu0 %v5947_v41  ;;  %v5997_v40 = vld [vmem:[%s7627_s4] sm:$0xff]  }
  0x49   : > { %5268 = vmatpush3.bf16.msra.mxu1 %v5948_v42  ;;  %5249 = vmatprep.subr.bf16.mxu0 %v6239_v1  ;;  %v5998_v41 = vld [vmem:[%s7627_s4 + $0x80] sm:$0xff]   ;;  %v5999_v42 = vld [vmem:[%s7627_s4 + $0x8] sm:$0xff]  }
  0x4a   : > { %5269 = vmatprep.subr.bf16.mxu1 %v6239_v1  ;;  %5263 = vmatprep.mubr.msk.bf16.mxu0 %vm6240_vm0, %v6239_v1 }
  0x4b   : > { %5283 = vmatprep.mubr.msk.bf16.mxu1 %vm6240_vm0, %v6239_v1 }
  0x4c   : > { %5250 = vmatpush3.bf16.msra.mxu0 %v5949_v43  ;;  %v6000_v43 = vld [vmem:[%s7627_s4 + $0x88] sm:$0xff]  }
  0x4d   : > { %5270 = vmatpush3.bf16.msra.mxu1 %v5950_v44  ;;  %5251 = vmatprep.subr.bf16.mxu0 %v6239_v1  ;;  %v6001_v44 = vld [vmem:[%s7627_s4 + $0x10] sm:$0xff]  }
  0x4e   : > { %5271 = vmatprep.subr.bf16.mxu1 %v6239_v1 }
  0x50   : > { %5252 = vmatpush3.bf16.msra.mxu0 %v5951_v45  ;;  %v6002_v45 = vld [vmem:[%s7627_s4 + $0x90] sm:$0xff]  }
  0x51   : > { %5272 = vmatpush3.bf16.msra.mxu1 %v5952_v46  ;;  %5253 = vmatprep.subr.bf16.mxu0 %v6239_v1  ;;  %v6003_v46 = vld [vmem:[%s7627_s4 + $0x18] sm:$0xff]  }
  0x52   : > { %5273 = vmatprep.subr.bf16.mxu1 %v6239_v1 }
  0x54   : > { %5254 = vmatpush3.bf16.msra.mxu0 %v5953_v47  ;;  %v6004_v47 = vld [vmem:[%s7627_s4 + $0x98] sm:$0xff]  }
  0x55   : > { %5274 = vmatpush3.bf16.msra.mxu1 %v5954_v48  ;;  %5255 = vmatprep.subr.bf16.mxu0 %v6239_v1  ;;  %v6005_v48 = vld [vmem:[%s7627_s4 + $0x20] sm:$0xff]  }
  0x56   : > { %5275 = vmatprep.subr.bf16.mxu1 %v6239_v1 }
  0x58   : > { %5256 = vmatpush3.bf16.msra.mxu0 %v5955_v49  ;;  %v6006_v49 = vld [vmem:[%s7627_s4 + $0xa0] sm:$0xff]  }
  0x59   : > { %5276 = vmatpush3.bf16.msra.mxu1 %v5956_v50  ;;  %5257 = vmatprep.subr.bf16.mxu0 %v6239_v1  ;;  %v6013_v50 = vld [vmem:[%s6376_s17 + $0x4] ss:$0 sps:$4 sm:$0x77]  }
  0x5a   : > { %5277 = vmatprep.subr.bf16.mxu1 %v6239_v1  ;;  %v1597_v55 = vshll.u32 %v6013_v50, 16  ;;  %v1595_v58 = vshrl.u32 %v6013_v50, 16  ;;  %v6049_v50 = vld [vmem:[%s7627_s4 + $0x1c8] sm:$0xff]  }
  0x5c   : > { %5258 = vmatpush3.bf16.msra.mxu0 %v5957_v52  ;;  %v6008_v52 = vld [vmem:[%s7627_s4 + $0xa8] sm:$0xff]   ;;  %v1599_v59 = vrot.slane %v1597_v55, 1  ;;  %v6054_v55 = vld [vmem:[%s7627_s4 + $0x218] sm:$0xff]  }
  0x5d   : > { %5278 = vmatpush3.bf16.msra.mxu1 %v5958_v53  ;;  %5259 = vmatprep.subr.bf16.mxu0 %v6239_v1  ;;  %v6009_v53 = vld [vmem:[%s7627_s4 + $0x30] sm:$0xff]  }
  0x5e   : > { %5279 = vmatprep.subr.bf16.mxu1 %v6239_v1 }
  0x60   : > { %5260 = vmatpush3.bf16.msra.mxu0 %v5959_v54  ;;  %v6010_v54 = vld [vmem:[%s7627_s4 + $0xb0] sm:$0xff]  }
  0x61   : > { %5280 = vmatpush3.bf16.msra.mxu1 %v5960_v56  ;;  %5261 = vmatprep.subr.bf16.mxu0 %v6239_v1  ;;  %v6011_v56 = vld [vmem:[%s7627_s4 + $0x38] sm:$0xff]  }
  0x62   : > { %5281 = vmatprep.subr.bf16.mxu1 %v6239_v1 }
  0x64   : > { %5262 = vmatpush3.bf16.msra.mxu0 %v5961_v57  ;;  %v6012_v57 = vld [vmem:[%s7627_s4 + $0xb8] sm:$0xff]  }
  0x65   : > { %5282 = vmatpush3.bf16.msra.mxu1 %v5962_v60  ;;  %5287 = vmatprep.subr.bf16.mxu0 %v6239_v1  ;;  %v4585_v60 = vld [vmem:[%s6376_s17 + $0x4] sm:$0x3] }
  0x66   : > { %5307 = vmatprep.subr.bf16.mxu1 %v6239_v1 }
  0x67   : > { %5264 = vmatmul.mubr.bf16.vlgmr.msra.gmra.mrb[8].mxu0 %v798_v61  ;;  %v6014_v61 = vld [vmem:[%s7627_s4 + $0xc0] sm:$0xff]  }
  0x68   : > { %5284 = vmatmul.mubr.bf16.vlgmr.msra.gmra.mrb[8].mxu1 %v930_v62  ;;  %5288 = vmatpush3.bf16.msra.mxu0 %v5964_v63  ;;  %v1600_v62 = vor.u32 %v1599_v59, %v1595_v58  ;;  %v6015_v63 = vld [vmem:[%s7627_s4 + $0x100] sm:$0xff]   ;;  %v6057_v58 = vld [vmem:[%s7627_s4 + $0x1e8] sm:$0xff]  }
  0x69   : > { %5308 = vmatpush3.bf16.msra.mxu1 %v5965_v0  ;;  %5289 = vmatprep.subr.bf16.mxu0 %v6239_v1  ;;  %v6016_v0 = vld [vmem:[%s7627_s4 + $0xc8] sm:$0xff]  }
  0x6a   : > { %5309 = vmatprep.subr.bf16.mxu1 %v6239_v1  ;;  %5303 = vmatprep.mubr.msk.bf16.mxu0 %vm6240_vm0, %v6239_v1  ;;  %v6063_v59 = vld [vmem:[%s6376_s17 + $0x8] ss:$0 sps:$4 sm:$0x77]  }
  0x6b   : > { %5323 = vmatprep.mubr.msk.bf16.mxu1 %vm6240_vm0, %v6239_v1 }
  0x6c   : > { %5290 = vmatpush3.bf16.msra.mxu0 %v5966_v2  ;;  %v6017_v2 = vld [vmem:[%s7627_s4 + $0x108] sm:$0xff]  }
  0x6d   : > { %5310 = vmatpush3.bf16.msra.mxu1 %v5967_v3  ;;  %5291 = vmatprep.subr.bf16.mxu0 %v6239_v1  ;;  %v6018_v3 = vld [vmem:[%s7627_s4 + $0xd0] sm:$0xff]  }
  0x6e   : > { %5311 = vmatprep.subr.bf16.mxu1 %v6239_v1 }
  0x70   : > { %5292 = vmatpush3.bf16.msra.mxu0 %v5968_v4  ;;  %v6019_v4 = vld [vmem:[%s7627_s4 + $0x110] sm:$0xff]  }
  0x71   : > { %5312 = vmatpush3.bf16.msra.mxu1 %v5969_v5  ;;  %5293 = vmatprep.subr.bf16.mxu0 %v6239_v1  ;;  %v6020_v5 = vld [vmem:[%s7627_s4 + $0xd8] sm:$0xff]  }
  0x72   : > { %5313 = vmatprep.subr.bf16.mxu1 %v6239_v1 }
  0x74   : > { %5294 = vmatpush3.bf16.msra.mxu0 %v5970_v6  ;;  %v6021_v6 = vld [vmem:[%s7627_s4 + $0x118] sm:$0xff]  }
  0x75   : > { %5314 = vmatpush3.bf16.msra.mxu1 %v5971_v7  ;;  %5295 = vmatprep.subr.bf16.mxu0 %v6239_v1  ;;  %v6022_v7 = vld [vmem:[%s7627_s4 + $0xe0] sm:$0xff]  }
  0x76   : > { %5315 = vmatprep.subr.bf16.mxu1 %v6239_v1 }
  0x78   : > { %5296 = vmatpush3.bf16.msra.mxu0 %v5972_v8  ;;  %v6023_v8 = vld [vmem:[%s7627_s4 + $0x120] sm:$0xff]  }
  0x79   : > { %5316 = vmatpush3.bf16.msra.mxu1 %v5973_v9  ;;  %5297 = vmatprep.subr.bf16.mxu0 %v6239_v1  ;;  %v6024_v9 = vld [vmem:[%s7627_s4 + $0xe8] sm:$0xff]  }
  0x7a   : > { %5317 = vmatprep.subr.bf16.mxu1 %v6239_v1 }
  0x7c   : > { %5298 = vmatpush3.bf16.msra.mxu0 %v5974_v10  ;;  %v6025_v10 = vld [vmem:[%s7627_s4 + $0x128] sm:$0xff]  }
  0x7d   : > { %5318 = vmatpush3.bf16.msra.mxu1 %v5975_v11  ;;  %5299 = vmatprep.subr.bf16.mxu0 %v6239_v1  ;;  %v6026_v11 = vld [vmem:[%s7627_s4 + $0xf0] sm:$0xff]  }
  0x7e   : > { %5319 = vmatprep.subr.bf16.mxu1 %v6239_v1 }
  0x80   : > { %5300 = vmatpush3.bf16.msra.mxu0 %v5976_v12  ;;  %v6027_v12 = vld [vmem:[%s7627_s4 + $0x130] sm:$0xff]  }
  0x81   : > { %5320 = vmatpush3.bf16.msra.mxu1 %v5977_v13  ;;  %5301 = vmatprep.subr.bf16.mxu0 %v6239_v1  ;;  %v6028_v13 = vld [vmem:[%s7627_s4 + $0xf8] sm:$0xff]  }
  0x82   : > { %5321 = vmatprep.subr.bf16.mxu1 %v6239_v1 }
  0x84   : > { %5302 = vmatpush3.bf16.msra.mxu0 %v5978_v14  ;;  %v6029_v14 = vld [vmem:[%s7627_s4 + $0x138] sm:$0xff]  }
  0x85   : > { %5322 = vmatpush3.bf16.msra.mxu1 %v5979_v15  ;;  %5327 = vmatprep.subr.bf16.mxu0 %v6239_v1  ;;  %v4613_v15 = vld [vmem:[%s6434_s30 + $0x4] sm:$0x3] }
  0x86   : > { %5347 = vmatprep.subr.bf16.mxu1 %v6239_v1 }
  0x87   : > { %5304 = vmatmul.mubr.bf16.vlgmr.msra.gmra.mrb[12].mxu0 %v4556_v16  ;;  %v4622_v16 = vld [vmem:[%s6529_s25 + $0x4] sm:$0x3] }
  0x88   : > { %5324 = vmatmul.mubr.bf16.vlgmr.msra.gmra.mrb[12].mxu1 %v4565_v17  ;;  %5328 = vmatpush3.bf16.msra.mxu0 %v5980_v18  ;;  %v6030_v17 = vld [vmem:[%s7627_s4 + $0x140] sm:$0xff]  }
  0x89   : > { %5348 = vmatpush3.bf16.msra.mxu1 %v5981_v19  ;;  %5329 = vmatprep.subr.bf16.mxu0 %v6239_v1  ;;  %v6031_v18 = vld [vmem:[%s7627_s4 + $0x180] sm:$0xff]   ;;  %v6032_v19 = vld [vmem:[%s7627_s4 + $0x148] sm:$0xff]  }
  0x8a   : > { %5349 = vmatprep.subr.bf16.mxu1 %v6239_v1  ;;  %5343 = vmatprep.mubr.msk.bf16.mxu0 %vm6240_vm0, %v6239_v1 }
  0x8b   : > { %5363 = vmatprep.mubr.msk.bf16.mxu1 %vm6240_vm0, %v6239_v1 }
  0x8c   : > { %5330 = vmatpush3.bf16.msra.mxu0 %v5982_v20  ;;  %v6033_v20 = vld [vmem:[%s7627_s4 + $0x188] sm:$0xff]  }
  0x8d   : > { %5350 = vmatpush3.bf16.msra.mxu1 %v5983_v21  ;;  %5331 = vmatprep.subr.bf16.mxu0 %v6239_v1  ;;  %v6034_v21 = vld [vmem:[%s7627_s4 + $0x150] sm:$0xff]  }
  0x8e   : > { %5351 = vmatprep.subr.bf16.mxu1 %v6239_v1 }
  0x90   : > { %5332 = vmatpush3.bf16.msra.mxu0 %v5984_v22  ;;  %v6035_v22 = vld [vmem:[%s7627_s4 + $0x190] sm:$0xff]  }
  0x91   : > { %5352 = vmatpush3.bf16.msra.mxu1 %v5985_v23  ;;  %5333 = vmatprep.subr.bf16.mxu0 %v6239_v1  ;;  %v6036_v23 = vld [vmem:[%s7627_s4 + $0x158] sm:$0xff]  }
  0x92   : > { %5353 = vmatprep.subr.bf16.mxu1 %v6239_v1 }
  0x94   : > { %5334 = vmatpush3.bf16.msra.mxu0 %v5986_v24  ;;  %v6037_v24 = vld [vmem:[%s7627_s4 + $0x198] sm:$0xff]  }
  0x95   : > { %5354 = vmatpush3.bf16.msra.mxu1 %v5987_v25  ;;  %5335 = vmatprep.subr.bf16.mxu0 %v6239_v1  ;;  %v6038_v25 = vld [vmem:[%s7627_s4 + $0x160] sm:$0xff]  }
  0x96   : > { %5355 = vmatprep.subr.bf16.mxu1 %v6239_v1 }
  0x98   : > { %5336 = vmatpush3.bf16.msra.mxu0 %v5988_v26  ;;  %v6039_v26 = vld [vmem:[%s7627_s4 + $0x1a0] sm:$0xff]  }
  0x99   : > { %5356 = vmatpush3.bf16.msra.mxu1 %v5989_v27  ;;  %5337 = vmatprep.subr.bf16.mxu0 %v6239_v1  ;;  %v6046_v27 = vld [vmem:[%s6434_s30 + $0x4] ss:$0 sps:$4 sm:$0x77]  }
  0x9a   : > { %5357 = vmatprep.subr.bf16.mxu1 %v6239_v1  ;;  %v1928_v35 = vshll.u32 %v6046_v27, 16 }
  0x9c   : > { %5338 = vmatpush3.bf16.msra.mxu0 %v5990_v29  ;;  %v6041_v29 = vld [vmem:[%s7627_s4 + $0x1a8] sm:$0xff]  }
  0x9d   : > { %5358 = vmatpush3.bf16.msra.mxu1 %v5991_v30  ;;  %5339 = vmatprep.subr.bf16.mxu0 %v6239_v1 }
  0x9e   : > { %5359 = vmatprep.subr.bf16.mxu1 %v6239_v1 }
  0xa0   : > { %5340 = vmatpush3.bf16.msra.mxu0 %v5992_v31  ;;  %v6042_v31 = vld [vmem:[%s7627_s4 + $0x170] sm:$0xff]  }
  0xa1   : > { %5360 = vmatpush3.bf16.msra.mxu1 %v5993_v32  ;;  %5341 = vmatprep.subr.bf16.mxu0 %v6239_v1 }
  0xa2   : > { %5361 = vmatprep.subr.bf16.mxu1 %v6239_v1 }
  0xa4   : > { %5342 = vmatpush3.bf16.msra.mxu0 %v5994_v36 }
  0xa5   : > { %5362 = vmatpush3.bf16.msra.mxu1 %v5995_v37  ;;  %5367 = vmatprep.subr.bf16.mxu0 %v6239_v1 }
  0xa6   : > { %5387 = vmatprep.subr.bf16.mxu1 %v6239_v1 }
  0xa7   : > { %5344 = vmatmul.mubr.bf16.vlgmr.msra.gmra.mrb[16].mxu0 %v1261_v38 }
  0xa8   : > { %5364 = vmatmul.mubr.bf16.vlgmr.msra.gmra.mrb[16].mxu1 %v4586_v39  ;;  %5368 = vmatpush3.bf16.msra.mxu0 %v5997_v40 }
  0xa9   : > { %5388 = vmatpush3.bf16.msra.mxu1 %v5998_v41  ;;  %5369 = vmatprep.subr.bf16.mxu0 %v6239_v1 }
  0xaa   : > { %5389 = vmatprep.subr.bf16.mxu1 %v6239_v1  ;;  %5383 = vmatprep.mubr.msk.bf16.mxu0 %vm6240_vm0, %v6239_v1 }
  0xab   : > { %5403 = vmatprep.mubr.msk.bf16.mxu1 %vm6240_vm0, %v6239_v1 }
  0xac   : > { %5370 = vmatpush3.bf16.msra.mxu0 %v5999_v42  ;;  %v1926_v42 = vshrl.u32 %v6046_v27, 16  ;;  %v6074_v27 = vld [vmem:[%s7627_s4 + $0x68] sm:$0xff]  }
  0xad   : > { %5390 = vmatpush3.bf16.msra.mxu1 %v6000_v43  ;;  %5371 = vmatprep.subr.bf16.mxu0 %v6239_v1  ;;  %v1930_v43 = vrot.slane %v1928_v35, 1  ;;  %v6076_v35 = vld [vmem:[%s7627_s4 + $0x70] sm:$0xff]  }
  0xae   : > { %5391 = vmatprep.subr.bf16.mxu1 %v6239_v1 }
  0xb0   : > { %5372 = vmatpush3.bf16.msra.mxu0 %v6001_v44  ;;  %v6044_v44 = vld [vmem:[%s7627_s4 + $0x178] sm:$0xff]  }
  0xb1   : > { %5392 = vmatpush3.bf16.msra.mxu1 %v6002_v45  ;;  %5373 = vmatprep.subr.bf16.mxu0 %v6239_v1  ;;  %v6045_v45 = vld [vmem:[%s7627_s4 + $0x1b8] sm:$0xff]  }
  0xb2   : > { %5393 = vmatprep.subr.bf16.mxu1 %v6239_v1 }
  0xb4   : > { %5374 = vmatpush3.bf16.msra.mxu0 %v6003_v46  ;;  %v1931_v46 = vor.u32 %v1930_v43, %v1926_v42  ;;  %v6079_v42 = vld [vmem:[%s7627_s4 + $0x38] sm:$0xff]   ;;  %v4671_v43 = vld [vmem:[%s6367_s12 + $0x8] sm:$0x3] }
  0xb5   : > { %5394 = vmatpush3.bf16.msra.mxu1 %v6004_v47  ;;  %5375 = vmatprep.subr.bf16.mxu0 %v6239_v1  ;;  %v6047_v47 = vld [vmem:[%s7627_s4 + $0x1c0] sm:$0xff]  }
  0xb6   : > { %5395 = vmatprep.subr.bf16.mxu1 %v6239_v1 }
  0xb8   : > { %5376 = vmatpush3.bf16.msra.mxu0 %v6005_v48  ;;  %v4641_v48 = vld [vmem:[%s6376_s17 + $0x8] sm:$0x3] }
  0xb9   : > { %5396 = vmatpush3.bf16.msra.mxu1 %v6006_v49  ;;  %5377 = vmatprep.subr.bf16.mxu0 %v6239_v1  ;;  %v6048_v49 = vld [vmem:[%s7627_s4 + $0x200] sm:$0xff]  }
  0xba   : > { %5397 = vmatprep.subr.bf16.mxu1 %v6239_v1 }
  0xbc   : > { %5378 = vmatpush3.bf16.msra.mxu0 %v6007_v51  ;;  %v6050_v51 = vld [vmem:[%s7627_s4 + $0x208] sm:$0xff]  }
  0xbd   : > { %5398 = vmatpush3.bf16.msra.mxu1 %v6008_v52  ;;  %5379 = vmatprep.subr.bf16.mxu0 %v6239_v1  ;;  %v6051_v52 = vld [vmem:[%s7627_s4 + $0x1d0] sm:$0xff]  }
  0xbe   : > { %5399 = vmatprep.subr.bf16.mxu1 %v6239_v1 }
  0xc0   : > { %5380 = vmatpush3.bf16.msra.mxu0 %v6009_v53  ;;  %v6052_v53 = vld [vmem:[%s7627_s4 + $0x210] sm:$0xff]  }
  0xc1   : > { %5400 = vmatpush3.bf16.msra.mxu1 %v6010_v54  ;;  %5381 = vmatprep.subr.bf16.mxu0 %v6239_v1  ;;  %v6053_v54 = vld [vmem:[%s7627_s4 + $0x1d8] sm:$0xff]  }
  0xc2   : > { %5401 = vmatprep.subr.bf16.mxu1 %v6239_v1 }
  0xc4   : > { %5382 = vmatpush3.bf16.msra.mxu0 %v6011_v56  ;;  %v6055_v56 = vld [vmem:[%s7627_s4 + $0x1e0] sm:$0xff]  }
  0xc5   : > { %5402 = vmatpush3.bf16.msra.mxu1 %v6012_v57  ;;  %5407 = vmatprep.subr.bf16.mxu0 %v6239_v1  ;;  %v6056_v57 = vld [vmem:[%s7627_s4 + $0x220] sm:$0xff]  }
  0xc6   : > { %5427 = vmatprep.subr.bf16.mxu1 %v6239_v1 }
  0xc7   : > { %5384 = vmatmul.mubr.bf16.vlgmr.msra.gmra.mrb[20].mxu0 %v4585_v60  ;;  %v6058_v60 = vld [vmem:[%s7627_s4 + $0x228] sm:$0xff]  }
  0xc8   : > { %5404 = vmatmul.mubr.bf16.vlgmr.msra.gmra.mrb[20].mxu1 %v1600_v62  ;;  %5408 = vmatpush3.bf16.msra.mxu0 %v6014_v61 }
  0xc9   : > { %5428 = vmatpush3.bf16.msra.mxu1 %v6015_v63  ;;  %5409 = vmatprep.subr.bf16.mxu0 %v6239_v1 }
  0xca   : > { %5429 = vmatprep.subr.bf16.mxu1 %v6239_v1  ;;  %5423 = vmatprep.mubr.msk.bf16.mxu0 %vm6240_vm0, %v6239_v1 }
  0xcb   : > { %5443 = vmatprep.mubr.msk.bf16.mxu1 %vm6240_vm0, %v6239_v1 }
  0xcc   : > { %5410 = vmatpush3.bf16.msra.mxu0 %v6016_v0 }
  0xcd   : > { %5430 = vmatpush3.bf16.msra.mxu1 %v6017_v2  ;;  %5411 = vmatprep.subr.bf16.mxu0 %v6239_v1 }
  0xce   : > { %5431 = vmatprep.subr.bf16.mxu1 %v6239_v1 }
  0xd0   : > { %5412 = vmatpush3.bf16.msra.mxu0 %v6018_v3 }
  0xd1   : > { %5432 = vmatpush3.bf16.msra.mxu1 %v6019_v4  ;;  %5413 = vmatprep.subr.bf16.mxu0 %v6239_v1  ;;  %v6059_v4 = vld [vmem:[%s7627_s4 + $0x1f0] sm:$0xff]  }
  0xd2   : > { %5433 = vmatprep.subr.bf16.mxu1 %v6239_v1 }
  0xd4   : > { %5414 = vmatpush3.bf16.msra.mxu0 %v6020_v5  ;;  %v2259_v5 = vshll.u32 %v6063_v59, 16 }
  0xd5   : > { %5434 = vmatpush3.bf16.msra.mxu1 %v6021_v6  ;;  %5415 = vmatprep.subr.bf16.mxu0 %v6239_v1 }
  0xd6   : > { %5435 = vmatprep.subr.bf16.mxu1 %v6239_v1 }
  0xd8   : > { %5416 = vmatpush3.bf16.msra.mxu0 %v6022_v7 }
  0xd9   : > { %5436 = vmatpush3.bf16.msra.mxu1 %v6023_v8  ;;  %5417 = vmatprep.subr.bf16.mxu0 %v6239_v1 }
  0xda   : > { %5437 = vmatprep.subr.bf16.mxu1 %v6239_v1 }
  0xdc   : > { %5418 = vmatpush3.bf16.msra.mxu0 %v6024_v9  ;;  %v6060_v9 = vld [vmem:[%s7627_s4 + $0x230] sm:$0xff]  }
  0xdd   : > { %5438 = vmatpush3.bf16.msra.mxu1 %v6025_v10  ;;  %5419 = vmatprep.subr.bf16.mxu0 %v6239_v1 }
  0xde   : > { %5439 = vmatprep.subr.bf16.mxu1 %v6239_v1 }
  0xe0   : > { %5420 = vmatpush3.bf16.msra.mxu0 %v6026_v11  ;;  %v6061_v11 = vld [vmem:[%s7627_s4 + $0x1f8] sm:$0xff]  }
  0xe1   : > { %5440 = vmatpush3.bf16.msra.mxu1 %v6027_v12  ;;  %5421 = vmatprep.subr.bf16.mxu0 %v6239_v1  ;;  %v2257_v12 = vshrl.u32 %v6063_v59, 16 }
  0xe2   : > { %5441 = vmatprep.subr.bf16.mxu1 %v6239_v1 }
  0xe4   : > { %5422 = vmatpush3.bf16.msra.mxu0 %v6028_v13  ;;  %v2261_v13 = vrot.slane %v2259_v5, 1 }
  0xe5   : > { %5442 = vmatpush3.bf16.msra.mxu1 %v6029_v14  ;;  %5447 = vmatprep.subr.bf16.mxu0 %v6239_v1  ;;  %v6062_v14 = vld [vmem:[%s7627_s4 + $0x238] sm:$0xff]  }
  0xe6   : > { %5467 = vmatprep.subr.bf16.mxu1 %v6239_v1 }
  0xe7   : > { %5424 = vmatmul.mubr.bf16.vlgmr.msra.gmra.mrb[24].mxu0 %v4613_v15  ;;  %v4650_v15 = vld [vmem:[%s6367_s12 + $0x8] sm:$0x3] }
  0xe8   : > { %5444 = vmatmul.mubr.bf16.vlgmr.msra.gmra.mrb[24].mxu1 %v4622_v16  ;;  %5448 = vmatpush3.bf16.msra.mxu0 %v6030_v17  ;;  %v2262_v16 = vor.u32 %v2261_v13, %v2257_v12  ;;  %v6064_v17 = vld [vmem:[%s7627_s4 + $0x40] sm:$0xff]  }
  0xe9   : > { %5468 = vmatpush3.bf16.msra.mxu1 %v6031_v18  ;;  %5449 = vmatprep.subr.bf16.mxu0 %v6239_v1  ;;  %v6065_v18 = vld [vmem:[%s7627_s4] sm:$0xff]  }
  0xea   : > { %5469 = vmatprep.subr.bf16.mxu1 %v6239_v1  ;;  %5463 = vmatprep.mubr.msk.bf16.mxu0 %vm6240_vm0, %v6239_v1  ;;  %v6097_v13 = vld [vmem:[%s7627_s4 + $0x100] sm:$0xff]  }
  0xeb   : > { %5483 = vmatprep.mubr.msk.bf16.mxu1 %vm6240_vm0, %v6239_v1 }
  0xec   : > { %5450 = vmatpush3.bf16.msra.mxu0 %v6032_v19  ;;  %v6066_v19 = vld [vmem:[%s7627_s4 + $0x48] sm:$0xff]  }
  0xed   : > { %5470 = vmatpush3.bf16.msra.mxu1 %v6033_v20  ;;  %5451 = vmatprep.subr.bf16.mxu0 %v6239_v1  ;;  %v6067_v20 = vld [vmem:[%s7627_s4 + $0x8] sm:$0xff]  }
  0xee   : > { %5471 = vmatprep.subr.bf16.mxu1 %v6239_v1 }
  0xf0   : > { %5452 = vmatpush3.bf16.msra.mxu0 %v6034_v21  ;;  %v6068_v21 = vld [vmem:[%s7627_s4 + $0x50] sm:$0xff]  }
  0xf1   : > { %5472 = vmatpush3.bf16.msra.mxu1 %v6035_v22  ;;  %5453 = vmatprep.subr.bf16.mxu0 %v6239_v1  ;;  %v6069_v22 = vld [vmem:[%s7627_s4 + $0x10] sm:$0xff]  }
  0xf2   : > { %5473 = vmatprep.subr.bf16.mxu1 %v6239_v1 }
  0xf4   : > { %5454 = vmatpush3.bf16.msra.mxu0 %v6036_v23  ;;  %v6070_v23 = vld [vmem:[%s7627_s4 + $0x58] sm:$0xff]  }
  0xf5   : > { %5474 = vmatpush3.bf16.msra.mxu1 %v6037_v24  ;;  %5455 = vmatprep.subr.bf16.mxu0 %v6239_v1  ;;  %v6071_v24 = vld [vmem:[%s7627_s4 + $0x18] sm:$0xff]  }
  0xf6   : > { %5475 = vmatprep.subr.bf16.mxu1 %v6239_v1 }
  0xf8   : > { %5456 = vmatpush3.bf16.msra.mxu0 %v6038_v25  ;;  %v6072_v25 = vld [vmem:[%s7627_s4 + $0x60] sm:$0xff]  }
  0xf9   : > { %5476 = vmatpush3.bf16.msra.mxu1 %v6039_v26  ;;  %5457 = vmatprep.subr.bf16.mxu0 %v6239_v1  ;;  %v6073_v26 = vld [vmem:[%s7627_s4 + $0x20] sm:$0xff]  }
  0xfa   : > { %v481_v30 = vpop.f32.mrb[0].mxu0  ;;  %5477 = vmatprep.subr.bf16.mxu1 %v6239_v1 }
  0xfb   : > { %v569_v32 = vpop.f32.mrb[0].mxu1  ;;  %v5185_v33 = vpop.f32.mrb[1].mxu0 }
  0xfc   : > { %v570_v36 = vadd.f32 %v569_v32, %v481_v30  ;;  %v5205_v37 = vpop.f32.mrb[1].mxu1  ;;  %v484_v38 = vpop.f32.mrb[2].mxu0  ;;  %5458 = vmatpush3.bf16.msra.mxu0 %v6040_v28  ;;  %v6075_v28 = vld [vmem:[%s7627_s4 + $0x28] sm:$0xff]  }
  0xfd   : > { %v572_v39 = vpop.f32.mrb[2].mxu1  ;;  %5478 = vmatpush3.bf16.msra.mxu1 %v6041_v29  ;;  %v5186_v40 = vpop.f32.mrb[3].mxu0  ;;  %5459 = vmatprep.subr.bf16.mxu0 %v6239_v1 }
  0xfe   : > { %v5206_v41 = vpop.f32.mrb[3].mxu1  ;;  %5479 = vmatprep.subr.bf16.mxu1 %v6239_v1  ;;  %v6077_v39 = vld [vmem:[%s7627_s4 + $0x30] sm:$0xff]  }
  0xff   : > { %v6078_v41 = vld [vmem:[%s7627_s4 + $0x78] sm:$0xff]  }
 0x100   : > { %5460 = vmatpush3.bf16.msra.mxu0 %v6042_v31 }
 0x101   : > { %5480 = vmatpush3.bf16.msra.mxu1 %v6043_v34  ;;  %5461 = vmatprep.subr.bf16.mxu0 %v6239_v1 }
 0x102   : > { %5481 = vmatprep.subr.bf16.mxu1 %v6239_v1 }
 0x104   : > { %5462 = vmatpush3.bf16.msra.mxu0 %v6044_v44  ;;  %v6080_v44 = vld [vmem:[%s7627_s4 + $0x80] sm:$0xff]  }
 0x105   : > { %5482 = vmatpush3.bf16.msra.mxu1 %v6045_v45  ;;  %5487 = vmatprep.subr.bf16.mxu0 %v6239_v1  ;;  %v4670_v45 = vld [vmem:[%s6376_s17 + $0x8] sm:$0x3] }
 0x106   : > { %5507 = vmatprep.subr.bf16.mxu1 %v6239_v1 }
 0x107   : > { %5464 = vmatmul.mubr.bf16.vlgmr.msra.gmra.mrb[28].mxu0 %v1931_v46  ;;  %v6081_v46 = vld [vmem:[%s7627_s4 + $0xc0] sm:$0xff]  }
 0x108   : > { %5484 = vmatmul.mubr.bf16.vlgmr.msra.gmra.mrb[28].mxu1 %v4641_v48  ;;  %5488 = vmatpush3.bf16.msra.mxu0 %v6047_v47  ;;  %v6082_v47 = vld [vmem:[%s7627_s4 + $0x88] sm:$0xff]  }
 0x109   : > { %5508 = vmatpush3.bf16.msra.mxu1 %v6048_v49  ;;  %5489 = vmatprep.subr.bf16.mxu0 %v6239_v1  ;;  %v6083_v48 = vld [vmem:[%s7627_s4 + $0xc8] sm:$0xff]   ;;  %v6084_v49 = vld [vmem:[%s7627_s4 + $0x90] sm:$0xff]  }
 0x10a   : > { %5509 = vmatprep.subr.bf16.mxu1 %v6239_v1  ;;  %5503 = vmatprep.mubr.msk.bf16.mxu0 %vm6240_vm0, %v6239_v1 }
 0x10b   : > { %5523 = vmatprep.mubr.msk.bf16.mxu1 %vm6240_vm0, %v6239_v1 }
 0x10c   : > { %5490 = vmatpush3.bf16.msra.mxu0 %v6049_v50  ;;  %v6085_v50 = vld [vmem:[%s7627_s4 + $0xd0] sm:$0xff]  }
 0x10d   : > { %5510 = vmatpush3.bf16.msra.mxu1 %v6050_v51  ;;  %5491 = vmatprep.subr.bf16.mxu0 %v6239_v1  ;;  %v6086_v51 = vld [vmem:[%s7627_s4 + $0x98] sm:$0xff]  }
 0x10e   : > { %5511 = vmatprep.subr.bf16.mxu1 %v6239_v1 }
 0x110   : > { %5492 = vmatpush3.bf16.msra.mxu0 %v6051_v52  ;;  %v6087_v52 = vld [vmem:[%s7627_s4 + $0xd8] sm:$0xff]  }
 0x111   : > { %5512 = vmatpush3.bf16.msra.mxu1 %v6052_v53  ;;  %5493 = vmatprep.subr.bf16.mxu0 %v6239_v1  ;;  %v6088_v53 = vld [vmem:[%s7627_s4 + $0xa0] sm:$0xff]  }
 0x112   : > { %5513 = vmatprep.subr.bf16.mxu1 %v6239_v1 }
 0x114   : > { %5494 = vmatpush3.bf16.msra.mxu0 %v6053_v54  ;;  %v6089_v54 = vld [vmem:[%s7627_s4 + $0xe0] sm:$0xff]  }
 0x115   : > { %5514 = vmatpush3.bf16.msra.mxu1 %v6054_v55  ;;  %5495 = vmatprep.subr.bf16.mxu0 %v6239_v1  ;;  %v6096_v55 = vld [vmem:[%s6376_s17 + $0x8] ss:$0 sps:$4 sm:$0x77]  }
 0x116   : > { %5515 = vmatprep.subr.bf16.mxu1 %v6239_v1 }
 0x118   : > { %5496 = vmatpush3.bf16.msra.mxu0 %v6055_v56  ;;  %v6090_v56 = vld [vmem:[%s7627_s4 + $0xa8] sm:$0xff]  }
 0x119   : > { %5516 = vmatpush3.bf16.msra.mxu1 %v6056_v57  ;;  %5497 = vmatprep.subr.bf16.mxu0 %v6239_v1  ;;  %v6091_v57 = vld [vmem:[%s7627_s4 + $0xe8] sm:$0xff]  }
 0x11a   : > { %v685_v61 = vpop.f32.mrb[4].mxu0  ;;  %5517 = vmatprep.subr.bf16.mxu1 %v6239_v1 }
 0x11b   : > { %v691_v62 = vadd.f32 %v685_v61, %v570_v36  ;;  %v791_v63 = vpop.f32.mrb[4].mxu1  ;;  %v5225_v0 = vpop.f32.mrb[5].mxu0 }
 0x11c   : > { %v5245_v2 = vpop.f32.mrb[5].mxu1  ;;  %v688_v3 = vpop.f32.mrb[6].mxu0  ;;  %5498 = vmatpush3.bf16.msra.mxu0 %v6057_v58 }
 0x11d   : > { %v797_v6 = vadd.f32 %v791_v63, %v691_v62  ;;  %v794_v7 = vpop.f32.mrb[6].mxu1  ;;  %5518 = vmatpush3.bf16.msra.mxu1 %v6058_v60  ;;  %v5226_v8 = vpop.f32.mrb[7].mxu0  ;;  %5499 = vmatprep.subr.bf16.mxu0 %v6239_v1  ;;  %v2593_v62 = vshll.u32 %v6096_v55, 16  ;;  %v6092_v2 = vld [vmem:[%s7627_s4 + $0xb0] sm:$0xff]  }
 0x11e   : > { %v5246_v10 = vpop.f32.mrb[7].mxu1  ;;  %5519 = vmatprep.subr.bf16.mxu1 %v6239_v1  ;;  %v2591_v8 = vshrl.u32 %v6096_v55, 16  ;;  %v6119_v55 = vld [vmem:[%s7627_s4 + $0x1d0] sm:$0xff]  }
 0x11f   : > { %v6094_v10 = vld [vmem:[%s7627_s4 + $0xb8] sm:$0xff]  }
 0x120   : > { %5500 = vmatpush3.bf16.msra.mxu0 %v6059_v4 }
 0x121   : > { %5520 = vmatpush3.bf16.msra.mxu1 %v6060_v9  ;;  %5501 = vmatprep.subr.bf16.mxu0 %v6239_v1  ;;  %v2595_v9 = vrot.slane %v2593_v62, 1 }
 0x122   : > { %5521 = vmatprep.subr.bf16.mxu1 %v6239_v1 }
 0x123   : > { %v2596_v12 = vor.u32 %v2595_v9, %v2591_v8  ;;  %v6127_v9 = vld [vmem:[%s7627_s4 + $0x1f0] sm:$0xff]  }
 0x124   : > { %5502 = vmatpush3.bf16.msra.mxu0 %v6061_v11  ;;  %v6095_v11 = vld [vmem:[%s7627_s4 + $0xf8] sm:$0xff]  }
 0x125   : > { %5522 = vmatpush3.bf16.msra.mxu1 %v6062_v14  ;;  %5527 = vmatprep.subr.bf16.mxu0 %v6239_v1  ;;  %v4698_v14 = vld [vmem:[%s6434_s30 + $0x8] sm:$0x3] }
 0x126   : > { %5547 = vmatprep.subr.bf16.mxu1 %v6239_v1 }
 0x127   : > { %5504 = vmatmul.mubr.bf16.vlgmr.msra.gmra.mrb[32].mxu0 %v4650_v15  ;;  %v6098_v15 = vld [vmem:[%s7627_s4 + $0x140] sm:$0xff]  }
 0x128   : > { %5524 = vmatmul.mubr.bf16.vlgmr.msra.gmra.mrb[32].mxu1 %v2262_v16  ;;  %5528 = vmatpush3.bf16.msra.mxu0 %v6064_v17  ;;  %v6099_v16 = vld [vmem:[%s7627_s4 + $0x108] sm:$0xff]  }
 0x129   : > { %5548 = vmatpush3.bf16.msra.mxu1 %v6065_v18  ;;  %5529 = vmatprep.subr.bf16.mxu0 %v6239_v1  ;;  %v6100_v17 = vld [vmem:[%s7627_s4 + $0x148] sm:$0xff]   ;;  %v6101_v18 = vld [vmem:[%s7627_s4 + $0x110] sm:$0xff]  }
 0x12a   : > { %5549 = vmatprep.subr.bf16.mxu1 %v6239_v1  ;;  %5543 = vmatprep.mubr.msk.bf16.mxu0 %vm6240_vm0, %v6239_v1 }
 0x12b   : > { %5563 = vmatprep.mubr.msk.bf16.mxu1 %vm6240_vm0, %v6239_v1 }
 0x12c   : > { %5530 = vmatpush3.bf16.msra.mxu0 %v6066_v19  ;;  %v6102_v19 = vld [vmem:[%s7627_s4 + $0x150] sm:$0xff]  }
 0x12d   : > { %5550 = vmatpush3.bf16.msra.mxu1 %v6067_v20  ;;  %5531 = vmatprep.subr.bf16.mxu0 %v6239_v1  ;;  %v6103_v20 = vld [vmem:[%s7627_s4 + $0x118] sm:$0xff]  }
 0x12e   : > { %5551 = vmatprep.subr.bf16.mxu1 %v6239_v1 }
 0x130   : > { %5532 = vmatpush3.bf16.msra.mxu0 %v6068_v21  ;;  %v6104_v21 = vld [vmem:[%s7627_s4 + $0x158] sm:$0xff]  }
 0x131   : > { %5552 = vmatpush3.bf16.msra.mxu1 %v6069_v22  ;;  %5533 = vmatprep.subr.bf16.mxu0 %v6239_v1  ;;  %v6105_v22 = vld [vmem:[%s7627_s4 + $0x120] sm:$0xff]  }
 0x132   : > { %5553 = vmatprep.subr.bf16.mxu1 %v6239_v1 }
 0x134   : > { %5534 = vmatpush3.bf16.msra.mxu0 %v6070_v23  ;;  %v6106_v23 = vld [vmem:[%s7627_s4 + $0x160] sm:$0xff]  }
 0x135   : > { %5554 = vmatpush3.bf16.msra.mxu1 %v6071_v24  ;;  %5535 = vmatprep.subr.bf16.mxu0 %v6239_v1  ;;  %v6107_v24 = vld [vmem:[%s7627_s4 + $0x128] sm:$0xff]  }
 0x136   : > { %5555 = vmatprep.subr.bf16.mxu1 %v6239_v1 }
 0x138   : > { %5536 = vmatpush3.bf16.msra.mxu0 %v6072_v25  ;;  %v6113_v25 = vld [vmem:[%s6434_s30 + $0x8] ss:$0 sps:$4 sm:$0x77]  }
 0x139   : > { %5556 = vmatpush3.bf16.msra.mxu1 %v6073_v26  ;;  %5537 = vmatprep.subr.bf16.mxu0 %v6239_v1  ;;  %v6108_v26 = vld [vmem:[%s7627_s4 + $0x168] sm:$0xff]  }
 0x13a   : > { %v897_v29 = vpop.f32.mrb[8].mxu0  ;;  %5557 = vmatprep.subr.bf16.mxu1 %v6239_v1 }
 0x13b   : > { %v903_v30 = vadd.f32 %v897_v29, %v797_v6  ;;  %v1014_v31 = vpop.f32.mrb[8].mxu1  ;;  %v5265_v32 = vpop.f32.mrb[9].mxu0  ;;  %v6093_v6 = vld [vmem:[%s7627_s4 + $0xf0] sm:$0xff]  }
 0x13c   : > { %v5285_v33 = vpop.f32.mrb[9].mxu1  ;;  %v900_v34 = vpop.f32.mrb[10].mxu0  ;;  %5538 = vmatpush3.bf16.msra.mxu0 %v6074_v27  ;;  %v7152_v27 = vld [vmem:[%s7628_s5] ss:$0 sm:$0xff] }
 0x13d   : > { %v1020_v36 = vadd.f32 %v1014_v31, %v903_v30  ;;  %v1017_v37 = vpop.f32.mrb[10].mxu1  ;;  %5558 = vmatpush3.bf16.msra.mxu1 %v6075_v28  ;;  %v5266_v38 = vpop.f32.mrb[11].mxu0  ;;  %5539 = vmatprep.subr.bf16.mxu0 %v6239_v1  ;;  %v6109_v34 = vld [vmem:[%s7627_s4 + $0x130] sm:$0xff]  }
 0x13e   : > { %v5286_v40 = vpop.f32.mrb[11].mxu1  ;;  %5559 = vmatprep.subr.bf16.mxu1 %v6239_v1 }
 0x140   : > { %5540 = vmatpush3.bf16.msra.mxu0 %v6076_v35  ;;  %v2924_v35 = vshll.u32 %v6113_v25, 16 }
 0x141   : > { %5560 = vmatpush3.bf16.msra.mxu1 %v6077_v39  ;;  %5541 = vmatprep.subr.bf16.mxu0 %v6239_v1  ;;  %v6110_v39 = vld [vmem:[%s7627_s4 + $0x170] sm:$0xff]  }
 0x142   : > { %5561 = vmatprep.subr.bf16.mxu1 %v6239_v1 }
 0x144   : > { %5542 = vmatpush3.bf16.msra.mxu0 %v6078_v41 }
 0x145   : > { %5562 = vmatpush3.bf16.msra.mxu1 %v6079_v42  ;;  %5567 = vmatprep.subr.bf16.mxu0 %v6239_v1  ;;  %v6111_v42 = vld [vmem:[%s7627_s4 + $0x138] sm:$0xff]  }
 0x146   : > { %5587 = vmatprep.subr.bf16.mxu1 %v6239_v1 }
 0x147   : > { %5544 = vmatmul.mubr.bf16.vlgmr.msra.gmra.mrb[36].mxu0 %v4671_v43  ;;  %v2922_v43 = vshrl.u32 %v6113_v25, 16  ;;  %v6146_v25 = vld [vmem:[%s6376_s17 + $0xc] ss:$0 sps:$4 sm:$0x77]  }
 0x148   : > { %5564 = vmatmul.mubr.bf16.vlgmr.msra.gmra.mrb[36].mxu1 %v4670_v45  ;;  %5568 = vmatpush3.bf16.msra.mxu0 %v6080_v44  ;;  %v2926_v44 = vrot.slane %v2924_v35, 1 }
 0x149   : > { %5588 = vmatpush3.bf16.msra.mxu1 %v6081_v46  ;;  %5569 = vmatprep.subr.bf16.mxu0 %v6239_v1  ;;  %v6112_v46 = vld [vmem:[%s7627_s4 + $0x178] sm:$0xff]  }
 0x14a   : > { %5589 = vmatprep.subr.bf16.mxu1 %v6239_v1  ;;  %5583 = vmatprep.mubr.msk.bf16.mxu0 %vm6240_vm0, %v6239_v1 }
 0x14b   : > { %5603 = vmatprep.mubr.msk.bf16.mxu1 %vm6240_vm0, %v6239_v1 }
 0x14c   : > { %5570 = vmatpush3.bf16.msra.mxu0 %v6082_v47 }
 0x14d   : > { %5590 = vmatpush3.bf16.msra.mxu1 %v6083_v48  ;;  %5571 = vmatprep.subr.bf16.mxu0 %v6239_v1  ;;  %v4707_v48 = vld [vmem:[%s6529_s25 + $0x8] sm:$0x3] }
 0x14e   : > { %5591 = vmatprep.subr.bf16.mxu1 %v6239_v1 }
 0x150   : > { %5572 = vmatpush3.bf16.msra.mxu0 %v6084_v49  ;;  %v2927_v49 = vor.u32 %v2926_v44, %v2922_v43  ;;  %v6144_v44 = vld [vmem:[%s7627_s4 + $0x238] sm:$0xff]  }
 0x151   : > { %5592 = vmatpush3.bf16.msra.mxu1 %v6085_v50  ;;  %5573 = vmatprep.subr.bf16.mxu0 %v6239_v1  ;;  %v6114_v50 = vld [vmem:[%s7627_s4 + $0x180] sm:$0xff]  }
 0x152   : > { %5593 = vmatprep.subr.bf16.mxu1 %v6239_v1 }
 0x154   : > { %5574 = vmatpush3.bf16.msra.mxu0 %v6086_v51  ;;  %v6115_v51 = vld [vmem:[%s7627_s4 + $0x1c0] sm:$0xff]  }
 0x155   : > { %5594 = vmatpush3.bf16.msra.mxu1 %v6087_v52  ;;  %5575 = vmatprep.subr.bf16.mxu0 %v6239_v1  ;;  %v6116_v52 = vld [vmem:[%s7627_s4 + $0x188] sm:$0xff]  }
 0x156   : > { %5595 = vmatprep.subr.bf16.mxu1 %v6239_v1 }
 0x158   : > { %5576 = vmatpush3.bf16.msra.mxu0 %v6088_v53  ;;  %v6117_v53 = vld [vmem:[%s7627_s4 + $0x1c8] sm:$0xff]  }
 0x159   : > { %5596 = vmatpush3.bf16.msra.mxu1 %v6089_v54  ;;  %5577 = vmatprep.subr.bf16.mxu0 %v6239_v1  ;;  %v6118_v54 = vld [vmem:[%s7627_s4 + $0x190] sm:$0xff]  }
 0x15a   : > { %v1121_v58 = vpop.f32.mrb[12].mxu0  ;;  %5597 = vmatprep.subr.bf16.mxu1 %v6239_v1 }
 0x15b   : > { %v1127_v59 = vadd.f32 %v1121_v58, %v1020_v36  ;;  %v1228_v60 = vpop.f32.mrb[12].mxu1  ;;  %v5305_v61 = vpop.f32.mrb[13].mxu0  ;;  %v6122_v58 = vld [vmem:[%s7627_s4 + $0x1a0] sm:$0xff]  }
 0x15c   : > { %v5325_v63 = vpop.f32.mrb[13].mxu1  ;;  %v1124_v0 = vpop.f32.mrb[14].mxu0  ;;  %5578 = vmatpush3.bf16.msra.mxu0 %v6090_v56  ;;  %v6120_v56 = vld [vmem:[%s7627_s4 + $0x198] sm:$0xff]   ;;  %v6125_v61 = vld [vmem:[%s7627_s4 + $0x1e8] sm:$0xff]  }
 0x15d   : > { %v1234_v3 = vadd.f32 %v1228_v60, %v1127_v59  ;;  %v1231_v4 = vpop.f32.mrb[14].mxu1  ;;  %5598 = vmatpush3.bf16.msra.mxu1 %v6091_v57  ;;  %v5306_v5 = vpop.f32.mrb[15].mxu0  ;;  %5579 = vmatprep.subr.bf16.mxu0 %v6239_v1  ;;  %v6121_v57 = vld [vmem:[%s7627_s4 + $0x1d8] sm:$0xff]   ;;  %v6123_v59 = vld [vmem:[%s7627_s4 + $0x1e0] sm:$0xff]   ;;  %v6124_v60 = vld [vmem:[%s7627_s4 + $0x1a8] sm:$0xff]  }
 0x15e   : > { %v5326_v7 = vpop.f32.mrb[15].mxu1  ;;  %5599 = vmatprep.subr.bf16.mxu1 %v6239_v1  ;;  %v6126_v5 = vld [vmem:[%s7627_s4 + $0x1b0] sm:$0xff]  }
 0x160   : > { %5580 = vmatpush3.bf16.msra.mxu0 %v6092_v2 }
 0x161   : > { %5600 = vmatpush3.bf16.msra.mxu1 %v6093_v6  ;;  %5581 = vmatprep.subr.bf16.mxu0 %v6239_v1 }
 0x162   : > { %5601 = vmatprep.subr.bf16.mxu1 %v6239_v1 }
 0x164   : > { %5582 = vmatpush3.bf16.msra.mxu0 %v6094_v10 }
 0x165   : > { %5602 = vmatpush3.bf16.msra.mxu1 %v6095_v11  ;;  %5607 = vmatprep.subr.bf16.mxu0 %v6239_v1  ;;  %v6128_v11 = vld [vmem:[%s7627_s4 + $0x1b8] sm:$0xff]  }
 0x166   : > { %5627 = vmatprep.subr.bf16.mxu1 %v6239_v1 }
 0x167   : > { %5584 = vmatmul.mubr.bf16.vlgmr.msra.gmra.mrb[40].mxu0 %v2596_v12  ;;  %v6129_v12 = vld [vmem:[%s7627_s4 + $0x1f8] sm:$0xff]  }
 0x168   : > { %5604 = vmatmul.mubr.bf16.vlgmr.msra.gmra.mrb[40].mxu1 %v4698_v14  ;;  %5608 = vmatpush3.bf16.msra.mxu0 %v6097_v13  ;;  %v4726_v13 = vld [vmem:[%s6376_s17 + $0xc] sm:$0x3]  ;;  %v6130_v14 = vld [vmem:[%s7627_s4 + $0x200] sm:$0xff]  }
 0x169   : > { %5628 = vmatpush3.bf16.msra.mxu1 %v6098_v15  ;;  %5609 = vmatprep.subr.bf16.mxu0 %v6239_v1  ;;  %v4735_v15 = vld [vmem:[%s6367_s12 + $0xc] sm:$0x3] }
 0x16a   : > { %5629 = vmatprep.subr.bf16.mxu1 %v6239_v1  ;;  %5623 = vmatprep.mubr.msk.bf16.mxu0 %vm6240_vm0, %v6239_v1 }
 0x16b   : > { %5643 = vmatprep.mubr.msk.bf16.mxu1 %vm6240_vm0, %v6239_v1 }
 0x16c   : > { %5610 = vmatpush3.bf16.msra.mxu0 %v6099_v16  ;;  %v6131_v16 = vld [vmem:[%s7627_s4 + $0x40] sm:$0xff]  }
 0x16d   : > { %5630 = vmatpush3.bf16.msra.mxu1 %v6100_v17  ;;  %5611 = vmatprep.subr.bf16.mxu0 %v6239_v1  ;;  %v6132_v17 = vld [vmem:[%s7627_s4 + $0x208] sm:$0xff]  }
 0x16e   : > { %5631 = vmatprep.subr.bf16.mxu1 %v6239_v1 }
 0x170   : > { %5612 = vmatpush3.bf16.msra.mxu0 %v6101_v18  ;;  %v6133_v18 = vld [vmem:[%s7627_s4 + $0x48] sm:$0xff]  }
 0x171   : > { %5632 = vmatpush3.bf16.msra.mxu1 %v6102_v19  ;;  %5613 = vmatprep.subr.bf16.mxu0 %v6239_v1  ;;  %v6134_v19 = vld [vmem:[%s7627_s4 + $0x210] sm:$0xff]  }
 0x172   : > { %5633 = vmatprep.subr.bf16.mxu1 %v6239_v1 }
 0x174   : > { %5614 = vmatpush3.bf16.msra.mxu0 %v6103_v20  ;;  %v6135_v20 = vld [vmem:[%s7627_s4 + $0x50] sm:$0xff]  }
 0x175   : > { %5634 = vmatpush3.bf16.msra.mxu1 %v6104_v21  ;;  %5615 = vmatprep.subr.bf16.mxu0 %v6239_v1  ;;  %v6136_v21 = vld [vmem:[%s7627_s4 + $0x218] sm:$0xff]  }
 0x176   : > { %5635 = vmatprep.subr.bf16.mxu1 %v6239_v1 }
 0x178   : > { %5616 = vmatpush3.bf16.msra.mxu0 %v6105_v22  ;;  %v6137_v22 = vld [vmem:[%s7627_s4 + $0x58] sm:$0xff]  }
 0x179   : > { %5636 = vmatpush3.bf16.msra.mxu1 %v6106_v23  ;;  %5617 = vmatprep.subr.bf16.mxu0 %v6239_v1  ;;  %v6138_v23 = vld [vmem:[%s7627_s4 + $0x220] sm:$0xff]  }
 0x17a   : > { %v1345_v28 = vpop.f32.mrb[16].mxu0  ;;  %5637 = vmatprep.subr.bf16.mxu1 %v6239_v1 }
 0x17b   : > { %v1351_v29 = vadd.f32 %v1345_v28, %v1234_v3  ;;  %v7155_v30 = vpop.f32.mrb[16].mxu1  ;;  %v5345_v31 = vpop.f32.mrb[17].mxu0  ;;  %v6141_v28 = vld [vmem:[%s7627_s4 + $0x68] sm:$0xff]  }
 0x17c   : > { %v5365_v32 = vpop.f32.mrb[17].mxu1  ;;  %v1348_v33 = vpop.f32.mrb[18].mxu0  ;;  %5618 = vmatpush3.bf16.msra.mxu0 %v6107_v24  ;;  %v6139_v24 = vld [vmem:[%s7627_s4 + $0x60] sm:$0xff]  }
 0x17d   : > { %v1358_v36 = vadd.f32 %v7152_v27, %v1351_v29  ;;  %v1483_v37 = vpop.f32.mrb[18].mxu1  ;;  %5638 = vmatpush3.bf16.msra.mxu1 %v6108_v26  ;;  %v5346_v38 = vpop.f32.mrb[19].mxu0  ;;  %5619 = vmatprep.subr.bf16.mxu0 %v6239_v1  ;;  %v6140_v26 = vld [vmem:[%s7627_s4 + $0x228] sm:$0xff]   ;;  %v3255_v33 = vshll.u32 %v6146_v25, 16 }
 0x17e   : > { %v5366_v40 = vpop.f32.mrb[19].mxu1  ;;  %5639 = vmatprep.subr.bf16.mxu1 %v6239_v1 }
 0x17f   : > { %vm1359_vm1 = vcmp.ge.f32.partialorder %v1358_v36, 0.0  ;;  %v1360_v41 = vmul.f32 0.01, %v1358_v36  ;;  %v6143_v40 = vld [vmem:[%s7627_s4 + $0x70] sm:$0xff]   ;;  %v3257_v43 = vrot.slane %v3255_v33, 1 }
 0x180   : > { %5620 = vmatpush3.bf16.msra.mxu0 %v6109_v34 }
 0x181   : > { %v1361_v45 = vsel %vm1359_vm1, %v1358_v36, %v1360_v41  ;;  %5640 = vmatpush3.bf16.msra.mxu1 %v6110_v39  ;;  %5621 = vmatprep.subr.bf16.mxu0 %v6239_v1  ;;  %v6142_v36 = vld [vmem:[%s7627_s4 + $0x230] sm:$0xff]  }
 0x182   : > { %v1362_v47 = vpack.c.bf16 %v1361_v45, %v1361_v45  ;;  %5641 = vmatprep.subr.bf16.mxu1 %v6239_v1  ;;  %v6145_v45 = vld [vmem:[%s7627_s4 + $0x78] sm:$0xff]  }
 0x184   : > { %1363 = vst [vmem:[%s7173_s8] sm:$0x3] %v1362_v47  ;;  %5622 = vmatpush3.bf16.msra.mxu0 %v6111_v42  ;;  %v3253_v42 = vshrl.u32 %v6146_v25, 16  ;;  %v6147_v47 = vld [vmem:[%s7627_s4] sm:$0xff]  }
 0x185   : > { %5642 = vmatpush3.bf16.msra.mxu1 %v6112_v46  ;;  %5647 = vmatprep.subr.bf16.mxu0 %v6239_v1  ;;  %v6172_v25 = vld [vmem:[%s7627_s4 + $0xe0] sm:$0xff]  }
 0x186   : > { %5667 = vmatprep.subr.bf16.mxu1 %v6239_v1  ;;  %v3258_v46 = vor.u32 %v3257_v43, %v3253_v42  ;;  %v6178_v43 = vld [vmem:[%s7627_s4 + $0xf8] sm:$0xff]  }
 0x187   : > { %5624 = vmatmul.mubr.bf16.vlgmr.msra.gmra.mrb[44].mxu0 %v4707_v48  ;;  %v4756_v48 = vld [vmem:[%s6367_s12 + $0xc] sm:$0x3] }
 0x188   : > { %5644 = vmatmul.mubr.bf16.vlgmr.msra.gmra.mrb[44].mxu1 %v2927_v49  ;;  %5648 = vmatpush3.bf16.msra.mxu0 %v6114_v50  ;;  %v6148_v49 = vld [vmem:[%s7627_s4 + $0x80] sm:$0xff]   ;;  %v6149_v50 = vld [vmem:[%s7627_s4 + $0x8] sm:$0xff]  }
 0x189   : > { %5668 = vmatpush3.bf16.msra.mxu1 %v6115_v51  ;;  %5649 = vmatprep.subr.bf16.mxu0 %v6239_v1  ;;  %v6150_v51 = vld [vmem:[%s7627_s4 + $0x88] sm:$0xff]  }
 0x18a   : > { %5669 = vmatprep.subr.bf16.mxu1 %v6239_v1  ;;  %5663 = vmatprep.mubr.msk.bf16.mxu0 %vm6240_vm0, %v6239_v1 }
 0x18b   : > { %5683 = vmatprep.mubr.msk.bf16.mxu1 %vm6240_vm0, %v6239_v1 }
 0x18c   : > { %5650 = vmatpush3.bf16.msra.mxu0 %v6116_v52  ;;  %v6151_v52 = vld [vmem:[%s7627_s4 + $0x10] sm:$0xff]  }
 0x18d   : > { %5670 = vmatpush3.bf16.msra.mxu1 %v6117_v53  ;;  %5651 = vmatprep.subr.bf16.mxu0 %v6239_v1  ;;  %v6152_v53 = vld [vmem:[%s7627_s4 + $0x90] sm:$0xff]  }
 0x18e   : > { %5671 = vmatprep.subr.bf16.mxu1 %v6239_v1 }
 0x190   : > { %5652 = vmatpush3.bf16.msra.mxu0 %v6118_v54  ;;  %v6153_v54 = vld [vmem:[%s7627_s4 + $0x18] sm:$0xff]  }
 0x191   : > { %5672 = vmatpush3.bf16.msra.mxu1 %v6119_v55  ;;  %5653 = vmatprep.subr.bf16.mxu0 %v6239_v1  ;;  %v6154_v55 = vld [vmem:[%s7627_s4 + $0x98] sm:$0xff]  }
 0x192   : > { %5673 = vmatprep.subr.bf16.mxu1 %v6239_v1 }
 0x194   : > { %5654 = vmatpush3.bf16.msra.mxu0 %v6120_v56  ;;  %v6155_v56 = vld [vmem:[%s7627_s4 + $0x20] sm:$0xff]  }
 0x195   : > { %5674 = vmatpush3.bf16.msra.mxu1 %v6121_v57  ;;  %5655 = vmatprep.subr.bf16.mxu0 %v6239_v1  ;;  %v6156_v57 = vld [vmem:[%s7627_s4 + $0xa0] sm:$0xff]  }
 0x196   : > { %5675 = vmatprep.subr.bf16.mxu1 %v6239_v1 }
 0x198   : > { %5656 = vmatpush3.bf16.msra.mxu0 %v6122_v58  ;;  %v6157_v58 = vld [vmem:[%s7627_s4 + $0x28] sm:$0xff]  }
 0x199   : > { %5676 = vmatpush3.bf16.msra.mxu1 %v6123_v59  ;;  %5657 = vmatprep.subr.bf16.mxu0 %v6239_v1  ;;  %v6163_v59 = vld [vmem:[%s6376_s17 + $0xc] ss:$0 sps:$4 sm:$0x77]  }
 0x19a   : > { %v1568_v62 = vpop.f32.mrb[20].mxu0  ;;  %5677 = vmatprep.subr.bf16.mxu1 %v6239_v1 }
 0x19b   : > { %v1569_v63 = vadd.f32 %v1568_v62, %v7155_v30  ;;  %v1684_v0 = vpop.f32.mrb[20].mxu1  ;;  %v5385_v2 = vpop.f32.mrb[21].mxu0 }
 0x19c   : > { %v5405_v3 = vpop.f32.mrb[21].mxu1  ;;  %v1571_v4 = vpop.f32.mrb[22].mxu0  ;;  %5658 = vmatpush3.bf16.msra.mxu0 %v6124_v60  ;;  %v6158_v60 = vld [vmem:[%s7627_s4 + $0xa8] sm:$0xff]  }
 0x19d   : > { %v1690_v6 = vadd.f32 %v1684_v0, %v1569_v63  ;;  %v1687_v7 = vpop.f32.mrb[22].mxu1  ;;  %5678 = vmatpush3.bf16.msra.mxu1 %v6125_v61  ;;  %v5386_v8 = vpop.f32.mrb[23].mxu0  ;;  %5659 = vmatprep.subr.bf16.mxu0 %v6239_v1  ;;  %v6159_v4 = vld [vmem:[%s7627_s4 + $0x30] sm:$0xff]  }
 0x19e   : > { %v5406_v10 = vpop.f32.mrb[23].mxu1  ;;  %5679 = vmatprep.subr.bf16.mxu1 %v6239_v1 }
 0x1a0   : > { %5660 = vmatpush3.bf16.msra.mxu0 %v6126_v5  ;;  %v3589_v5 = vshll.u32 %v6163_v59, 16 }
 0x1a1   : > { %5680 = vmatpush3.bf16.msra.mxu1 %v6127_v9  ;;  %5661 = vmatprep.subr.bf16.mxu0 %v6239_v1  ;;  %v6160_v9 = vld [vmem:[%s7627_s4 + $0xb0] sm:$0xff]  }
 0x1a2   : > { %5681 = vmatprep.subr.bf16.mxu1 %v6239_v1 }
 0x1a4   : > { %5662 = vmatpush3.bf16.msra.mxu0 %v6128_v11  ;;  %v6161_v11 = vld [vmem:[%s7627_s4 + $0x38] sm:$0xff]  }
 0x1a5   : > { %5682 = vmatpush3.bf16.msra.mxu1 %v6129_v12  ;;  %5687 = vmatprep.subr.bf16.mxu0 %v6239_v1  ;;  %v3587_v12 = vshrl.u32 %v6163_v59, 16  ;;  %v6189_v59 = vld [vmem:[%s7627_s4 + $0x1a0] sm:$0xff]  }
 0x1a6   : > { %5707 = vmatprep.subr.bf16.mxu1 %v6239_v1 }
 0x1a7   : > { %5664 = vmatmul.mubr.bf16.vlgmr.msra.gmra.mrb[48].mxu0 %v4726_v13  ;;  %v3591_v13 = vrot.slane %v3589_v5, 1 }
 0x1a8   : > { %5684 = vmatmul.mubr.bf16.vlgmr.msra.gmra.mrb[48].mxu1 %v4735_v15  ;;  %5688 = vmatpush3.bf16.msra.mxu0 %v6130_v14  ;;  %v6162_v14 = vld [vmem:[%s7627_s4 + $0xb8] sm:$0xff]   ;;  %v4755_v15 = vld [vmem:[%s6376_s17 + $0xc] sm:$0x3] }
 0x1a9   : > { %5708 = vmatpush3.bf16.msra.mxu1 %v6131_v16  ;;  %5689 = vmatprep.subr.bf16.mxu0 %v6239_v1  ;;  %v3592_v16 = vor.u32 %v3591_v13, %v3587_v12 }
 0x1aa   : > { %5709 = vmatprep.subr.bf16.mxu1 %v6239_v1  ;;  %5703 = vmatprep.mubr.msk.bf16.mxu0 %vm6240_vm0, %v6239_v1 }
 0x1ab   : > { %5723 = vmatprep.mubr.msk.bf16.mxu1 %vm6240_vm0, %v6239_v1 }
 0x1ac   : > { %5690 = vmatpush3.bf16.msra.mxu0 %v6132_v17  ;;  %v6164_v17 = vld [vmem:[%s7627_s4 + $0xc0] sm:$0xff]  }
 0x1ad   : > { %5710 = vmatpush3.bf16.msra.mxu1 %v6133_v18  ;;  %5691 = vmatprep.subr.bf16.mxu0 %v6239_v1  ;;  %v6165_v18 = vld [vmem:[%s7627_s4 + $0x100] sm:$0xff]  }
 0x1ae   : > { %5711 = vmatprep.subr.bf16.mxu1 %v6239_v1 }
 0x1b0   : > { %5692 = vmatpush3.bf16.msra.mxu0 %v6134_v19  ;;  %v6166_v19 = vld [vmem:[%s7627_s4 + $0xc8] sm:$0xff]  }
 0x1b1   : > { %5712 = vmatpush3.bf16.msra.mxu1 %v6135_v20  ;;  %5693 = vmatprep.subr.bf16.mxu0 %v6239_v1  ;;  %v6167_v20 = vld [vmem:[%s7627_s4 + $0x108] sm:$0xff]  }
 0x1b2   : > { %5713 = vmatprep.subr.bf16.mxu1 %v6239_v1 }
 0x1b4   : > { %5694 = vmatpush3.bf16.msra.mxu0 %v6136_v21  ;;  %v6168_v21 = vld [vmem:[%s7627_s4 + $0xd0] sm:$0xff]  }
 0x1b5   : > { %5714 = vmatpush3.bf16.msra.mxu1 %v6137_v22  ;;  %5695 = vmatprep.subr.bf16.mxu0 %v6239_v1  ;;  %v6169_v22 = vld [vmem:[%s7627_s4 + $0x110] sm:$0xff]  }
 0x1b6   : > { %5715 = vmatprep.subr.bf16.mxu1 %v6239_v1 }
 0x1b8   : > { %5696 = vmatpush3.bf16.msra.mxu0 %v6138_v23  ;;  %v6170_v23 = vld [vmem:[%s7627_s4 + $0xd8] sm:$0xff]  }
 0x1b9   : > { %5716 = vmatpush3.bf16.msra.mxu1 %v6139_v24  ;;  %5697 = vmatprep.subr.bf16.mxu0 %v6239_v1  ;;  %v6171_v24 = vld [vmem:[%s7627_s4 + $0x118] sm:$0xff]  }
 0x1ba   : > { %v1791_v29 = vpop.f32.mrb[24].mxu0  ;;  %5717 = vmatprep.subr.bf16.mxu1 %v6239_v1 }
 0x1bb   : > { %v1797_v30 = vadd.f32 %v1791_v29, %v1690_v6  ;;  %v1898_v31 = vpop.f32.mrb[24].mxu1  ;;  %v5425_v32 = vpop.f32.mrb[25].mxu0  ;;  %v6175_v29 = vld [vmem:[%s7627_s4 + $0x128] sm:$0xff]  }
 0x1bc   : > { %v5445_v34 = vpop.f32.mrb[25].mxu1  ;;  %v1794_v35 = vpop.f32.mrb[26].mxu0  ;;  %5698 = vmatpush3.bf16.msra.mxu0 %v6140_v26  ;;  %v6173_v26 = vld [vmem:[%s7627_s4 + $0x120] sm:$0xff]  }
 0x1bd   : > { %v1904_v37 = vadd.f32 %v1898_v31, %v1797_v30  ;;  %v1901_v38 = vpop.f32.mrb[26].mxu1  ;;  %5718 = vmatpush3.bf16.msra.mxu1 %v6141_v28  ;;  %v5426_v39 = vpop.f32.mrb[27].mxu0  ;;  %5699 = vmatprep.subr.bf16.mxu0 %v6239_v1  ;;  %v6174_v28 = vld [vmem:[%s7627_s4 + $0xe8] sm:$0xff]  }
 0x1be   : > { %v5446_v41 = vpop.f32.mrb[27].mxu1  ;;  %5719 = vmatprep.subr.bf16.mxu1 %v6239_v1 }
 0x1c0   : > { %5700 = vmatpush3.bf16.msra.mxu0 %v6142_v36  ;;  %v6176_v36 = vld [vmem:[%s7627_s4 + $0xf0] sm:$0xff]  }
 0x1c1   : > { %5720 = vmatpush3.bf16.msra.mxu1 %v6143_v40  ;;  %5701 = vmatprep.subr.bf16.mxu0 %v6239_v1  ;;  %v6177_v40 = vld [vmem:[%s7627_s4 + $0x130] sm:$0xff]  }
 0x1c2   : > { %5721 = vmatprep.subr.bf16.mxu1 %v6239_v1 }
 0x1c4   : > { %5702 = vmatpush3.bf16.msra.mxu0 %v6144_v44 }
 0x1c5   : > { %5722 = vmatpush3.bf16.msra.mxu1 %v6145_v45  ;;  %5727 = vmatprep.subr.bf16.mxu0 %v6239_v1  ;;  %v6179_v45 = vld [vmem:[%s7627_s4 + $0x138] sm:$0xff]  }
 0x1c6   : > { %5747 = vmatprep.subr.bf16.mxu1 %v6239_v1 }
 0x1c7   : > { %5704 = vmatmul.mubr.bf16.vlgmr.msra.gmra.mrb[52].mxu0 %v3258_v46 }
 0x1c8   : > { %5724 = vmatmul.mubr.bf16.vlgmr.msra.gmra.mrb[52].mxu1 %v4756_v48  ;;  %5728 = vmatpush3.bf16.msra.mxu0 %v6147_v47  ;;  %v4783_v48 = vld [vmem:[%s6434_s30 + $0xc] sm:$0x3] }
 0x1c9   : > { %5748 = vmatpush3.bf16.msra.mxu1 %v6148_v49  ;;  %5729 = vmatprep.subr.bf16.mxu0 %v6239_v1  ;;  %v6180_v49 = vld [vmem:[%s7627_s4 + $0x140] sm:$0xff]  }
 0x1ca   : > { %5749 = vmatprep.subr.bf16.mxu1 %v6239_v1  ;;  %5743 = vmatprep.mubr.msk.bf16.mxu0 %vm6240_vm0, %v6239_v1 }
 0x1cb   : > { %5763 = vmatprep.mubr.msk.bf16.mxu1 %vm6240_vm0, %v6239_v1 }
 0x1cc   : > { %5730 = vmatpush3.bf16.msra.mxu0 %v6149_v50  ;;  %v4792_v50 = vld [vmem:[%s6529_s25 + $0xc] sm:$0x3] }
 0x1cd   : > { %5750 = vmatpush3.bf16.msra.mxu1 %v6150_v51  ;;  %5731 = vmatprep.subr.bf16.mxu0 %v6239_v1  ;;  %v6181_v51 = vld [vmem:[%s7627_s4 + $0x180] sm:$0xff]  }
 0x1ce   : > { %5751 = vmatprep.subr.bf16.mxu1 %v6239_v1 }
 0x1d0   : > { %5732 = vmatpush3.bf16.msra.mxu0 %v6151_v52  ;;  %v6182_v52 = vld [vmem:[%s7627_s4 + $0x148] sm:$0xff]  }
 0x1d1   : > { %5752 = vmatpush3.bf16.msra.mxu1 %v6152_v53  ;;  %5733 = vmatprep.subr.bf16.mxu0 %v6239_v1  ;;  %v6183_v53 = vld [vmem:[%s7627_s4 + $0x188] sm:$0xff]  }
 0x1d2   : > { %5753 = vmatprep.subr.bf16.mxu1 %v6239_v1 }
 0x1d4   : > { %5734 = vmatpush3.bf16.msra.mxu0 %v6153_v54  ;;  %v6184_v54 = vld [vmem:[%s7627_s4 + $0x150] sm:$0xff]  }
 0x1d5   : > { %5754 = vmatpush3.bf16.msra.mxu1 %v6154_v55  ;;  %5735 = vmatprep.subr.bf16.mxu0 %v6239_v1  ;;  %v6185_v55 = vld [vmem:[%s7627_s4 + $0x190] sm:$0xff]  }
 0x1d6   : > { %5755 = vmatprep.subr.bf16.mxu1 %v6239_v1 }
 0x1d8   : > { %5736 = vmatpush3.bf16.msra.mxu0 %v6155_v56  ;;  %v6186_v56 = vld [vmem:[%s7627_s4 + $0x158] sm:$0xff]  }
 0x1d9   : > { %5756 = vmatpush3.bf16.msra.mxu1 %v6156_v57  ;;  %5737 = vmatprep.subr.bf16.mxu0 %v6239_v1  ;;  %v6187_v57 = vld [vmem:[%s7627_s4 + $0x198] sm:$0xff]  }
 0x1da   : > { %v2015_v61 = vpop.f32.mrb[28].mxu0  ;;  %5757 = vmatprep.subr.bf16.mxu1 %v6239_v1 }
 0x1db   : > { %v2021_v62 = vadd.f32 %v2015_v61, %v1904_v37  ;;  %v2122_v63 = vpop.f32.mrb[28].mxu1  ;;  %v5465_v0 = vpop.f32.mrb[29].mxu0  ;;  %v6190_v61 = vld [vmem:[%s7627_s4 + $0x168] sm:$0xff]  }
 0x1dc   : > { %v5485_v2 = vpop.f32.mrb[29].mxu1  ;;  %v2018_v3 = vpop.f32.mrb[30].mxu0  ;;  %5738 = vmatpush3.bf16.msra.mxu0 %v6157_v58  ;;  %v6188_v58 = vld [vmem:[%s7627_s4 + $0x160] sm:$0xff]  }
 0x1dd   : > { %v2128_v6 = vadd.f32 %v2122_v63, %v2021_v62  ;;  %v2125_v7 = vpop.f32.mrb[30].mxu1  ;;  %5758 = vmatpush3.bf16.msra.mxu1 %v6158_v60  ;;  %v5466_v8 = vpop.f32.mrb[31].mxu0  ;;  %5739 = vmatprep.subr.bf16.mxu0 %v6239_v1  ;;  %v6196_v60 = vld [vmem:[%s6434_s30 + $0xc] ss:$0 sps:$4 sm:$0x77]  }
 0x1de   : > { %v5486_v10 = vpop.f32.mrb[31].mxu1  ;;  %5759 = vmatprep.subr.bf16.mxu1 %v6239_v1  ;;  %v6191_v62 = vld [vmem:[%s7627_s4 + $0x1a8] sm:$0xff]   ;;  %v3920_v3 = vshll.u32 %v6196_v60, 16  ;;  %v6192_v7 = vld [vmem:[%s7627_s4 + $0x170] sm:$0xff]   ;;  %v3918_v12 = vshrl.u32 %v6196_v60, 16 }
 0x1df   : > { %v6193_v10 = vld [vmem:[%s7627_s4 + $0x1b0] sm:$0xff]  }
 0x1e0   : > { %5740 = vmatpush3.bf16.msra.mxu0 %v6159_v4  ;;  %v3922_v13 = vrot.slane %v3920_v3, 1 }
 0x1e1   : > { %5760 = vmatpush3.bf16.msra.mxu1 %v6160_v9  ;;  %5741 = vmatprep.subr.bf16.mxu0 %v6239_v1 }
 0x1e2   : > { %5761 = vmatprep.subr.bf16.mxu1 %v6239_v1 }
 0x1e4   : > { %5742 = vmatpush3.bf16.msra.mxu0 %v6161_v11 }
 0x1e5   : > { %5762 = vmatpush3.bf16.msra.mxu1 %v6162_v14  ;;  %5767 = vmatprep.subr.bf16.mxu0 %v6239_v1  ;;  %v6194_v14 = vld [vmem:[%s7627_s4 + $0x178] sm:$0xff]  }
 0x1e6   : > { %5787 = vmatprep.subr.bf16.mxu1 %v6239_v1 }
 0x1e7   : > { %5744 = vmatmul.mubr.bf16.vlgmr.msra.gmra.mrb[56].mxu0 %v4755_v15  ;;  %v6195_v15 = vld [vmem:[%s7627_s4 + $0x1b8] sm:$0xff]  }
 0x1e8   : > { %5764 = vmatmul.mubr.bf16.vlgmr.msra.gmra.mrb[56].mxu1 %v3592_v16  ;;  %5768 = vmatpush3.bf16.msra.mxu0 %v6164_v17  ;;  %v3923_v16 = vor.u32 %v3922_v13, %v3918_v12  ;;  %v6197_v17 = vld [vmem:[%s7627_s4 + $0x1c0] sm:$0xff]  }
 0x1e9   : > { %5788 = vmatpush3.bf16.msra.mxu1 %v6165_v18  ;;  %5769 = vmatprep.subr.bf16.mxu0 %v6239_v1  ;;  %v4811_v18 = vld [vmem:[%s6376_s17 + $0x10] sm:$0x3] }
 0x1ea   : > { %5789 = vmatprep.subr.bf16.mxu1 %v6239_v1  ;;  %5783 = vmatprep.mubr.msk.bf16.mxu0 %vm6240_vm0, %v6239_v1 }
 0x1eb   : > { %5803 = vmatprep.mubr.msk.bf16.mxu1 %vm6240_vm0, %v6239_v1 }
 0x1ec   : > { %5770 = vmatpush3.bf16.msra.mxu0 %v6166_v19  ;;  %v6198_v19 = vld [vmem:[%s7627_s4 + $0x200] sm:$0xff]  }
 0x1ed   : > { %5790 = vmatpush3.bf16.msra.mxu1 %v6167_v20  ;;  %5771 = vmatprep.subr.bf16.mxu0 %v6239_v1  ;;  %v6199_v20 = vld [vmem:[%s7627_s4 + $0x1c8] sm:$0xff]  }
 0x1ee   : > { %5791 = vmatprep.subr.bf16.mxu1 %v6239_v1 }
 0x1f0   : > { %5772 = vmatpush3.bf16.msra.mxu0 %v6168_v21  ;;  %v6200_v21 = vld [vmem:[%s7627_s4 + $0x208] sm:$0xff]  }
 0x1f1   : > { %5792 = vmatpush3.bf16.msra.mxu1 %v6169_v22  ;;  %5773 = vmatprep.subr.bf16.mxu0 %v6239_v1  ;;  %v6201_v22 = vld [vmem:[%s7627_s4 + $0x1d0] sm:$0xff]  }
 0x1f2   : > { %5793 = vmatprep.subr.bf16.mxu1 %v6239_v1 }
 0x1f4   : > { %5774 = vmatpush3.bf16.msra.mxu0 %v6170_v23  ;;  %v6202_v23 = vld [vmem:[%s7627_s4 + $0x210] sm:$0xff]  }
 0x1f5   : > { %5794 = vmatpush3.bf16.msra.mxu1 %v6171_v24  ;;  %5775 = vmatprep.subr.bf16.mxu0 %v6239_v1  ;;  %v6203_v24 = vld [vmem:[%s7627_s4 + $0x1d8] sm:$0xff]  }
 0x1f6   : > { %5795 = vmatprep.subr.bf16.mxu1 %v6239_v1 }
 0x1f8   : > { %5776 = vmatpush3.bf16.msra.mxu0 %v6172_v25  ;;  %v6204_v25 = vld [vmem:[%s7627_s4 + $0x218] sm:$0xff]  }
 0x1f9   : > { %5796 = vmatpush3.bf16.msra.mxu1 %v6173_v26  ;;  %5777 = vmatprep.subr.bf16.mxu0 %v6239_v1  ;;  %v6205_v26 = vld [vmem:[%s7627_s4 + $0x1e0] sm:$0xff]  }
 0x1fa   : > { %v2229_v30 = vpop.f32.mrb[32].mxu0  ;;  %5797 = vmatprep.subr.bf16.mxu1 %v6239_v1 }
 0x1fb   : > { %v2235_v31 = vadd.f32 %v2229_v30, %v2128_v6  ;;  %v2346_v32 = vpop.f32.mrb[32].mxu1  ;;  %v5505_v33 = vpop.f32.mrb[33].mxu0  ;;  %v6213_v30 = vld [vmem:[%s6376_s17 + $0x10] ss:$0 sps:$4 sm:$0x77]  }
 0x1fc   : > { %v5525_v34 = vpop.f32.mrb[33].mxu1  ;;  %v2232_v35 = vpop.f32.mrb[34].mxu0  ;;  %5778 = vmatpush3.bf16.msra.mxu0 %v6174_v28  ;;  %v6206_v28 = vld [vmem:[%s7627_s4 + $0x220] sm:$0xff]  }
 0x1fd   : > { %v2352_v37 = vadd.f32 %v2346_v32, %v2235_v31  ;;  %v2349_v38 = vpop.f32.mrb[34].mxu1  ;;  %5798 = vmatpush3.bf16.msra.mxu1 %v6175_v29  ;;  %v5506_v39 = vpop.f32.mrb[35].mxu0  ;;  %5779 = vmatprep.subr.bf16.mxu0 %v6239_v1  ;;  %v6207_v29 = vld [vmem:[%s7627_s4 + $0x1e8] sm:$0xff]  }
 0x1fe   : > { %v5526_v41 = vpop.f32.mrb[35].mxu1  ;;  %5799 = vmatprep.subr.bf16.mxu1 %v6239_v1  ;;  %v6208_v31 = vld [vmem:[%s7627_s4 + $0x228] sm:$0xff]   ;;  %v6209_v38 = vld [vmem:[%s7627_s4 + $0x1f0] sm:$0xff]   ;;  %v4251_v39 = vshll.u32 %v6213_v30, 16 }
 0x1ff   : > { %v2353_v42 = vadd.f32 %v7152_v27, %v2352_v37 }
 0x200   : > { %5780 = vmatpush3.bf16.msra.mxu0 %v6176_v36 }
 0x201   : > { %vm2354_vm2 = vcmp.ge.f32.partialorder %v2353_v42, 0.0  ;;  %v2355_v44 = vmul.f32 0.01, %v2353_v42  ;;  %5800 = vmatpush3.bf16.msra.mxu1 %v6177_v40  ;;  %5781 = vmatprep.subr.bf16.mxu0 %v6239_v1 }
 0x202   : > { %5801 = vmatprep.subr.bf16.mxu1 %v6239_v1 }
 0x203   : > { %v2356_v46 = vsel %vm2354_vm2, %v2353_v42, %v2355_v44 }
 0x204   : > { %v2357_v47 = vpack.c.bf16 %v2356_v46, %v2356_v46  ;;  %5782 = vmatpush3.bf16.msra.mxu0 %v6178_v43  ;;  %v6210_v43 = vld [vmem:[%s7627_s4 + $0x230] sm:$0xff]   ;;  %v4249_v46 = vshrl.u32 %v6213_v30, 16 }
 0x205   : > { %5802 = vmatpush3.bf16.msra.mxu1 %v6179_v45  ;;  %5807 = vmatprep.subr.bf16.mxu0 %v6239_v1  ;;  %v6211_v45 = vld [vmem:[%s7627_s4 + $0x1f8] sm:$0xff]  }
 0x206   : > { %4669 = vst [vmem:[%s7173_s8 + $0x2] sm:$0x3] %v2357_v47  ;;  %5827 = vmatprep.subr.bf16.mxu1 %v6239_v1  ;;  %v4253_v47 = vrot.slane %v4251_v39, 1 }
 0x207   : > { %5784 = vmatmul.mubr.bf16.vlgmr.msra.gmra.mrb[60].mxu0 %v4783_v48  ;;  %v6212_v48 = vld [vmem:[%s7627_s4 + $0x238] sm:$0xff]  }
 0x208   : > { %5804 = vmatmul.mubr.bf16.vlgmr.msra.gmra.mrb[60].mxu1 %v4792_v50  ;;  %5808 = vmatpush3.bf16.msra.mxu0 %v6180_v49  ;;  %v4820_v49 = vld [vmem:[%s6367_s12 + $0x10] sm:$0x3]  ;;  %v4254_v50 = vor.u32 %v4253_v47, %v4249_v46 }
 0x209   : > { %5828 = vmatpush3.bf16.msra.mxu1 %v6181_v51  ;;  %5809 = vmatprep.subr.bf16.mxu0 %v6239_v1 }
 0x20a   : > { %5829 = vmatprep.subr.bf16.mxu1 %v6239_v1  ;;  %5823 = vmatprep.mubr.msk.bf16.mxu0 %vm6240_vm0, %v6239_v1 }
 0x20b   : > { %5843 = vmatprep.mubr.msk.bf16.mxu1 %vm6240_vm0, %v6239_v1 }
 0x20c   : > { %5810 = vmatpush3.bf16.msra.mxu0 %v6182_v52 }
 0x20d   : > { %5830 = vmatpush3.bf16.msra.mxu1 %v6183_v53  ;;  %5811 = vmatprep.subr.bf16.mxu0 %v6239_v1 }
 0x20e   : > { %5831 = vmatprep.subr.bf16.mxu1 %v6239_v1 }
 0x210   : > { %5812 = vmatpush3.bf16.msra.mxu0 %v6184_v54 }
 0x211   : > { %5832 = vmatpush3.bf16.msra.mxu1 %v6185_v55  ;;  %5813 = vmatprep.subr.bf16.mxu0 %v6239_v1 }
 0x212   : > { %5833 = vmatprep.subr.bf16.mxu1 %v6239_v1 }
 0x214   : > { %5814 = vmatpush3.bf16.msra.mxu0 %v6186_v56 }
 0x215   : > { %5834 = vmatpush3.bf16.msra.mxu1 %v6187_v57  ;;  %5815 = vmatprep.subr.bf16.mxu0 %v6239_v1 }
 0x216   : > { %5835 = vmatprep.subr.bf16.mxu1 %v6239_v1 }
 0x218   : > { %5816 = vmatpush3.bf16.msra.mxu0 %v6188_v58 }
 0x219   : > { %5836 = vmatpush3.bf16.msra.mxu1 %v6189_v59  ;;  %5817 = vmatprep.subr.bf16.mxu0 %v6239_v1 }
 0x21a   : > { %v2476_v63 = vpop.f32.mrb[36].mxu0  ;;  %5837 = vmatprep.subr.bf16.mxu1 %v6239_v1 }
 0x21b   : > { %v2564_v0 = vpop.f32.mrb[36].mxu1  ;;  %v5545_v2 = vpop.f32.mrb[37].mxu0 }
 0x21c   : > { %v7518_v4 = vadd.f32 %v2564_v0, %v2476_v63  ;;  %v5565_v5 = vpop.f32.mrb[37].mxu1  ;;  %v2479_v6 = vpop.f32.mrb[38].mxu0  ;;  %5818 = vmatpush3.bf16.msra.mxu0 %v6190_v61 }
 0x21d   : > { %v2567_v8 = vpop.f32.mrb[38].mxu1  ;;  %5838 = vmatpush3.bf16.msra.mxu1 %v6191_v62  ;;  %v5546_v9 = vpop.f32.mrb[39].mxu0  ;;  %5819 = vmatprep.subr.bf16.mxu0 %v6239_v1 }
 0x21e   : > { %v5566_v11 = vpop.f32.mrb[39].mxu1  ;;  %5839 = vmatprep.subr.bf16.mxu1 %v6239_v1 }
 0x220   : > { %5820 = vmatpush3.bf16.msra.mxu0 %v6192_v7 }
 0x221   : > { %5840 = vmatpush3.bf16.msra.mxu1 %v6193_v10  ;;  %5821 = vmatprep.subr.bf16.mxu0 %v6239_v1 }
 0x222   : > { %5841 = vmatprep.subr.bf16.mxu1 %v6239_v1 }
 0x224   : > { %5822 = vmatpush3.bf16.msra.mxu0 %v6194_v14 }
 0x225   : > { %5842 = vmatpush3.bf16.msra.mxu1 %v6195_v15  ;;  %5847 = vmatprep.subr.bf16.mxu0 %v6239_v1 }
 0x226   : > { %5867 = vmatprep.subr.bf16.mxu1 %v6239_v1 }
 0x227   : > { %5824 = vmatmul.mubr.bf16.vlgmr.msra.gmra.mrb[64].mxu0 %v3923_v16 }
 0x228   : > { %5844 = vmatmul.mubr.bf16.vlgmr.msra.gmra.mrb[64].mxu1 %v4811_v18  ;;  %5848 = vmatpush3.bf16.msra.mxu0 %v6197_v17 }
 0x229   : > { %5868 = vmatpush3.bf16.msra.mxu1 %v6198_v19  ;;  %5849 = vmatprep.subr.bf16.mxu0 %v6239_v1 }
 0x22a   : > { %5869 = vmatprep.subr.bf16.mxu1 %v6239_v1  ;;  %5863 = vmatprep.mubr.msk.bf16.mxu0 %vm6240_vm0, %v6239_v1 }
 0x22b   : > { %5883 = vmatprep.mubr.msk.bf16.mxu1 %vm6240_vm0, %v6239_v1 }
 0x22c   : > { %5850 = vmatpush3.bf16.msra.mxu0 %v6199_v20 }
 0x22d   : > { %5870 = vmatpush3.bf16.msra.mxu1 %v6200_v21  ;;  %5851 = vmatprep.subr.bf16.mxu0 %v6239_v1 }
 0x22e   : > { %5871 = vmatprep.subr.bf16.mxu1 %v6239_v1 }
 0x230   : > { %5852 = vmatpush3.bf16.msra.mxu0 %v6201_v22 }
 0x231   : > { %5872 = vmatpush3.bf16.msra.mxu1 %v6202_v23  ;;  %5853 = vmatprep.subr.bf16.mxu0 %v6239_v1 }
 0x232   : > { %5873 = vmatprep.subr.bf16.mxu1 %v6239_v1 }
 0x234   : > { %5854 = vmatpush3.bf16.msra.mxu0 %v6203_v24 }
 0x235   : > { %5874 = vmatpush3.bf16.msra.mxu1 %v6204_v25  ;;  %5855 = vmatprep.subr.bf16.mxu0 %v6239_v1 }
 0x236   : > { %5875 = vmatprep.subr.bf16.mxu1 %v6239_v1 }
 0x238   : > { %5856 = vmatpush3.bf16.msra.mxu0 %v6205_v26 }
 0x239   : > { %5876 = vmatpush3.bf16.msra.mxu1 %v6206_v28  ;;  %5857 = vmatprep.subr.bf16.mxu0 %v6239_v1 }
 0x23a   : > { %v2680_v32 = vpop.f32.mrb[40].mxu0  ;;  %5877 = vmatprep.subr.bf16.mxu1 %v6239_v1 }
 0x23b   : > { %v2686_v33 = vadd.f32 %v2680_v32, %v7518_v4  ;;  %v2787_v34 = vpop.f32.mrb[40].mxu1  ;;  %v5585_v35 = vpop.f32.mrb[41].mxu0 }
 0x23c   : > { %v5605_v36 = vpop.f32.mrb[41].mxu1  ;;  %v2683_v37 = vpop.f32.mrb[42].mxu0  ;;  %5858 = vmatpush3.bf16.msra.mxu0 %v6207_v29 }
 0x23d   : > { %v2793_v40 = vadd.f32 %v2787_v34, %v2686_v33  ;;  %v2790_v41 = vpop.f32.mrb[42].mxu1  ;;  %5878 = vmatpush3.bf16.msra.mxu1 %v6208_v31  ;;  %v5586_v42 = vpop.f32.mrb[43].mxu0  ;;  %5859 = vmatprep.subr.bf16.mxu0 %v6239_v1 }
 0x23e   : > { %v5606_v44 = vpop.f32.mrb[43].mxu1  ;;  %5879 = vmatprep.subr.bf16.mxu1 %v6239_v1 }
 0x240   : > { %5860 = vmatpush3.bf16.msra.mxu0 %v6209_v38 }
 0x241   : > { %5880 = vmatpush3.bf16.msra.mxu1 %v6210_v43  ;;  %5861 = vmatprep.subr.bf16.mxu0 %v6239_v1 }
 0x242   : > { %5881 = vmatprep.subr.bf16.mxu1 %v6239_v1 }
 0x244   : > { %5862 = vmatpush3.bf16.msra.mxu0 %v6211_v45 }
 0x245   : > { %5882 = vmatpush3.bf16.msra.mxu1 %v6212_v48 }
 0x247   : > { %5864 = vmatmul.mubr.bf16.vlgmr.msra.gmra.mrb[68].mxu0 %v4820_v49 }
 0x248   : > { %5884 = vmatmul.mubr.bf16.vlgmr.msra.gmra.mrb[68].mxu1 %v4254_v50 }
 0x25a   : > { %v2894_v51 = vpop.f32.mrb[44].mxu0 }
 0x25b   : > { %v2900_v52 = vadd.f32 %v2894_v51, %v2793_v40  ;;  %v3011_v53 = vpop.f32.mrb[44].mxu1  ;;  %v5625_v54 = vpop.f32.mrb[45].mxu0 }
 0x25c   : > { %v5645_v55 = vpop.f32.mrb[45].mxu1  ;;  %v2897_v56 = vpop.f32.mrb[46].mxu0 }
 0x25d   : > { %v3017_v57 = vadd.f32 %v3011_v53, %v2900_v52  ;;  %v3014_v58 = vpop.f32.mrb[46].mxu1  ;;  %v5626_v59 = vpop.f32.mrb[47].mxu0 }
 0x25e   : > { %v5646_v60 = vpop.f32.mrb[47].mxu1 }
 0x25f   : > { %v6214_v60 = vld [vmem:[%s7628_s5] ss:$0 sm:$0xff] }
 0x27a   : > { %v3118_v61 = vpop.f32.mrb[48].mxu0 }
 0x27b   : > { %v3124_v62 = vadd.f32 %v3118_v61, %v3017_v57  ;;  %v3225_v63 = vpop.f32.mrb[48].mxu1  ;;  %v5665_v1 = vpop.f32.mrb[49].mxu0 }
 0x27c   : > { %v5685_v0 = vpop.f32.mrb[49].mxu1  ;;  %v3121_v2 = vpop.f32.mrb[50].mxu0 }
 0x27d   : > { %v3231_v3 = vadd.f32 %v3225_v63, %v3124_v62  ;;  %v3228_v4 = vpop.f32.mrb[50].mxu1  ;;  %v5666_v5 = vpop.f32.mrb[51].mxu0 }
 0x27e   : > { %v5686_v6 = vpop.f32.mrb[51].mxu1 }
 0x29a   : > { %v3342_v7 = vpop.f32.mrb[52].mxu0 }
 0x29b   : > { %v3348_v8 = vadd.f32 %v3342_v7, %v3231_v3  ;;  %v3472_v9 = vpop.f32.mrb[52].mxu1  ;;  %v5705_v10 = vpop.f32.mrb[53].mxu0 }
 0x29c   : > { %v5725_v11 = vpop.f32.mrb[53].mxu1  ;;  %v3345_v12 = vpop.f32.mrb[54].mxu0 }
 0x29d   : > { %v3349_v13 = vadd.f32 %v7152_v27, %v3348_v8  ;;  %v3475_v14 = vpop.f32.mrb[54].mxu1  ;;  %v5706_v15 = vpop.f32.mrb[55].mxu0 }
 0x29e   : > { %v5726_v16 = vpop.f32.mrb[55].mxu1 }
 0x29f   : > { %vm3350_vm3 = vcmp.ge.f32.partialorder %v3349_v13, 0.0  ;;  %v3351_v17 = vmul.f32 0.01, %v3349_v13 }
 0x2a1   : > { %v3352_v18 = vsel %vm3350_vm3, %v3349_v13, %v3351_v17 }
 0x2a2   : > { %v3353_v19 = vpack.c.bf16 %v3352_v18, %v3352_v18 }
 0x2a4   : > { %4754 = vst [vmem:[%s7173_s8 + $0x4] sm:$0x3] %v3353_v19 }
 0x2ba   : > { %v3560_v20 = vpop.f32.mrb[56].mxu0 }
 0x2bb   : > { %v3561_v21 = vadd.f32 %v3560_v20, %v3472_v9  ;;  %v3676_v22 = vpop.f32.mrb[56].mxu1  ;;  %v5745_v23 = vpop.f32.mrb[57].mxu0 }
 0x2bc   : > { %v5765_v24 = vpop.f32.mrb[57].mxu1  ;;  %v3563_v25 = vpop.f32.mrb[58].mxu0 }
 0x2bd   : > { %v3682_v26 = vadd.f32 %v3676_v22, %v3561_v21  ;;  %v3679_v28 = vpop.f32.mrb[58].mxu1  ;;  %v5746_v29 = vpop.f32.mrb[59].mxu0 }
 0x2be   : > { %v5766_v30 = vpop.f32.mrb[59].mxu1 }
 0x2da   : > { %v3783_v31 = vpop.f32.mrb[60].mxu0 }
 0x2db   : > { %v3789_v27 = vadd.f32 %v3783_v31, %v3682_v26  ;;  %v3890_v32 = vpop.f32.mrb[60].mxu1  ;;  %v5785_v33 = vpop.f32.mrb[61].mxu0 }
 0x2dc   : > { %v5805_v34 = vpop.f32.mrb[61].mxu1  ;;  %v3786_v35 = vpop.f32.mrb[62].mxu0 }
 0x2dd   : > { %v3896_v36 = vadd.f32 %v3890_v32, %v3789_v27  ;;  %v3893_v37 = vpop.f32.mrb[62].mxu1  ;;  %v5786_v38 = vpop.f32.mrb[63].mxu0 }
 0x2de   : > { %v5806_v39 = vpop.f32.mrb[63].mxu1 }
 0x2fa   : > { %v4007_v40 = vpop.f32.mrb[64].mxu0 }
 0x2fb   : > { %v4013_v41 = vadd.f32 %v4007_v40, %v3896_v36  ;;  %v4114_v42 = vpop.f32.mrb[64].mxu1  ;;  %v5825_v43 = vpop.f32.mrb[65].mxu0 }
 0x2fc   : > { %v5845_v44 = vpop.f32.mrb[65].mxu1  ;;  %v4010_v45 = vpop.f32.mrb[66].mxu0 }
 0x2fd   : > { %v4120_v46 = vadd.f32 %v4114_v42, %v4013_v41  ;;  %v4117_v47 = vpop.f32.mrb[66].mxu1  ;;  %v5826_v48 = vpop.f32.mrb[67].mxu0 }
 0x2fe   : > { %v5846_v49 = vpop.f32.mrb[67].mxu1 }
 0x31a   : > { %v4221_v50 = vpop.f32.mrb[68].mxu0 }
 0x31b   : > { %v4227_v51 = vadd.f32 %v4221_v50, %v4120_v46  ;;  %v4338_v52 = vpop.f32.mrb[68].mxu1  ;;  %v5865_v53 = vpop.f32.mrb[69].mxu0 }
 0x31c   : > { %v5885_v54 = vpop.f32.mrb[69].mxu1  ;;  %v4224_v55 = vpop.f32.mrb[70].mxu0 }
 0x31d   : > { %v4344_v56 = vadd.f32 %v4338_v52, %v4227_v51  ;;  %v4341_v57 = vpop.f32.mrb[70].mxu1  ;;  %v5866_v58 = vpop.f32.mrb[71].mxu0 }
 0x31e   : > { %v5886_v59 = vpop.f32.mrb[71].mxu1 }
 0x31f   : > { %v4345_v61 = vadd.f32 %v6214_v60, %v4344_v56 }
 0x321   : > { %vm4346_vm4 = vcmp.ge.f32.partialorder %v4345_v61, 0.0  ;;  %v4347_v62 = vmul.f32 0.01, %v4345_v61 }
 0x323   : > { %v4348_v63 = vsel %vm4346_vm4, %v4345_v61, %v4347_v62 }
 0x324   : > { %v4349_v1 = vpack.c.bf16 %v4348_v63, %v4348_v63 }
 0x326   : > { %4839 = vst [vmem:[%s7173_s8 + $0x6] sm:$0x3] %v4349_v1 }
 0x327 PF: > { %s16_s23 = sadd.s32 1, %s6237_s23   ;;  %s7630_s21 = smov %s6233_s22 }
 0x328   : > { %p13_p5 = scmp.ge.s32.totalorder %s16_s23, 4   ;;  %s7631_s22 = smov %s7633_s24 }
 0x32a   :  { %15 = sbr.rel (!%p13_p5) target bundleno = 2 (0x2), region = 106 }

</bundles_post_ra>
